<compile_context>
chip_gen: v5e
topology: v5e:2x2
jax: 0.10.0
libtpu: 0.0.40
codegen_flags: <defaults>
</compile_context>

<pallas_src>
import math
import functools

import jax
import jax.numpy as jnp
import numpy as np
from jax.experimental import pallas as pl
from jax.experimental.pallas import tpu as pltpu


def _self_attention_kernel(x_ref, wqkv_ref, bqkv_ref, wo_ref, bo_ref, o_ref,
                           *, num_heads, head_dim, embed_dim, seq_len):
    d = embed_dim
    s = seq_len

    # x block is (1, D, S): channel-major layout straight from the NCHW tensor.
    x_t = x_ref[0]                                                      # (D, S)

    # Fused Q/K/V projection, channel-major:  qkv_t = W_qkv @ x_t + b_qkv
    qkv_t = jnp.dot(wqkv_ref[...], x_t,
                    preferred_element_type=jnp.float32) + bqkv_ref[...]  # (3D, S)

    # Fold the 1/sqrt(head_dim) scale into q once (D*S elems, not H*S*S).
    scale = 1.0 / math.sqrt(head_dim)
    q3 = (qkv_t[0:d, :] * scale).reshape(num_heads, head_dim, s)         # (H, hd, S)
    k3 = qkv_t[d:2 * d, :].reshape(num_heads, head_dim, s)               # (H, hd, S)
    v3 = qkv_t[2 * d:3 * d, :].reshape(num_heads, head_dim, s)           # (H, hd, S)

    # Batched attention over all heads at once (no per-head loop / concat).
    q_h = jnp.transpose(q3, (0, 2, 1))                                   # (H, S, hd)
    k_h = jnp.transpose(k3, (0, 2, 1))                                   # (H, S, hd)
    scores = jnp.einsum('hqd,hkd->hqk', q_h, k_h,
                        preferred_element_type=jnp.float32)              # (H, S, S)

    scores = scores - jnp.max(scores, axis=-1, keepdims=True)
    p = jnp.exp(scores)
    denom = jnp.sum(p, axis=-1, keepdims=True)
    p = p * pl.reciprocal(denom, approx=False)      # EUP reciprocal (exact)

    # attn_t3[h, e, q] = sum_k v3[h, e, k] * p[h, q, k]  (NT form, no transpose)
    attn_t3 = jnp.einsum('hdk,hqk->hdq', v3, p,
                         preferred_element_type=jnp.float32)             # (H, hd, S)
    attn_t = attn_t3.reshape(d, s)                                       # (D, S)

    # Output projection + residual, still channel-major.
    out_t = jnp.dot(wo_ref[...], attn_t,
                    preferred_element_type=jnp.float32) + bo_ref[...]    # (D, S)
    o_ref[0] = (x_t + out_t).astype(o_ref.dtype)


def self_attention_pallas(x_nchw, params, num_heads):
    """x_nchw: (B, C, H, W).  params: dict of (W, b) pairs (PyTorch Linear layout)."""
    b, c, h, w = x_nchw.shape
    d = c
    s = h * w
    head_dim = d // num_heads
    assert head_dim * num_heads == d

    # NCHW -> (B, D, S): a pure reshape, no HBM transpose.  The kernel keeps
    # this channel-major layout end-to-end.
    x_bds = x_nchw.reshape(b, c, s)

    # Fused QKV weights/biases.  PyTorch (out, in) weights are used AS-IS:
    # the kernel computes W @ x_t, so no weight transpose is needed.
    w_qkv = jnp.concatenate([params["wq"], params["wk"], params["wv"]], axis=0)  # (3D, D)
    b_qkv = jnp.concatenate([params["bq"], params["bk"], params["bv"]],
                            axis=0).reshape(3 * d, 1)                            # (3D, 1)
    w_o = params["wo"]                                                           # (D, D)
    b_o = params["bo"].reshape(d, 1)                                             # (D, 1)

    kernel = functools.partial(_self_attention_kernel,
                               num_heads=num_heads, head_dim=head_dim,
                               embed_dim=d, seq_len=s)

    out_bds = pl.pallas_call(
        kernel,
        out_shape=jax.ShapeDtypeStruct((b, d, s), x_bds.dtype),
        grid=(b,),
        in_specs=[
            pl.BlockSpec((1, d, s), lambda i: (i, 0, 0)),     # x, one batch element / step
            pl.BlockSpec((3 * d, d), lambda i: (0, 0)),       # fused W_qkv
            pl.BlockSpec((3 * d, 1), lambda i: (0, 0)),       # fused b_qkv
            pl.BlockSpec((d, d), lambda i: (0, 0)),           # W_out
            pl.BlockSpec((d, 1), lambda i: (0, 0)),           # b_out
        ],
        out_specs=pl.BlockSpec((1, d, s), lambda i: (i, 0, 0)),
        compiler_params=pltpu.CompilerParams(
            dimension_semantics=("parallel",)),                # B across v7x's 2 TCs
    )(x_bds, w_qkv, b_qkv, w_o, b_o)

    # (B, D, S) -> (B, C, H, W): again a pure reshape, no transpose.
    return out_bds.reshape(b, c, h, w)


def _reference(x_nchw, params, num_heads):
    """Pure-JAX reference mirroring the PyTorch forward."""
    b, c, h, w = x_nchw.shape
    d = c
    s = h * w
    hd = d // num_heads
    with jax.default_matmul_precision("highest"):
        x = jnp.transpose(x_nchw.reshape(b, c, s), (0, 2, 1))          # (B, S, D)
        q = x @ params["wq"].T + params["bq"]
        k = x @ params["wk"].T + params["bk"]
        v = x @ params["wv"].T + params["bv"]
        q = q.reshape(b, s, num_heads, hd).transpose(0, 2, 1, 3)
        k = k.reshape(b, s, num_heads, hd).transpose(0, 2, 1, 3)
        v = v.reshape(b, s, num_heads, hd).transpose(0, 2, 1, 3)
        scores = jnp.einsum("bhqd,bhkd->bhqk", q, k) / math.sqrt(hd)
        wts = jax.nn.softmax(scores, axis=-1)
        ao = jnp.einsum("bhqk,bhkd->bhqd", wts, v)
        ao = ao.transpose(0, 2, 1, 3).reshape(b, s, d)
        ao = ao @ params["wo"].T + params["bo"]
        out = x + ao
        return jnp.transpose(out, (0, 2, 1)).reshape(b, c, h, w)


if __name__ == "__main__":
    # Small shapes consistent with the module: embed_dim = channels.
    B, C, H, W = 2, 32, 16, 16          # S = 256 (lane-dense), head_dim = 8
    NUM_HEADS = 4
    D = C

    key = jax.random.PRNGKey(0)
    keys = jax.random.split(key, 9)
    x = jax.random.normal(keys[0], (B, C, H, W), dtype=jnp.float32)

    # Deterministic parameter init (PyTorch nn.Linear layout: W is (out, in)).
    def init_linear(kw, kb):
        bound = 1.0 / math.sqrt(D)
        wgt = jax.random.uniform(kw, (D, D), jnp.float32, -bound, bound)
        bias = jax.random.uniform(kb, (D,), jnp.float32, -bound, bound)
        return wgt, bias

    wq, bq = init_linear(keys[1], keys[2])
    wk, bk = init_linear(keys[3], keys[4])
    wv, bv = init_linear(keys[5], keys[6])
    wo, bo = init_linear(keys[7], keys[8])
    params = dict(wq=wq, bq=bq, wk=wk, bk=bk, wv=wv, bv=bv, wo=wo, bo=bo)

    out = self_attention_pallas(x, params, NUM_HEADS)
    out = jax.block_until_ready(out)

    ref = jax.block_until_ready(_reference(x, params, NUM_HEADS))
    np.testing.assert_allclose(np.asarray(out), np.asarray(ref), rtol=5e-5, atol=5e-5)

    print("KERNEL_OK")
</pallas_src>

<mosaic_0001>
module attributes {stable_mosaic.version = 11 : i64} {
  func.func @_self_attention_kernel(%arg0: i32, %arg1: memref<1x32x256xf32, #tpu.memory_space<vmem>>, %arg2: memref<96x32xf32, #tpu.memory_space<vmem>>, %arg3: memref<96x1xf32, #tpu.memory_space<vmem>>, %arg4: memref<32x32xf32, #tpu.memory_space<vmem>>, %arg5: memref<32x1xf32, #tpu.memory_space<vmem>>, %arg6: memref<1x32x256xf32, #tpu.memory_space<vmem>>) attributes {dimension_semantics = [#tpu.dimension_semantics<parallel>], iteration_bounds = array<i64: 2>, scalar_prefetch = 0 : i64, scratch_operands = 0 : i64, tpu.core_type = #tpu.core_type<tc>, window_params = [{transform_indices = @transform_0, window_bounds = array<i64: 1, 32, 256>}, {pipeline_mode = #tpu.pipeline_mode<synchronous>, transform_indices = @transform_1, window_bounds = array<i64: 96, 32>}, {pipeline_mode = #tpu.pipeline_mode<synchronous>, transform_indices = @transform_2, window_bounds = array<i64: 96, 1>}, {pipeline_mode = #tpu.pipeline_mode<synchronous>, transform_indices = @transform_3, window_bounds = array<i64: 32, 32>}, {pipeline_mode = #tpu.pipeline_mode<synchronous>, transform_indices = @transform_4, window_bounds = array<i64: 32, 1>}, {transform_indices = @transform_5, window_bounds = array<i64: 1, 32, 256>}]} {
    %c0 = arith.constant 0 : index
    %c0_0 = arith.constant 0 : index
    %c0_1 = arith.constant 0 : index
    %0 = vector.load %arg1[%c0, %c0_0, %c0_1] : memref<1x32x256xf32, #tpu.memory_space<vmem>>, vector<1x32x256xf32>
    %1 = vector.shape_cast %0 : vector<1x32x256xf32> to vector<32x256xf32>
    %c0_2 = arith.constant 0 : index
    %c0_3 = arith.constant 0 : index
    %2 = vector.load %arg2[%c0_2, %c0_3] : memref<96x32xf32, #tpu.memory_space<vmem>>, vector<96x32xf32>
    %cst = arith.constant dense<0.000000e+00> : vector<96x256xf32>
    %3 = tpu.matmul %2, %1, %cst {dimension_numbers = #tpu.dot_dimension_numbers<[1], [0], [0], [1], [0, 0, 1, 1], [], []>} : vector<96x32xf32>, vector<32x256xf32>, vector<96x256xf32> -> vector<96x256xf32>
    %c0_4 = arith.constant 0 : index
    %c0_5 = arith.constant 0 : index
    %4 = vector.load %arg3[%c0_4, %c0_5] : memref<96x1xf32, #tpu.memory_space<vmem>>, vector<96x1xf32>
    %5 = vector.broadcast %4 : vector<96x1xf32> to vector<96x256xf32>
    %6 = arith.addf %3, %5 : vector<96x256xf32>
    %7 = vector.extract_strided_slice %6 {offsets = [0, 0], sizes = [32, 256], strides = [1, 1]} : vector<96x256xf32> to vector<32x256xf32>
    %cst_6 = arith.constant 0.353553385 : f32
    %8 = vector.broadcast %cst_6 : f32 to vector<32x256xf32>
    %9 = arith.mulf %7, %8 : vector<32x256xf32>
    %10 = vector.shape_cast %9 : vector<32x256xf32> to vector<4x8x256xf32>
    %11 = vector.extract_strided_slice %6 {offsets = [32, 0], sizes = [32, 256], strides = [1, 1]} : vector<96x256xf32> to vector<32x256xf32>
    %12 = vector.shape_cast %11 : vector<32x256xf32> to vector<4x8x256xf32>
    %13 = vector.extract_strided_slice %6 {offsets = [64, 0], sizes = [32, 256], strides = [1, 1]} : vector<96x256xf32> to vector<32x256xf32>
    %14 = vector.shape_cast %13 : vector<32x256xf32> to vector<4x8x256xf32>
    %15 = tpu.transpose %10, [0, 2, 1] : vector<4x8x256xf32> -> vector<4x256x8xf32>
    %16 = tpu.transpose %12, [0, 2, 1] : vector<4x8x256xf32> -> vector<4x256x8xf32>
    "tpu.trace_start"() <{level = 10 : i32, message = "hqd,hkd->hqk"}> : () -> ()
    %cst_7 = arith.constant dense<0.000000e+00> : vector<4x256x256xf32>
    %17 = tpu.matmul %15, %16, %cst_7 {dimension_numbers = #tpu.dot_dimension_numbers<[2], [2], [1], [1], [0, 0, 0, 1, 1, 1], [0], [0]>} : vector<4x256x8xf32>, vector<4x256x8xf32>, vector<4x256x256xf32> -> vector<4x256x256xf32>
    "tpu.trace_stop"() : () -> ()
    %cst_8 = arith.constant dense<0xFF800000> : vector<4x256xf32>
    %18 = vector.multi_reduction <maximumf>, %17, %cst_8 [2] : vector<4x256x256xf32> to vector<4x256xf32>
    %19 = vector.shape_cast %18 : vector<4x256xf32> to vector<4x256x1xf32>
    %20 = vector.broadcast %19 : vector<4x256x1xf32> to vector<4x256x256xf32>
    %21 = arith.subf %17, %20 : vector<4x256x256xf32>
    %22 = math.exp %21 : vector<4x256x256xf32>
    %cst_9 = arith.constant dense<0.000000e+00> : vector<4x256xf32>
    %23 = vector.multi_reduction <add>, %22, %cst_9 [2] : vector<4x256x256xf32> to vector<4x256xf32>
    %24 = vector.shape_cast %23 : vector<4x256xf32> to vector<4x256x1xf32>
    %25 = tpu.reciprocal %24 : vector<4x256x1xf32> -> vector<4x256x1xf32>
    %26 = vector.broadcast %25 : vector<4x256x1xf32> to vector<4x256x256xf32>
    %27 = arith.mulf %22, %26 : vector<4x256x256xf32>
    "tpu.trace_start"() <{level = 10 : i32, message = "hdk,hqk->hdq"}> : () -> ()
    %cst_10 = arith.constant dense<0.000000e+00> : vector<4x8x256xf32>
    %28 = tpu.matmul %14, %27, %cst_10 {dimension_numbers = #tpu.dot_dimension_numbers<[2], [2], [1], [1], [0, 0, 0, 1, 1, 1], [0], [0]>} : vector<4x8x256xf32>, vector<4x256x256xf32>, vector<4x8x256xf32> -> vector<4x8x256xf32>
    "tpu.trace_stop"() : () -> ()
    %29 = vector.shape_cast %28 : vector<4x8x256xf32> to vector<32x256xf32>
    %c0_11 = arith.constant 0 : index
    %c0_12 = arith.constant 0 : index
    %30 = vector.load %arg4[%c0_11, %c0_12] : memref<32x32xf32, #tpu.memory_space<vmem>>, vector<32x32xf32>
    %cst_13 = arith.constant dense<0.000000e+00> : vector<32x256xf32>
    %31 = tpu.matmul %30, %29, %cst_13 {dimension_numbers = #tpu.dot_dimension_numbers<[1], [0], [0], [1], [0, 0, 1, 1], [], []>} : vector<32x32xf32>, vector<32x256xf32>, vector<32x256xf32> -> vector<32x256xf32>
    %c0_14 = arith.constant 0 : index
    %c0_15 = arith.constant 0 : index
    %32 = vector.load %arg5[%c0_14, %c0_15] : memref<32x1xf32, #tpu.memory_space<vmem>>, vector<32x1xf32>
    %33 = vector.broadcast %32 : vector<32x1xf32> to vector<32x256xf32>
    %34 = arith.addf %31, %33 : vector<32x256xf32>
    %35 = arith.addf %1, %34 : vector<32x256xf32>
    %c0_16 = arith.constant 0 : index
    %c0_17 = arith.constant 0 : index
    %c0_18 = arith.constant 0 : index
    %36 = vector.load %arg6[%c0_16, %c0_17, %c0_18] : memref<1x32x256xf32, #tpu.memory_space<vmem>>, vector<1x32x256xf32>
    %37 = vector.shape_cast %36 : vector<1x32x256xf32> to vector<32x256xf32>
    %38 = vector.shape_cast %35 : vector<32x256xf32> to vector<1x32x256xf32>
    tpu.vector_store %arg6[%c0_16, %c0_17, %c0_18], %38 {strides = array<i32>} : memref<1x32x256xf32, #tpu.memory_space<vmem>>, vector<1x32x256xf32>,
    return
  }
  func.func @transform_0(%arg0: i32) -> (i32, i32, i32) {
    %c0_i32 = arith.constant 0 : i32
    %c0_i32_0 = arith.constant 0 : i32
    %c0_i32_1 = arith.constant 0 : i32
    return %arg0, %c0_i32, %c0_i32_0 : i32, i32, i32
  }
  func.func @transform_1(%arg0: i32) -> (i32, i32) {
    %c0_i32 = arith.constant 0 : i32
    %c0_i32_0 = arith.constant 0 : i32
    %c0_i32_1 = arith.constant 0 : i32
    return %c0_i32, %c0_i32_0 : i32, i32
  }
  func.func @transform_2(%arg0: i32) -> (i32, i32) {
    %c0_i32 = arith.constant 0 : i32
    %c0_i32_0 = arith.constant 0 : i32
    %c0_i32_1 = arith.constant 0 : i32
    return %c0_i32, %c0_i32_0 : i32, i32
  }
  func.func @transform_3(%arg0: i32) -> (i32, i32) {
    %c0_i32 = arith.constant 0 : i32
    %c0_i32_0 = arith.constant 0 : i32
    %c0_i32_1 = arith.constant 0 : i32
    return %c0_i32, %c0_i32_0 : i32, i32
  }
  func.func @transform_4(%arg0: i32) -> (i32, i32) {
    %c0_i32 = arith.constant 0 : i32
    %c0_i32_0 = arith.constant 0 : i32
    %c0_i32_1 = arith.constant 0 : i32
    return %c0_i32, %c0_i32_0 : i32, i32
  }
  func.func @transform_5(%arg0: i32) -> (i32, i32, i32) {
    %c0_i32 = arith.constant 0 : i32
    %c0_i32_0 = arith.constant 0 : i32
    %c0_i32_1 = arith.constant 0 : i32
    return %arg0, %c0_i32, %c0_i32_0 : i32, i32, i32
  }
}

</mosaic_0001>

<bundles_post_ra>
// kernel: tpu_custom_call.1
= control target key start
LH: loop header
LB: loop body
LE: loop exit
PB: predicated region body
PF: predicated region fallthrough
CT: control target
= control target key end

     0   :  { %10 = vsyncpa [#allocation3], 0  ;;  %s13690_s0 = inlined_call_operand.vmem [shape: f32[2,32,256], index: 0, kind: input, shape index: {}]   ;;  %s13691_s1 = inlined_call_operand.vmem [shape: f32[96,32], index: 1, kind: input, shape index: {}]   ;;  %s13692_s2 = inlined_call_operand.vmem [shape: f32[96,1], index: 2, kind: input, shape index: {}]   ;;  %s13693_s3 = inlined_call_operand.vmem [shape: f32[32,32], index: 3, kind: input, shape index: {}]   ;;  %s13694_s4 = inlined_call_operand.vmem [shape: f32[32,1], index: 4, kind: input, shape index: {}]   ;;  %s13695_s5 = inlined_call_operand.hbm [shape: f32[2,32,256], index: 5, kind: output, shape index: {}]  }
   0x1   :  { %12 = vsyncpa [#allocation3 + $0x1], 0  ;;  %s7328_s18 = smov 0   ;;  %s7330_s19 = smov 0  }
   0x2   :  { %s7332_s20 = smov 0   ;;  %s7334_s21 = smov 0  }
   0x3 LB: > { %s7349_s22 = sadd.s32 4294967295, %s7293_s21   ;;  %s6107_s23 = sadd.s32 4294967294, %s7293_s21   ;;  %s7293_s21 = sphi %s7334_s21, %s16090_s21   ;;  %s7289_s20 = sphi %s7332_s20, %s16089_s20   ;;  %s7285_s19 = sphi %s7330_s19, %s16088_s19   ;;  %s7281_s18 = sphi %s7328_s18, %s16087_s18  }
   0x4   : > { %s7353_s24 = sadd.s32 1, %s7293_s21   ;;  %s135_s25 = sadd.s32 1, %s7289_s20 }
   0x5   : > { %s132_s26 = ssub.s32 %s7293_s21, %s7353_s24  ;;  %p145_p0 = scmp.ne.s32.totalorder %s7289_s20, %s7285_s19 }
   0x6   : > { %p133_p1 = scmp.eq.s32.totalorder %s132_s26, 0  ;;  %p146_p2 = scmp.eq.s32.totalorder %s7349_s22, 1 }
   0x7   : > { %p151_p3 = scmp.ne.s32.totalorder %s7285_s19, %s7281_s18  ;;  %p152_p4 = scmp.eq.s32.totalorder %s6107_s23, 1 }
   0x8   : > { %s7364_s27 = scalar_select %p133_p1, %s7289_s20, %s135_s25  }
   0x9   : > { %p7366_p5 = por %p146_p2, %p145_p0  ;;  %p7370_p6 = por %p152_p4, %p151_p3 }
   0xa   : > { %p6110_p7 = scmp.ge.s32.totalorder %s7293_s21, 1  ;;  %p190_p8 = scmp.lt.s32.totalorder %s7293_s21, 3 }
   0xc   : > { %p191_p9 = pnand %p6110_p7, %p190_p8 }
   0xe   : > { %194 = sbr.rel (%p191_p9) target bundleno = 2328 (0x918), region = 40 }
  0x13   : > { %p218_p10 = scmp.lt.s32.totalorder %s7349_s22, 1  ;;  %v243_v0 = vld [vmem:[%s13692_s2] sm:$0xff]  ;;  %v7295_v1 = vmov 0   ;;  %v245_v2 = vld [vmem:[%s13692_s2 + $0x10] sm:$0xff]  ;;  %v244_v8 = vld [vmem:[%s13692_s2 + $0x8] sm:$0xff]  ;;  %vm315_vm0 = vcmask 261120  }
  0x14   : > { %6452 = vset.pattern.permute.xlu0 %v7295_v1  ;;  %6453 = vset.pattern.permute.xlu1 %v7295_v1  ;;  %v247_v3 = vld [vmem:[%s13692_s2 + $0x20] sm:$0xff]  ;;  %v248_v11 = vld [vmem:[%s13692_s2 + $0x28] sm:$0xff]  ;;  %v233_v16 = vld [vmem:[%s13691_s1 + $0x10] sm:$0xff]  ;;  %vm722_vm1 = vcmask 64512   ;;  %s215_s13 = sand.u32 1, %s7285_s19   ;;  %s6408_s17 = sshll.u32 %s7349_s22, 6 }
  0x15   : > { %s219_s9 = scalar_select %p218_p10, %s7349_s22, 1  ;;  %257 = vperm.xlu0 %6452, %v243_v0   ;;  %267 = vperm.xlu1 %6453, %v245_v2   ;;  %v231_v14 = vld [vmem:[%s13691_s1] sm:$0xff]  ;;  %v232_v15 = vld [vmem:[%s13691_s1 + $0x8] sm:$0xff]  ;;  %v234_v17 = vld [vmem:[%s13691_s1 + $0x18] sm:$0xff] }
  0x16   : > { %6454 = vset.pattern.permute.xlu2 %v7295_v1  ;;  %v235_v18 = vld [vmem:[%s13691_s1 + $0x20] sm:$0xff]  ;;  %v236_v46 = vld [vmem:[%s13691_s1 + $0x28] sm:$0xff]  ;;  %v237_v62 = vld [vmem:[%s13691_s1 + $0x30] sm:$0xff]  ;;  %s6111_s14 = sshll.u32 %s215_s13, 6  ;;  %s6041_s26 = scalar_lea.hbm %s13695_s5, %s6408_s17 }
  0x17   : > { %s6407_s12 = sshll.u32 %s219_s9, 6  ;;  %277 = vperm.xlu2 %6454, %v247_v3   ;;  %v238_v1 = vld [vmem:[%s13691_s1 + $0x38] sm:$0xff]  ;;  %s13639_s16 = scalar_lea.vmem [#allocation2], %s6111_s14 }
  0x18   : > { %s7390_s15 = scalar_lea.vmem %s13690_s0, %s6407_s12  ;;  %s6042_s30 = sshll.u32 %s13639_s16, 4  ;;  %s6043_s30 = int_to_ptr.vmem [resolvable:$true] %s6042_s30 }
  0x19   : > { %v229_v4 = vld [vmem:[%s7390_s15 + $0x30] sm:$0xff]  ;;  %v230_v5 = vld [vmem:[%s7390_s15 + $0x38] sm:$0xff]  ;;  %v227_v6 = vld [vmem:[%s7390_s15 + $0x20] sm:$0xff]  ;;  %s6044_s6 = sshll.u32 %s6041_s26, 4  ;;  %s6030_s22 = scalar_lea.sflag [#allocation3], %s215_s13  ;;  %s6045_s6 = int_to_ptr.hbm [resolvable:$true] %s6044_s6 }
  0x1a   : > { %364 = vmatpush.msra.mxu0 %v229_v4  ;;  %417 = vmatpush.msra.mxu1 %v230_v5  ;;  %v228_v7 = vld [vmem:[%s7390_s15 + $0x28] sm:$0xff]  ;;  %v225_v9 = vld [vmem:[%s7390_s15 + $0x10] sm:$0xff]  ;;  %v226_v10 = vld [vmem:[%s7390_s15 + $0x18] sm:$0xff]  ;;  %s7245_s7 = sshra.s32 %s6045_s6, 4  ;;  %s7251_s11 = scalar_lea.hbm %s13695_s5, 128  ;;  %s7246_s7 = int_to_ptr.hbm [resolvable:$true] %s7245_s7 }
  0x1b   : > { %v223_v12 = vld [vmem:[%s7390_s15] sm:$0xff]  ;;  %v224_v13 = vld [vmem:[%s7390_s15 + $0x8] sm:$0xff]  ;;  %s7247_s8 = scalar_lea.hbm %s7246_s7, 64  ;;  %p7252_p0 = scmp.lt.s32.totalorder %s7246_s7, %s13695_s5 }
  0x1c   : > { %365 = vmatpush.msra.mxu0 %v227_v6  ;;  %418 = vmatpush.msra.mxu1 %v228_v7  ;;  %v239_v4 = vld [vmem:[%s13691_s1 + $0x40] sm:$0xff]  ;;  %v240_v7 = vld [vmem:[%s13691_s1 + $0x48] sm:$0xff]  ;;  %p7248_p11 = scmp.ne.s32.totalorder %s7246_s7, %s7247_s8  ;;  %p7253_p1 = scmp.lt.s32.totalorder %s7251_s11, %s7247_s8 }
  0x1d   : > { %262 = vperm.xlu0 %6452, %v244_v8  }
  0x1e   : > { %366 = vmatpush.msra.mxu0 %v225_v9  ;;  %419 = vmatpush.msra.mxu1 %v226_v10  ;;  %v241_v10 = vld [vmem:[%s13691_s1 + $0x50] sm:$0xff]  ;;  %p7249_p12 = pnand %p7248_p11, %p7366_p5  ;;  %p7254_p2 = por %p7253_p1, %p7252_p0 }
  0x1f   : > { %282 = vperm.xlu2 %6454, %v248_v11  }
  0x20   : > { %367 = vmatpush.msra.mxu0 %v223_v12  ;;  %420 = vmatpush.msra.mxu1 %v224_v13  ;;  %v242_v13 = vld [vmem:[%s13691_s1 + $0x58] sm:$0xff]  ;;  %p7250_p13 = pneg %p7249_p12 }
  0x21   : > { %6114 = vmatmul.msk.f32.vlgmr.msra.gmra.mxu0 %vm315_vm0, %v231_v14  ;;  %6126 = vmatmul.msk.f32.vlgmr.msra.gmra.mxu1 %vm315_vm0, %v231_v14 }
  0x22   : > { %p7255_p3 = pnand %p7254_p2, %p7250_p13 }
  0x29   : > { %6115 = vmatmul.msk.f32.gmra.mxu0 %vm315_vm0, %v232_v15  ;;  %6127 = vmatmul.msk.f32.gmra.mxu1 %vm315_vm0, %v232_v15 }
  0x31   : > { %6116 = vmatmul.msk.f32.gmra.mxu0 %vm315_vm0, %v233_v16  ;;  %6128 = vmatmul.msk.f32.gmra.mxu1 %vm315_vm0, %v233_v16 }
  0x39   : > { %6117 = vmatmul.msk.f32.gmra.mxu0 %vm315_vm0, %v234_v17  ;;  %6129 = vmatmul.msk.f32.gmra.mxu1 %vm315_vm0, %v234_v17 }
  0x41   : > { %6118 = vmatmul.msk.f32.gmra.mxu0 %vm315_vm0, %v235_v18  ;;  %6130 = vmatmul.msk.f32.gmra.mxu1 %vm315_vm0, %v235_v18 }
  0x49   : > { %6119 = vmatmul.msk.f32.gmra.mxu0 %vm315_vm0, %v236_v46  ;;  %6131 = vmatmul.msk.f32.gmra.mxu1 %vm315_vm0, %v236_v46 }
  0x51   : > { %6132 = vmatmul.msk.f32.gmra.mxu1 %vm315_vm0, %v237_v62  ;;  %6120 = vmatmul.msk.f32.gmra.mxu0 %vm315_vm0, %v237_v62 }
  0x59   : > { %6133 = vmatmul.msk.f32.gmra.mxu1 %vm315_vm0, %v238_v1  ;;  %6121 = vmatmul.msk.f32.gmra.mxu0 %vm315_vm0, %v238_v1 }
  0x61   : > { %6134 = vmatmul.msk.f32.gmra.mxu1 %vm315_vm0, %v239_v4  ;;  %6122 = vmatmul.msk.f32.gmra.mxu0 %vm315_vm0, %v239_v4 }
  0x69   : > { %6135 = vmatmul.msk.f32.gmra.mxu1 %vm315_vm0, %v240_v7  ;;  %6123 = vmatmul.msk.f32.gmra.mxu0 %vm315_vm0, %v240_v7 }
  0x71   : > { %v278_v35 = vpop.permute.xlu2 %277  ;;  %6136 = vmatmul.msk.f32.gmra.mxu1 %vm315_vm0, %v241_v10  ;;  %6124 = vmatmul.msk.f32.gmra.mxu0 %vm315_vm0, %v241_v10 }
  0x79   : > { %v283_v14 = vpop.permute.xlu2 %282  ;;  %6137 = vmatmul.msk.f32.gmra.mxu1 %vm315_vm0, %v242_v13  ;;  %6125 = vmatmul.msk.f32.gmra.mxu0 %vm315_vm0, %v242_v13 }
  0x87   : > { %v258_v19 = vpop.permute.xlu0 %257  ;;  %v268_v40 = vpop.permute.xlu1 %267 }
  0x8f   : > { %v263_v26 = vpop.permute.xlu0 %262 }
  0x9e   : > { %v369_v20 = vpop.f32.mrf.mxu0  ;;  %v422_v21 = vpop.f32.mrf.mxu1 }
  0x9f   : > { %v370_v22 = vadd.f32 %v369_v20, %v258_v19  ;;  %v423_v23 = vadd.f32 %v422_v21, %v258_v19 }
  0xa1   : > { %v458_v24 = vmul.f32 0.35355338, %v370_v22  ;;  %v459_v25 = vmul.f32 0.35355338, %v423_v23 }
  0xa3   : > { %498 = vxpose.xlu1.b32.start.end [1/1] (short) %v459_v25, 128  ;;  %466 = vxpose.xlu0.b32.start.end [1/1] (short) %v458_v24, 128 }
  0xa6   : > { %v372_v27 = vpop.f32.mrf.mxu0  ;;  %v425_v30 = vpop.f32.mrf.mxu1 }
  0xa7   : > { %v373_v28 = vadd.f32 %v372_v27, %v263_v26  ;;  %v426_v41 = vadd.f32 %v425_v30, %v263_v26 }
  0xa9   : > { %v460_v29 = vmul.f32 0.35355338, %v373_v28  ;;  %v461_v43 = vmul.f32 0.35355338, %v426_v41 }
  0xab   : > { %530 = vxpose.xlu2.b32.start.end [1/1] (short) %v460_v29, 128 }
  0xae   : > { %v375_v31 = vpop.f32.mrf.mxu0  ;;  %v428_v32 = vpop.f32.mrf.mxu1 }
  0xaf   : > { %v429_v42 = vadd.f32 %v428_v32, %v268_v40  ;;  %v376_v45 = vadd.f32 %v375_v31, %v268_v40 }
  0xb1   : > { %v463_v44 = vmul.f32 0.35355338, %v429_v42  ;;  %v462_v47 = vmul.f32 0.35355338, %v376_v45 }
  0xb6   : > { %v7431_v33 = vpop.f32.mrf.mxu0  ;;  %v7433_v34 = vpop.f32.mrf.mxu1 }
  0xbe   : > { %v381_v36 = vpop.f32.mrf.mxu0  ;;  %v434_v37 = vpop.f32.mrf.mxu1 }
  0xbf   : > { %v382_v38 = vadd.f32 %v381_v36, %v278_v35  ;;  %v435_v39 = vadd.f32 %v434_v37, %v278_v35 }
  0xc1   : > { %834 = vmatpush.msra.mxu2 %v382_v38  ;;  %947 = vmatpush.msra.mxu3 %v435_v39 }
  0xc6   : > { %v384_v17 = vpop.f32.mrf.mxu0  ;;  %v437_v18 = vpop.f32.mrf.mxu1 }
  0xc7   : > { %v385_v19 = vadd.f32 %v384_v17, %v283_v14  ;;  %v438_v20 = vadd.f32 %v437_v18, %v283_v14 }
  0xc9   : > { %1156 = vmatpush.msrb.mxu0 %v385_v19  ;;  %1269 = vmatpush.msrb.mxu1 %v438_v20 }
  0xce   : > { %v7628_v62 = vpop.f32.mrf.mxu0 }
  0xd6   : > { %v7647_v7 = vpop.f32.mrf.mxu0 }
  0xde   : > { %v7663_v14 = vpop.f32.mrf.mxu0 }
  0xdf   : > { %14395 = vst [vmem:[#allocation29_spill] sm:$0xff] %v7663_v14 }
  0xe6   : > { %v7679_v20 = vpop.f32.mrf.mxu0 }
  0xe7   : > { %14400 = vst [vmem:[#allocation34_spill] sm:$0xff] %v7679_v20 }
 0x123   : > { %626 = vxpose.xlu1.b32.start.end [1/1] (short) %v463_v44, 128  ;;  %562 = vxpose.xlu0.b32.start.end [1/1] (short) %v461_v43, 128 }
 0x12b   : > { %594 = vxpose.xlu2.b32.start.end [1/1] (short) %v462_v47, 128 }
 0x144   : > { %v546_v21 = vpop.trf.xlu2 }
 0x145   : > { %6202 = vmatmul.msk.f32.vlgmr.msrb.gmra.mxu0 %vm722_vm1, %v546_v21  ;;  %6234 = vmatmul.msk.f32.vlgmr.msrb.gmra.mxu1 %vm722_vm1, %v546_v21 }
 0x147   : > { %v482_v48 = vpop.trf.xlu0  ;;  %v7440_v49 = vpop.trf.xlu1 }
 0x148   : > { %6138 = vmatmul.msk.f32.vlgmr.msra.gmra.mxu2 %vm722_vm1, %v482_v48  ;;  %6170 = vmatmul.msk.f32.vlgmr.msra.gmra.mxu3 %vm722_vm1, %v482_v48 }
 0x14c   : > { %v547_v24 = vpop.trf.xlu2 }
 0x14d   : > { %6203 = vmatmul.msk.f32.gmra.mxu0 %vm722_vm1, %v547_v24  ;;  %6235 = vmatmul.msk.f32.gmra.mxu1 %vm722_vm1, %v547_v24 }
 0x14f   : > { %v483_v50 = vpop.trf.xlu0  ;;  %v7444_v51 = vpop.trf.xlu1 }
 0x150   : > { %6139 = vmatmul.msk.f32.gmra.mxu2 %vm722_vm1, %v483_v50  ;;  %6171 = vmatmul.msk.f32.gmra.mxu3 %vm722_vm1, %v483_v50 }
 0x154   : > { %v548_v27 = vpop.trf.xlu2 }
 0x155   : > { %6204 = vmatmul.msk.f32.gmra.mxu0 %vm722_vm1, %v548_v27  ;;  %6236 = vmatmul.msk.f32.gmra.mxu1 %vm722_vm1, %v548_v27 }
 0x157   : > { %v484_v52 = vpop.trf.xlu0  ;;  %v7448_v53 = vpop.trf.xlu1 }
 0x158   : > { %6140 = vmatmul.msk.f32.gmra.mxu2 %vm722_vm1, %v484_v52  ;;  %6172 = vmatmul.msk.f32.gmra.mxu3 %vm722_vm1, %v484_v52 }
 0x15c   : > { %v549_v30 = vpop.trf.xlu2 }
 0x15d   : > { %6205 = vmatmul.msk.f32.gmra.mxu0 %vm722_vm1, %v549_v30  ;;  %6237 = vmatmul.msk.f32.gmra.mxu1 %vm722_vm1, %v549_v30 }
 0x15f   : > { %v485_v54 = vpop.trf.xlu0  ;;  %v7452_v55 = vpop.trf.xlu1 }
 0x160   : > { %6141 = vmatmul.msk.f32.gmra.mxu2 %vm722_vm1, %v485_v54  ;;  %6173 = vmatmul.msk.f32.gmra.mxu3 %vm722_vm1, %v485_v54 }
 0x164   : > { %v550_v36 = vpop.trf.xlu2 }
 0x165   : > { %6206 = vmatmul.msk.f32.gmra.mxu0 %vm722_vm1, %v550_v36  ;;  %6238 = vmatmul.msk.f32.gmra.mxu1 %vm722_vm1, %v550_v36 }
 0x167   : > { %v486_v56 = vpop.trf.xlu0  ;;  %v7456_v57 = vpop.trf.xlu1 }
 0x168   : > { %6142 = vmatmul.msk.f32.gmra.mxu2 %vm722_vm1, %v486_v56  ;;  %6174 = vmatmul.msk.f32.gmra.mxu3 %vm722_vm1, %v486_v56 }
 0x16c   : > { %v551_v40 = vpop.trf.xlu2 }
 0x16d   : > { %6207 = vmatmul.msk.f32.gmra.mxu0 %vm722_vm1, %v551_v40  ;;  %6239 = vmatmul.msk.f32.gmra.mxu1 %vm722_vm1, %v551_v40 }
 0x16f   : > { %v487_v58 = vpop.trf.xlu0  ;;  %v7460_v59 = vpop.trf.xlu1 }
 0x170   : > { %6143 = vmatmul.msk.f32.gmra.mxu2 %vm722_vm1, %v487_v58  ;;  %6175 = vmatmul.msk.f32.gmra.mxu3 %vm722_vm1, %v487_v58  ;;  %v250_v58 = vld [vmem:[%s13692_s2 + $0x38] sm:$0xff] }
 0x174   : > { %v552_v44 = vpop.trf.xlu2 }
 0x175   : > { %6208 = vmatmul.msk.f32.gmra.mxu0 %vm722_vm1, %v552_v44  ;;  %6240 = vmatmul.msk.f32.gmra.mxu1 %vm722_vm1, %v552_v44 }
 0x177   : > { %v488_v60 = vpop.trf.xlu0  ;;  %v7464_v61 = vpop.trf.xlu1 }
 0x178   : > { %6144 = vmatmul.msk.f32.gmra.mxu2 %vm722_vm1, %v488_v60  ;;  %6176 = vmatmul.msk.f32.gmra.mxu3 %vm722_vm1, %v488_v60 }
 0x17c   : > { %v553_v48 = vpop.trf.xlu2 }
 0x17d   : > { %6209 = vmatmul.msk.f32.gmra.mxu0 %vm722_vm1, %v553_v48  ;;  %6241 = vmatmul.msk.f32.gmra.mxu1 %vm722_vm1, %v553_v48 }
 0x17f   : > { %v489_v63 = vpop.trf.xlu0  ;;  %v7473_v0 = vpop.trf.xlu1 }
 0x180   : > { %6145 = vmatmul.msk.f32.gmra.mxu2 %vm722_vm1, %v489_v63  ;;  %6177 = vmatmul.msk.f32.gmra.mxu3 %vm722_vm1, %v489_v63  ;;  %v7630_v63 = vpop.f32.mrf.mxu1 }
 0x184   : > { %v554_v52 = vpop.trf.xlu2 }
 0x185   : > { %6210 = vmatmul.msk.f32.gmra.mxu0 %vm722_vm1, %v554_v52  ;;  %6242 = vmatmul.msk.f32.gmra.mxu1 %vm722_vm1, %v554_v52 }
 0x187   : > { %v490_v2 = vpop.trf.xlu0  ;;  %v7482_v3 = vpop.trf.xlu1 }
 0x188   : > { %6146 = vmatmul.msk.f32.gmra.mxu2 %vm722_vm1, %v490_v2  ;;  %6178 = vmatmul.msk.f32.gmra.mxu3 %vm722_vm1, %v490_v2 }
 0x18f   : > { %v491_v5 = vpop.trf.xlu0  ;;  %v7491_v6 = vpop.trf.xlu1 }
 0x190   : > { %6147 = vmatmul.msk.f32.gmra.mxu2 %vm722_vm1, %v491_v5  ;;  %6179 = vmatmul.msk.f32.gmra.mxu3 %vm722_vm1, %v491_v5 }
 0x197   : > { %v492_v8 = vpop.trf.xlu0  ;;  %v7500_v9 = vpop.trf.xlu1 }
 0x198   : > { %6148 = vmatmul.msk.f32.gmra.mxu2 %vm722_vm1, %v492_v8  ;;  %6180 = vmatmul.msk.f32.gmra.mxu3 %vm722_vm1, %v492_v8  ;;  %v7649_v8 = vpop.f32.mrf.mxu1 }
 0x19f   : > { %v493_v11 = vpop.trf.xlu0  ;;  %v7509_v12 = vpop.trf.xlu1 }
 0x1a0   : > { %6149 = vmatmul.msk.f32.gmra.mxu2 %vm722_vm1, %v493_v11  ;;  %6181 = vmatmul.msk.f32.gmra.mxu3 %vm722_vm1, %v493_v11 }
 0x1a7   : > { %v494_v15 = vpop.trf.xlu0  ;;  %v7518_v16 = vpop.trf.xlu1 }
 0x1a8   : > { %6150 = vmatmul.msk.f32.gmra.mxu2 %vm722_vm1, %v494_v15  ;;  %6182 = vmatmul.msk.f32.gmra.mxu3 %vm722_vm1, %v494_v15  ;;  %v7665_v15 = vpop.f32.mrf.mxu1 }
 0x1a9   : > { %14396 = vst [vmem:[#allocation30_spill] sm:$0xff] %v7665_v15 }
 0x1af   : > { %v495_v22 = vpop.trf.xlu0  ;;  %v7524_v23 = vpop.trf.xlu1 }
 0x1b0   : > { %6151 = vmatmul.msk.f32.gmra.mxu2 %vm722_vm1, %v495_v22  ;;  %6183 = vmatmul.msk.f32.gmra.mxu3 %vm722_vm1, %v495_v22  ;;  %v7681_v21 = vpop.f32.mrf.mxu1 }
 0x1b1   : > { %14401 = vst [vmem:[#allocation35_spill] sm:$0xff] %v7681_v21 }
 0x1b7   : > { %v496_v25 = vpop.trf.xlu0  ;;  %v7530_v26 = vpop.trf.xlu1 }
 0x1b8   : > { %6152 = vmatmul.msk.f32.gmra.mxu2 %vm722_vm1, %v496_v25  ;;  %6184 = vmatmul.msk.f32.gmra.mxu3 %vm722_vm1, %v496_v25  ;;  %v7693_v25 = vpop.f32.mrf.mxu0  ;;  %v7695_v27 = vpop.f32.mrf.mxu1 }
 0x1b9   : > { %14404 = vst [vmem:[#allocation38_spill] sm:$0xff] %v7693_v25 }
 0x1ba   : > { %14405 = vst [vmem:[#allocation39_spill] sm:$0xff] %v7695_v27 }
 0x1bf   : > { %v497_v28 = vpop.trf.xlu0  ;;  %v7536_v29 = vpop.trf.xlu1 }
 0x1c0   : > { %6153 = vmatmul.msk.f32.gmra.mxu2 %vm722_vm1, %v497_v28  ;;  %6185 = vmatmul.msk.f32.gmra.mxu3 %vm722_vm1, %v497_v28  ;;  %v7709_v40 = vpop.f32.mrf.mxu0  ;;  %v7711_v44 = vpop.f32.mrf.mxu1 }
 0x1c1   : > { %14409 = vst [vmem:[#allocation43_spill] sm:$0xff] %v7709_v40 }
 0x1c2   : > { %14410 = vst [vmem:[#allocation44_spill] sm:$0xff] %v7711_v44 }
 0x1c7   : > { %v7542_v31 = vpop.trf.xlu1 }
 0x1c8   : > { %14371 = vst [vmem:[#allocation5_spill] sm:$0xff] %v7542_v31  ;;  %6154 = vmatmul.msk.f32.gmra.mxu2 %vm722_vm1, %v7440_v49  ;;  %6186 = vmatmul.msk.f32.gmra.mxu3 %vm722_vm1, %v7440_v49 }
 0x1cb   : > { %v7548_v32 = vpop.f32.mrf.mxu2  ;;  %v7550_v35 = vpop.f32.mrf.mxu3 }
 0x1cc   : > { %14372 = vst [vmem:[#allocation6_spill] sm:$0xff] %v7548_v32 }
 0x1cd   : > { %14373 = vst [vmem:[#allocation7_spill] sm:$0xff] %v7550_v35 }
 0x1cf   : > { %v7554_v37 = vpop.trf.xlu1 }
 0x1d0   : > { %14374 = vst [vmem:[#allocation8_spill] sm:$0xff] %v7554_v37  ;;  %6155 = vmatmul.msk.f32.gmra.mxu2 %vm722_vm1, %v7444_v51  ;;  %6187 = vmatmul.msk.f32.gmra.mxu3 %vm722_vm1, %v7444_v51 }
 0x1d3   : > { %v7560_v38 = vpop.f32.mrf.mxu2  ;;  %v7562_v39 = vpop.f32.mrf.mxu3 }
 0x1d4   : > { %14375 = vst [vmem:[#allocation9_spill] sm:$0xff] %v7562_v39 }
 0x1d7   : > { %v7566_v41 = vpop.trf.xlu1 }
 0x1d8   : > { %14376 = vst [vmem:[#allocation10_spill] sm:$0xff] %v7566_v41  ;;  %6156 = vmatmul.msk.f32.gmra.mxu2 %vm722_vm1, %v7448_v53  ;;  %6188 = vmatmul.msk.f32.gmra.mxu3 %vm722_vm1, %v7448_v53  ;;  %v246_v53 = vld [vmem:[%s13692_s2 + $0x18] sm:$0xff] }
 0x1db   : > { %v7572_v42 = vpop.f32.mrf.mxu2  ;;  %v7574_v43 = vpop.f32.mrf.mxu3 }
 0x1dc   : > { %14377 = vst [vmem:[#allocation11_spill] sm:$0xff] %v7574_v43 }
 0x1df   : > { %v7582_v45 = vpop.trf.xlu1 }
 0x1e0   : > { %6157 = vmatmul.msk.f32.gmra.mxu2 %vm722_vm1, %v7452_v55  ;;  %6189 = vmatmul.msk.f32.gmra.mxu3 %vm722_vm1, %v7452_v55  ;;  %14378 = vst [vmem:[#allocation12_spill] sm:$0xff] %v7582_v45 }
 0x1e3   : > { %v7584_v46 = vpop.f32.mrf.mxu2  ;;  %v7586_v47 = vpop.f32.mrf.mxu3 }
 0x1e4   : > { %14379 = vst [vmem:[#allocation13_spill] sm:$0xff] %v7584_v46 }
 0x1e5   : > { %14380 = vst [vmem:[#allocation14_spill] sm:$0xff] %v7586_v47 }
 0x1e7   : > { %v7594_v49 = vpop.trf.xlu1 }
 0x1e8   : > { %6158 = vmatmul.msk.f32.gmra.mxu2 %vm722_vm1, %v7456_v57  ;;  %6190 = vmatmul.msk.f32.gmra.mxu3 %vm722_vm1, %v7456_v57  ;;  %14381 = vst [vmem:[#allocation15_spill] sm:$0xff] %v7594_v49  ;;  %v555_v57 = vpop.trf.xlu2 }
 0x1e9   : > { %6211 = vmatmul.msk.f32.gmra.mxu0 %vm722_vm1, %v555_v57  ;;  %6243 = vmatmul.msk.f32.gmra.mxu1 %vm722_vm1, %v555_v57  ;;  %v2011_v57 = vmax.f32 %v7548_v32, %v7550_v35 }
 0x1eb   : > { %v7596_v50 = vpop.f32.mrf.mxu2  ;;  %v7598_v51 = vpop.f32.mrf.mxu3 }
 0x1ec   : > { %14382 = vst [vmem:[#allocation16_spill] sm:$0xff] %v7596_v50  ;;  %v2023_v44 = vmax.f32 %v7596_v50, %v7598_v51 }
 0x1ed   : > { %14383 = vst [vmem:[#allocation17_spill] sm:$0xff] %v7598_v51 }
 0x1ef   : > { %v7613_v56 = vpop.trf.xlu1 }
 0x1f0   : > { %6159 = vmatmul.msk.f32.gmra.mxu2 %vm722_vm1, %v7460_v59  ;;  %6191 = vmatmul.msk.f32.gmra.mxu3 %vm722_vm1, %v7460_v59  ;;  %14386 = vst [vmem:[#allocation20_spill] sm:$0xff] %v7613_v56  ;;  %v556_v1 = vpop.trf.xlu2 }
 0x1f1   : > { %6212 = vmatmul.msk.f32.gmra.mxu0 %vm722_vm1, %v556_v1  ;;  %6244 = vmatmul.msk.f32.gmra.mxu1 %vm722_vm1, %v556_v1  ;;  %v7729_v1 = vpop.f32.mrf.mxu1 }
 0x1f2   : > { %14415 = vst [vmem:[#allocation49_spill] sm:$0xff] %v7729_v1 }
 0x1f3   : > { %v7609_v54 = vpop.f32.mrf.mxu2  ;;  %v7611_v55 = vpop.f32.mrf.mxu3 }
 0x1f4   : > { %14384 = vst [vmem:[#allocation18_spill] sm:$0xff] %v7609_v54  ;;  %v2026_v15 = vmax.f32 %v7609_v54, %v7611_v55 }
 0x1f5   : > { %14385 = vst [vmem:[#allocation19_spill] sm:$0xff] %v7611_v55  ;;  %272 = vperm.xlu1 %6453, %v246_v53  }
 0x1f7   : > { %v7632_v2 = vpop.trf.xlu1 }
 0x1f8   : > { %6160 = vmatmul.msk.f32.gmra.mxu2 %vm722_vm1, %v7464_v61  ;;  %6192 = vmatmul.msk.f32.gmra.mxu3 %vm722_vm1, %v7464_v61  ;;  %14389 = vst [vmem:[#allocation23_spill] sm:$0xff] %v7632_v2  ;;  %v253_v61 = vld [vmem:[%s13692_s2 + $0x50] sm:$0xff]  ;;  %v557_v10 = vpop.trf.xlu2 }
 0x1f9   : > { %6213 = vmatmul.msk.f32.gmra.mxu0 %vm722_vm1, %v557_v10  ;;  %6245 = vmatmul.msk.f32.gmra.mxu1 %vm722_vm1, %v557_v10 }
 0x1fb   : > { %v7624_v59 = vpop.f32.mrf.mxu2  ;;  %v7626_v60 = vpop.f32.mrf.mxu3 }
 0x1fc   : > { %14387 = vst [vmem:[#allocation21_spill] sm:$0xff] %v7624_v59  ;;  %v2029_v51 = vmax.f32 %v7624_v59, %v7626_v60 }
 0x1fd   : > { %14388 = vst [vmem:[#allocation22_spill] sm:$0xff] %v7626_v60  ;;  %292 = vperm.xlu1 %6453, %v250_v58   ;;  %v7727_v58 = vpop.f32.mrf.mxu0 }
 0x1fe   : > { %14414 = vst [vmem:[#allocation48_spill] sm:$0xff] %v7727_v58 }
 0x200   : > { %6161 = vmatmul.msk.f32.gmra.mxu2 %vm722_vm1, %v7473_v0  ;;  %6193 = vmatmul.msk.f32.gmra.mxu3 %vm722_vm1, %v7473_v0  ;;  %v7657_v0 = vpop.trf.xlu1  ;;  %v558_v17 = vpop.trf.xlu2 }
 0x201   : > { %14392 = vst [vmem:[#allocation26_spill] sm:$0xff] %v7657_v0  ;;  %6214 = vmatmul.msk.f32.gmra.mxu0 %vm722_vm1, %v558_v17  ;;  %6246 = vmatmul.msk.f32.gmra.mxu1 %vm722_vm1, %v558_v17 }
 0x203   : > { %v7643_v4 = vpop.f32.mrf.mxu2  ;;  %v7645_v5 = vpop.f32.mrf.mxu3 }
 0x204   : > { %14390 = vst [vmem:[#allocation24_spill] sm:$0xff] %v7643_v4 }
 0x205   : > { %14391 = vst [vmem:[#allocation25_spill] sm:$0xff] %v7645_v5  ;;  %307 = vperm.xlu1 %6453, %v253_v61   ;;  %v578_v61 = vpop.trf.xlu0 }
 0x208   : > { %6162 = vmatmul.msk.f32.gmra.mxu2 %vm722_vm1, %v7482_v3  ;;  %6194 = vmatmul.msk.f32.gmra.mxu3 %vm722_vm1, %v7482_v3  ;;  %v7673_v3 = vpop.trf.xlu1  ;;  %v559_v22 = vpop.trf.xlu2 }
 0x209   : > { %14397 = vst [vmem:[#allocation31_spill] sm:$0xff] %v7673_v3  ;;  %6215 = vmatmul.msk.f32.gmra.mxu0 %vm722_vm1, %v559_v22  ;;  %6247 = vmatmul.msk.f32.gmra.mxu1 %vm722_vm1, %v559_v22  ;;  %v2020_v22 = vmax.f32 %v7584_v46, %v7586_v47  ;;  %v2032_v46 = vmax.f32 %v7643_v4, %v7645_v5 }
 0x20b   : > { %v7659_v11 = vpop.f32.mrf.mxu2  ;;  %v7661_v13 = vpop.f32.mrf.mxu3 }
 0x20c   : > { %14393 = vst [vmem:[#allocation27_spill] sm:$0xff] %v7659_v11  ;;  %v2035_v32 = vmax.f32 %v7659_v11, %v7661_v13 }
 0x20d   : > { %14394 = vst [vmem:[#allocation28_spill] sm:$0xff] %v7661_v13 }
 0x210   : > { %6163 = vmatmul.msk.f32.gmra.mxu2 %vm722_vm1, %v7491_v6  ;;  %6195 = vmatmul.msk.f32.gmra.mxu3 %vm722_vm1, %v7491_v6  ;;  %v560_v28 = vpop.trf.xlu2  ;;  %v7697_v30 = vpop.trf.xlu1 }
 0x211   : > { %14406 = vst [vmem:[#allocation40_spill] sm:$0xff] %v7697_v30  ;;  %6216 = vmatmul.msk.f32.gmra.mxu0 %vm722_vm1, %v560_v28  ;;  %6248 = vmatmul.msk.f32.gmra.mxu1 %vm722_vm1, %v560_v28  ;;  %v7745_v28 = vpop.f32.mrf.mxu0 }
 0x212   : > { %14419 = vst [vmem:[#allocation53_spill] sm:$0xff] %v7745_v28 }
 0x213   : > { %v7675_v18 = vpop.f32.mrf.mxu2  ;;  %v7677_v19 = vpop.f32.mrf.mxu3 }
 0x214   : > { %14398 = vst [vmem:[#allocation32_spill] sm:$0xff] %v7675_v18 }
 0x215   : > { %14399 = vst [vmem:[#allocation33_spill] sm:$0xff] %v7677_v19 }
 0x218   : > { %6164 = vmatmul.msk.f32.gmra.mxu2 %vm722_vm1, %v7500_v9  ;;  %6196 = vmatmul.msk.f32.gmra.mxu3 %vm722_vm1, %v7500_v9  ;;  %v561_v48 = vpop.trf.xlu2 }
 0x219   : > { %6217 = vmatmul.msk.f32.gmra.mxu0 %vm722_vm1, %v561_v48  ;;  %6249 = vmatmul.msk.f32.gmra.mxu1 %vm722_vm1, %v561_v48  ;;  %v7747_v48 = vpop.f32.mrf.mxu1  ;;  %v7761_v40 = vpop.f32.mrf.mxu0 }
 0x21a   : > { %14420 = vst [vmem:[#allocation54_spill] sm:$0xff] %v7747_v48 }
 0x21b   : > { %v7689_v6 = vpop.f32.mrf.mxu2  ;;  %v7691_v24 = vpop.f32.mrf.mxu3  ;;  %14423 = vst [vmem:[#allocation57_spill] sm:$0xff] %v7761_v40 }
 0x21c   : > { %14402 = vst [vmem:[#allocation36_spill] sm:$0xff] %v7689_v6 }
 0x21d   : > { %14403 = vst [vmem:[#allocation37_spill] sm:$0xff] %v7691_v24 }
 0x220   : > { %6165 = vmatmul.msk.f32.gmra.mxu2 %vm722_vm1, %v7509_v12  ;;  %6197 = vmatmul.msk.f32.gmra.mxu3 %vm722_vm1, %v7509_v12  ;;  %v7719_v12 = vpop.trf.xlu1 }
 0x221   : > { %14411 = vst [vmem:[#allocation45_spill] sm:$0xff] %v7719_v12  ;;  %6218 = vmatmul.msk.f32.gmra.mxu0 %vm722_vm1, %v578_v61  ;;  %6250 = vmatmul.msk.f32.gmra.mxu1 %vm722_vm1, %v578_v61  ;;  %v7763_v21 = vpop.f32.mrf.mxu1  ;;  %v7779_v14 = vpop.f32.mrf.mxu0 }
 0x222   : > { %14424 = vst [vmem:[#allocation58_spill] sm:$0xff] %v7763_v21 }
 0x223   : > { %v7705_v9 = vpop.f32.mrf.mxu2  ;;  %v7707_v36 = vpop.f32.mrf.mxu3  ;;  %14428 = vst [vmem:[#allocation62_spill] sm:$0xff] %v7779_v14 }
 0x224   : > { %14407 = vst [vmem:[#allocation41_spill] sm:$0xff] %v7705_v9 }
 0x225   : > { %14408 = vst [vmem:[#allocation42_spill] sm:$0xff] %v7707_v36 }
 0x228   : > { %6166 = vmatmul.msk.f32.gmra.mxu2 %vm722_vm1, %v7518_v16  ;;  %6198 = vmatmul.msk.f32.gmra.mxu3 %vm722_vm1, %v7518_v16  ;;  %v7737_v16 = vpop.trf.xlu1 }
 0x229   : > { %14416 = vst [vmem:[#allocation50_spill] sm:$0xff] %v7737_v16  ;;  %v7781_v27 = vpop.f32.mrf.mxu1  ;;  %v7793_v55 = vpop.f32.mrf.mxu0 }
 0x22a   : > { %14429 = vst [vmem:[#allocation63_spill] sm:$0xff] %v7781_v27 }
 0x22b   : > { %v7721_v52 = vpop.f32.mrf.mxu2  ;;  %v7723_v53 = vpop.f32.mrf.mxu3  ;;  %14433 = vst [vmem:[#allocation67_spill] sm:$0xff] %v7793_v55 }
 0x22c   : > { %14412 = vst [vmem:[#allocation46_spill] sm:$0xff] %v7721_v52 }
 0x22d   : > { %14413 = vst [vmem:[#allocation47_spill] sm:$0xff] %v7723_v53 }
 0x22f   : > { %2012 = vmax.xlane.f32.xlu1 %v2011_v57  ;;  %v579_v57 = vpop.trf.xlu0 }
 0x230   : > { %6167 = vmatmul.msk.f32.gmra.mxu2 %vm722_vm1, %v7524_v23  ;;  %6199 = vmatmul.msk.f32.gmra.mxu3 %vm722_vm1, %v7524_v23 }
 0x231   : > { %6219 = vmatmul.msk.f32.gmra.mxu0 %vm722_vm1, %v579_v57  ;;  %6251 = vmatmul.msk.f32.gmra.mxu1 %vm722_vm1, %v579_v57  ;;  %v7765_v57 = vpop.trf.xlu1  ;;  %v7795_v54 = vpop.f32.mrf.mxu1 }
 0x232   : > { %14425 = vst [vmem:[#allocation59_spill] sm:$0xff] %v7765_v57  ;;  %v7807_v60 = vpop.f32.mrf.mxu0 }
 0x233   : > { %v7739_v10 = vpop.f32.mrf.mxu2  ;;  %v7741_v17 = vpop.f32.mrf.mxu3  ;;  %14434 = vst [vmem:[#allocation68_spill] sm:$0xff] %v7795_v54 }
 0x234   : > { %14417 = vst [vmem:[#allocation51_spill] sm:$0xff] %v7739_v10 }
 0x235   : > { %14418 = vst [vmem:[#allocation52_spill] sm:$0xff] %v7741_v17 }
 0x236   : > { %14438 = vst [vmem:[#allocation72_spill] sm:$0xff] %v7807_v60 }
 0x237   : > { %2021 = vmax.xlane.f32.xlu1 %v2020_v22  ;;  %v580_v20 = vpop.trf.xlu0 }
 0x238   : > { %6168 = vmatmul.msk.f32.gmra.mxu2 %vm722_vm1, %v7530_v26  ;;  %6200 = vmatmul.msk.f32.gmra.mxu3 %vm722_vm1, %v7530_v26 }
 0x239   : > { %6220 = vmatmul.msk.f32.gmra.mxu0 %vm722_vm1, %v580_v20  ;;  %6252 = vmatmul.msk.f32.gmra.mxu1 %vm722_vm1, %v580_v20  ;;  %v7785_v20 = vpop.trf.xlu1  ;;  %v7809_v59 = vpop.f32.mrf.mxu1 }
 0x23a   : > { %14430 = vst [vmem:[#allocation64_spill] sm:$0xff] %v7785_v20 }
 0x23b   : > { %v7755_v23 = vpop.f32.mrf.mxu2  ;;  %v7757_v61 = vpop.f32.mrf.mxu3  ;;  %14439 = vst [vmem:[#allocation73_spill] sm:$0xff] %v7809_v59 }
 0x23c   : > { %14421 = vst [vmem:[#allocation55_spill] sm:$0xff] %v7755_v23 }
 0x23d   : > { %14422 = vst [vmem:[#allocation56_spill] sm:$0xff] %v7757_v61 }
 0x23f   : > { %2024 = vmax.xlane.f32.xlu1 %v2023_v44  ;;  %v581_v25 = vpop.trf.xlu0 }
 0x240   : > { %6169 = vmatmul.msk.f32.gmra.mxu2 %vm722_vm1, %v7536_v29  ;;  %6201 = vmatmul.msk.f32.gmra.mxu3 %vm722_vm1, %v7536_v29 }
 0x241   : > { %6221 = vmatmul.msk.f32.gmra.mxu0 %vm722_vm1, %v581_v25  ;;  %6253 = vmatmul.msk.f32.gmra.mxu1 %vm722_vm1, %v581_v25  ;;  %v7821_v5 = vpop.f32.mrf.mxu1 }
 0x242   : > { %14443 = vst [vmem:[#allocation77_spill] sm:$0xff] %v7821_v5 }
 0x243   : > { %v7773_v26 = vpop.f32.mrf.mxu2  ;;  %v7775_v22 = vpop.f32.mrf.mxu3 }
 0x244   : > { %14426 = vst [vmem:[#allocation60_spill] sm:$0xff] %v7773_v26 }
 0x245   : > { %14427 = vst [vmem:[#allocation61_spill] sm:$0xff] %v7775_v22 }
 0x247   : > { %2027 = vmax.xlane.f32.xlu1 %v2026_v15  ;;  %v582_v50 = vpop.trf.xlu0  ;;  %v7799_v15 = vpop.trf.xlu1 }
 0x248   : > { %14435 = vst [vmem:[#allocation69_spill] sm:$0xff] %v7799_v15  ;;  %v7819_v15 = vpop.f32.mrf.mxu0 }
 0x249   : > { %6222 = vmatmul.msk.f32.gmra.mxu0 %vm722_vm1, %v582_v50  ;;  %6254 = vmatmul.msk.f32.gmra.mxu1 %vm722_vm1, %v582_v50  ;;  %14442 = vst [vmem:[#allocation76_spill] sm:$0xff] %v7819_v15  ;;  %v7833_v13 = vpop.f32.mrf.mxu1 }
 0x24a   : > { %14446 = vst [vmem:[#allocation80_spill] sm:$0xff] %v7833_v13 }
 0x24b   : > { %v7787_v29 = vpop.f32.mrf.mxu2  ;;  %v7789_v44 = vpop.f32.mrf.mxu3 }
 0x24c   : > { %14431 = vst [vmem:[#allocation65_spill] sm:$0xff] %v7787_v29 }
 0x24d   : > { %14432 = vst [vmem:[#allocation66_spill] sm:$0xff] %v7789_v44 }
 0x24f   : > { %2030 = vmax.xlane.f32.xlu1 %v2029_v51  ;;  %v583_v35 = vpop.trf.xlu0  ;;  %v7823_v4 = vpop.trf.xlu1 }
 0x250   : > { %14444 = vst [vmem:[#allocation78_spill] sm:$0xff] %v7823_v4  ;;  %v7831_v57 = vpop.f32.mrf.mxu0 }
 0x251   : > { %6223 = vmatmul.msk.f32.gmra.mxu0 %vm722_vm1, %v583_v35  ;;  %6255 = vmatmul.msk.f32.gmra.mxu1 %vm722_vm1, %v583_v35  ;;  %14445 = vst [vmem:[#allocation79_spill] sm:$0xff] %v7831_v57  ;;  %v7845_v3 = vpop.f32.mrf.mxu1 }
 0x252   : > { %14449 = vst [vmem:[#allocation83_spill] sm:$0xff] %v7845_v3 }
 0x253   : > { %v7801_v25 = vpop.f32.mrf.mxu2  ;;  %v7803_v47 = vpop.f32.mrf.mxu3 }
 0x254   : > { %14436 = vst [vmem:[#allocation70_spill] sm:$0xff] %v7801_v25  ;;  %v2062_v45 = vmax.f32 %v7801_v25, %v7803_v47 }
 0x255   : > { %14437 = vst [vmem:[#allocation71_spill] sm:$0xff] %v7803_v47 }
 0x257   : > { %2033 = vmax.xlane.f32.xlu1 %v2032_v46  ;;  %v584_v20 = vpop.trf.xlu0  ;;  %v2038_v46 = vmax.f32 %v7675_v18, %v7677_v19  ;;  %v2041_v19 = vmax.f32 %v7689_v6, %v7691_v24 }
 0x258   : > { %v7843_v18 = vpop.f32.mrf.mxu0 }
 0x259   : > { %6224 = vmatmul.msk.f32.gmra.mxu0 %vm722_vm1, %v584_v20  ;;  %6256 = vmatmul.msk.f32.gmra.mxu1 %vm722_vm1, %v584_v20  ;;  %14448 = vst [vmem:[#allocation82_spill] sm:$0xff] %v7843_v18 }
 0x25b   : > { %v7813_v50 = vpop.f32.mrf.mxu2  ;;  %v7815_v51 = vpop.f32.mrf.mxu3 }
 0x25c   : > { %14440 = vst [vmem:[#allocation74_spill] sm:$0xff] %v7813_v50 }
 0x25d   : > { %14441 = vst [vmem:[#allocation75_spill] sm:$0xff] %v7815_v51 }
 0x25f   : > { %2036 = vmax.xlane.f32.xlu1 %v2035_v32  ;;  %v585_v16 = vpop.trf.xlu0 }
 0x261   : > { %6225 = vmatmul.msk.f32.gmra.mxu0 %vm722_vm1, %v585_v16  ;;  %6257 = vmatmul.msk.f32.gmra.mxu1 %vm722_vm1, %v585_v16 }
 0x263   : > { %v7827_v35 = vpop.f32.mrf.mxu2  ;;  %v7835_v11 = vpop.f32.mrf.mxu3 }
 0x264   : > { %14447 = vst [vmem:[#allocation81_spill] sm:$0xff] %v7835_v11 }
 0x266   : > { %v7857_v16 = vpop.f32.mrf.mxu0 }
 0x267   : > { %v273_v4 = vpop.permute.xlu1 %272  ;;  %2039 = vmax.xlane.f32.xlu1 %v2038_v46  ;;  %v586_v0 = vpop.trf.xlu0  ;;  %14452 = vst [vmem:[#allocation86_spill] sm:$0xff] %v7857_v16 }
 0x268   : > { %v379_v32 = vadd.f32 %v7431_v33, %v273_v4  ;;  %v432_v20 = vadd.f32 %v7433_v34, %v273_v4  ;;  %v7859_v46 = vpop.f32.mrf.mxu1 }
 0x269   : > { %6226 = vmatmul.msk.f32.gmra.mxu0 %vm722_vm1, %v586_v0  ;;  %6258 = vmatmul.msk.f32.gmra.mxu1 %vm722_vm1, %v586_v0  ;;  %14453 = vst [vmem:[#allocation87_spill] sm:$0xff] %v7859_v46 }
 0x26a   : > { %v464_v12 = vmul.f32 0.35355338, %v379_v32  ;;  %v465_v30 = vmul.f32 0.35355338, %v432_v20 }
 0x26b   : > { %v7847_v2 = vpop.f32.mrf.mxu2  ;;  %v7851_v33 = vpop.f32.mrf.mxu3 }
 0x26c   : > { %690 = vxpose.xlu2.b32.start.end [1/1] (short) %v465_v30, 128  ;;  %658 = vxpose.xlu0.b32.start.end [1/1] (short) %v464_v12, 128  ;;  %14450 = vst [vmem:[#allocation84_spill] sm:$0xff] %v7847_v2  ;;  %v2044_v12 = vmax.f32 %v7705_v9, %v7707_v36  ;;  %v2071_v47 = vmax.f32 %v7847_v2, %v7851_v33 }
 0x26d   : > { %14451 = vst [vmem:[#allocation85_spill] sm:$0xff] %v7851_v33 }
 0x26f   : > { %v293_v34 = vpop.permute.xlu1 %292  ;;  %2042 = vmax.xlane.f32.xlu1 %v2041_v19  ;;  %v587_v32 = vpop.trf.xlu0 }
 0x270   : > { %v391_v4 = vadd.f32 %v7647_v7, %v293_v34  ;;  %v444_v30 = vadd.f32 %v7649_v8, %v293_v34  ;;  %v2047_v8 = vmax.f32 %v7721_v52, %v7723_v53  ;;  %v7869_v19 = vpop.f32.mrf.mxu0  ;;  %v7871_v20 = vpop.f32.mrf.mxu1 }
 0x271   : > { %6227 = vmatmul.msk.f32.gmra.mxu0 %vm722_vm1, %v587_v32  ;;  %6259 = vmatmul.msk.f32.gmra.mxu1 %vm722_vm1, %v587_v32  ;;  %14454 = vst [vmem:[#allocation88_spill] sm:$0xff] %v7869_v19 }
 0x272   : > { %1800 = vmatpush.msra.mxu0 %v391_v4  ;;  %1913 = vmatpush.msra.mxu1 %v444_v30  ;;  %14455 = vst [vmem:[#allocation89_spill] sm:$0xff] %v7871_v20 }
 0x273   : > { %v7863_v0 = vpop.f32.mrf.mxu2  ;;  %v7865_v7 = vpop.f32.mrf.mxu3 }
 0x277   : > { %2045 = vmax.xlane.f32.xlu1 %v2044_v12  ;;  %v588_v34 = vpop.trf.xlu0  ;;  %v2050_v12 = vmax.f32 %v7739_v10, %v7741_v17 }
 0x278   : > { %v7881_v32 = vpop.f32.mrf.mxu0  ;;  %v7883_v53 = vpop.f32.mrf.mxu1 }
 0x279   : > { %6228 = vmatmul.msk.f32.gmra.mxu0 %vm722_vm1, %v588_v34  ;;  %6260 = vmatmul.msk.f32.gmra.mxu1 %vm722_vm1, %v588_v34  ;;  %14457 = vst [vmem:[#allocation91_spill] sm:$0xff] %v7881_v32 }
 0x27a   : > { %14458 = vst [vmem:[#allocation92_spill] sm:$0xff] %v7883_v53 }
 0x27b   : > { %v7875_v4 = vpop.f32.mrf.mxu2  ;;  %v7877_v30 = vpop.f32.mrf.mxu3 }
 0x27c   : > { %14456 = vst [vmem:[#allocation90_spill] sm:$0xff] %v7877_v30 }
 0x27f   : > { %2048 = vmax.xlane.f32.xlu1 %v2047_v8  ;;  %v589_v52 = vpop.trf.xlu0  ;;  %v2053_v8 = vmax.f32 %v7755_v23, %v7757_v61 }
 0x280   : > { %v7889_v34 = vpop.f32.mrf.mxu0  ;;  %v7891_v24 = vpop.f32.mrf.mxu1 }
 0x281   : > { %6229 = vmatmul.msk.f32.gmra.mxu0 %vm722_vm1, %v589_v52  ;;  %6261 = vmatmul.msk.f32.gmra.mxu1 %vm722_vm1, %v589_v52  ;;  %14459 = vst [vmem:[#allocation93_spill] sm:$0xff] %v7889_v34  ;;  %v2056_v52 = vmax.f32 %v7773_v26, %v7775_v22  ;;  %v2059_v22 = vmax.f32 %v7787_v29, %v7789_v44 }
 0x282   : > { %14460 = vst [vmem:[#allocation94_spill] sm:$0xff] %v7891_v24 }
 0x283   : > { %v7893_v6 = vpop.f32.mrf.mxu2  ;;  %v7895_v17 = vpop.f32.mrf.mxu3 }
 0x284   : > { %14461 = vst [vmem:[#allocation95_spill] sm:$0xff] %v7893_v6 }
 0x285   : > { %14462 = vst [vmem:[#allocation96_spill] sm:$0xff] %v7895_v17 }
 0x287   : > { %2051 = vmax.xlane.f32.xlu1 %v2050_v12  ;;  %v590_v10 = vpop.trf.xlu0 }
 0x288   : > { %v7901_v12 = vpop.f32.mrf.mxu0  ;;  %v7903_v61 = vpop.f32.mrf.mxu1 }
 0x289   : > { %6230 = vmatmul.msk.f32.gmra.mxu0 %vm722_vm1, %v590_v10  ;;  %6262 = vmatmul.msk.f32.gmra.mxu1 %vm722_vm1, %v590_v10  ;;  %14463 = vst [vmem:[#allocation97_spill] sm:$0xff] %v7901_v12 }
 0x28a   : > { %14464 = vst [vmem:[#allocation98_spill] sm:$0xff] %v7903_v61 }
 0x28b   : > { %v7905_v36 = vpop.f32.mrf.mxu2  ;;  %v7907_v9 = vpop.f32.mrf.mxu3 }
 0x28f   : > { %2054 = vmax.xlane.f32.xlu1 %v2053_v8  ;;  %v591_v23 = vpop.trf.xlu0 }
 0x290   : > { %v7911_v8 = vpop.f32.mrf.mxu0  ;;  %v7913_v10 = vpop.f32.mrf.mxu1 }
 0x291   : > { %6231 = vmatmul.msk.f32.gmra.mxu0 %vm722_vm1, %v591_v23  ;;  %6263 = vmatmul.msk.f32.gmra.mxu1 %vm722_vm1, %v591_v23  ;;  %14465 = vst [vmem:[#allocation99_spill] sm:$0xff] %v7911_v8 }
 0x292   : > { %14466 = vst [vmem:[#allocation100_spill] sm:$0xff] %v7913_v10 }
 0x293   : > { %v7919_v56 = vpop.f32.mrf.mxu2 }
 0x294   : > { %14467 = vst [vmem:[#allocation101_spill] sm:$0xff] %v7919_v56 }
 0x297   : > { %2057 = vmax.xlane.f32.xlu1 %v2056_v52  ;;  %v592_v26 = vpop.trf.xlu0  ;;  %v7921_v52 = vpop.f32.mrf.mxu3 }
 0x298   : > { %14468 = vst [vmem:[#allocation102_spill] sm:$0xff] %v7921_v52  ;;  %v7923_v49 = vpop.f32.mrf.mxu0  ;;  %v7925_v23 = vpop.f32.mrf.mxu1 }
 0x299   : > { %6232 = vmatmul.msk.f32.gmra.mxu0 %vm722_vm1, %v592_v26  ;;  %6264 = vmatmul.msk.f32.gmra.mxu1 %vm722_vm1, %v592_v26  ;;  %14469 = vst [vmem:[#allocation103_spill] sm:$0xff] %v7923_v49  ;;  %v2065_v26 = vmax.f32 %v7813_v50, %v7815_v51  ;;  %v2080_v51 = vmax.f32 %v7893_v6, %v7895_v17 }
 0x29a   : > { %14470 = vst [vmem:[#allocation104_spill] sm:$0xff] %v7925_v23  ;;  %v2107_v6 = vmax.f32 %v7727_v58, %v7729_v1  ;;  %v7993_v1 = vpop.trf.xlu2 }
 0x29b   : > { %v7929_v41 = vpop.f32.mrf.mxu2 }
 0x29c   : > { %14471 = vst [vmem:[#allocation105_spill] sm:$0xff] %v7929_v41 }
 0x29f   : > { %2060 = vmax.xlane.f32.xlu1 %v2059_v22  ;;  %v7931_v44 = vpop.f32.mrf.mxu3 }
 0x2a0   : > { %14472 = vst [vmem:[#allocation106_spill] sm:$0xff] %v7931_v44  ;;  %v7933_v22 = vpop.f32.mrf.mxu0  ;;  %v7935_v29 = vpop.f32.mrf.mxu1  ;;  %v2089_v2 = vmax.f32 %v7929_v41, %v7931_v44 }
 0x2a1   : > { %14473 = vst [vmem:[#allocation107_spill] sm:$0xff] %v7933_v22 }
 0x2a2   : > { %14474 = vst [vmem:[#allocation108_spill] sm:$0xff] %v7935_v29 }
 0x2a7   : > { %2063 = vmax.xlane.f32.xlu1 %v2062_v45  ;;  %v7945_v45 = vpop.f32.mrf.mxu2  ;;  %v7947_v25 = vpop.f32.mrf.mxu3 }
 0x2a8   : > { %14477 = vst [vmem:[#allocation111_spill] sm:$0xff] %v7947_v25 }
 0x2ae   : > { %v7939_v37 = vpop.f32.mrf.mxu0  ;;  %v7941_v31 = vpop.f32.mrf.mxu1 }
 0x2af   : > { %2066 = vmax.xlane.f32.xlu1 %v2065_v26  ;;  %14475 = vst [vmem:[#allocation109_spill] sm:$0xff] %v7939_v37  ;;  %v7955_v26 = vpop.f32.mrf.mxu2  ;;  %v7957_v50 = vpop.f32.mrf.mxu3 }
 0x2b0   : > { %14476 = vst [vmem:[#allocation110_spill] sm:$0xff] %v7941_v31 }
 0x2b1   : > { %14480 = vst [vmem:[#allocation114_spill] sm:$0xff] %v7955_v26 }
 0x2b2   : > { %14481 = vst [vmem:[#allocation115_spill] sm:$0xff] %v7957_v50 }
 0x2b6   : > { %v7949_v8 = vpop.f32.mrf.mxu0  ;;  %v7951_v10 = vpop.f32.mrf.mxu1 }
 0x2b7   : > { %2072 = vmax.xlane.f32.xlu1 %v2071_v47  ;;  %14478 = vst [vmem:[#allocation112_spill] sm:$0xff] %v7949_v8  ;;  %v7965_v47 = vpop.f32.mrf.mxu2  ;;  %v7967_v31 = vpop.f32.mrf.mxu3 }
 0x2b8   : > { %14479 = vst [vmem:[#allocation113_spill] sm:$0xff] %v7951_v10 }
 0x2b9   : > { %14484 = vst [vmem:[#allocation118_spill] sm:$0xff] %v7965_v47 }
 0x2ba   : > { %14485 = vst [vmem:[#allocation119_spill] sm:$0xff] %v7967_v31 }
 0x2be   : > { %v7959_v37 = vpop.f32.mrf.mxu0  ;;  %v7961_v33 = vpop.f32.mrf.mxu1 }
 0x2bf   : > { %2081 = vmax.xlane.f32.xlu1 %v2080_v51  ;;  %14482 = vst [vmem:[#allocation116_spill] sm:$0xff] %v7959_v37  ;;  %v2098_v51 = vmax.f32 %v7965_v47, %v7967_v31  ;;  %v2125_v31 = vmax.f32 %v7819_v15, %v7821_v5 }
 0x2c0   : > { %14483 = vst [vmem:[#allocation117_spill] sm:$0xff] %v7961_v33 }
 0x2c6   : > { %v7969_v22 = vpop.f32.mrf.mxu0  ;;  %v7971_v17 = vpop.f32.mrf.mxu1 }
 0x2c7   : > { %2090 = vmax.xlane.f32.xlu1 %v2089_v2  ;;  %14486 = vst [vmem:[#allocation120_spill] sm:$0xff] %v7969_v22  ;;  %v2116_v2 = vmax.f32 %v7779_v14, %v7781_v27  ;;  %v8003_v14 = vpop.trf.xlu2 }
 0x2c8   : > { %14487 = vst [vmem:[#allocation121_spill] sm:$0xff] %v7971_v17 }
 0x2ce   : > { %v7977_v37 = vpop.f32.mrf.mxu0  ;;  %v7979_v33 = vpop.f32.mrf.mxu1 }
 0x2cf   : > { %2099 = vmax.xlane.f32.xlu1 %v2098_v51  ;;  %14488 = vst [vmem:[#allocation122_spill] sm:$0xff] %v7977_v37 }
 0x2d0   : > { %14489 = vst [vmem:[#allocation123_spill] sm:$0xff] %v7979_v33 }
 0x2d6   : > { %v7983_v44 = vpop.f32.mrf.mxu0  ;;  %v7985_v41 = vpop.f32.mrf.mxu1 }
 0x2d7   : > { %2108 = vmax.xlane.f32.xlu1 %v2107_v6  ;;  %14490 = vst [vmem:[#allocation124_spill] sm:$0xff] %v7983_v44  ;;  %v2134_v6 = vmax.f32 %v7857_v16, %v7859_v46  ;;  %v8015_v16 = vpop.trf.xlu2 }
 0x2d8   : > { %14491 = vst [vmem:[#allocation125_spill] sm:$0xff] %v7985_v41 }
 0x2de   : > { %v7989_v51 = vpop.f32.mrf.mxu0  ;;  %v7991_v47 = vpop.f32.mrf.mxu1 }
 0x2df   : > { %2117 = vmax.xlane.f32.xlu1 %v2116_v2  ;;  %14492 = vst [vmem:[#allocation126_spill] sm:$0xff] %v7989_v51  ;;  %v2143_v2 = vmax.f32 %v7889_v34, %v7891_v24 }
 0x2e0   : > { %14493 = vst [vmem:[#allocation127_spill] sm:$0xff] %v7991_v47  ;;  %v8023_v47 = vpop.trf.xlu2 }
 0x2e6   : > { %v7997_v58 = vpop.f32.mrf.mxu0  ;;  %v7999_v27 = vpop.f32.mrf.mxu1 }
 0x2e7   : > { %2126 = vmax.xlane.f32.xlu1 %v2125_v31  ;;  %14494 = vst [vmem:[#allocation128_spill] sm:$0xff] %v7997_v58  ;;  %v2152_v31 = vmax.f32 %v7923_v49, %v7925_v23 }
 0x2e8   : > { %14495 = vst [vmem:[#allocation129_spill] sm:$0xff] %v7999_v27 }
 0x2ee   : > { %v8005_v5 = vpop.f32.mrf.mxu0  ;;  %v8007_v15 = vpop.f32.mrf.mxu1 }
 0x2ef   : > { %2135 = vmax.xlane.f32.xlu1 %v2134_v6  ;;  %14496 = vst [vmem:[#allocation130_spill] sm:$0xff] %v8005_v5  ;;  %v2161_v6 = vmax.f32 %v7949_v8, %v7951_v10 }
 0x2f0   : > { %14497 = vst [vmem:[#allocation131_spill] sm:$0xff] %v8007_v15 }
 0x2f6   : > { %v8011_v51 = vpop.f32.mrf.mxu0  ;;  %v8013_v46 = vpop.f32.mrf.mxu1 }
 0x2f7   : > { %2144 = vmax.xlane.f32.xlu1 %v2143_v2  ;;  %14498 = vst [vmem:[#allocation132_spill] sm:$0xff] %v8011_v51  ;;  %v2170_v2 = vmax.f32 %v7977_v37, %v7979_v33  ;;  %v8031_v51 = vpop.trf.xlu2  ;;  %v593_v33 = vpop.trf.xlu0 }
 0x2f8   : > { %14499 = vst [vmem:[#allocation133_spill] sm:$0xff] %v8013_v46  ;;  %6233 = vmatmul.msk.f32.gmra.mxu0 %vm722_vm1, %v593_v33  ;;  %6265 = vmatmul.msk.f32.gmra.mxu1 %vm722_vm1, %v593_v33 }
 0x2fe   : > { %v8019_v24 = vpop.f32.mrf.mxu0  ;;  %v8021_v34 = vpop.f32.mrf.mxu1 }
 0x2ff   : > { %2153 = vmax.xlane.f32.xlu1 %v2152_v31  ;;  %14500 = vst [vmem:[#allocation134_spill] sm:$0xff] %v8019_v24  ;;  %v2179_v31 = vmax.f32 %v7997_v58, %v7999_v27  ;;  %v8041_v46 = vpop.trf.xlu2 }
 0x300   : > { %14501 = vst [vmem:[#allocation135_spill] sm:$0xff] %v8021_v34 }
 0x306   : > { %v8027_v23 = vpop.f32.mrf.mxu0  ;;  %v8029_v49 = vpop.f32.mrf.mxu1 }
 0x307   : > { %2162 = vmax.xlane.f32.xlu1 %v2161_v6  ;;  %14502 = vst [vmem:[#allocation136_spill] sm:$0xff] %v8027_v23  ;;  %v2188_v6 = vmax.f32 %v8019_v24, %v8021_v34  ;;  %v8051_v58 = vpop.trf.xlu2 }
 0x308   : > { %14503 = vst [vmem:[#allocation137_spill] sm:$0xff] %v8029_v49 }
 0x30e   : > { %v8035_v10 = vpop.f32.mrf.mxu0  ;;  %v8037_v8 = vpop.f32.mrf.mxu1 }
 0x30f   : > { %2171 = vmax.xlane.f32.xlu1 %v2170_v2  ;;  %14504 = vst [vmem:[#allocation138_spill] sm:$0xff] %v8035_v10  ;;  %v8056_v34 = vpop.trf.xlu2 }
 0x310   : > { %14505 = vst [vmem:[#allocation139_spill] sm:$0xff] %v8037_v8 }
 0x311   : > { %14508 = vst [vmem:[#allocation142_spill] sm:$0xff] %v8056_v34 }
 0x316   : > { %v8044_v2 = vpop.f32.mrf.mxu0  ;;  %v8046_v37 = vpop.f32.mrf.mxu1 }
 0x317   : > { %2180 = vmax.xlane.f32.xlu1 %v2179_v31  ;;  %14506 = vst [vmem:[#allocation140_spill] sm:$0xff] %v8044_v2  ;;  %v2197_v27 = vmax.f32 %v8044_v2, %v8046_v37  ;;  %v674_v31 = vpop.trf.xlu0  ;;  %v8061_v33 = vpop.trf.xlu2 }
 0x318   : > { %14507 = vst [vmem:[#allocation141_spill] sm:$0xff] %v8046_v37  ;;  %6330 = vmatmul.msk.f32.vlgmr.msra.gmra.mxu0 %vm722_vm1, %v674_v31  ;;  %6362 = vmatmul.msk.f32.vlgmr.msra.gmra.mxu1 %vm722_vm1, %v674_v31 }
 0x319   : > { %14509 = vst [vmem:[#allocation143_spill] sm:$0xff] %v8061_v33  ;;  %v249_v33 = vld [vmem:[%s13692_s2 + $0x30] sm:$0xff] }
 0x31f   : > { %2189 = vmax.xlane.f32.xlu1 %v2188_v6  ;;  %v675_v6 = vpop.trf.xlu0 }
 0x320   : > { %6331 = vmatmul.msk.f32.gmra.mxu0 %vm722_vm1, %v675_v6  ;;  %6363 = vmatmul.msk.f32.gmra.mxu1 %vm722_vm1, %v675_v6  ;;  %v251_v6 = vld [vmem:[%s13692_s2 + $0x40] sm:$0xff] }
 0x327   : > { %2198 = vmax.xlane.f32.xlu1 %v2197_v27  ;;  %v676_v24 = vpop.trf.xlu0  ;;  %v8065_v27 = vpop.trf.xlu2 }
 0x328   : > { %6332 = vmatmul.msk.f32.gmra.mxu0 %vm722_vm1, %v676_v24  ;;  %6364 = vmatmul.msk.f32.gmra.mxu1 %vm722_vm1, %v676_v24  ;;  %14510 = vst [vmem:[#allocation144_spill] sm:$0xff] %v8065_v27 }
 0x32f   : > { %v677_v37 = vpop.trf.xlu0  ;;  %v8072_v24 = vpop.trf.xlu2 }
 0x330   : > { %6333 = vmatmul.msk.f32.gmra.mxu0 %vm722_vm1, %v677_v37  ;;  %6365 = vmatmul.msk.f32.gmra.mxu1 %vm722_vm1, %v677_v37  ;;  %14511 = vst [vmem:[#allocation145_spill] sm:$0xff] %v8072_v24  ;;  %v254_v37 = vld [vmem:[%s13692_s2 + $0x58] sm:$0xff] }
 0x337   : > { %v678_v31 = vpop.trf.xlu0  ;;  %v8086_v24 = vpop.trf.xlu2 }
 0x338   : > { %6334 = vmatmul.msk.f32.gmra.mxu0 %vm722_vm1, %v678_v31  ;;  %6366 = vmatmul.msk.f32.gmra.mxu1 %vm722_vm1, %v678_v31 }
 0x33f   : > { %v679_v2 = vpop.trf.xlu0 }
 0x340   : > { %6335 = vmatmul.msk.f32.gmra.mxu0 %vm722_vm1, %v679_v2  ;;  %6367 = vmatmul.msk.f32.gmra.mxu1 %vm722_vm1, %v679_v2  ;;  %v8091_v2 = vpop.trf.xlu2 }
 0x341   : > { %14512 = vst [vmem:[#allocation146_spill] sm:$0xff] %v8091_v2 }
 0x347   : > { %v680_v31 = vpop.trf.xlu0 }
 0x348   : > { %6336 = vmatmul.msk.f32.gmra.mxu0 %vm722_vm1, %v680_v31  ;;  %6368 = vmatmul.msk.f32.gmra.mxu1 %vm722_vm1, %v680_v31 }
 0x34d   : > { %297 = vperm.xlu2 %6454, %v251_v6   ;;  %v252_v6 = vld [vmem:[%s13692_s2 + $0x48] sm:$0xff] }
 0x34f   : > { %v681_v27 = vpop.trf.xlu0 }
 0x350   : > { %6337 = vmatmul.msk.f32.gmra.mxu0 %vm722_vm1, %v681_v27  ;;  %6369 = vmatmul.msk.f32.gmra.mxu1 %vm722_vm1, %v681_v27  ;;  %v2017_v27 = vmax.f32 %v7572_v42, %v7574_v43 }
 0x352   : > { %287 = vperm.xlu0 %6452, %v249_v33  }
 0x355   : > { %312 = vperm.xlu2 %6454, %v254_v37   ;;  %v8095_v37 = vpop.trf.xlu2 }
 0x357   : > { %v682_v33 = vpop.trf.xlu0 }
 0x358   : > { %6338 = vmatmul.msk.f32.gmra.mxu0 %vm722_vm1, %v682_v33  ;;  %6370 = vmatmul.msk.f32.gmra.mxu1 %vm722_vm1, %v682_v33 }
 0x35a   : > { %302 = vperm.xlu0 %6452, %v252_v6  }
 0x35d   : > { %v8099_v31 = vpop.trf.xlu2 }
 0x35e   : > { %14513 = vst [vmem:[#allocation147_spill] sm:$0xff] %v8099_v31  ;;  %v2074_v31 = vmax.f32 %v7863_v0, %v7865_v7 }
 0x35f   : > { %v683_v34 = vpop.trf.xlu0 }
 0x360   : > { %6339 = vmatmul.msk.f32.gmra.mxu0 %vm722_vm1, %v683_v34  ;;  %6371 = vmatmul.msk.f32.gmra.mxu1 %vm722_vm1, %v683_v34  ;;  %v2014_v34 = vmax.f32 %v7560_v38, %v7562_v39 }
 0x365   : > { %v8106_v33 = vpop.trf.xlu2 }
 0x367   : > { %v684_v6 = vpop.trf.xlu0 }
 0x368   : > { %6340 = vmatmul.msk.f32.gmra.mxu0 %vm722_vm1, %v684_v6  ;;  %6372 = vmatmul.msk.f32.gmra.mxu1 %vm722_vm1, %v684_v6 }
 0x36d   : > { %v706_v43 = vpop.trf.xlu2 }
 0x36f   : > { %v685_v2 = vpop.trf.xlu0 }
 0x370   : > { %6341 = vmatmul.msk.f32.gmra.mxu0 %vm722_vm1, %v685_v2  ;;  %6373 = vmatmul.msk.f32.gmra.mxu1 %vm722_vm1, %v685_v2  ;;  %v2083_v2 = vmax.f32 %v7905_v36, %v7907_v9 }
 0x377   : > { %v686_v6 = vpop.trf.xlu0 }
 0x378   : > { %6342 = vmatmul.msk.f32.gmra.mxu0 %vm722_vm1, %v686_v6  ;;  %6374 = vmatmul.msk.f32.gmra.mxu1 %vm722_vm1, %v686_v6  ;;  %v707_v6 = vpop.trf.xlu2 }
 0x37e   : > { %2018 = vmax.xlane.f32.xlu2 %v2017_v27  ;;  %v2068_v27 = vmax.f32 %v7827_v35, %v7835_v11 }
 0x37f   : > { %v687_v39 = vpop.trf.xlu0 }
 0x380   : > { %6343 = vmatmul.msk.f32.gmra.mxu0 %vm722_vm1, %v687_v39  ;;  %6375 = vmatmul.msk.f32.gmra.mxu1 %vm722_vm1, %v687_v39  ;;  %v2086_v39 = vmax.f32 %v7919_v56, %v7921_v52 }
 0x384   : > { %2015 = vmax.xlane.f32.xlu0 %v2014_v34  ;;  %v2092_v34 = vmax.f32 %v7945_v45, %v7947_v25  ;;  %v708_v25 = vpop.trf.xlu2 }
 0x386   : > { %2075 = vmax.xlane.f32.xlu2 %v2074_v31  ;;  %v2077_v31 = vmax.f32 %v7875_v4, %v7877_v30 }
 0x387   : > { %v688_v11 = vpop.trf.xlu0 }
 0x388   : > { %6344 = vmatmul.msk.f32.gmra.mxu0 %vm722_vm1, %v688_v11  ;;  %6376 = vmatmul.msk.f32.gmra.mxu1 %vm722_vm1, %v688_v11  ;;  %v2095_v11 = vmax.f32 %v7955_v26, %v7957_v50 }
 0x38c   : > { %2069 = vmax.xlane.f32.xlu0 %v2068_v27  ;;  %v8127_v27 = vpop.f32.mrf.mxu2 }
 0x38d   : > { %14514 = vst [vmem:[#allocation148_spill] sm:$0xff] %v8127_v27 }
 0x38e   : > { %2084 = vmax.xlane.f32.xlu2 %v2083_v2  ;;  %v8129_v2 = vpop.f32.mrf.mxu3 }
 0x38f   : > { %14515 = vst [vmem:[#allocation149_spill] sm:$0xff] %v8129_v2  ;;  %v2101_v30 = vmax.f32 %v8127_v27, %v8129_v2 }
 0x394   : > { %2078 = vmax.xlane.f32.xlu0 %v2077_v31  ;;  %v689_v31 = vpop.trf.xlu0  ;;  %v8141_v52 = vpop.f32.mrf.mxu2 }
 0x395   : > { %6345 = vmatmul.msk.f32.gmra.mxu0 %vm722_vm1, %v689_v31  ;;  %6377 = vmatmul.msk.f32.gmra.mxu1 %vm722_vm1, %v689_v31  ;;  %14516 = vst [vmem:[#allocation150_spill] sm:$0xff] %v8141_v52  ;;  %v2119_v31 = vmax.f32 %v7793_v55, %v7795_v54 }
 0x396   : > { %2093 = vmax.xlane.f32.xlu2 %v2092_v34  ;;  %v2110_v34 = vmax.f32 %v7745_v28, %v7747_v48  ;;  %v8143_v56 = vpop.f32.mrf.mxu3  ;;  %v2128_v48 = vmax.f32 %v7831_v57, %v7833_v13 }
 0x397   : > { %14517 = vst [vmem:[#allocation151_spill] sm:$0xff] %v8143_v56 }
 0x39c   : > { %2087 = vmax.xlane.f32.xlu0 %v2086_v39  ;;  %v2104_v39 = vmax.f32 %v8141_v52, %v8143_v56 }
 0x39d   : > { %6346 = vmatmul.msk.f32.gmra.mxu0 %vm722_vm1, %v706_v43  ;;  %6378 = vmatmul.msk.f32.gmra.mxu1 %vm722_vm1, %v706_v43  ;;  %v8158_v43 = vpop.permute.xlu1 %307 }
 0x39e   : > { %2102 = vmax.xlane.f32.xlu2 %v2101_v30  ;;  %v709_v30 = vpop.trf.xlu2  ;;  %14518 = vst [vmem:[#allocation152_spill] sm:$0xff] %v8158_v43 }
 0x3a4   : > { %2096 = vmax.xlane.f32.xlu0 %v2095_v11  ;;  %v2113_v11 = vmax.f32 %v7761_v40, %v7763_v21 }
 0x3a5   : > { %6347 = vmatmul.msk.f32.gmra.mxu0 %vm722_vm1, %v707_v6  ;;  %6379 = vmatmul.msk.f32.gmra.mxu1 %vm722_vm1, %v707_v6  ;;  %v2137_v6 = vmax.f32 %v7869_v19, %v7871_v20  ;;  %v8166_v13 = vpop.xlane.xlu1 %2012  ;;  %v14606_v19 = vld [vmem:[#allocation50_spill] sm:$0xff] }
 0x3a6   : > { %2111 = vmax.xlane.f32.xlu2 %v2110_v34  ;;  %v710_v34 = vpop.trf.xlu2 }
 0x3ac   : > { %2105 = vmax.xlane.f32.xlu0 %v2104_v39  ;;  %v2122_v39 = vmax.f32 %v7807_v60, %v7809_v59  ;;  %v14610_v59 = vld [vmem:[#allocation59_spill] sm:$0xff] }
 0x3ad   : > { %6348 = vmatmul.msk.f32.gmra.mxu0 %vm722_vm1, %v708_v25  ;;  %6380 = vmatmul.msk.f32.gmra.mxu1 %vm722_vm1, %v708_v25  ;;  %v2146_v25 = vmax.f32 %v7901_v12, %v7903_v61 }
 0x3ae   : > { %2120 = vmax.xlane.f32.xlu2 %v2119_v31  ;;  %v711_v31 = vpop.trf.xlu2 }
 0x3b4   : > { %2114 = vmax.xlane.f32.xlu0 %v2113_v11 }
 0x3b5   : > { %6349 = vmatmul.msk.f32.gmra.mxu0 %vm722_vm1, %v709_v30  ;;  %6381 = vmatmul.msk.f32.gmra.mxu1 %vm722_vm1, %v709_v30  ;;  %v2140_v30 = vmax.f32 %v7881_v32, %v7883_v53 }
 0x3b6   : > { %2129 = vmax.xlane.f32.xlu2 %v2128_v48  ;;  %v2131_v48 = vmax.f32 %v7843_v18, %v7845_v3 }
 0x3bc   : > { %2123 = vmax.xlane.f32.xlu0 %v2122_v39  ;;  %v712_v39 = vpop.trf.xlu2 }
 0x3bd   : > { %6350 = vmatmul.msk.f32.gmra.mxu0 %vm722_vm1, %v710_v34  ;;  %6382 = vmatmul.msk.f32.gmra.mxu1 %vm722_vm1, %v710_v34  ;;  %v8193_v34 = vpop.f32.mrf.mxu1 }
 0x3be   : > { %2138 = vmax.xlane.f32.xlu2 %v2137_v6  ;;  %14521 = vst [vmem:[#allocation154_spill] sm:$0xff] %v8193_v34 }
 0x3c4   : > { %2132 = vmax.xlane.f32.xlu0 %v2131_v48  ;;  %v288_v11 = vpop.permute.xlu0 %287  ;;  %v14523_v48 = vld [vmem:[#allocation99_spill] sm:$0xff] }
 0x3c5   : > { %v388_v43 = vadd.f32 %v7628_v62, %v288_v11  ;;  %v441_v20 = vadd.f32 %v7630_v63, %v288_v11  ;;  %v8183_v62 = vpop.xlane.xlu1 %2021  ;;  %v14519_v63 = vld [vmem:[#allocation107_spill] sm:$0xff]  ;;  %6351 = vmatmul.msk.f32.gmra.mxu0 %vm722_vm1, %v711_v31  ;;  %6383 = vmatmul.msk.f32.gmra.mxu1 %vm722_vm1, %v711_v31  ;;  %v14527_v31 = vld [vmem:[#allocation109_spill] sm:$0xff]  ;;  %v8213_v61 = vpop.f32.mrf.mxu1 }
 0x3c6   : > { %2147 = vmax.xlane.f32.xlu2 %v2146_v25  ;;  %v2155_v6 = vmax.f32 %v14519_v63, %v7935_v29  ;;  %14529 = vst [vmem:[#allocation156_spill] sm:$0xff] %v8213_v61 }
 0x3c7   : > { %1478 = vmatpush.msrb.mxu2 %v388_v43  ;;  %1591 = vmatpush.msrb.mxu3 %v441_v20  ;;  %v713_v20 = vpop.trf.xlu2  ;;  %v14522_v43 = vld [vmem:[#allocation100_spill] sm:$0xff] }
 0x3c8   : > { %6266 = vmatmul.msk.f32.vlgmr.msrb.gmra.mxu2 %vm722_vm1, %v7993_v1  ;;  %6298 = vmatmul.msk.f32.vlgmr.msrb.gmra.mxu3 %vm722_vm1, %v7993_v1  ;;  %v8191_v1 = vpop.f32.mrf.mxu0  ;;  %v2149_v25 = vmax.f32 %v14523_v48, %v14522_v43 }
 0x3c9   : > { %14520 = vst [vmem:[#allocation153_spill] sm:$0xff] %v8191_v1 }
 0x3cc   : > { %2141 = vmax.xlane.f32.xlu0 %v2140_v30  ;;  %v14524_v30 = vld [vmem:[#allocation117_spill] sm:$0xff] }
 0x3cd   : > { %v8199_v11 = vpop.xlane.xlu1 %2024  ;;  %6352 = vmatmul.msk.f32.gmra.mxu0 %vm722_vm1, %v712_v39  ;;  %6384 = vmatmul.msk.f32.gmra.mxu1 %vm722_vm1, %v712_v39  ;;  %v2182_v39 = vmax.f32 %v8005_v5, %v8007_v15  ;;  %v14557_v5 = vld [vmem:[#allocation8_spill] sm:$0xff] }
 0x3ce   : > { %2156 = vmax.xlane.f32.xlu2 %v2155_v6  ;;  %v14525_v6 = vld [vmem:[#allocation116_spill] sm:$0xff] }
 0x3cf   : > { %v2164_v29 = vmax.f32 %v14525_v6, %v14524_v30  ;;  %v714_v53 = vpop.trf.xlu2 }
 0x3d0   : > { %6267 = vmatmul.msk.f32.gmra.mxu2 %vm722_vm1, %v8003_v14  ;;  %6299 = vmatmul.msk.f32.gmra.mxu3 %vm722_vm1, %v8003_v14  ;;  %v14526_v14 = vld [vmem:[#allocation110_spill] sm:$0xff]  ;;  %v8211_v32 = vpop.f32.mrf.mxu0 }
 0x3d1   : > { %v2158_v63 = vmax.f32 %v14527_v31, %v14526_v14  ;;  %14528 = vst [vmem:[#allocation155_spill] sm:$0xff] %v8211_v32 }
 0x3d4   : > { %2150 = vmax.xlane.f32.xlu0 %v2149_v25 }
 0x3d5   : > { %v8217_v25 = vpop.xlane.xlu1 %2027  ;;  %6353 = vmatmul.msk.f32.gmra.mxu0 %vm722_vm1, %v713_v20  ;;  %6385 = vmatmul.msk.f32.gmra.mxu1 %vm722_vm1, %v713_v20  ;;  %v14533_v20 = vld [vmem:[#allocation126_spill] sm:$0xff] }
 0x3d6   : > { %2165 = vmax.xlane.f32.xlu2 %v2164_v29  ;;  %v2173_v29 = vmax.f32 %v7983_v44, %v7985_v41 }
 0x3d8   : > { %6268 = vmatmul.msk.f32.gmra.mxu2 %vm722_vm1, %v8015_v16  ;;  %6300 = vmatmul.msk.f32.gmra.mxu3 %vm722_vm1, %v8015_v16  ;;  %v2167_v16 = vmax.f32 %v7969_v22, %v7971_v17  ;;  %v8229_v32 = vpop.f32.mrf.mxu0 }
 0x3d9   : > { %14530 = vst [vmem:[#allocation157_spill] sm:$0xff] %v8229_v32  ;;  %v2191_v32 = vmax.f32 %v8027_v23, %v8029_v49  ;;  %v14560_v49 = vld [vmem:[#allocation10_spill] sm:$0xff] }
 0x3dc   : > { %2159 = vmax.xlane.f32.xlu0 %v2158_v63  ;;  %v715_v63 = vpop.trf.xlu2 }
 0x3dd   : > { %v8233_v61 = vpop.xlane.xlu1 %2030  ;;  %6354 = vmatmul.msk.f32.gmra.mxu0 %vm722_vm1, %v714_v53  ;;  %6386 = vmatmul.msk.f32.gmra.mxu1 %vm722_vm1, %v714_v53 }
 0x3de   : > { %2174 = vmax.xlane.f32.xlu2 %v2173_v29  ;;  %v8231_v29 = vpop.f32.mrf.mxu1 }
 0x3df   : > { %14531 = vst [vmem:[#allocation158_spill] sm:$0xff] %v8231_v29 }
 0x3e0   : > { %6269 = vmatmul.msk.f32.gmra.mxu2 %vm722_vm1, %v8023_v47  ;;  %6301 = vmatmul.msk.f32.gmra.mxu3 %vm722_vm1, %v8023_v47  ;;  %v14532_v47 = vld [vmem:[#allocation127_spill] sm:$0xff]  ;;  %v8245_v29 = vpop.f32.mrf.mxu0 }
 0x3e1   : > { %14534 = vst [vmem:[#allocation159_spill] sm:$0xff] %v8245_v29 }
 0x3e4   : > { %2168 = vmax.xlane.f32.xlu0 %v2167_v16  ;;  %v2176_v16 = vmax.f32 %v14533_v20, %v14532_v47 }
 0x3e5   : > { %6355 = vmatmul.msk.f32.gmra.mxu0 %vm722_vm1, %v715_v63  ;;  %6387 = vmatmul.msk.f32.gmra.mxu1 %vm722_vm1, %v715_v63  ;;  %v8255_v53 = vpop.xlane.xlu1 %2033 }
 0x3e6   : > { %2183 = vmax.xlane.f32.xlu2 %v2182_v39  ;;  %v716_v39 = vpop.trf.xlu2  ;;  %v8247_v15 = vpop.f32.mrf.mxu1 }
 0x3e7   : > { %14535 = vst [vmem:[#allocation160_spill] sm:$0xff] %v8247_v15  ;;  %v2194_v15 = vmax.f32 %v8035_v10, %v8037_v8 }
 0x3e8   : > { %6270 = vmatmul.msk.f32.gmra.mxu2 %vm722_vm1, %v8031_v51  ;;  %6302 = vmatmul.msk.f32.gmra.mxu3 %vm722_vm1, %v8031_v51  ;;  %v14536_v51 = vld [vmem:[#allocation133_spill] sm:$0xff] }
 0x3ec   : > { %2177 = vmax.xlane.f32.xlu0 %v2176_v16  ;;  %v14537_v16 = vld [vmem:[#allocation132_spill] sm:$0xff] }
 0x3ed   : > { %v2185_v47 = vmax.f32 %v14537_v16, %v14536_v51  ;;  %6356 = vmatmul.msk.f32.gmra.mxu0 %vm722_vm1, %v716_v39  ;;  %6388 = vmatmul.msk.f32.gmra.mxu1 %vm722_vm1, %v716_v39  ;;  %v14543_v51 = vld [vmem:[#allocation143_spill] sm:$0xff] }
 0x3ee   : > { %2192 = vmax.xlane.f32.xlu2 %v2191_v32  ;;  %v2200_v32 = vmax.f32 %v8191_v1, %v8193_v34  ;;  %v717_v29 = vpop.trf.xlu2  ;;  %v8267_v63 = vpop.f32.mrf.mxu1 }
 0x3ef   : > { %14539 = vst [vmem:[#allocation162_spill] sm:$0xff] %v8267_v63 }
 0x3f0   : > { %6271 = vmatmul.msk.f32.gmra.mxu2 %vm722_vm1, %v8041_v46  ;;  %6303 = vmatmul.msk.f32.gmra.mxu3 %vm722_vm1, %v8041_v46  ;;  %v8265_v46 = vpop.f32.mrf.mxu0 }
 0x3f1   : > { %14538 = vst [vmem:[#allocation161_spill] sm:$0xff] %v8265_v46 }
 0x3f4   : > { %2186 = vmax.xlane.f32.xlu0 %v2185_v47  ;;  %v8273_v47 = vpop.xlane.xlu1 %2036 }
 0x3f5   : > { %6357 = vmatmul.msk.f32.gmra.mxu0 %vm722_vm1, %v717_v29  ;;  %6389 = vmatmul.msk.f32.gmra.mxu1 %vm722_vm1, %v717_v29 }
 0x3f6   : > { %2201 = vmax.xlane.f32.xlu2 %v2200_v32  ;;  %v14540_v32 = vld [vmem:[#allocation142_spill] sm:$0xff]  ;;  %v8283_v39 = vpop.f32.mrf.mxu1 }
 0x3f7   : > { %14542 = vst [vmem:[#allocation163_spill] sm:$0xff] %v8283_v39  ;;  %v14546_v39 = vld [vmem:[#allocation144_spill] sm:$0xff] }
 0x3f8   : > { %6272 = vmatmul.msk.f32.gmra.mxu2 %vm722_vm1, %v8051_v58  ;;  %6304 = vmatmul.msk.f32.gmra.mxu3 %vm722_vm1, %v8051_v58  ;;  %v718_v58 = vpop.trf.xlu2  ;;  %v8281_v46 = vpop.f32.mrf.mxu0 }
 0x3f9   : > { %14541 = vst [vmem:[#allocation142_spill] sm:$0xff] %v8281_v46 }
 0x3fc   : > { %2195 = vmax.xlane.f32.xlu0 %v2194_v15  ;;  %v8285_v63 = vpop.xlane.xlu1 %2039 }
 0x3fd   : > { %6358 = vmatmul.msk.f32.gmra.mxu0 %vm722_vm1, %v718_v58  ;;  %6390 = vmatmul.msk.f32.gmra.mxu1 %vm722_vm1, %v718_v58 }
 0x3fe   : > { %v8295_v29 = vpop.f32.mrf.mxu1 }
 0x3ff   : > { %14545 = vst [vmem:[#allocation164_spill] sm:$0xff] %v8295_v29 }
 0x400   : > { %6273 = vmatmul.msk.f32.gmra.mxu2 %vm722_vm1, %v14540_v32  ;;  %6305 = vmatmul.msk.f32.gmra.mxu3 %vm722_vm1, %v14540_v32  ;;  %v719_v15 = vpop.trf.xlu2  ;;  %v8293_v32 = vpop.f32.mrf.mxu0 }
 0x401   : > { %14544 = vst [vmem:[#allocation143_spill] sm:$0xff] %v8293_v32  ;;  %v14549_v32 = vld [vmem:[#allocation145_spill] sm:$0xff] }
 0x404   : > { %v8297_v46 = vpop.xlane.xlu1 %2042 }
 0x405   : > { %6359 = vmatmul.msk.f32.gmra.mxu0 %vm722_vm1, %v719_v15  ;;  %6391 = vmatmul.msk.f32.gmra.mxu1 %vm722_vm1, %v719_v15 }
 0x406   : > { %v8307_v58 = vpop.f32.mrf.mxu1 }
 0x407   : > { %14548 = vst [vmem:[#allocation165_spill] sm:$0xff] %v8307_v58 }
 0x408   : > { %6274 = vmatmul.msk.f32.gmra.mxu2 %vm722_vm1, %v14543_v51  ;;  %6306 = vmatmul.msk.f32.gmra.mxu3 %vm722_vm1, %v14543_v51  ;;  %v720_v51 = vpop.trf.xlu2  ;;  %v8305_v16 = vpop.f32.mrf.mxu0 }
 0x409   : > { %14547 = vst [vmem:[#allocation144_spill] sm:$0xff] %v8305_v16 }
 0x40d   : > { %6360 = vmatmul.msk.f32.gmra.mxu0 %vm722_vm1, %v720_v51  ;;  %6392 = vmatmul.msk.f32.gmra.mxu1 %vm722_vm1, %v720_v51  ;;  %v14552_v51 = vld [vmem:[#allocation146_spill] sm:$0xff] }
 0x40e   : > { %v8323_v16 = vpop.f32.mrf.mxu1 }
 0x40f   : > { %14551 = vst [vmem:[#allocation166_spill] sm:$0xff] %v8323_v16 }
 0x410   : > { %6275 = vmatmul.msk.f32.gmra.mxu2 %vm722_vm1, %v14546_v39  ;;  %6307 = vmatmul.msk.f32.gmra.mxu3 %vm722_vm1, %v14546_v39  ;;  %v8315_v39 = vpop.xlane.xlu1 %2045  ;;  %v721_v29 = vpop.trf.xlu2 }
 0x411   : > { %v8321_v15 = vpop.f32.mrf.mxu0 }
 0x412   : > { %14550 = vst [vmem:[#allocation145_spill] sm:$0xff] %v8321_v15  ;;  %v14553_v15 = vld [vmem:[#allocation147_spill] sm:$0xff] }
 0x415   : > { %6361 = vmatmul.msk.f32.gmra.mxu0 %vm722_vm1, %v721_v29  ;;  %6393 = vmatmul.msk.f32.gmra.mxu1 %vm722_vm1, %v721_v29 }
 0x416   : > { %v8397_v23 = vpop.f32.mrf.mxu1 }
 0x417   : > { %14567 = vst [vmem:[#allocation170_spill] sm:$0xff] %v8397_v23 }
 0x418   : > { %6276 = vmatmul.msk.f32.gmra.mxu2 %vm722_vm1, %v14549_v32  ;;  %6308 = vmatmul.msk.f32.gmra.mxu3 %vm722_vm1, %v14549_v32  ;;  %v8327_v32 = vpop.xlane.xlu1 %2048 }
 0x420   : > { %6277 = vmatmul.msk.f32.gmra.mxu2 %vm722_vm1, %v8086_v24  ;;  %6309 = vmatmul.msk.f32.gmra.mxu3 %vm722_vm1, %v8086_v24  ;;  %v8333_v58 = vpop.xlane.xlu1 %2051 }
 0x428   : > { %6278 = vmatmul.msk.f32.gmra.mxu2 %vm722_vm1, %v14552_v51  ;;  %6310 = vmatmul.msk.f32.gmra.mxu3 %vm722_vm1, %v14552_v51  ;;  %v8339_v24 = vpop.xlane.xlu1 %2054  ;;  %v14554_v51 = vld [vmem:[#allocation5_spill] sm:$0xff] }
 0x430   : > { %6279 = vmatmul.msk.f32.gmra.mxu2 %vm722_vm1, %v8095_v37  ;;  %6311 = vmatmul.msk.f32.gmra.mxu3 %vm722_vm1, %v8095_v37  ;;  %v8349_v29 = vpop.xlane.xlu1 %2057 }
 0x438   : > { %6280 = vmatmul.msk.f32.gmra.mxu2 %vm722_vm1, %v14553_v15  ;;  %6312 = vmatmul.msk.f32.gmra.mxu3 %vm722_vm1, %v14553_v15  ;;  %v8359_v20 = vpop.xlane.xlu1 %2060 }
 0x440   : > { %6281 = vmatmul.msk.f32.gmra.mxu2 %vm722_vm1, %v8106_v33  ;;  %6313 = vmatmul.msk.f32.gmra.mxu3 %vm722_vm1, %v8106_v33  ;;  %v8373_v22 = vpop.xlane.xlu1 %2063 }
 0x448   : > { %6282 = vmatmul.msk.f32.gmra.mxu2 %vm722_vm1, %v14554_v51  ;;  %6314 = vmatmul.msk.f32.gmra.mxu3 %vm722_vm1, %v14554_v51 }
 0x44b   : > { %v8355_v37 = vpop.f32.mrf.mxu2  ;;  %v8357_v16 = vpop.f32.mrf.mxu3 }
 0x44c   : > { %14555 = vst [vmem:[#allocation146_spill] sm:$0xff] %v8355_v37  ;;  %v2203_v15 = vmax.f32 %v8355_v37, %v8357_v16  ;;  %v8385_v37 = vpop.xlane.xlu1 %2066 }
 0x44d   : > { %14556 = vst [vmem:[#allocation147_spill] sm:$0xff] %v8357_v16 }
 0x44e   : > { %2204 = vmax.xlane.f32.xlu0 %v2203_v15 }
 0x450   : > { %6283 = vmatmul.msk.f32.gmra.mxu2 %vm722_vm1, %v14557_v5  ;;  %6315 = vmatmul.msk.f32.gmra.mxu3 %vm722_vm1, %v14557_v5 }
 0x453   : > { %v8367_v33 = vpop.f32.mrf.mxu2  ;;  %v8369_v17 = vpop.f32.mrf.mxu3 }
 0x454   : > { %14558 = vst [vmem:[#allocation5_spill] sm:$0xff] %v8367_v33  ;;  %v2206_v51 = vmax.f32 %v8367_v33, %v8369_v17 }
 0x455   : > { %14559 = vst [vmem:[#allocation8_spill] sm:$0xff] %v8369_v17  ;;  %v14563_v17 = vld [vmem:[#allocation12_spill] sm:$0xff] }
 0x456   : > { %2207 = vmax.xlane.f32.xlu1 %v2206_v51  ;;  %v8391_v51 = vpop.f32.mrf.mxu0 }
 0x457   : > { %14564 = vst [vmem:[#allocation12_spill] sm:$0xff] %v8391_v51 }
 0x458   : > { %6284 = vmatmul.msk.f32.gmra.mxu2 %vm722_vm1, %v14560_v49  ;;  %6316 = vmatmul.msk.f32.gmra.mxu3 %vm722_vm1, %v14560_v49 }
 0x45b   : > { %v8379_v15 = vpop.f32.mrf.mxu2  ;;  %v8381_v16 = vpop.f32.mrf.mxu3 }
 0x45c   : > { %14561 = vst [vmem:[#allocation10_spill] sm:$0xff] %v8379_v15  ;;  %v2209_v5 = vmax.f32 %v8379_v15, %v8381_v16  ;;  %v14569_v15 = vld [vmem:[#allocation15_spill] sm:$0xff] }
 0x45d   : > { %14562 = vst [vmem:[#allocation167_spill] sm:$0xff] %v8381_v16 }
 0x45e   : > { %2210 = vmax.xlane.f32.xlu2 %v2209_v5  ;;  %v8401_v5 = vpop.permute.xlu2 %297  ;;  %v8413_v44 = vpop.f32.mrf.mxu0 }
 0x45f   : > { %14568 = vst [vmem:[#allocation171_spill] sm:$0xff] %v8401_v5  ;;  %v14575_v5 = vld [vmem:[#allocation20_spill] sm:$0xff] }
 0x460   : > { %6285 = vmatmul.msk.f32.gmra.mxu2 %vm722_vm1, %v14563_v17  ;;  %6317 = vmatmul.msk.f32.gmra.mxu3 %vm722_vm1, %v14563_v17  ;;  %v8407_v17 = vpop.xlane.xlu1 %2072  ;;  %14572 = vst [vmem:[#allocation173_spill] sm:$0xff] %v8413_v44 }
 0x463   : > { %v8393_v33 = vpop.f32.mrf.mxu2  ;;  %v8395_v49 = vpop.f32.mrf.mxu3 }
 0x464   : > { %14565 = vst [vmem:[#allocation168_spill] sm:$0xff] %v8393_v33  ;;  %v2212_v16 = vmax.f32 %v8393_v33, %v8395_v49 }
 0x465   : > { %14566 = vst [vmem:[#allocation169_spill] sm:$0xff] %v8395_v49  ;;  %v8417_v49 = vpop.f32.mrf.mxu1 }
 0x466   : > { %2213 = vmax.xlane.f32.xlu0 %v2212_v16  ;;  %14573 = vst [vmem:[#allocation174_spill] sm:$0xff] %v8417_v49  ;;  %v8419_v16 = vpop.permute.xlu2 %312 }
 0x467   : > { %14574 = vst [vmem:[#allocation175_spill] sm:$0xff] %v8419_v16 }
 0x468   : > { %6286 = vmatmul.msk.f32.gmra.mxu2 %vm722_vm1, %v14569_v15  ;;  %6318 = vmatmul.msk.f32.gmra.mxu3 %vm722_vm1, %v14569_v15  ;;  %v8431_v14 = vpop.xlane.xlu1 %2081 }
 0x46b   : > { %v8409_v51 = vpop.f32.mrf.mxu2  ;;  %v8411_v41 = vpop.f32.mrf.mxu3 }
 0x46c   : > { %14570 = vst [vmem:[#allocation15_spill] sm:$0xff] %v8409_v51  ;;  %v2215_v23 = vmax.f32 %v8409_v51, %v8411_v41  ;;  %v14581_v51 = vld [vmem:[#allocation23_spill] sm:$0xff] }
 0x46d   : > { %14571 = vst [vmem:[#allocation172_spill] sm:$0xff] %v8411_v41  ;;  %v8433_v41 = vpop.f32.mrf.mxu0  ;;  %v8439_v49 = vpop.f32.mrf.mxu1 }
 0x46e   : > { %2216 = vmax.xlane.f32.xlu1 %v2215_v23  ;;  %14578 = vst [vmem:[#allocation177_spill] sm:$0xff] %v8433_v41  ;;  %v8435_v23 = vpop.permute.xlu0 %302  ;;  %v8437_v16 = vpop.xlane.xlu2 %2018 }
 0x46f   : > { %14579 = vst [vmem:[#allocation178_spill] sm:$0xff] %v8435_v23 }
 0x470   : > { %6287 = vmatmul.msk.f32.gmra.mxu2 %vm722_vm1, %v14575_v5  ;;  %6319 = vmatmul.msk.f32.gmra.mxu3 %vm722_vm1, %v14575_v5  ;;  %14580 = vst [vmem:[#allocation179_spill] sm:$0xff] %v8439_v49  ;;  %v14585_v49 = vld [vmem:[#allocation26_spill] sm:$0xff] }
 0x473   : > { %v8425_v15 = vpop.f32.mrf.mxu2  ;;  %v8427_v33 = vpop.f32.mrf.mxu3 }
 0x474   : > { %14576 = vst [vmem:[#allocation20_spill] sm:$0xff] %v8425_v15  ;;  %v2218_v44 = vmax.f32 %v8425_v15, %v8427_v33 }
 0x475   : > { %14577 = vst [vmem:[#allocation176_spill] sm:$0xff] %v8427_v33  ;;  %v8455_v15 = vpop.f32.mrf.mxu0  ;;  %v8463_v31 = vpop.f32.mrf.mxu1 }
 0x476   : > { %2219 = vmax.xlane.f32.xlu2 %v2218_v44  ;;  %v8451_v44 = vpop.xlane.xlu1 %2090  ;;  %v8453_v23 = vpop.xlane.xlu0 %2015  ;;  %14584 = vst [vmem:[#allocation181_spill] sm:$0xff] %v8455_v15 }
 0x477   : > { %14586 = vst [vmem:[#allocation26_spill] sm:$0xff] %v8463_v31 }
 0x478   : > { %6288 = vmatmul.msk.f32.gmra.mxu2 %vm722_vm1, %v14581_v51  ;;  %6320 = vmatmul.msk.f32.gmra.mxu3 %vm722_vm1, %v14581_v51  ;;  %v8461_v51 = vpop.xlane.xlu2 %2075 }
 0x47b   : > { %v8445_v5 = vpop.f32.mrf.mxu2  ;;  %v8447_v33 = vpop.f32.mrf.mxu3 }
 0x47c   : > { %14582 = vst [vmem:[#allocation23_spill] sm:$0xff] %v8445_v5  ;;  %v2221_v41 = vmax.f32 %v8445_v5, %v8447_v33  ;;  %v14589_v5 = vld [vmem:[#allocation31_spill] sm:$0xff] }
 0x47d   : > { %14583 = vst [vmem:[#allocation180_spill] sm:$0xff] %v8447_v33  ;;  %v8479_v6 = vpop.f32.mrf.mxu0 }
 0x47e   : > { %2222 = vmax.xlane.f32.xlu0 %v2221_v41  ;;  %v8475_v15 = vpop.xlane.xlu1 %2099  ;;  %14590 = vst [vmem:[#allocation31_spill] sm:$0xff] %v8479_v6 }
 0x480   : > { %6289 = vmatmul.msk.f32.gmra.mxu2 %vm722_vm1, %v14585_v49  ;;  %6321 = vmatmul.msk.f32.gmra.mxu3 %vm722_vm1, %v14585_v49  ;;  %v8477_v49 = vpop.xlane.xlu0 %2069  ;;  %v8485_v3 = vpop.xlane.xlu2 %2084 }
 0x483   : > { %v8465_v30 = vpop.f32.mrf.mxu2  ;;  %v8467_v33 = vpop.f32.mrf.mxu3 }
 0x484   : > { %14587 = vst [vmem:[#allocation182_spill] sm:$0xff] %v8465_v30  ;;  %v2224_v41 = vmax.f32 %v8465_v30, %v8467_v33  ;;  %v14594_v30 = vld [vmem:[#allocation40_spill] sm:$0xff] }
 0x485   : > { %14588 = vst [vmem:[#allocation183_spill] sm:$0xff] %v8467_v33  ;;  %v8487_v33 = vpop.f32.mrf.mxu1  ;;  %v8501_v8 = vpop.f32.mrf.mxu0 }
 0x486   : > { %2225 = vmax.xlane.f32.xlu1 %v2224_v41  ;;  %14593 = vst [vmem:[#allocation186_spill] sm:$0xff] %v8487_v33  ;;  %v8499_v43 = vpop.xlane.xlu1 %2108 }
 0x487   : > { %14597 = vst [vmem:[#allocation188_spill] sm:$0xff] %v8501_v8 }
 0x488   : > { %6290 = vmatmul.msk.f32.gmra.mxu2 %vm722_vm1, %v14589_v5  ;;  %6322 = vmatmul.msk.f32.gmra.mxu3 %vm722_vm1, %v14589_v5  ;;  %v8505_v10 = vpop.xlane.xlu0 %2078 }
 0x48b   : > { %v8481_v31 = vpop.f32.mrf.mxu2  ;;  %v8483_v12 = vpop.f32.mrf.mxu3 }
 0x48c   : > { %14591 = vst [vmem:[#allocation184_spill] sm:$0xff] %v8481_v31  ;;  %v2227_v41 = vmax.f32 %v8481_v31, %v8483_v12  ;;  %v14599_v31 = vld [vmem:[#allocation45_spill] sm:$0xff] }
 0x48d   : > { %14592 = vst [vmem:[#allocation185_spill] sm:$0xff] %v8483_v12  ;;  %v8509_v12 = vpop.f32.mrf.mxu1 }
 0x48e   : > { %2228 = vmax.xlane.f32.xlu2 %v2227_v41  ;;  %v8507_v41 = vpop.xlane.xlu2 %2093  ;;  %14598 = vst [vmem:[#allocation189_spill] sm:$0xff] %v8509_v12 }
 0x490   : > { %6291 = vmatmul.msk.f32.gmra.mxu2 %vm722_vm1, %v14594_v30  ;;  %6323 = vmatmul.msk.f32.gmra.mxu3 %vm722_vm1, %v14594_v30  ;;  %v8525_v12 = vpop.xlane.xlu0 %2087 }
 0x491   : > { %14603 = vst [vmem:[#allocation192_spill] sm:$0xff] %v8525_v12 }
 0x493   : > { %v8495_v5 = vpop.f32.mrf.mxu2  ;;  %v8497_v6 = vpop.f32.mrf.mxu3 }
 0x494   : > { %14595 = vst [vmem:[#allocation40_spill] sm:$0xff] %v8495_v5  ;;  %v2230_v33 = vmax.f32 %v8495_v5, %v8497_v6  ;;  %v8523_v5 = vpop.f32.mrf.mxu0 }
 0x495   : > { %14596 = vst [vmem:[#allocation187_spill] sm:$0xff] %v8497_v6  ;;  %v8521_v6 = vpop.xlane.xlu1 %2117  ;;  %v8529_v18 = vpop.f32.mrf.mxu1 }
 0x496   : > { %2231 = vmax.xlane.f32.xlu0 %v2230_v33  ;;  %14602 = vst [vmem:[#allocation191_spill] sm:$0xff] %v8523_v5  ;;  %v8527_v33 = vpop.xlane.xlu2 %2102 }
 0x497   : > { %14604 = vst [vmem:[#allocation193_spill] sm:$0xff] %v8527_v33  ;;  %v14686_v33 = vld [vmem:[#allocation56_spill] sm:$0xff] }
 0x498   : > { %6292 = vmatmul.msk.f32.gmra.mxu2 %vm722_vm1, %v14599_v31  ;;  %6324 = vmatmul.msk.f32.gmra.mxu3 %vm722_vm1, %v14599_v31  ;;  %14605 = vst [vmem:[#allocation194_spill] sm:$0xff] %v8529_v18  ;;  %v8549_v18 = vpop.xlane.xlu0 %2096 }
 0x499   : > { %14611 = vst [vmem:[#allocation59_spill] sm:$0xff] %v8549_v18  ;;  %v14636_v18 = vld [vmem:[#allocation78_spill] sm:$0xff] }
 0x49b   : > { %v8515_v30 = vpop.f32.mrf.mxu2  ;;  %v8517_v48 = vpop.f32.mrf.mxu3 }
 0x49c   : > { %14600 = vst [vmem:[#allocation45_spill] sm:$0xff] %v8515_v30  ;;  %v2233_v8 = vmax.f32 %v8515_v30, %v8517_v48  ;;  %v8543_v30 = vpop.f32.mrf.mxu0 }
 0x49d   : > { %14601 = vst [vmem:[#allocation190_spill] sm:$0xff] %v8517_v48  ;;  %v8553_v60 = vpop.f32.mrf.mxu1 }
 0x49e   : > { %2234 = vmax.xlane.f32.xlu1 %v2233_v8  ;;  %v8541_v8 = vpop.xlane.xlu1 %2126  ;;  %14609 = vst [vmem:[#allocation196_spill] sm:$0xff] %v8543_v30 }
 0x49f   : > { %14613 = vst [vmem:[#allocation198_spill] sm:$0xff] %v8553_v60 }
 0x4a0   : > { %6293 = vmatmul.msk.f32.gmra.mxu2 %vm722_vm1, %v14606_v19  ;;  %6325 = vmatmul.msk.f32.gmra.mxu3 %vm722_vm1, %v14606_v19  ;;  %v8551_v19 = vpop.xlane.xlu2 %2111  ;;  %v8575_v54 = vpop.xlane.xlu0 %2105 }
 0x4a1   : > { %14612 = vst [vmem:[#allocation197_spill] sm:$0xff] %v8551_v19 }
 0x4a2   : > { %14621 = vst [vmem:[#allocation204_spill] sm:$0xff] %v8575_v54 }
 0x4a3   : > { %v8535_v31 = vpop.f32.mrf.mxu2  ;;  %v8537_v48 = vpop.f32.mrf.mxu3 }
 0x4a4   : > { %14607 = vst [vmem:[#allocation50_spill] sm:$0xff] %v8535_v31  ;;  %v2236_v5 = vmax.f32 %v8535_v31, %v8537_v48  ;;  %v14616_v31 = vld [vmem:[#allocation64_spill] sm:$0xff] }
 0x4a5   : > { %14608 = vst [vmem:[#allocation195_spill] sm:$0xff] %v8537_v48  ;;  %v8569_v21 = vpop.f32.mrf.mxu1 }
 0x4a6   : > { %2237 = vmax.xlane.f32.xlu2 %v2236_v5  ;;  %v8567_v30 = vpop.xlane.xlu1 %2135  ;;  %14618 = vst [vmem:[#allocation201_spill] sm:$0xff] %v8569_v21 }
 0x4a8   : > { %6294 = vmatmul.msk.f32.gmra.mxu2 %vm722_vm1, %v14610_v59  ;;  %6326 = vmatmul.msk.f32.gmra.mxu3 %vm722_vm1, %v14610_v59  ;;  %v8565_v59 = vpop.f32.mrf.mxu0  ;;  %v8605_v1 = vpop.xlane.xlu0 %2114 }
 0x4a9   : > { %14617 = vst [vmem:[#allocation64_spill] sm:$0xff] %v8565_v59  ;;  %v14625_v59 = vld [vmem:[#allocation6_spill] sm:$0xff] }
 0x4aa   : > { %v2395_v21 = vsub.f32 %v14625_v59, %v8166_v13 }
 0x4ab   : > { %v8555_v57 = vpop.f32.mrf.mxu2  ;;  %v8557_v48 = vpop.f32.mrf.mxu3 }
 0x4ac   : > { %14614 = vst [vmem:[#allocation199_spill] sm:$0xff] %v8555_v57  ;;  %v2239_v5 = vmax.f32 %v8555_v57, %v8557_v48  ;;  %v14623_v57 = vld [vmem:[#allocation69_spill] sm:$0xff]  ;;  %v2651_v26 = vmul.f32 1.442695, %v2395_v21  ;;  %v14638_v21 = vld [vmem:[#allocation19_spill] sm:$0xff] }
 0x4ad   : > { %14615 = vst [vmem:[#allocation200_spill] sm:$0xff] %v8557_v48  ;;  %v8577_v48 = vpop.xlane.xlu2 %2120 }
 0x4ae   : > { %2240 = vmax.xlane.f32.xlu0 %v2239_v5  ;;  %14622 = vst [vmem:[#allocation205_spill] sm:$0xff] %v8577_v48  ;;  %v14628_v48 = vld [vmem:[#allocation7_spill] sm:$0xff]  ;;  %v8601_v34 = vpop.xlane.xlu1 %2144  ;;  %6455 = vpow2.f32 %v2651_v26 }
 0x4af   : > { %v2396_v19 = vsub.f32 %v14628_v48, %v8166_v13  ;;  %v14634_v13 = vld [vmem:[#allocation16_spill] sm:$0xff] }
 0x4b0   : > { %6295 = vmatmul.msk.f32.gmra.mxu2 %vm722_vm1, %v14616_v31  ;;  %6327 = vmatmul.msk.f32.gmra.mxu3 %vm722_vm1, %v14616_v31  ;;  %v8585_v31 = vpop.f32.mrf.mxu0  ;;  %v2403_v48 = vsub.f32 %v14634_v13, %v8199_v11 }
 0x4b1   : > { %14624 = vst [vmem:[#allocation69_spill] sm:$0xff] %v8585_v31  ;;  %v14631_v31 = vld [vmem:[#allocation14_spill] sm:$0xff] }
 0x4b2   : > { %v2402_v59 = vsub.f32 %v14631_v31, %v8183_v62  ;;  %v2667_v13 = vmul.f32 1.442695, %v2403_v48 }
 0x4b3   : > { %v8571_v60 = vpop.f32.mrf.mxu2  ;;  %v8573_v40 = vpop.f32.mrf.mxu3 }
 0x4b4   : > { %14619 = vst [vmem:[#allocation202_spill] sm:$0xff] %v8571_v60  ;;  %v2242_v5 = vmax.f32 %v8571_v60, %v8573_v40  ;;  %v14630_v60 = vld [vmem:[#allocation13_spill] sm:$0xff] }
 0x4b5   : > { %14620 = vst [vmem:[#allocation203_spill] sm:$0xff] %v8573_v40  ;;  %v8597_v40 = vpop.f32.mrf.mxu1  ;;  %v8607_v50 = vpop.xlane.xlu2 %2129 }
 0x4b6   : > { %2243 = vmax.xlane.f32.xlu1 %v2242_v5  ;;  %14629 = vst [vmem:[#allocation7_spill] sm:$0xff] %v8597_v40  ;;  %v14635_v40 = vld [vmem:[#allocation17_spill] sm:$0xff] }
 0x4b7   : > { %14632 = vst [vmem:[#allocation13_spill] sm:$0xff] %v8605_v1 }
 0x4b8   : > { %6296 = vmatmul.msk.f32.gmra.mxu2 %vm722_vm1, %v14623_v57  ;;  %6328 = vmatmul.msk.f32.gmra.mxu3 %vm722_vm1, %v14623_v57  ;;  %v2401_v57 = vsub.f32 %v14630_v60, %v8183_v62  ;;  %14633 = vst [vmem:[#allocation14_spill] sm:$0xff] %v8607_v50  ;;  %v14637_v62 = vld [vmem:[#allocation18_spill] sm:$0xff]  ;;  %v2665_v50 = vmul.f32 1.442695, %v2402_v59 }
 0x4b9   : > { %v2405_v31 = vsub.f32 %v14637_v62, %v8217_v25  ;;  %v8631_v62 = vpop.f32.mrf.mxu0 }
 0x4ba   : > { %v2663_v60 = vmul.f32 1.442695, %v2401_v57  ;;  %14643 = vst [vmem:[#allocation78_spill] sm:$0xff] %v8631_v62 }
 0x4bb   : > { %v8589_v55 = vpop.f32.mrf.mxu2  ;;  %v8591_v28 = vpop.f32.mrf.mxu3  ;;  %v2671_v26 = vmul.f32 1.442695, %v2405_v31  ;;  %v14648_v31 = vld [vmem:[#allocation28_spill] sm:$0xff] }
 0x4bc   : > { %14626 = vst [vmem:[#allocation6_spill] sm:$0xff] %v8589_v55  ;;  %v2245_v5 = vmax.f32 %v8589_v55, %v8591_v28  ;;  %v2404_v55 = vsub.f32 %v14635_v40, %v8199_v11 }
 0x4bd   : > { %14627 = vst [vmem:[#allocation206_spill] sm:$0xff] %v8591_v28  ;;  %v2653_v28 = vmul.f32 1.442695, %v2396_v19  ;;  %v14639_v19 = vld [vmem:[#allocation21_spill] sm:$0xff] }
 0x4be   : > { %2246 = vmax.xlane.f32.xlu2 %v2245_v5  ;;  %v2406_v5 = vsub.f32 %v14638_v21, %v8217_v25  ;;  %v2407_v1 = vsub.f32 %v14639_v19, %v8233_v61  ;;  %v2669_v2 = vmul.f32 1.442695, %v2404_v55  ;;  %v14644_v25 = vld [vmem:[#allocation24_spill] sm:$0xff]  ;;  %v14645_v19 = vld [vmem:[#allocation25_spill] sm:$0xff]  ;;  %v8637_v55 = vpop.f32.mrf.mxu1 }
 0x4bf   : > { %6457 = vpow2.f32 %v2653_v28  ;;  %v2409_v48 = vsub.f32 %v14644_v25, %v8255_v53  ;;  %v2410_v27 = vsub.f32 %v14645_v19, %v8255_v53  ;;  %14646 = vst [vmem:[#allocation18_spill] sm:$0xff] %v8637_v55  ;;  %v2412_v25 = vsub.f32 %v14648_v31, %v8273_v47  ;;  %v8649_v53 = vpop.eup %6455  ;;  %v14656_v31 = vld [vmem:[#allocation42_spill] sm:$0xff] }
 0x4c0   : > { %6297 = vmatmul.msk.f32.gmra.mxu2 %vm722_vm1, %v14636_v18  ;;  %6329 = vmatmul.msk.f32.gmra.mxu3 %vm722_vm1, %v14636_v18  ;;  %v14642_v18 = vld [vmem:[#allocation22_spill] sm:$0xff]  ;;  %6459 = vpow2.f32 %v2663_v60  ;;  %v2673_v21 = vmul.f32 1.442695, %v2406_v5  ;;  %v2675_v28 = vmul.f32 1.442695, %v2407_v1  ;;  %v8647_v5 = vpop.xlane.xlu2 %2138  ;;  %v14652_v1 = vld [vmem:[#allocation32_spill] sm:$0xff]  ;;  %v2418_v55 = vsub.f32 %v14656_v31, %v8315_v39 }
 0x4c1   : > { %v2408_v57 = vsub.f32 %v14642_v18, %v8233_v61  ;;  %6461 = vpow2.f32 %v2665_v50  ;;  %v14647_v61 = vld [vmem:[#allocation27_spill] sm:$0xff]  ;;  %v8645_v50 = vpop.xlane.xlu0 %2123  ;;  %14650 = vst [vmem:[#allocation21_spill] sm:$0xff] %v8647_v5 }
 0x4c2   : > { %6463 = vpow2.f32 %v2667_v13  ;;  %v2411_v18 = vsub.f32 %v14647_v61, %v8273_v47  ;;  %14649 = vst [vmem:[#allocation19_spill] sm:$0xff] %v8645_v50  ;;  %v2413_v13 = vsub.f32 %v14652_v1, %v8285_v63  ;;  %v2681_v61 = vmul.f32 1.442695, %v2410_v27  ;;  %v14660_v27 = vld [vmem:[#allocation33_spill] sm:$0xff] }
 0x4c3   : > { %v8623_v40 = vpop.f32.mrf.mxu2  ;;  %v8625_v11 = vpop.f32.mrf.mxu3  ;;  %6465 = vpow2.f32 %v2669_v2  ;;  %v2677_v60 = vmul.f32 1.442695, %v2408_v57  ;;  %14651 = vst [vmem:[#allocation22_spill] sm:$0xff] %v8649_v53  ;;  %v14654_v2 = vld [vmem:[#allocation41_spill] sm:$0xff]  ;;  %v2685_v1 = vmul.f32 1.442695, %v2412_v25 }
 0x4c4   : > { %14640 = vst [vmem:[#allocation16_spill] sm:$0xff] %v8623_v40  ;;  %v2248_v59 = vmax.f32 %v8623_v40, %v8625_v11  ;;  %6467 = vpow2.f32 %v2671_v26  ;;  %v2417_v57 = vsub.f32 %v14654_v2, %v8315_v39  ;;  %v2683_v47 = vmul.f32 1.442695, %v2411_v18  ;;  %v14662_v39 = vld [vmem:[#allocation36_spill] sm:$0xff]  ;;  %v14664_v50 = vld [vmem:[#allocation37_spill] sm:$0xff] }
 0x4c5   : > { %14641 = vst [vmem:[#allocation17_spill] sm:$0xff] %v8625_v11  ;;  %v8641_v11 = vpop.xlane.xlu1 %2153  ;;  %v8653_v19 = vpop.eup %6457  ;;  %6469 = vpow2.f32 %v2673_v21  ;;  %v2414_v21 = vsub.f32 %v14660_v27, %v8285_v63  ;;  %v2415_v18 = vsub.f32 %v14662_v39, %v8297_v46  ;;  %v2697_v27 = vmul.f32 1.442695, %v2418_v55 }
 0x4c6   : > { %2249 = vmax.xlane.f32.xlu0 %v2248_v59  ;;  %v2679_v59 = vmul.f32 1.442695, %v2409_v48  ;;  %14653 = vst [vmem:[#allocation24_spill] sm:$0xff] %v8653_v19  ;;  %v8657_v62 = vpop.eup %6459  ;;  %6471 = vpow2.f32 %v2675_v28  ;;  %v2687_v28 = vmul.f32 1.442695, %v2413_v13  ;;  %v8679_v19 = vpop.f32.mrf.mxu0 }
 0x4c7   : > { %14655 = vst [vmem:[#allocation25_spill] sm:$0xff] %v8657_v62  ;;  %v8665_v48 = vpop.eup %6461  ;;  %6473 = vpow2.f32 %v2677_v60  ;;  %v2416_v60 = vsub.f32 %v14664_v50, %v8297_v46  ;;  %v2695_v25 = vmul.f32 1.442695, %v2417_v57  ;;  %v2689_v39 = vmul.f32 1.442695, %v2414_v21  ;;  %v8689_v53 = vpop.f32.mrf.mxu1  ;;  %v14672_v57 = vld [vmem:[#allocation51_spill] sm:$0xff] }
 0x4c8   : > { %14659 = vst [vmem:[#allocation32_spill] sm:$0xff] %v8665_v48  ;;  %v8671_v5 = vpop.eup %6463  ;;  %6475 = vpow2.f32 %v2679_v59  ;;  %v14667_v59 = vld [vmem:[#allocation46_spill] sm:$0xff]  ;;  %v2691_v50 = vmul.f32 1.442695, %v2415_v18  ;;  %v14678_v18 = vld [vmem:[#allocation61_spill] sm:$0xff] }
 0x4c9   : > { %14661 = vst [vmem:[#allocation41_spill] sm:$0xff] %v8671_v5  ;;  %v8675_v31 = vpop.eup %6465  ;;  %6477 = vpow2.f32 %v2681_v61  ;;  %v2419_v13 = vsub.f32 %v14667_v59, %v8327_v32  ;;  %v14669_v61 = vld [vmem:[#allocation47_spill] sm:$0xff]  ;;  %v2693_v59 = vmul.f32 1.442695, %v2416_v60 }
 0x4ca   : > { %14663 = vst [vmem:[#allocation42_spill] sm:$0xff] %v8675_v31  ;;  %v8681_v63 = vpop.eup %6467  ;;  %6479 = vpow2.f32 %v2683_v47  ;;  %v2421_v47 = vsub.f32 %v14672_v57, %v8333_v58  ;;  %v2426_v57 = vsub.f32 %v14678_v18, %v8349_v29 }
 0x4cb   : > { %v8661_v40 = vpop.f32.mrf.mxu2  ;;  %v8663_v26 = vpop.f32.mrf.mxu3  ;;  %14665 = vst [vmem:[#allocation33_spill] sm:$0xff] %v8679_v19  ;;  %6481 = vpow2.f32 %v2685_v1  ;;  %v14674_v1 = vld [vmem:[#allocation60_spill] sm:$0xff] }
 0x4cc   : > { %14657 = vst [vmem:[#allocation27_spill] sm:$0xff] %v8661_v40  ;;  %v2251_v2 = vmax.f32 %v8661_v40, %v8663_v26  ;;  %v2420_v40 = vsub.f32 %v14669_v61, %v8327_v32  ;;  %6483 = vpow2.f32 %v2687_v28  ;;  %v2425_v21 = vsub.f32 %v14674_v1, %v8349_v29  ;;  %v8701_v19 = vpop.xlane.xlu0 %2132  ;;  %v8703_v32 = vpop.xlane.xlu2 %2147  ;;  %v14682_v1 = vld [vmem:[#allocation52_spill] sm:$0xff]  ;;  %v14684_v29 = vld [vmem:[#allocation55_spill] sm:$0xff] }
 0x4cd   : > { %14658 = vst [vmem:[#allocation28_spill] sm:$0xff] %v8663_v26  ;;  %v8685_v26 = vpop.eup %6469  ;;  %v8695_v55 = vpop.xlane.xlu1 %2162  ;;  %6485 = vpow2.f32 %v2695_v25  ;;  %v2699_v28 = vmul.f32 1.442695, %v2419_v13  ;;  %v2423_v13 = vsub.f32 %v14684_v29, %v8339_v24  ;;  %v14690_v29 = vld [vmem:[#allocation66_spill] sm:$0xff] }
 0x4ce   : > { %2252 = vmax.xlane.f32.xlu1 %v2251_v2  ;;  %14666 = vst [vmem:[#allocation36_spill] sm:$0xff] %v8681_v63  ;;  %v8691_v46 = vpop.eup %6471  ;;  %6487 = vpow2.f32 %v2697_v27  ;;  %v2701_v25 = vmul.f32 1.442695, %v2420_v40  ;;  %v2703_v27 = vmul.f32 1.442695, %v2421_v47 }
 0x4cf   : > { %14668 = vst [vmem:[#allocation37_spill] sm:$0xff] %v8685_v26  ;;  %v8697_v2 = vpop.eup %6473  ;;  %6489 = vpow2.f32 %v2689_v39  ;;  %v2424_v39 = vsub.f32 %v14686_v33, %v8339_v24  ;;  %v2711_v40 = vmul.f32 1.442695, %v2425_v21  ;;  %v2707_v24 = vmul.f32 1.442695, %v2423_v13  ;;  %v14693_v33 = vld [vmem:[#allocation70_spill] sm:$0xff] }
 0x4d0   : > { %14670 = vst [vmem:[#allocation46_spill] sm:$0xff] %v8689_v53  ;;  %v8705_v61 = vpop.eup %6475  ;;  %6491 = vpow2.f32 %v2691_v50  ;;  %v2429_v21 = vsub.f32 %v14693_v33, %v8373_v22 }
 0x4d1   : > { %14671 = vst [vmem:[#allocation47_spill] sm:$0xff] %v8691_v46  ;;  %v8713_v60 = vpop.eup %6477  ;;  %6493 = vpow2.f32 %v2693_v59  ;;  %v8735_v59 = vpop.f32.mrf.mxu0 }
 0x4d2   : > { %14673 = vst [vmem:[#allocation51_spill] sm:$0xff] %v8697_v2  ;;  %v8719_v62 = vpop.eup %6479  ;;  %6495 = vpow2.f32 %v2699_v28  ;;  %v2709_v28 = vmul.f32 1.442695, %v2424_v39 }
 0x4d3   : > { %14675 = vst [vmem:[#allocation60_spill] sm:$0xff] %v8701_v19  ;;  %v8709_v53 = vpop.f32.mrf.mxu2  ;;  %v8711_v48 = vpop.f32.mrf.mxu3  ;;  %v2422_v19 = vsub.f32 %v14682_v1, %v8333_v58  ;;  %v2713_v58 = vmul.f32 1.442695, %v2426_v57  ;;  %v14688_v1 = vld [vmem:[#allocation65_spill] sm:$0xff]  ;;  %6497 = vpow2.f32 %v2701_v25  ;;  %v14695_v57 = vld [vmem:[#allocation71_spill] sm:$0xff] }
 0x4d4   : > { %14676 = vst [vmem:[#allocation207_spill] sm:$0xff] %v8703_v32  ;;  %v2254_v32 = vmax.f32 %v8709_v53, %v8711_v48  ;;  %v8723_v18 = vpop.eup %6481  ;;  %6499 = vpow2.f32 %v2703_v27  ;;  %v2430_v25 = vsub.f32 %v14695_v57, %v8373_v22  ;;  %v8759_v22 = vpop.xlane.xlu2 %2156 }
 0x4d5   : > { %14677 = vst [vmem:[#allocation208_spill] sm:$0xff] %v8705_v61  ;;  %v8727_v56 = vpop.eup %6483  ;;  %v2705_v47 = vmul.f32 1.442695, %v2422_v19  ;;  %6501 = vpow2.f32 %v2711_v40  ;;  %v8745_v19 = vpop.f32.mrf.mxu1 }
 0x4d6   : > { %14679 = vst [vmem:[#allocation61_spill] sm:$0xff] %v8709_v53  ;;  %2255 = vmax.xlane.f32.xlu2 %v2254_v32  ;;  %v8731_v50 = vpop.eup %6485  ;;  %v2428_v53 = vsub.f32 %v14690_v29, %v8359_v20  ;;  %6503 = vpow2.f32 %v2713_v58  ;;  %v14698_v29 = vld [vmem:[#allocation74_spill] sm:$0xff]  ;;  %v8757_v40 = vpop.xlane.xlu0 %2141 }
 0x4d7   : > { %14680 = vst [vmem:[#allocation209_spill] sm:$0xff] %v8711_v48  ;;  %v2427_v48 = vsub.f32 %v14688_v1, %v8359_v20  ;;  %v8737_v26 = vpop.eup %6487  ;;  %v2431_v27 = vsub.f32 %v14698_v29, %v8385_v37  ;;  %6505 = vpow2.f32 %v2705_v47  ;;  %v2719_v29 = vmul.f32 1.442695, %v2429_v21  ;;  %v8769_v52 = vpop.xlane.xlu1 %2171 }
 0x4d8   : > { %14681 = vst [vmem:[#allocation210_spill] sm:$0xff] %v8713_v60  ;;  %v8741_v32 = vpop.eup %6489  ;;  %v2717_v39 = vmul.f32 1.442695, %v2428_v53  ;;  %6507 = vpow2.f32 %v2707_v24  ;;  %v2721_v47 = vmul.f32 1.442695, %v2430_v25  ;;  %v14709_v24 = vld [vmem:[#allocation85_spill] sm:$0xff] }
 0x4d9   : > { %14683 = vst [vmem:[#allocation52_spill] sm:$0xff] %v8719_v62  ;;  %v8747_v1 = vpop.eup %6491  ;;  %v2715_v20 = vmul.f32 1.442695, %v2427_v48  ;;  %v3196_v48 = vadd.f32 %v8737_v26, %v8731_v50  ;;  %6509 = vpow2.f32 %v2709_v28  ;;  %v2436_v21 = vsub.f32 %v14709_v24, %v8407_v17  ;;  %v8791_v24 = vpop.f32.mrf.mxu0 }
 0x4da   : > { %14685 = vst [vmem:[#allocation55_spill] sm:$0xff] %v8723_v18  ;;  %v8755_v33 = vpop.eup %6493 }
 0x4db   : > { %14687 = vst [vmem:[#allocation56_spill] sm:$0xff] %v8727_v56  ;;  %v8751_v13 = vpop.f32.mrf.mxu2  ;;  %v8765_v58 = vpop.eup %6495  ;;  %6511 = vpow2.f32 %v2715_v20 }
 0x4dc   : > { %14689 = vst [vmem:[#allocation65_spill] sm:$0xff] %v8731_v50  ;;  %v8771_v53 = vpop.eup %6497  ;;  %6513 = vpow2.f32 %v2717_v39  ;;  %v14718_v50 = vld [vmem:[#allocation106_spill] sm:$0xff] }
 0x4dd   : > { %14691 = vst [vmem:[#allocation66_spill] sm:$0xff] %v8735_v59  ;;  %v8753_v59 = vpop.f32.mrf.mxu3  ;;  %6515 = vpow2.f32 %v2719_v29  ;;  %v2448_v29 = vsub.f32 %v14718_v50, %v8451_v44  ;;  %v14725_v50 = vld [vmem:[#allocation119_spill] sm:$0xff] }
 0x4de   : > { %14692 = vst [vmem:[#allocation211_spill] sm:$0xff] %v8737_v26  ;;  %v2257_v57 = vmax.f32 %v8751_v13, %v8753_v59  ;;  %3197 = vadd.xlane.f32.xlu2 %v3196_v48  ;;  %6517 = vpow2.f32 %v2721_v47  ;;  %v2454_v31 = vsub.f32 %v14725_v50, %v8475_v15 }
 0x4df   : > { %14694 = vst [vmem:[#allocation70_spill] sm:$0xff] %v8741_v32  ;;  %v8827_v50 = vpop.xlane.xlu1 %2180 }
 0x4e0   : > { %14696 = vst [vmem:[#allocation71_spill] sm:$0xff] %v8745_v19  ;;  %v14705_v19 = vld [vmem:[#allocation75_spill] sm:$0xff]  ;;  %2258 = vmax.xlane.f32.xlu0 %v2257_v57 }
 0x4e1   : > { %14697 = vst [vmem:[#allocation212_spill] sm:$0xff] %v8747_v1  ;;  %v2432_v63 = vsub.f32 %v14705_v19, %v8385_v37  ;;  %v14711_v37 = vld [vmem:[#allocation95_spill] sm:$0xff] }
 0x4e2   : > { %14699 = vst [vmem:[#allocation74_spill] sm:$0xff] %v8751_v13  ;;  %v2723_v13 = vmul.f32 1.442695, %v2431_v27  ;;  %v2441_v19 = vsub.f32 %v14711_v37, %v8431_v14  ;;  %v14715_v27 = vld [vmem:[#allocation105_spill] sm:$0xff]  ;;  %v2733_v37 = vmul.f32 1.442695, %v2436_v21  ;;  %v8809_v21 = vpop.f32.mrf.mxu1 }
 0x4e3   : > { %14700 = vst [vmem:[#allocation213_spill] sm:$0xff] %v8753_v59  ;;  %v8775_v59 = vpop.eup %6499  ;;  %v2725_v25 = vmul.f32 1.442695, %v2432_v63  ;;  %v8797_v63 = vpop.f32.mrf.mxu2 }
 0x4e4   : > { %14701 = vst [vmem:[#allocation214_spill] sm:$0xff] %v8755_v33  ;;  %v8779_v26 = vpop.eup %6501  ;;  %6519 = vpow2.f32 %v2723_v13  ;;  %v2743_v47 = vmul.f32 1.442695, %v2441_v19 }
 0x4e5   : > { %14702 = vst [vmem:[#allocation215_spill] sm:$0xff] %v8757_v40  ;;  %v8783_v28 = vpop.eup %6503  ;;  %v8799_v54 = vpop.f32.mrf.mxu3  ;;  %6521 = vpow2.f32 %v2725_v25  ;;  %v2757_v25 = vmul.f32 1.442695, %v2448_v29 }
 0x4e6   : > { %14703 = vst [vmem:[#allocation216_spill] sm:$0xff] %v8759_v22  ;;  %v14707_v22 = vld [vmem:[#allocation84_spill] sm:$0xff]  ;;  %v8787_v48 = vpop.eup %6505  ;;  %v3208_v13 = vadd.f32 %v8783_v28, %v8779_v26 }
 0x4e7   : > { %14704 = vst [vmem:[#allocation217_spill] sm:$0xff] %v8765_v58  ;;  %v2435_v40 = vsub.f32 %v14707_v22, %v8407_v17  ;;  %v14713_v22 = vld [vmem:[#allocation96_spill] sm:$0xff]  ;;  %v2447_v17 = vsub.f32 %v14715_v27, %v8451_v44  ;;  %v8793_v39 = vpop.eup %6507  ;;  %v2260_v27 = vmax.f32 %v8797_v63, %v8799_v54 }
 0x4e8   : > { %14706 = vst [vmem:[#allocation75_spill] sm:$0xff] %v8771_v53  ;;  %v2442_v57 = vsub.f32 %v14713_v22, %v8431_v14  ;;  %v8801_v14 = vpop.eup %6509  ;;  %3209 = vadd.xlane.f32.xlu0 %v3208_v13  ;;  %v14733_v13 = vld [vmem:[#allocation63_spill] sm:$0xff] }
 0x4e9   : > { %14708 = vst [vmem:[#allocation84_spill] sm:$0xff] %v8775_v59  ;;  %v2731_v20 = vmul.f32 1.442695, %v2435_v40  ;;  %v14722_v40 = vld [vmem:[#allocation118_spill] sm:$0xff]  ;;  %v2755_v19 = vmul.f32 1.442695, %v2447_v17  ;;  %2261 = vmax.xlane.f32.xlu1 %v2260_v27 }
 0x4ea   : > { %14710 = vst [vmem:[#allocation85_spill] sm:$0xff] %v8779_v26  ;;  %v2453_v22 = vsub.f32 %v14722_v40, %v8475_v15  ;;  %v2745_v44 = vmul.f32 1.442695, %v2442_v57  ;;  %v14727_v40 = vld [vmem:[#allocation48_spill] sm:$0xff]  ;;  %v14729_v57 = vld [vmem:[#allocation49_spill] sm:$0xff] }
 0x4eb   : > { %14712 = vst [vmem:[#allocation95_spill] sm:$0xff] %v8783_v28  ;;  %6523 = vpow2.f32 %v2731_v20  ;;  %v2459_v12 = vsub.f32 %v14727_v40, %v8499_v43  ;;  %v2460_v15 = vsub.f32 %v14729_v57, %v8499_v43  ;;  %v14731_v40 = vld [vmem:[#allocation62_spill] sm:$0xff]  ;;  %v2769_v27 = vmul.f32 1.442695, %v2454_v31  ;;  %v14734_v43 = vld [vmem:[#allocation76_spill] sm:$0xff] }
 0x4ec   : > { %14714 = vst [vmem:[#allocation96_spill] sm:$0xff] %v8787_v48  ;;  %6525 = vpow2.f32 %v2733_v37  ;;  %v2767_v17 = vmul.f32 1.442695, %v2453_v22  ;;  %v2465_v28 = vsub.f32 %v14731_v40, %v8521_v6  ;;  %v2466_v37 = vsub.f32 %v14733_v13, %v8521_v6  ;;  %v14736_v40 = vld [vmem:[#allocation77_spill] sm:$0xff]  ;;  %v14740_v13 = vld [vmem:[#allocation86_spill] sm:$0xff] }
 0x4ed   : > { %14716 = vst [vmem:[#allocation105_spill] sm:$0xff] %v8791_v24  ;;  %v8811_v24 = vpop.eup %6511  ;;  %6527 = vpow2.f32 %v2743_v47  ;;  %v2779_v29 = vmul.f32 1.442695, %v2459_v12  ;;  %v2471_v57 = vsub.f32 %v14734_v43, %v8541_v8  ;;  %v2781_v22 = vmul.f32 1.442695, %v2460_v15  ;;  %v8847_v31 = vpop.f32.mrf.mxu3 }
 0x4ee   : > { %14717 = vst [vmem:[#allocation218_spill] sm:$0xff] %v8793_v39  ;;  %v8815_v5 = vpop.eup %6513  ;;  %6529 = vpow2.f32 %v2745_v44  ;;  %v8845_v44 = vpop.f32.mrf.mxu2  ;;  %v3205_v12 = vadd.f32 %v8801_v14, %v8793_v39  ;;  %v2477_v43 = vsub.f32 %v14740_v13, %v8567_v30 }
 0x4ef   : > { %14719 = vst [vmem:[#allocation106_spill] sm:$0xff] %v8797_v63  ;;  %v8821_v63 = vpop.xlane.xlu2 %2165  ;;  %6531 = vpow2.f32 %v2755_v19  ;;  %v2791_v19 = vmul.f32 1.442695, %v2465_v28  ;;  %v8857_v15 = vpop.f32.mrf.mxu0  ;;  %v14745_v28 = vld [vmem:[#allocation93_spill] sm:$0xff] }
 0x4f0   : > { %14720 = vst [vmem:[#allocation219_spill] sm:$0xff] %v8799_v54  ;;  %v8819_v54 = vpop.xlane.xlu0 %2150  ;;  %6533 = vpow2.f32 %v2757_v25  ;;  %v2263_v25 = vmax.f32 %v8845_v44, %v8847_v31  ;;  %v2483_v39 = vsub.f32 %v14745_v28, %v8601_v34  ;;  %v8867_v13 = vpop.f32.mrf.mxu1 }
 0x4f1   : > { %14721 = vst [vmem:[#allocation220_spill] sm:$0xff] %v8801_v14  ;;  %6535 = vpow2.f32 %v2767_v17  ;;  %v2803_v17 = vmul.f32 1.442695, %v2471_v57  ;;  %3206 = vadd.xlane.f32.xlu1 %v3205_v12 }
 0x4f2   : > { %14723 = vst [vmem:[#allocation118_spill] sm:$0xff] %v8809_v21  ;;  %v8823_v21 = vpop.eup %6515  ;;  %6537 = vpow2.f32 %v2769_v27  ;;  %v14748_v27 = vld [vmem:[#allocation94_spill] sm:$0xff]  ;;  %2264 = vmax.xlane.f32.xlu2 %v2263_v25  ;;  %v2827_v25 = vmul.f32 1.442695, %v2483_v39  ;;  %v3199_v39 = vadd.f32 %v8771_v53, %v8765_v58 }
 0x4f3   : > { %14724 = vst [vmem:[#allocation221_spill] sm:$0xff] %v8811_v24  ;;  %v8829_v20 = vpop.eup %6517  ;;  %6539 = vpow2.f32 %v2779_v29  ;;  %v14750_v29 = vld [vmem:[#allocation103_spill] sm:$0xff] }
 0x4f4   : > { %14726 = vst [vmem:[#allocation119_spill] sm:$0xff] %v8815_v5  ;;  %v8833_v26 = vpop.eup %6519  ;;  %6541 = vpow2.f32 %v2781_v22 }
 0x4f5   : > { %14728 = vst [vmem:[#allocation48_spill] sm:$0xff] %v8823_v21  ;;  %v8841_v47 = vpop.eup %6521  ;;  %v2472_v21 = vsub.f32 %v14736_v40, %v8541_v8  ;;  %v2793_v40 = vmul.f32 1.442695, %v2466_v37  ;;  %v2484_v37 = vsub.f32 %v14748_v27, %v8601_v34  ;;  %6543 = vpow2.f32 %v2791_v19  ;;  %v14752_v34 = vld [vmem:[#allocation104_spill] sm:$0xff] }
 0x4f6   : > { %14730 = vst [vmem:[#allocation49_spill] sm:$0xff] %v8829_v20  ;;  %v3202_v20 = vadd.f32 %v8787_v48, %v8775_v59  ;;  %v8851_v6 = vpop.eup %6523  ;;  %v14743_v48 = vld [vmem:[#allocation87_spill] sm:$0xff]  ;;  %v2490_v22 = vsub.f32 %v14752_v34, %v8641_v11  ;;  %v14754_v19 = vld [vmem:[#allocation112_spill] sm:$0xff] }
 0x4f7   : > { %14732 = vst [vmem:[#allocation62_spill] sm:$0xff] %v8833_v26  ;;  %v8859_v8 = vpop.eup %6525  ;;  %v2478_v59 = vsub.f32 %v14743_v48, %v8567_v30  ;;  %v2815_v48 = vmul.f32 1.442695, %v2477_v43  ;;  %v8881_v12 = vpop.xlane.xlu2 %2174  ;;  %6545 = vpow2.f32 %v2793_v40  ;;  %v2495_v43 = vsub.f32 %v14754_v19, %v8695_v55  ;;  %v14756_v40 = vld [vmem:[#allocation113_spill] sm:$0xff]  ;;  %v14760_v19 = vld [vmem:[#allocation122_spill] sm:$0xff] }
 0x4f8   : > { %14735 = vst [vmem:[#allocation63_spill] sm:$0xff] %v8841_v47  ;;  %v8863_v14 = vpop.eup %6527  ;;  %3203 = vadd.xlane.f32.xlu0 %v3202_v20  ;;  %v2489_v20 = vsub.f32 %v14750_v29, %v8641_v11  ;;  %v8879_v57 = vpop.xlane.xlu0 %2159  ;;  %6547 = vpow2.f32 %v2803_v17  ;;  %v3187_v29 = vadd.f32 %v8723_v18, %v8719_v62  ;;  %v2501_v18 = vsub.f32 %v14760_v19, %v8769_v52 }
 0x4f9   : > { %14737 = vst [vmem:[#allocation76_spill] sm:$0xff] %v8845_v44  ;;  %v8873_v44 = vpop.xlane.xlu1 %2189  ;;  %v8899_v11 = vpop.f32.mrf.mxu3  ;;  %v2851_v53 = vmul.f32 1.442695, %v2495_v43  ;;  %3200 = vadd.xlane.f32.xlu1 %v3199_v39  ;;  %v14769_v43 = vld [vmem:[#allocation134_spill] sm:$0xff] }
 0x4fa   : > { %14738 = vst [vmem:[#allocation77_spill] sm:$0xff] %v8847_v31  ;;  %v8869_v31 = vpop.eup %6529  ;;  %v2839_v34 = vmul.f32 1.442695, %v2489_v20  ;;  %v8917_v19 = vpop.f32.mrf.mxu0 }
 0x4fb   : > { %14739 = vst [vmem:[#allocation222_spill] sm:$0xff] %v8851_v6  ;;  %v8875_v30 = vpop.eup %6531 }
 0x4fc   : > { %14741 = vst [vmem:[#allocation86_spill] sm:$0xff] %v8857_v15  ;;  %v2805_v15 = vmul.f32 1.442695, %v2472_v21  ;;  %v8883_v28 = vpop.eup %6533  ;;  %v2817_v21 = vmul.f32 1.442695, %v2478_v59  ;;  %v2496_v59 = vsub.f32 %v14756_v40, %v8695_v55  ;;  %v14762_v40 = vld [vmem:[#allocation123_spill] sm:$0xff] }
 0x4fd   : > { %14742 = vst [vmem:[#allocation223_spill] sm:$0xff] %v8859_v8  ;;  %v8887_v27 = vpop.eup %6535  ;;  %v2841_v55 = vmul.f32 1.442695, %v2490_v22  ;;  %v2502_v62 = vsub.f32 %v14762_v40, %v8769_v52  ;;  %v2513_v40 = vsub.f32 %v14769_v43, %v8873_v44 }
 0x4fe   : > { %14744 = vst [vmem:[#allocation87_spill] sm:$0xff] %v8863_v14  ;;  %6549 = vpow2.f32 %v2805_v15 }
 0x4ff   : > { %14746 = vst [vmem:[#allocation93_spill] sm:$0xff] %v8867_v13  ;;  %v8893_v13 = vpop.eup %6537  ;;  %6551 = vpow2.f32 %v2815_v48  ;;  %v14764_v48 = vld [vmem:[#allocation128_spill] sm:$0xff] }
 0x500   : > { %14747 = vst [vmem:[#allocation224_spill] sm:$0xff] %v8869_v31  ;;  %v8903_v17 = vpop.eup %6539  ;;  %6553 = vpow2.f32 %v2817_v21  ;;  %v2507_v20 = vsub.f32 %v14764_v48, %v8827_v50  ;;  %3188 = vadd.xlane.f32.xlu0 %v3187_v29  ;;  %v14767_v21 = vld [vmem:[#allocation129_spill] sm:$0xff]  ;;  %v8927_v29 = vpop.f32.mrf.mxu1  ;;  %v2865_v48 = vmul.f32 1.442695, %v2502_v62 }
 0x501   : > { %14749 = vst [vmem:[#allocation94_spill] sm:$0xff] %v8875_v30  ;;  %v2829_v30 = vmul.f32 1.442695, %v2484_v37  ;;  %v8909_v37 = vpop.eup %6541  ;;  %6555 = vpow2.f32 %v2827_v25  ;;  %v2508_v22 = vsub.f32 %v14767_v21, %v8827_v50  ;;  %v2863_v25 = vmul.f32 1.442695, %v2501_v18  ;;  %v8938_v18 = vpop.xlane.xlu2 %2183 }
 0x502   : > { %14751 = vst [vmem:[#allocation103_spill] sm:$0xff] %v8883_v28  ;;  %v8897_v28 = vpop.f32.mrf.mxu2  ;;  %v8913_v31 = vpop.eup %6543  ;;  %v2875_v50 = vmul.f32 1.442695, %v2507_v20  ;;  %v2887_v20 = vmul.f32 1.442695, %v2513_v40 }
 0x503   : > { %14753 = vst [vmem:[#allocation104_spill] sm:$0xff] %v8887_v27  ;;  %v2266_v15 = vmax.f32 %v8897_v28, %v8899_v11  ;;  %v8919_v58 = vpop.eup %6545  ;;  %6557 = vpow2.f32 %v2829_v30  ;;  %v14772_v30 = vld [vmem:[#allocation135_spill] sm:$0xff] }
 0x504   : > { %14755 = vst [vmem:[#allocation112_spill] sm:$0xff] %v8893_v13  ;;  %v8923_v52 = vpop.eup %6547  ;;  %6559 = vpow2.f32 %v2839_v34  ;;  %v8936_v34 = vpop.xlane.xlu0 %2168 }
 0x505   : > { %14757 = vst [vmem:[#allocation113_spill] sm:$0xff] %v8897_v28  ;;  %v2199_v28 = vpop.xlane.xlu1 %2198  ;;  %2267 = vmax.xlane.f32.xlu2 %v2266_v15  ;;  %v8929_v39 = vpop.eup %6549  ;;  %6561 = vpow2.f32 %v2841_v55  ;;  %v14774_v15 = vld [vmem:[#allocation140_spill] sm:$0xff] }
 0x506   : > { %14758 = vst [vmem:[#allocation225_spill] sm:$0xff] %v8899_v11  ;;  %v2853_v11 = vmul.f32 1.442695, %v2496_v59  ;;  %v2514_v59 = vsub.f32 %v14772_v30, %v8873_v44  ;;  %6563 = vpow2.f32 %v2851_v53  ;;  %v2519_v21 = vsub.f32 %v14774_v15, %v2199_v28 }
 0x507   : > { %14759 = vst [vmem:[#allocation226_spill] sm:$0xff] %v8903_v17  ;;  %v3193_v53 = vadd.f32 %v8755_v33, %v8747_v1  ;;  %v2399_v30 = vsub.f32 %v7572_v42, %v8437_v16  ;;  %v3190_v33 = vadd.f32 %v8741_v32, %v8727_v56  ;;  %v2397_v42 = vsub.f32 %v7560_v38, %v8453_v23 }
 0x508   : > { %14761 = vst [vmem:[#allocation122_spill] sm:$0xff] %v8909_v37  ;;  %6565 = vpow2.f32 %v2853_v11 }
 0x509   : > { %14763 = vst [vmem:[#allocation123_spill] sm:$0xff] %v8913_v31  ;;  %6567 = vpow2.f32 %v2863_v25  ;;  %v2899_v25 = vmul.f32 1.442695, %v2519_v21  ;;  %3194 = vadd.xlane.f32.xlu1 %v3193_v53  ;;  %v8973_v21 = vpop.f32.mrf.mxu0 }
 0x50a   : > { %14765 = vst [vmem:[#allocation128_spill] sm:$0xff] %v8917_v19  ;;  %v8933_v19 = vpop.eup %6551  ;;  %v8943_v62 = vpop.f32.mrf.mxu2  ;;  %6569 = vpow2.f32 %v2865_v48 }
 0x50b   : > { %14766 = vst [vmem:[#allocation227_spill] sm:$0xff] %v8919_v58  ;;  %v8940_v43 = vpop.eup %6553  ;;  %6571 = vpow2.f32 %v2875_v50  ;;  %v2437_v50 = vsub.f32 %v7863_v0, %v8461_v51 }
 0x50c   : > { %14768 = vst [vmem:[#allocation129_spill] sm:$0xff] %v8923_v52  ;;  %v8945_v52 = vpop.f32.mrf.mxu3  ;;  %v8949_v44 = vpop.eup %6555 }
 0x50d   : > { %14770 = vst [vmem:[#allocation134_spill] sm:$0xff] %v8927_v29  ;;  %v2877_v29 = vmul.f32 1.442695, %v2508_v22  ;;  %v2269_v11 = vmax.f32 %v8943_v62, %v8945_v52  ;;  %v8955_v22 = vpop.eup %6557  ;;  %3191 = vadd.xlane.f32.xlu2 %v3190_v33  ;;  %v2433_v33 = vsub.f32 %v7827_v35, %v8477_v49  ;;  %v2735_v35 = vmul.f32 1.442695, %v2437_v50 }
 0x50e   : > { %14771 = vst [vmem:[#allocation228_spill] sm:$0xff] %v8929_v39  ;;  %v14776_v39 = vld [vmem:[#allocation141_spill] sm:$0xff]  ;;  %v8961_v1 = vpop.eup %6559 }
 0x50f   : > { %14773 = vst [vmem:[#allocation135_spill] sm:$0xff] %v8933_v19  ;;  %v2520_v55 = vsub.f32 %v14776_v39, %v2199_v28  ;;  %v2889_v28 = vmul.f32 1.442695, %v2514_v59  ;;  %v14781_v39 = vld [vmem:[#allocation11_spill] sm:$0xff]  ;;  %2270 = vmax.xlane.f32.xlu0 %v2269_v11  ;;  %v8965_v40 = vpop.eup %6561  ;;  %6573 = vpow2.f32 %v2877_v29  ;;  %v14784_v59 = vld [vmem:[#allocation9_spill] sm:$0xff]  ;;  %v2438_v29 = vsub.f32 %v7865_v7, %v8461_v51 }
 0x510   : > { %14775 = vst [vmem:[#allocation140_spill] sm:$0xff] %v8940_v43  ;;  %v2400_v15 = vsub.f32 %v14781_v39, %v8437_v16  ;;  %v8969_v16 = vpop.eup %6563  ;;  %6575 = vpow2.f32 %v2887_v20  ;;  %v2659_v39 = vmul.f32 1.442695, %v2399_v30  ;;  %v8983_v20 = vpop.f32.mrf.mxu1  ;;  %v14791_v11 = vld [vmem:[#allocation81_spill] sm:$0xff]  ;;  %v3181_v7 = vadd.f32 %v8697_v2, %v8691_v46  ;;  %v14810_v46 = vld [vmem:[#allocation150_spill] sm:$0xff] }
 0x511   : > { %14777 = vst [vmem:[#allocation141_spill] sm:$0xff] %v8943_v62  ;;  %v2901_v48 = vmul.f32 1.442695, %v2520_v55  ;;  %v8975_v38 = vpop.eup %6565  ;;  %6577 = vpow2.f32 %v2889_v28  ;;  %v2434_v28 = vsub.f32 %v14791_v11, %v8477_v49  ;;  %v2737_v49 = vmul.f32 1.442695, %v2438_v29  ;;  %v9005_v11 = vpop.xlane.xlu0 %2177 }
 0x512   : > { %14778 = vst [vmem:[#allocation229_spill] sm:$0xff] %v8945_v52  ;;  %v2398_v52 = vsub.f32 %v14784_v59, %v8453_v23  ;;  %v2661_v53 = vmul.f32 1.442695, %v2400_v15  ;;  %v8979_v55 = vpop.eup %6567  ;;  %6579 = vpow2.f32 %v2899_v25  ;;  %v2655_v23 = vmul.f32 1.442695, %v2397_v42  ;;  %v8989_v15 = vpop.f32.mrf.mxu2 }
 0x513   : > { %14779 = vst [vmem:[#allocation230_spill] sm:$0xff] %v8949_v44  ;;  %v8985_v30 = vpop.eup %6569  ;;  %6581 = vpow2.f32 %v2901_v48  ;;  %v2443_v25 = vsub.f32 %v7905_v36, %v8485_v3  ;;  %v2444_v48 = vsub.f32 %v7907_v9, %v8485_v3  ;;  %v9007_v62 = vpop.xlane.xlu2 %2192  ;;  %v2727_v36 = vmul.f32 1.442695, %v2433_v33  ;;  %v14798_v9 = vld [vmem:[#allocation90_spill] sm:$0xff] }
 0x514   : > { %14780 = vst [vmem:[#allocation231_spill] sm:$0xff] %v8955_v22  ;;  %v2657_v0 = vmul.f32 1.442695, %v2398_v52  ;;  %v8991_v59 = vpop.f32.mrf.mxu3  ;;  %v8995_v51 = vpop.eup %6571  ;;  %6583 = vpow2.f32 %v2659_v39  ;;  %v3184_v39 = vadd.f32 %v8713_v60, %v8705_v61  ;;  %v2729_v3 = vmul.f32 1.442695, %v2434_v28 }
 0x515   : > { %14782 = vst [vmem:[#allocation11_spill] sm:$0xff] %v8961_v1  ;;  %v2272_v52 = vmax.f32 %v8989_v15, %v8991_v59  ;;  %v9001_v42 = vpop.eup %6573  ;;  %6585 = vpow2.f32 %v2661_v53  ;;  %v2440_v29 = vsub.f32 %v14798_v9, %v8505_v10  ;;  %v9033_v2 = vpop.f32.mrf.mxu0 }
 0x516   : > { %14783 = vst [vmem:[#allocation232_spill] sm:$0xff] %v8965_v40  ;;  %v9011_v50 = vpop.eup %6575  ;;  %6587 = vpow2.f32 %v2655_v23  ;;  %3185 = vadd.xlane.f32.xlu2 %v3184_v39  ;;  %v2449_v23 = vsub.f32 %v7945_v45, %v8507_v41  ;;  %v14804_v39 = vld [vmem:[#allocation101_spill] sm:$0xff] }
 0x517   : > { %14785 = vst [vmem:[#allocation9_spill] sm:$0xff] %v8969_v16  ;;  %3182 = vadd.xlane.f32.xlu0 %v3181_v7  ;;  %2273 = vmax.xlane.f32.xlu1 %v2272_v52  ;;  %v9015_v53 = vpop.eup %6577  ;;  %6589 = vpow2.f32 %v2657_v0  ;;  %v14801_v7 = vld [vmem:[#allocation111_spill] sm:$0xff] }
 0x518   : > { %14786 = vst [vmem:[#allocation233_spill] sm:$0xff] %v8973_v21  ;;  %6591 = vpow2.f32 %v2735_v35  ;;  %v2747_v21 = vmul.f32 1.442695, %v2443_v25  ;;  %v2450_v52 = vsub.f32 %v14801_v7, %v8507_v41  ;;  %v14806_v35 = vld [vmem:[#allocation42_spill] sm:$0xff] }
 0x519   : > { %14787 = vst [vmem:[#allocation234_spill] sm:$0xff] %v8975_v38  ;;  %6593 = vpow2.f32 %v2737_v49  ;;  %v2741_v49 = vmul.f32 1.442695, %v2440_v29  ;;  %v9051_v29 = vpop.f32.mrf.mxu1 }
 0x51a   : > { %14788 = vst [vmem:[#allocation235_spill] sm:$0xff] %v8979_v55  ;;  %6595 = vpow2.f32 %v2727_v36  ;;  %v9039_v41 = vpop.f32.mrf.mxu2  ;;  %v14814_v36 = vld [vmem:[#allocation37_spill] sm:$0xff]  ;;  %v2761_v56 = vmul.f32 1.442695, %v2450_v52  ;;  %v9065_v52 = vpop.xlane.xlu0 %2186 }
 0x51b   : > { %14789 = vst [vmem:[#allocation236_spill] sm:$0xff] %v8983_v20  ;;  %v14805_v20 = vld [vmem:[#allocation41_spill] sm:$0xff]  ;;  %6597 = vpow2.f32 %v2729_v3 }
 0x51c   : > { %14790 = vst [vmem:[#allocation237_spill] sm:$0xff] %v8985_v30  ;;  %v3175_v25 = vadd.f32 %v14806_v35, %v14805_v20  ;;  %v9041_v7 = vpop.f32.mrf.mxu3  ;;  %6599 = vpow2.f32 %v2747_v21  ;;  %v2759_v35 = vmul.f32 1.442695, %v2449_v23  ;;  %v14816_v20 = vld [vmem:[#allocation151_spill] sm:$0xff]  ;;  %v14821_v23 = vld [vmem:[#allocation193_spill] sm:$0xff] }
 0x51d   : > { %14792 = vst [vmem:[#allocation81_spill] sm:$0xff] %v8989_v15  ;;  %v9019_v15 = vpop.eup %6579  ;;  %v2275_v3 = vmax.f32 %v9039_v41, %v9041_v7 }
 0x51e   : > { %14793 = vst [vmem:[#allocation238_spill] sm:$0xff] %v8991_v59  ;;  %v2439_v59 = vsub.f32 %v7875_v4, %v8505_v10  ;;  %v9023_v33 = vpop.eup %6581  ;;  %v2749_v4 = vmul.f32 1.442695, %v2444_v48  ;;  %v14803_v10 = vld [vmem:[#allocation192_spill] sm:$0xff] }
 0x51f   : > { %14794 = vst [vmem:[#allocation239_spill] sm:$0xff] %v8995_v51  ;;  %v9027_v0 = vpop.eup %6583  ;;  %v2445_v9 = vsub.f32 %v14804_v39, %v14803_v10  ;;  %v14809_v48 = vld [vmem:[#allocation204_spill] sm:$0xff]  ;;  %3176 = vadd.xlane.f32.xlu0 %v3175_v25  ;;  %2276 = vmax.xlane.f32.xlu2 %v2275_v3 }
 0x520   : > { %14795 = vst [vmem:[#allocation240_spill] sm:$0xff] %v9001_v42  ;;  %v2739_v28 = vmul.f32 1.442695, %v2439_v59  ;;  %v9035_v45 = vpop.eup %6585  ;;  %v2457_v60 = vsub.f32 %v14810_v46, %v14809_v48  ;;  %v14813_v59 = vld [vmem:[#allocation36_spill] sm:$0xff]  ;;  %v2458_v32 = vsub.f32 %v14816_v20, %v14809_v48  ;;  %6601 = vpow2.f32 %v2749_v4  ;;  %v14824_v48 = vld [vmem:[#allocation149_spill] sm:$0xff] }
 0x521   : > { %14796 = vst [vmem:[#allocation241_spill] sm:$0xff] %v9011_v50  ;;  %v3178_v61 = vadd.f32 %v14814_v36, %v14813_v59  ;;  %v9045_v39 = vpop.eup %6587  ;;  %v2751_v21 = vmul.f32 1.442695, %v2445_v9  ;;  %v14822_v59 = vld [vmem:[#allocation148_spill] sm:$0xff] }
 0x522   : > { %14797 = vst [vmem:[#allocation242_spill] sm:$0xff] %v9015_v53  ;;  %v9053_v46 = vpop.eup %6589  ;;  %6603 = vpow2.f32 %v2739_v28  ;;  %v2455_v44 = vsub.f32 %v14822_v59, %v14821_v23  ;;  %v2775_v4 = vmul.f32 1.442695, %v2457_v60  ;;  %v14826_v28 = vld [vmem:[#allocation59_spill] sm:$0xff]  ;;  %v2777_v59 = vmul.f32 1.442695, %v2458_v32  ;;  %v9081_v32 = vpop.f32.mrf.mxu2 }
 0x523   : > { %14799 = vst [vmem:[#allocation90_spill] sm:$0xff] %v9019_v15  ;;  %v9057_v36 = vpop.eup %6591  ;;  %3179 = vadd.xlane.f32.xlu1 %v3178_v61  ;;  %6605 = vpow2.f32 %v2741_v49  ;;  %v14829_v49 = vld [vmem:[#allocation115_spill] sm:$0xff] }
 0x524   : > { %14800 = vst [vmem:[#allocation243_spill] sm:$0xff] %v9023_v33  ;;  %v9061_v20 = vpop.eup %6593  ;;  %6607 = vpow2.f32 %v2759_v35  ;;  %v2771_v60 = vmul.f32 1.442695, %v2455_v44  ;;  %v14840_v44 = vld [vmem:[#allocation53_spill] sm:$0xff] }
 0x525   : > { %14802 = vst [vmem:[#allocation111_spill] sm:$0xff] %v9027_v0  ;;  %6609 = vpow2.f32 %v2761_v56  ;;  %v14836_v56 = vld [vmem:[#allocation25_spill] sm:$0xff] }
 0x526   : > { %14807 = vst [vmem:[#allocation192_spill] sm:$0xff] %v9033_v2  ;;  %v14819_v2 = vld [vmem:[#allocation102_spill] sm:$0xff]  ;;  %6611 = vpow2.f32 %v2751_v21  ;;  %v14839_v21 = vld [vmem:[#allocation197_spill] sm:$0xff] }
 0x527   : > { %14808 = vst [vmem:[#allocation101_spill] sm:$0xff] %v9035_v45  ;;  %v2446_v22 = vsub.f32 %v14819_v2, %v14803_v10  ;;  %v9067_v2 = vpop.eup %6595  ;;  %v14827_v10 = vld [vmem:[#allocation114_spill] sm:$0xff]  ;;  %6613 = vpow2.f32 %v2775_v4  ;;  %v9093_v4 = vpop.f32.mrf.mxu0 }
 0x528   : > { %14811 = vst [vmem:[#allocation204_spill] sm:$0xff] %v9039_v41  ;;  %v2202_v41 = vpop.xlane.xlu2 %2201  ;;  %v2451_v9 = vsub.f32 %v14827_v10, %v14826_v28  ;;  %v9071_v25 = vpop.eup %6597  ;;  %6615 = vpow2.f32 %v2777_v59  ;;  %v14846_v59 = vld [vmem:[#allocation67_spill] sm:$0xff] }
 0x529   : > { %14812 = vst [vmem:[#allocation150_spill] sm:$0xff] %v9041_v7  ;;  %v2456_v7 = vsub.f32 %v14824_v48, %v14821_v23  ;;  %v2753_v61 = vmul.f32 1.442695, %v2446_v22  ;;  %v9075_v23 = vpop.eup %6599  ;;  %v14831_v48 = vld [vmem:[#allocation153_spill] sm:$0xff]  ;;  %v14837_v22 = vld [vmem:[#allocation32_spill] sm:$0xff] }
 0x52a   : > { %14815 = vst [vmem:[#allocation244_spill] sm:$0xff] %v9045_v39  ;;  %v2521_v3 = vsub.f32 %v14831_v48, %v2202_v41  ;;  %v14843_v48 = vld [vmem:[#allocation54_spill] sm:$0xff] }
 0x52b   : > { %14817 = vst [vmem:[#allocation151_spill] sm:$0xff] %v9051_v29  ;;  %v2452_v29 = vsub.f32 %v14829_v49, %v14826_v28  ;;  %v2773_v35 = vmul.f32 1.442695, %v2456_v7  ;;  %v2763_v49 = vmul.f32 1.442695, %v2451_v9  ;;  %6617 = vpow2.f32 %v2753_v61 }
 0x52c   : > { %14818 = vst [vmem:[#allocation245_spill] sm:$0xff] %v9053_v46  ;;  %6619 = vpow2.f32 %v2771_v60 }
 0x52d   : > { %14820 = vst [vmem:[#allocation102_spill] sm:$0xff] %v9057_v36  ;;  %v3172_v36 = vadd.f32 %v14837_v22, %v14836_v56  ;;  %v3169_v22 = vadd.f32 %v9035_v45, %v9027_v0  ;;  %6621 = vpow2.f32 %v2773_v35  ;;  %v14851_v45 = vld [vmem:[#allocation13_spill] sm:$0xff]  ;;  %v9119_v35 = vpop.xlane.xlu0 %2195 }
 0x52e   : > { %14823 = vst [vmem:[#allocation193_spill] sm:$0xff] %v9061_v20  ;;  %v9078_v20 = vpop.eup %6601  ;;  %6623 = vpow2.f32 %v2763_v49  ;;  %v14852_v0 = vld [vmem:[#allocation57_spill] sm:$0xff] }
 0x52f   : > { %14825 = vst [vmem:[#allocation148_spill] sm:$0xff] %v9067_v2  ;;  %v14833_v2 = vld [vmem:[#allocation154_spill] sm:$0xff]  ;;  %v9087_v28 = vpop.eup %6603  ;;  %3173 = vadd.xlane.f32.xlu1 %v3172_v36  ;;  %3170 = vadd.xlane.f32.xlu2 %v3169_v22 }
 0x530   : > { %14828 = vst [vmem:[#allocation149_spill] sm:$0xff] %v9071_v25  ;;  %v2522_v10 = vsub.f32 %v14833_v2, %v2202_v41  ;;  %v9083_v25 = vpop.f32.mrf.mxu3  ;;  %v9095_v41 = vpop.eup %6605  ;;  %v2765_v2 = vmul.f32 1.442695, %v2452_v29  ;;  %v14849_v29 = vld [vmem:[#allocation68_spill] sm:$0xff]  ;;  %v14856_v22 = vld [vmem:[#allocation14_spill] sm:$0xff] }
 0x531   : > { %14830 = vst [vmem:[#allocation59_spill] sm:$0xff] %v9075_v23  ;;  %v2461_v23 = vsub.f32 %v14840_v44, %v14839_v21  ;;  %v2278_v7 = vmax.f32 %v9081_v32, %v9083_v25  ;;  %v9101_v9 = vpop.eup %6607  ;;  %v14845_v44 = vld [vmem:[#allocation205_spill] sm:$0xff] }
 0x532   : > { %14832 = vst [vmem:[#allocation114_spill] sm:$0xff] %v9078_v20  ;;  %v2462_v20 = vsub.f32 %v14843_v48, %v14839_v21  ;;  %v2467_v56 = vsub.f32 %v14846_v59, %v14845_v44  ;;  %v2468_v61 = vsub.f32 %v14849_v29, %v14845_v44  ;;  %v2905_v21 = vmul.f32 1.442695, %v2522_v10  ;;  %v14857_v44 = vld [vmem:[#allocation79_spill] sm:$0xff] }
 0x533   : > { %14834 = vst [vmem:[#allocation115_spill] sm:$0xff] %v9081_v32  ;;  %2279 = vmax.xlane.f32.xlu0 %v2278_v7  ;;  %v9107_v32 = vpop.eup %6609  ;;  %v2783_v60 = vmul.f32 1.442695, %v2461_v23  ;;  %v2463_v59 = vsub.f32 %v14852_v0, %v14851_v45  ;;  %6625 = vpow2.f32 %v2765_v2  ;;  %v14854_v7 = vld [vmem:[#allocation58_spill] sm:$0xff]  ;;  %v2473_v29 = vsub.f32 %v14857_v44, %v14856_v22  ;;  %v14859_v0 = vld [vmem:[#allocation80_spill] sm:$0xff]  ;;  %v14865_v44 = vld [vmem:[#allocation19_spill] sm:$0xff] }
 0x534   : > { %14835 = vst [vmem:[#allocation153_spill] sm:$0xff] %v9083_v25  ;;  %v9105_v25 = vpop.f32.mrf.mxu1  ;;  %v9111_v48 = vpop.eup %6611  ;;  %v2785_v36 = vmul.f32 1.442695, %v2462_v20  ;;  %v2795_v10 = vmul.f32 1.442695, %v2467_v56 }
 0x535   : > { %14838 = vst [vmem:[#allocation154_spill] sm:$0xff] %v9087_v28  ;;  %v2903_v28 = vmul.f32 1.442695, %v2521_v3  ;;  %v9115_v3 = vpop.eup %6613  ;;  %v2797_v49 = vmul.f32 1.442695, %v2468_v61  ;;  %v9129_v20 = vpop.f32.mrf.mxu2  ;;  %v3166_v61 = vadd.f32 %v9053_v46, %v9045_v39 }
 0x536   : > { %14841 = vst [vmem:[#allocation197_spill] sm:$0xff] %v9093_v4  ;;  %v2464_v4 = vsub.f32 %v14854_v7, %v14851_v45  ;;  %v14862_v45 = vld [vmem:[#allocation22_spill] sm:$0xff]  ;;  %v14863_v7 = vld [vmem:[#allocation24_spill] sm:$0xff]  ;;  %v2787_v56 = vmul.f32 1.442695, %v2463_v59  ;;  %v14870_v59 = vld [vmem:[#allocation21_spill] sm:$0xff]  ;;  %v9151_v46 = vpop.f32.mrf.mxu0 }
 0x537   : > { %14842 = vst [vmem:[#allocation53_spill] sm:$0xff] %v9095_v41  ;;  %6627 = vpow2.f32 %v2903_v28  ;;  %v2474_v41 = vsub.f32 %v14859_v0, %v14856_v22  ;;  %v14866_v28 = vld [vmem:[#allocation72_spill] sm:$0xff]  ;;  %v14868_v22 = vld [vmem:[#allocation73_spill] sm:$0xff]  ;;  %3167 = vadd.xlane.f32.xlu1 %v3166_v61 }
 0x538   : > { %14844 = vst [vmem:[#allocation54_spill] sm:$0xff] %v9101_v9  ;;  %6629 = vpow2.f32 %v2905_v21  ;;  %v9131_v2 = vpop.f32.mrf.mxu3  ;;  %v2469_v50 = vsub.f32 %v14866_v28, %v14865_v44  ;;  %v2789_v21 = vmul.f32 1.442695, %v2464_v4  ;;  %v2470_v0 = vsub.f32 %v14868_v22, %v14865_v44 }
 0x539   : > { %14847 = vst [vmem:[#allocation205_spill] sm:$0xff] %v9105_v25  ;;  %v9121_v25 = vpop.eup %6615  ;;  %6631 = vpow2.f32 %v2783_v60  ;;  %v2807_v60 = vmul.f32 1.442695, %v2473_v29  ;;  %v2809_v4 = vmul.f32 1.442695, %v2474_v41  ;;  %v14876_v29 = vld [vmem:[#allocation60_spill] sm:$0xff] }
 0x53a   : > { %14848 = vst [vmem:[#allocation67_spill] sm:$0xff] %v9107_v32  ;;  %v9125_v23 = vpop.eup %6617  ;;  %6633 = vpow2.f32 %v2785_v36  ;;  %v14874_v36 = vld [vmem:[#allocation89_spill] sm:$0xff]  ;;  %v2801_v61 = vmul.f32 1.442695, %v2470_v0 }
 0x53b   : > { %14850 = vst [vmem:[#allocation68_spill] sm:$0xff] %v9111_v48  ;;  %v3163_v48 = vadd.f32 %v14863_v7, %v14862_v45  ;;  %v9135_v53 = vpop.eup %6619  ;;  %v3256_v7 = vadd.f32 %v9121_v25, %v9115_v3  ;;  %6635 = vpow2.f32 %v2795_v10  ;;  %v2480_v44 = vsub.f32 %v14874_v36, %v14870_v59 }
 0x53c   : > { %14853 = vst [vmem:[#allocation13_spill] sm:$0xff] %v9115_v3  ;;  %6637 = vpow2.f32 %v2797_v49  ;;  %v2799_v10 = vmul.f32 1.442695, %v2469_v50  ;;  %v14880_v49 = vld [vmem:[#allocation99_spill] sm:$0xff]  ;;  %v14882_v50 = vld [vmem:[#allocation138_spill] sm:$0xff] }
 0x53d   : > { %14855 = vst [vmem:[#allocation57_spill] sm:$0xff] %v9121_v25  ;;  %3164 = vadd.xlane.f32.xlu0 %v3163_v48  ;;  %3257 = vadd.xlane.f32.xlu2 %v3256_v7  ;;  %6639 = vpow2.f32 %v2787_v56  ;;  %v14877_v25 = vld [vmem:[#allocation82_spill] sm:$0xff]  ;;  %v2487_v41 = vsub.f32 %v14880_v49, %v8819_v54  ;;  %v2517_v56 = vsub.f32 %v14882_v50, %v9119_v35  ;;  %v9177_v0 = vpop.f32.mrf.mxu2 }
 0x53e   : > { %14858 = vst [vmem:[#allocation58_spill] sm:$0xff] %v9125_v23  ;;  %v9141_v23 = vpop.eup %6621  ;;  %v2475_v3 = vsub.f32 %v14877_v25, %v14876_v29  ;;  %6641 = vpow2.f32 %v2789_v21  ;;  %v2821_v25 = vmul.f32 1.442695, %v2480_v44  ;;  %v14890_v44 = vld [vmem:[#allocation83_spill] sm:$0xff] }
 0x53f   : > { %14860 = vst [vmem:[#allocation14_spill] sm:$0xff] %v9129_v20  ;;  %v9147_v45 = vpop.eup %6623  ;;  %v14871_v20 = vld [vmem:[#allocation88_spill] sm:$0xff]  ;;  %6643 = vpow2.f32 %v2807_v60  ;;  %v3253_v49 = vadd.f32 %v9141_v23, %v9135_v53 }
 0x540   : > { %14861 = vst [vmem:[#allocation79_spill] sm:$0xff] %v9131_v2  ;;  %v2479_v28 = vsub.f32 %v14871_v20, %v14870_v59  ;;  %v9153_v39 = vpop.eup %6625  ;;  %v9161_v20 = vpop.f32.mrf.mxu1  ;;  %6645 = vpow2.f32 %v2809_v4  ;;  %v2811_v60 = vmul.f32 1.442695, %v2475_v3  ;;  %v14892_v3 = vld [vmem:[#allocation207_spill] sm:$0xff] }
 0x541   : > { %14864 = vst [vmem:[#allocation80_spill] sm:$0xff] %v9135_v53  ;;  %v9157_v22 = vpop.eup %6627  ;;  %v9179_v2 = vpop.f32.mrf.mxu3  ;;  %6647 = vpow2.f32 %v2799_v10  ;;  %v2895_v53 = vmul.f32 1.442695, %v2517_v56  ;;  %3254 = vadd.xlane.f32.xlu1 %v3253_v49 }
 0x542   : > { %14867 = vst [vmem:[#allocation19_spill] sm:$0xff] %v9141_v23  ;;  %v9163_v48 = vpop.eup %6629  ;;  %v2819_v7 = vmul.f32 1.442695, %v2479_v28  ;;  %v14888_v28 = vld [vmem:[#allocation100_spill] sm:$0xff]  ;;  %6649 = vpow2.f32 %v2801_v61  ;;  %v3250_v23 = vadd.f32 %v8893_v13, %v8887_v27  ;;  %v14895_v61 = vld [vmem:[#allocation98_spill] sm:$0xff]  ;;  %v14898_v13 = vld [vmem:[#allocation91_spill] sm:$0xff] }
 0x543   : > { %14869 = vst [vmem:[#allocation72_spill] sm:$0xff] %v9147_v45  ;;  %v9169_v59 = vpop.eup %6631  ;;  %v2488_v50 = vsub.f32 %v14888_v28, %v8819_v54  ;;  %v3352_v4 = vadd.f32 %v9163_v48, %v9157_v22  ;;  %v14893_v54 = vld [vmem:[#allocation97_spill] sm:$0xff] }
 0x544   : > { %14872 = vst [vmem:[#allocation73_spill] sm:$0xff] %v9151_v46  ;;  %v9167_v46 = vpop.xlane.xlu0 %2204  ;;  %v9173_v36 = vpop.eup %6633  ;;  %6651 = vpow2.f32 %v2819_v7  ;;  %v2485_v28 = vsub.f32 %v14893_v54, %v14892_v3 }
 0x545   : > { %14873 = vst [vmem:[#allocation21_spill] sm:$0xff] %v9153_v39  ;;  %3353 = vadd.xlane.f32.xlu0 %v3352_v4  ;;  %6653 = vpow2.f32 %v2821_v25  ;;  %3251 = vadd.xlane.f32.xlu2 %v3250_v23  ;;  %v2837_v27 = vmul.f32 1.442695, %v2488_v50  ;;  %v14901_v4 = vld [vmem:[#allocation92_spill] sm:$0xff]  ;;  %v9215_v54 = vpop.xlane.xlu1 %2207 }
 0x546   : > { %14875 = vst [vmem:[#allocation88_spill] sm:$0xff] %v9157_v22  ;;  %v2486_v22 = vsub.f32 %v14895_v61, %v14892_v3  ;;  %6655 = vpow2.f32 %v2811_v60  ;;  %v2831_v60 = vmul.f32 1.442695, %v2485_v28  ;;  %v14903_v3 = vld [vmem:[#allocation216_spill] sm:$0xff]  ;;  %v14904_v61 = vld [vmem:[#allocation107_spill] sm:$0xff]  ;;  %v3349_v28 = vadd.f32 %v9023_v33, %v9019_v15 }
 0x547   : > { %14878 = vst [vmem:[#allocation89_spill] sm:$0xff] %v9161_v20  ;;  %v14884_v20 = vld [vmem:[#allocation139_spill] sm:$0xff]  ;;  %v3247_v33 = vadd.f32 %v9153_v39, %v9147_v45 }
 0x548   : > { %14879 = vst [vmem:[#allocation60_spill] sm:$0xff] %v9163_v48  ;;  %v2518_v21 = vsub.f32 %v14884_v20, %v9119_v35  ;;  %v2476_v20 = vsub.f32 %v14890_v44, %v14876_v29  ;;  %v14897_v44 = vld [vmem:[#allocation215_spill] sm:$0xff]  ;;  %v9223_v50 = vpop.f32.mrf.mxu1 }
 0x549   : > { %14881 = vst [vmem:[#allocation82_spill] sm:$0xff] %v9169_v59  ;;  %v9183_v59 = vpop.eup %6635  ;;  %v2481_v7 = vsub.f32 %v14898_v13, %v14897_v44  ;;  %v2482_v25 = vsub.f32 %v14901_v4, %v14897_v44  ;;  %v2491_v13 = vsub.f32 %v14904_v61, %v14903_v3  ;;  %v9231_v4 = vpop.f32.mrf.mxu3 }
 0x54a   : > { %14883 = vst [vmem:[#allocation99_spill] sm:$0xff] %v9173_v36  ;;  %v9187_v36 = vpop.xlane.xlu2 %2210  ;;  %v9191_v35 = vpop.eup %6637  ;;  %v2897_v29 = vmul.f32 1.442695, %v2518_v21  ;;  %v2813_v49 = vmul.f32 1.442695, %v2476_v20 }
 0x54b   : > { %14885 = vst [vmem:[#allocation138_spill] sm:$0xff] %v9177_v0  ;;  %v2835_v0 = vmul.f32 1.442695, %v2487_v41  ;;  %v9197_v10 = vpop.eup %6639  ;;  %v2833_v20 = vmul.f32 1.442695, %v2486_v22  ;;  %v3304_v22 = vadd.f32 %v8965_v40, %v8961_v1 }
 0x54c   : > { %14886 = vst [vmem:[#allocation139_spill] sm:$0xff] %v9179_v2  ;;  %v9201_v48 = vpop.eup %6641  ;;  %v9217_v21 = vpop.xlane.xlu0 %2213  ;;  %v2823_v61 = vmul.f32 1.442695, %v2481_v7 }
 0x54d   : > { %14887 = vst [vmem:[#allocation246_spill] sm:$0xff] %v9183_v59  ;;  %v9205_v41 = vpop.eup %6643  ;;  %6657 = vpow2.f32 %v2835_v0  ;;  %v9229_v0 = vpop.f32.mrf.mxu2  ;;  %3350 = vadd.xlane.f32.xlu0 %v3349_v28  ;;  %3305 = vadd.xlane.f32.xlu1 %v3304_v22  ;;  %v14921_v22 = vld [vmem:[#allocation125_spill] sm:$0xff] }
 0x54e   : > { %14889 = vst [vmem:[#allocation100_spill] sm:$0xff] %v9191_v35  ;;  %v9211_v56 = vpop.eup %6645  ;;  %6659 = vpow2.f32 %v2895_v53  ;;  %v14911_v53 = vld [vmem:[#allocation116_spill] sm:$0xff]  ;;  %3248 = vadd.xlane.f32.xlu2 %v3247_v33 }
 0x54f   : > { %14891 = vst [vmem:[#allocation83_spill] sm:$0xff] %v9197_v10  ;;  %v9209_v10 = vpop.f32.mrf.mxu0  ;;  %v9219_v23 = vpop.eup %6647  ;;  %6661 = vpow2.f32 %v2897_v29  ;;  %v2825_v29 = vmul.f32 1.442695, %v2482_v25  ;;  %v14917_v25 = vld [vmem:[#allocation110_spill] sm:$0xff] }
 0x550   : > { %14894 = vst [vmem:[#allocation207_spill] sm:$0xff] %v9201_v48  ;;  %v14907_v48 = vld [vmem:[#allocation108_spill] sm:$0xff]  ;;  %6663 = vpow2.f32 %v2837_v27  ;;  %v2843_v27 = vmul.f32 1.442695, %v2491_v13  ;;  %v2494_v1 = vsub.f32 %v14917_v25, %v8879_v57 }
 0x551   : > { %14896 = vst [vmem:[#allocation97_spill] sm:$0xff] %v9205_v41  ;;  %v2492_v44 = vsub.f32 %v14907_v48, %v14903_v3  ;;  %6665 = vpow2.f32 %v2813_v49  ;;  %v14913_v3 = vld [vmem:[#allocation117_spill] sm:$0xff]  ;;  %v14937_v41 = vld [vmem:[#allocation39_spill] sm:$0xff] }
 0x552   : > { %14899 = vst [vmem:[#allocation98_spill] sm:$0xff] %v9209_v10  ;;  %v9225_v10 = vpop.eup %6649  ;;  %6667 = vpow2.f32 %v2831_v60  ;;  %v14919_v60 = vld [vmem:[#allocation124_spill] sm:$0xff] }
 0x553   : > { %14900 = vst [vmem:[#allocation215_spill] sm:$0xff] %v9211_v56  ;;  %v2498_v56 = vsub.f32 %v14913_v3, %v8821_v63  ;;  %6669 = vpow2.f32 %v2833_v20  ;;  %v2845_v49 = vmul.f32 1.442695, %v2492_v44  ;;  %v2503_v13 = vsub.f32 %v14919_v60, %v8881_v12  ;;  %v9265_v20 = vpop.xlane.xlu1 %2216 }
 0x554   : > { %14902 = vst [vmem:[#allocation91_spill] sm:$0xff] %v9219_v23  ;;  %v9235_v23 = vpop.eup %6651  ;;  %6671 = vpow2.f32 %v2823_v61  ;;  %v9267_v44 = vpop.xlane.xlu0 %2222 }
 0x555   : > { %14905 = vst [vmem:[#allocation92_spill] sm:$0xff] %v9223_v50  ;;  %v2497_v50 = vsub.f32 %v14911_v53, %v8821_v63  ;;  %v9243_v48 = vpop.eup %6653  ;;  %v14915_v53 = vld [vmem:[#allocation109_spill] sm:$0xff]  ;;  %6673 = vpow2.f32 %v2825_v29  ;;  %v2857_v28 = vmul.f32 1.442695, %v2498_v56  ;;  %v14926_v29 = vld [vmem:[#allocation152_spill] sm:$0xff]  ;;  %v14927_v56 = vld [vmem:[#allocation38_spill] sm:$0xff] }
 0x556   : > { %14906 = vst [vmem:[#allocation216_spill] sm:$0xff] %v9225_v10  ;;  %v9239_v10 = vpop.xlane.xlu2 %2219  ;;  %v9249_v7 = vpop.eup %6655  ;;  %v2493_v15 = vsub.f32 %v14915_v53, %v8879_v57  ;;  %v2504_v53 = vsub.f32 %v14921_v22, %v8881_v12  ;;  %6675 = vpow2.f32 %v2843_v27  ;;  %v9279_v45 = vadd.f32 %v14927_v56, %v14926_v29  ;;  %v14929_v22 = vld [vmem:[#allocation137_spill] sm:$0xff] }
 0x557   : > { %14908 = vst [vmem:[#allocation107_spill] sm:$0xff] %v9229_v0  ;;  %v9253_v40 = vpop.eup %6657  ;;  %v2855_v3 = vmul.f32 1.442695, %v2497_v50  ;;  %v14923_v50 = vld [vmem:[#allocation136_spill] sm:$0xff]  ;;  %v9273_v25 = vpop.f32.mrf.mxu0  ;;  %6677 = vpow2.f32 %v2845_v49  ;;  %v2849_v12 = vmul.f32 1.442695, %v2494_v1 }
 0x558   : > { %14909 = vst [vmem:[#allocation108_spill] sm:$0xff] %v9231_v4  ;;  %v9257_v63 = vpop.eup %6659  ;;  %v2847_v33 = vmul.f32 1.442695, %v2493_v15  ;;  %v2515_v61 = vsub.f32 %v14923_v50, %v9007_v62  ;;  %v9285_v27 = vpop.f32.mrf.mxu3  ;;  %v2867_v50 = vmul.f32 1.442695, %v2503_v13 }
 0x559   : > { %14910 = vst [vmem:[#allocation247_spill] sm:$0xff] %v9235_v23  ;;  %v9261_v39 = vpop.eup %6661  ;;  %6679 = vpow2.f32 %v2855_v3  ;;  %v9295_v1 = vpop.f32.mrf.mxu1 }
 0x55a   : > { %14912 = vst [vmem:[#allocation116_spill] sm:$0xff] %v9243_v48  ;;  %v9269_v57 = vpop.eup %6663  ;;  %v9283_v48 = vpop.f32.mrf.mxu2  ;;  %v3346_v49 = vadd.f32 %v9261_v39, %v9257_v63  ;;  %6681 = vpow2.f32 %v2857_v28 }
 0x55b   : > { %14914 = vst [vmem:[#allocation117_spill] sm:$0xff] %v9249_v7  ;;  %v9275_v60 = vpop.eup %6665  ;;  %v2516_v7 = vsub.f32 %v14929_v22, %v9007_v62  ;;  %v2869_v62 = vmul.f32 1.442695, %v2504_v53  ;;  %v14935_v22 = vld [vmem:[#allocation120_spill] sm:$0xff]  ;;  %v3301_v3 = vadd.f32 %v9269_v57, %v9253_v40  ;;  %6683 = vpow2.f32 %v2847_v33  ;;  %v14941_v53 = vld [vmem:[#allocation130_spill] sm:$0xff] }
 0x55c   : > { %14916 = vst [vmem:[#allocation109_spill] sm:$0xff] %v9253_v40  ;;  %v9287_v15 = vpop.eup %6667  ;;  %3347 = vadd.xlane.f32.xlu1 %v3346_v49  ;;  %6685 = vpow2.f32 %v2849_v12  ;;  %v9317_v40 = vadd.f32 %v8815_v5, %v8811_v24  ;;  %v9325_v33 = vadd.f32 %v8841_v47, %v8833_v26  ;;  %v14950_v49 = vld [vmem:[#allocation126_spill] sm:$0xff]  ;;  %v14952_v5 = vld [vmem:[#allocation127_spill] sm:$0xff] }
 0x55d   : > { %14918 = vst [vmem:[#allocation110_spill] sm:$0xff] %v9257_v63  ;;  %v9297_v56 = vpop.eup %6669  ;;  %3302 = vadd.xlane.f32.xlu2 %v3301_v3  ;;  %6687 = vpow2.f32 %v2867_v50  ;;  %v2505_v3 = vsub.f32 %v14950_v49, %v9005_v11  ;;  %v9337_v50 = vpop.xlane.xlu0 %2231  ;;  %v2506_v24 = vsub.f32 %v14952_v5, %v9005_v11 }
 0x55e   : > { %14920 = vst [vmem:[#allocation124_spill] sm:$0xff] %v9261_v39  ;;  %v9289_v23 = vpop.xlane.xlu2 %2228  ;;  %v9303_v13 = vpop.eup %6671  ;;  %v14939_v39 = vld [vmem:[#allocation121_spill] sm:$0xff]  ;;  %6689 = vpow2.f32 %v2869_v62 }
 0x55f   : > { %14922 = vst [vmem:[#allocation125_spill] sm:$0xff] %v9269_v57  ;;  %v2500_v63 = vsub.f32 %v14939_v39, %v8936_v34  ;;  %v9311_v28 = vpop.eup %6673  ;;  %v2893_v57 = vmul.f32 1.442695, %v2516_v7 }
 0x560   : > { %14924 = vst [vmem:[#allocation136_spill] sm:$0xff] %v9273_v25 }
 0x561   : > { %14925 = vst [vmem:[#allocation248_spill] sm:$0xff] %v9275_v60  ;;  %v3244_v60 = vadd.f32 %v9107_v32, %v9101_v9  ;;  %v9307_v32 = vadd.f32 %v14937_v41, %v14926_v29  ;;  %v2891_v9 = vmul.f32 1.442695, %v2515_v61  ;;  %v9319_v41 = vpop.eup %6675  ;;  %v14946_v61 = vld [vmem:[#allocation48_spill] sm:$0xff] }
 0x562   : > { %14928 = vst [vmem:[#allocation152_spill] sm:$0xff] %v9279_v45  ;;  %v2499_v45 = vsub.f32 %v14935_v22, %v8936_v34  ;;  %v2509_v22 = vsub.f32 %v14941_v53, %v8938_v18  ;;  %v14944_v34 = vld [vmem:[#allocation131_spill] sm:$0xff]  ;;  %v9331_v7 = vpop.eup %6677  ;;  %v9335_v53 = vpop.xlane.xlu1 %2225 }
 0x563   : > { %14930 = vst [vmem:[#allocation38_spill] sm:$0xff] %v9283_v48  ;;  %3245 = vadd.xlane.f32.xlu0 %v3244_v60  ;;  %v2510_v39 = vsub.f32 %v14944_v34, %v8938_v18  ;;  %v14947_v60 = vld [vmem:[#allocation49_spill] sm:$0xff]  ;;  %v9341_v18 = vadd.f32 %v8859_v8, %v8851_v6  ;;  %v9343_v34 = vpop.eup %6679  ;;  %6691 = vpow2.f32 %v2891_v9  ;;  %v9355_v26 = vpop.f32.mrf.mxu2 }
 0x564   : > { %14931 = vst [vmem:[#allocation137_spill] sm:$0xff] %v9285_v27  ;;  %v9329_v29 = vadd.f32 %v14947_v60, %v14946_v61  ;;  %v2859_v12 = vmul.f32 1.442695, %v2499_v45  ;;  %v14953_v45 = vld [vmem:[#allocation224_spill] sm:$0xff]  ;;  %v9351_v49 = vpop.eup %6681  ;;  %v2879_v60 = vmul.f32 1.442695, %v2509_v22  ;;  %6693 = vpow2.f32 %v2893_v57  ;;  %v9357_v8 = vpop.f32.mrf.mxu3 }
 0x565   : > { %14932 = vst [vmem:[#allocation249_spill] sm:$0xff] %v9287_v15  ;;  %v9349_v62 = vadd.f32 %v14953_v45, %v8863_v14  ;;  %v14955_v61 = vld [vmem:[#allocation132_spill] sm:$0xff]  ;;  %v9361_v5 = vpop.eup %6683  ;;  %v2881_v11 = vmul.f32 1.442695, %v2510_v39  ;;  %v14959_v9 = vld [vmem:[#allocation133_spill] sm:$0xff]  ;;  %v2290_v22 = vmax.f32 %v9283_v48, %v9285_v27  ;;  %v14963_v39 = vld [vmem:[#allocation103_spill] sm:$0xff]  ;;  %v9381_v48 = vpop.f32.mrf.mxu0 }
 0x566   : > { %14933 = vst [vmem:[#allocation250_spill] sm:$0xff] %v9295_v1  ;;  %v2511_v47 = vsub.f32 %v14955_v61, %v9065_v52  ;;  %v2512_v6 = vsub.f32 %v14959_v9, %v9065_v52  ;;  %v9367_v57 = vpop.xlane.xlu2 %2237  ;;  %v2293_v61 = vmax.f32 %v9355_v26, %v9357_v8  ;;  %v9371_v45 = vpop.eup %6685  ;;  %6695 = vpow2.f32 %v2859_v12  ;;  %v14965_v9 = vld [vmem:[#allocation147_spill] sm:$0xff] }
 0x567   : > { %14934 = vst [vmem:[#allocation251_spill] sm:$0xff] %v9297_v56  ;;  %v2871_v14 = vmul.f32 1.442695, %v2505_v3  ;;  %v2873_v52 = vmul.f32 1.442695, %v2506_v24  ;;  %v2524_v27 = vsub.f32 %v14965_v9, %v9167_v46  ;;  %v9387_v12 = vadd.f32 %v8909_v37, %v8903_v17  ;;  %v14973_v9 = vld [vmem:[#allocation8_spill] sm:$0xff] }
 0x568   : > { %14936 = vst [vmem:[#allocation120_spill] sm:$0xff] %v9303_v13  ;;  %v2883_v3 = vmul.f32 1.442695, %v2511_v47  ;;  %2294 = vmax.xlane.f32.xlu2 %v2293_v61  ;;  %v2526_v37 = vsub.f32 %v14973_v9, %v9215_v54  ;;  %v14974_v17 = vld [vmem:[#allocation129_spill] sm:$0xff]  ;;  %v14977_v61 = vld [vmem:[#allocation10_spill] sm:$0xff] }
 0x569   : > { %14938 = vst [vmem:[#allocation39_spill] sm:$0xff] %v9307_v32  ;;  %v2861_v32 = vmul.f32 1.442695, %v2500_v63  ;;  %v3298_v63 = vadd.f32 %v9297_v56, %v9287_v15  ;;  %v14961_v56 = vld [vmem:[#allocation146_spill] sm:$0xff] }
 0x56a   : > { %14940 = vst [vmem:[#allocation121_spill] sm:$0xff] %v9311_v28  ;;  %v2523_v15 = vsub.f32 %v14961_v56, %v9167_v46  ;;  %v9395_v46 = vadd.f32 %v8919_v58, %v8913_v31  ;;  %v9409_v58 = vpop.xlane.xlu1 %2234  ;;  %v9411_v31 = vpop.xlane.xlu0 %2240 }
 0x56b   : > { %14942 = vst [vmem:[#allocation130_spill] sm:$0xff] %v9317_v40  ;;  %v14962_v40 = vld [vmem:[#allocation94_spill] sm:$0xff]  ;;  %6697 = vpow2.f32 %v2861_v32  ;;  %2291 = vmax.xlane.f32.xlu0 %v2290_v22  ;;  %3299 = vadd.xlane.f32.xlu1 %v3298_v63  ;;  %v14970_v32 = vld [vmem:[#allocation5_spill] sm:$0xff]  ;;  %v2885_v22 = vmul.f32 1.442695, %v2512_v6  ;;  %v9415_v6 = vadd.f32 %v8975_v38, %v8969_v16 }
 0x56c   : > { %14943 = vst [vmem:[#allocation252_spill] sm:$0xff] %v9319_v41  ;;  %6699 = vpow2.f32 %v2879_v60  ;;  %v2525_v24 = vsub.f32 %v14970_v32, %v9215_v54  ;;  %v2907_v60 = vmul.f32 1.442695, %v2523_v15  ;;  %v2527_v32 = vsub.f32 %v14977_v61, %v9187_v36  ;;  %v9429_v38 = vpop.f32.mrf.mxu3 }
 0x56d   : > { %14945 = vst [vmem:[#allocation131_spill] sm:$0xff] %v9325_v33  ;;  %6701 = vpow2.f32 %v2881_v11  ;;  %v2909_v54 = vmul.f32 1.442695, %v2524_v27  ;;  %v14979_v11 = vld [vmem:[#allocation167_spill] sm:$0xff]  ;;  %v9433_v27 = vadd.f32 %v8985_v30, %v8979_v55  ;;  %v9449_v55 = vadd.f32 %v9001_v42, %v8995_v51  ;;  %v14994_v51 = vld [vmem:[#allocation230_spill] sm:$0xff] }
 0x56e   : > { %14948 = vst [vmem:[#allocation253_spill] sm:$0xff] %v9329_v29  ;;  %6703 = vpow2.f32 %v2871_v14  ;;  %v2528_v9 = vsub.f32 %v14979_v11, %v9187_v36  ;;  %v9421_v14 = vadd.f32 %v8940_v43, %v8933_v19  ;;  %v2911_v61 = vmul.f32 1.442695, %v2525_v24  ;;  %v9437_v11 = vpop.xlane.xlu2 %2246  ;;  %v14987_v43 = vld [vmem:[#allocation169_spill] sm:$0xff]  ;;  %v14989_v19 = vld [vmem:[#allocation15_spill] sm:$0xff] }
 0x56f   : > { %14949 = vst [vmem:[#allocation254_spill] sm:$0xff] %v9331_v7  ;;  %v9377_v7 = vpop.eup %6687  ;;  %6705 = vpow2.f32 %v2873_v52  ;;  %v2913_v52 = vmul.f32 1.442695, %v2526_v37  ;;  %v2915_v16 = vmul.f32 1.442695, %v2527_v32  ;;  %v2530_v30 = vsub.f32 %v14987_v43, %v9217_v21  ;;  %v15012_v29 = vld [vmem:[#allocation23_spill] sm:$0xff] }
 0x570   : > { %14951 = vst [vmem:[#allocation126_spill] sm:$0xff] %v9343_v34  ;;  %v9389_v56 = vpop.eup %6689  ;;  %6707 = vpow2.f32 %v2883_v3  ;;  %v15088_v34 = vld [vmem:[#allocation138_spill] sm:$0xff] }
 0x571   : > { %14954 = vst [vmem:[#allocation127_spill] sm:$0xff] %v9351_v49  ;;  %v9397_v63 = vpop.eup %6691  ;;  %6709 = vpow2.f32 %v2885_v22  ;;  %v2917_v22 = vmul.f32 1.442695, %v2528_v9 }
 0x572   : > { %14956 = vst [vmem:[#allocation132_spill] sm:$0xff] %v9355_v26  ;;  %v9405_v47 = vpop.eup %6693  ;;  %6711 = vpow2.f32 %v2907_v60  ;;  %v9489_v26 = vpop.xlane.xlu1 %2243 }
 0x573   : > { %14957 = vst [vmem:[#allocation255_spill] sm:$0xff] %v9357_v8  ;;  %v9383_v8 = vpop.f32.mrf.mxu1  ;;  %v9423_v15 = vpop.eup %6695  ;;  %6713 = vpow2.f32 %v2909_v54  ;;  %v14995_v54 = vld [vmem:[#allocation231_spill] sm:$0xff] }
 0x574   : > { %14958 = vst [vmem:[#allocation256_spill] sm:$0xff] %v9361_v5  ;;  %v3241_v5 = vadd.f32 %v14963_v39, %v14962_v40  ;;  %v9427_v40 = vpop.f32.mrf.mxu2  ;;  %v9435_v36 = vpop.eup %6697  ;;  %6715 = vpow2.f32 %v2911_v61  ;;  %v9465_v9 = vadd.f32 %v14995_v54, %v14994_v51  ;;  %v15008_v51 = vld [vmem:[#allocation176_spill] sm:$0xff] }
 0x575   : > { %14960 = vst [vmem:[#allocation133_spill] sm:$0xff] %v9371_v45  ;;  %v2296_v3 = vmax.f32 %v9427_v40, %v9429_v38  ;;  %v9443_v24 = vpop.eup %6699  ;;  %6717 = vpow2.f32 %v2913_v52  ;;  %v9491_v52 = vpop.xlane.xlu0 %2249  ;;  %v15018_v45 = vld [vmem:[#allocation182_spill] sm:$0xff] }
 0x576   : > { %14964 = vst [vmem:[#allocation146_spill] sm:$0xff] %v9377_v7  ;;  %v9451_v37 = vpop.eup %6701  ;;  %3242 = vadd.xlane.f32.xlu2 %v3241_v5  ;;  %6719 = vpow2.f32 %v2915_v16  ;;  %v15024_v16 = vld [vmem:[#allocation184_spill] sm:$0xff] }
 0x577   : > { %14966 = vst [vmem:[#allocation147_spill] sm:$0xff] %v9381_v48  ;;  %2297 = vmax.xlane.f32.xlu1 %v2296_v3  ;;  %v9459_v32 = vpop.eup %6703  ;;  %v14998_v3 = vld [vmem:[#allocation29_spill] sm:$0xff]  ;;  %6721 = vpow2.f32 %v2917_v22  ;;  %v2537_v22 = vsub.f32 %v15018_v45, %v9335_v53 }
 0x578   : > { %14967 = vst [vmem:[#allocation257_spill] sm:$0xff] %v9383_v8 }
 0x579   : > { %14968 = vst [vmem:[#allocation258_spill] sm:$0xff] %v9387_v12  ;;  %v14975_v12 = vld [vmem:[#allocation228_spill] sm:$0xff] }
 0x57a   : > { %14969 = vst [vmem:[#allocation259_spill] sm:$0xff] %v9389_v56  ;;  %v9403_v39 = vadd.f32 %v14975_v12, %v14974_v17  ;;  %v14981_v12 = vld [vmem:[#allocation168_spill] sm:$0xff] }
 0x57b   : > { %14971 = vst [vmem:[#allocation5_spill] sm:$0xff] %v9395_v46  ;;  %v2529_v17 = vsub.f32 %v14981_v12, %v9217_v21  ;;  %v3343_v12 = vadd.f32 %v9405_v47, %v9397_v63  ;;  %v14993_v21 = vld [vmem:[#allocation172_spill] sm:$0xff]  ;;  %v9467_v46 = vpop.eup %6705 }
 0x57c   : > { %14972 = vst [vmem:[#allocation260_spill] sm:$0xff] %v9397_v63  ;;  %v14991_v63 = vld [vmem:[#allocation242_spill] sm:$0xff]  ;;  %v2532_v42 = vsub.f32 %v14993_v21, %v9265_v20  ;;  %v9481_v5 = vpop.eup %6707 }
 0x57d   : > { %14976 = vst [vmem:[#allocation8_spill] sm:$0xff] %v9405_v47  ;;  %3344 = vadd.xlane.f32.xlu0 %v3343_v12  ;;  %v14990_v47 = vld [vmem:[#allocation241_spill] sm:$0xff]  ;;  %v2919_v43 = vmul.f32 1.442695, %v2529_v17  ;;  %v15002_v17 = vld [vmem:[#allocation20_spill] sm:$0xff]  ;;  %v15006_v21 = vld [vmem:[#allocation30_spill] sm:$0xff] }
 0x57e   : > { %14978 = vst [vmem:[#allocation10_spill] sm:$0xff] %v9415_v6  ;;  %v2531_v6 = vsub.f32 %v14989_v19, %v9265_v20  ;;  %v9457_v60 = vadd.f32 %v14991_v63, %v14990_v47  ;;  %v14997_v19 = vld [vmem:[#allocation171_spill] sm:$0xff]  ;;  %v2533_v61 = vsub.f32 %v15002_v17, %v9239_v10  ;;  %v9479_v20 = vpop.f32.mrf.mxu1  ;;  %v9493_v17 = vpop.eup %6709 }
 0x57f   : > { %14980 = vst [vmem:[#allocation167_spill] sm:$0xff] %v9423_v15  ;;  %v9471_v12 = vadd.f32 %v14998_v3, %v14997_v19  ;;  %v9485_v54 = vadd.f32 %v15006_v21, %v14997_v19  ;;  %v2921_v3 = vmul.f32 1.442695, %v2530_v30  ;;  %v2535_v19 = vsub.f32 %v15012_v29, %v9267_v44  ;;  %v9499_v21 = vpop.eup %6711  ;;  %v9511_v29 = vpop.xlane.xlu2 %2255 }
 0x580   : > { %14982 = vst [vmem:[#allocation168_spill] sm:$0xff] %v9427_v40  ;;  %v2534_v40 = vsub.f32 %v15008_v51, %v9239_v10  ;;  %v2923_v41 = vmul.f32 1.442695, %v2531_v6  ;;  %6723 = vpow2.f32 %v2919_v43  ;;  %v2925_v51 = vmul.f32 1.442695, %v2532_v42  ;;  %v15016_v10 = vld [vmem:[#allocation180_spill] sm:$0xff] }
 0x581   : > { %14983 = vst [vmem:[#allocation261_spill] sm:$0xff] %v9429_v38  ;;  %v9477_v38 = vpop.f32.mrf.mxu0  ;;  %v2927_v49 = vmul.f32 1.442695, %v2533_v61  ;;  %v2389_v6 = vmax.f32 %v9381_v48, %v9383_v8  ;;  %6725 = vpow2.f32 %v2921_v3  ;;  %v2287_v61 = vmax.f32 %v9229_v0, %v9231_v4  ;;  %v15028_v8 = vld [vmem:[#allocation185_spill] sm:$0xff]  ;;  %v15060_v4 = vld [vmem:[#allocation26_spill] sm:$0xff] }
 0x582   : > { %14984 = vst [vmem:[#allocation262_spill] sm:$0xff] %v9433_v27  ;;  %v2929_v42 = vmul.f32 1.442695, %v2534_v40  ;;  %6727 = vpow2.f32 %v2923_v41  ;;  %v2931_v47 = vmul.f32 1.442695, %v2535_v19  ;;  %v2539_v30 = vsub.f32 %v15024_v16, %v9289_v23  ;;  %v15030_v41 = vld [vmem:[#allocation178_spill] sm:$0xff] }
 0x583   : > { %14985 = vst [vmem:[#allocation263_spill] sm:$0xff] %v9435_v36  ;;  %6729 = vpow2.f32 %v2925_v51  ;;  %2288 = vmax.xlane.f32.xlu2 %v2287_v61  ;;  %v15031_v19 = vld [vmem:[#allocation34_spill] sm:$0xff]  ;;  %v2935_v16 = vmul.f32 1.442695, %v2537_v22  ;;  %v15035_v51 = vld [vmem:[#allocation35_spill] sm:$0xff]  ;;  %v15070_v22 = vld [vmem:[#allocation193_spill] sm:$0xff] }
 0x584   : > { %14986 = vst [vmem:[#allocation264_spill] sm:$0xff] %v9443_v24  ;;  %v9537_v63 = vadd.f32 %v15031_v19, %v15030_v41  ;;  %6731 = vpow2.f32 %v2927_v49  ;;  %v9551_v19 = vpop.xlane.xlu0 %2258  ;;  %v15128_v27 = vld [vmem:[#allocation95_spill] sm:$0xff] }
 0x585   : > { %14988 = vst [vmem:[#allocation169_spill] sm:$0xff] %v9451_v37  ;;  %2390 = vmax.xlane.f32.xlu0 %v2389_v6  ;;  %6733 = vpow2.f32 %v2929_v42 }
 0x586   : > { %14992 = vst [vmem:[#allocation15_spill] sm:$0xff] %v9459_v32  ;;  %6735 = vpow2.f32 %v2931_v47 }
 0x587   : > { %14996 = vst [vmem:[#allocation172_spill] sm:$0xff] %v9467_v46 }
 0x588   : > { %14999 = vst [vmem:[#allocation171_spill] sm:$0xff] %v9471_v12  ;;  %v9505_v12 = vpop.eup %6713 }
 0x589   : > { %15003 = vst [vmem:[#allocation29_spill] sm:$0xff] %v9477_v38  ;;  %v9515_v33 = vpop.eup %6715 }
 0x58a   : > { %15004 = vst [vmem:[#allocation20_spill] sm:$0xff] %v9479_v20 }
 0x58b   : > { %15005 = vst [vmem:[#allocation265_spill] sm:$0xff] %v9481_v5  ;;  %3341 = vadd.xlane.f32.xlu2 %v9457_v60 }
 0x58c   : > { %15007 = vst [vmem:[#allocation30_spill] sm:$0xff] %v9485_v54  ;;  %v2536_v54 = vsub.f32 %v15016_v10, %v9267_v44  ;;  %v15020_v44 = vld [vmem:[#allocation183_spill] sm:$0xff]  ;;  %v9521_v10 = vpop.eup %6717 }
 0x58d   : > { %15009 = vst [vmem:[#allocation176_spill] sm:$0xff] %v9493_v17  ;;  %v2538_v43 = vsub.f32 %v15020_v44, %v9335_v53  ;;  %v9527_v3 = vpop.eup %6719  ;;  %v15048_v53 = vld [vmem:[#allocation198_spill] sm:$0xff] }
 0x58e   : > { %15013 = vst [vmem:[#allocation23_spill] sm:$0xff] %v9499_v21  ;;  %v2392_v21 = vmax.f32 %v9477_v38, %v9479_v20  ;;  %v2933_v44 = vmul.f32 1.442695, %v2536_v54  ;;  %v9533_v48 = vpop.eup %6721  ;;  %v9545_v54 = vadd.f32 %v15035_v51, %v15030_v41  ;;  %v15044_v51 = vld [vmem:[#allocation187_spill] sm:$0xff] }
 0x58f   : > { %15017 = vst [vmem:[#allocation180_spill] sm:$0xff] %v9505_v12  ;;  %v2937_v61 = vmul.f32 1.442695, %v2538_v43  ;;  %v2542_v42 = vsub.f32 %v15044_v51, %v9337_v50  ;;  %v15045_v43 = vld [vmem:[#allocation68_spill] sm:$0xff]  ;;  %v15050_v12 = vld [vmem:[#allocation45_spill] sm:$0xff]  ;;  %v15064_v51 = vld [vmem:[#allocation186_spill] sm:$0xff] }
 0x590   : > { %15019 = vst [vmem:[#allocation182_spill] sm:$0xff] %v9515_v33  ;;  %2393 = vmax.xlane.f32.xlu1 %v2392_v21  ;;  %v15033_v21 = vld [vmem:[#allocation40_spill] sm:$0xff]  ;;  %6737 = vpow2.f32 %v2933_v44  ;;  %v2543_v47 = vsub.f32 %v15050_v12, %v9409_v58  ;;  %v15061_v12 = vld [vmem:[#allocation181_spill] sm:$0xff]  ;;  %v15081_v44 = vld [vmem:[#allocation194_spill] sm:$0xff] }
 0x591   : > { %15021 = vst [vmem:[#allocation183_spill] sm:$0xff] %v9521_v10  ;;  %v2540_v10 = vsub.f32 %v15028_v8, %v9289_v23  ;;  %v2541_v6 = vsub.f32 %v15033_v21, %v9337_v50  ;;  %v15046_v23 = vld [vmem:[#allocation58_spill] sm:$0xff]  ;;  %v15049_v8 = vld [vmem:[#allocation196_spill] sm:$0xff]  ;;  %6739 = vpow2.f32 %v2935_v16  ;;  %v15059_v16 = vld [vmem:[#allocation177_spill] sm:$0xff]  ;;  %v2945_v49 = vmul.f32 1.442695, %v2542_v42  ;;  %v9609_v42 = vpop.xlane.xlu0 %3209 }
 0x592   : > { %15025 = vst [vmem:[#allocation184_spill] sm:$0xff] %v9527_v3  ;;  %v9541_v3 = vpop.eup %6723  ;;  %6741 = vpow2.f32 %v2937_v61  ;;  %vm3762_vm3 = vweird.f32 %v9609_v42 }
 0x593   : > { %15029 = vst [vmem:[#allocation185_spill] sm:$0xff] %v9533_v48  ;;  %v9549_v48 = vpop.xlane.xlu1 %2252  ;;  %v9557_v40 = vpop.eup %6725  ;;  %v2941_v41 = vmul.f32 1.442695, %v2540_v10  ;;  %v15082_v10 = vld [vmem:[#allocation191_spill] sm:$0xff] }
 0x594   : > { %15032 = vst [vmem:[#allocation178_spill] sm:$0xff] %v9537_v63  ;;  %v9563_v33 = vpop.eup %6727  ;;  %v2344_v63 = vmax.f32 %v15049_v8, %v15048_v53  ;;  %v15058_v53 = vld [vmem:[#allocation179_spill] sm:$0xff] }
 0x595   : > { %15034 = vst [vmem:[#allocation34_spill] sm:$0xff] %v9541_v3  ;;  %v2939_v3 = vmul.f32 1.442695, %v2539_v30  ;;  %v2943_v30 = vmul.f32 1.442695, %v2541_v6  ;;  %v9569_v20 = vpop.eup %6729 }
 0x596   : > { %15036 = vst [vmem:[#allocation40_spill] sm:$0xff] %v9545_v54  ;;  %v3238_v54 = vadd.f32 %v15046_v23, %v15045_v43  ;;  %v15056_v23 = vld [vmem:[#allocation190_spill] sm:$0xff]  ;;  %v9577_v43 = vpop.eup %6731  ;;  %2345 = vmax.xlane.f32.xlu0 %v2344_v63  ;;  %v2947_v6 = vmul.f32 1.442695, %v2543_v47  ;;  %v15074_v47 = vld [vmem:[#allocation149_spill] sm:$0xff] }
 0x597   : > { %15043 = vst [vmem:[#allocation35_spill] sm:$0xff] %v9557_v40  ;;  %6743 = vpow2.f32 %v2939_v3  ;;  %v9585_v40 = vpop.xlane.xlu2 %3197  ;;  %v9587_v61 = vpop.eup %6733 }
 0x598   : > { %15047 = vst [vmem:[#allocation187_spill] sm:$0xff] %v9563_v33  ;;  %v2544_v33 = vsub.f32 %v15056_v23, %v9409_v58  ;;  %3239 = vadd.xlane.f32.xlu1 %v3238_v54  ;;  %v15065_v58 = vld [vmem:[#allocation31_spill] sm:$0xff]  ;;  %6745 = vpow2.f32 %v2941_v41  ;;  %v9594_v3 = vpop.eup %6735  ;;  %v15069_v54 = vld [vmem:[#allocation102_spill] sm:$0xff]  ;;  %v15072_v23 = vld [vmem:[#allocation200_spill] sm:$0xff]  ;;  %vm3706_vm10 = vweird.f32 %v9585_v40 }
 0x599   : > { %15051 = vst [vmem:[#allocation45_spill] sm:$0xff] %v9569_v20  ;;  %v15062_v20 = vld [vmem:[#allocation50_spill] sm:$0xff]  ;;  %6747 = vpow2.f32 %v2943_v30  ;;  %v9602_v45 = vpop.eup %6737 }
 0x59a   : > { %15057 = vst [vmem:[#allocation190_spill] sm:$0xff] %v9577_v43  ;;  %v2545_v0 = vsub.f32 %v15062_v20, %v9367_v57  ;;  %v15066_v43 = vld [vmem:[#allocation195_spill] sm:$0xff]  ;;  %v2949_v41 = vmul.f32 1.442695, %v2544_v33  ;;  %6749 = vrcp.f32 %v9585_v40 }
 0x59b   : > { %15063 = vst [vmem:[#allocation50_spill] sm:$0xff] %v9587_v61  ;;  %v2546_v8 = vsub.f32 %v15066_v43, %v9367_v57  ;;  %v15068_v20 = vld [vmem:[#allocation199_spill] sm:$0xff]  ;;  %v9600_v61 = vadd.f32 %v15070_v22, %v15069_v54  ;;  %v2548_v57 = vsub.f32 %v15072_v23, %v9411_v31  ;;  %v9607_v60 = vpop.xlane.xlu1 %2261  ;;  %v15073_v43 = vld [vmem:[#allocation148_spill] sm:$0xff]  ;;  %6751 = vrcp.f32 %v9609_v42 }
 0x59c   : > { %15067 = vst [vmem:[#allocation186_spill] sm:$0xff] %v9594_v3  ;;  %v2547_v63 = vsub.f32 %v15068_v20, %v9411_v31  ;;  %v9613_v30 = vadd.f32 %v15074_v47, %v15073_v43  ;;  %v9615_v20 = vpop.eup %6739  ;;  %v15076_v3 = vld [vmem:[#allocation189_spill] sm:$0xff]  ;;  %v15077_v22 = vld [vmem:[#allocation188_spill] sm:$0xff]  ;;  %v15078_v33 = vld [vmem:[#allocation59_spill] sm:$0xff]  ;;  %6753 = vpow2.f32 %v2945_v49 }
 0x59d   : > { %15071 = vst [vmem:[#allocation31_spill] sm:$0xff] %v9602_v45  ;;  %v2951_v45 = vmul.f32 1.442695, %v2545_v0  ;;  %v15079_v31 = vld [vmem:[#allocation114_spill] sm:$0xff]  ;;  %v9624_v21 = vpop.eup %6741  ;;  %v2953_v36 = vmul.f32 1.442695, %v2546_v8  ;;  %6755 = vpow2.f32 %v2947_v6  ;;  %v2284_v8 = vmax.f32 %v15088_v34, %v9179_v2 }
 0x59e   : > { %15075 = vst [vmem:[#allocation195_spill] sm:$0xff] %v9615_v20  ;;  %v9622_v23 = vadd.f32 %v15079_v31, %v15078_v33  ;;  %v15083_v47 = vld [vmem:[#allocation154_spill] sm:$0xff]  ;;  %v15084_v43 = vld [vmem:[#allocation53_spill] sm:$0xff]  ;;  %v9632_v15 = vpop.eup %6743  ;;  %v2386_v31 = vmax.f32 %v9273_v25, %v9295_v1  ;;  %v2955_v33 = vmul.f32 1.442695, %v2547_v63  ;;  %6757 = vpow2.f32 %v2949_v41  ;;  %v15091_v6 = vld [vmem:[#allocation203_spill] sm:$0xff] }
 0x59f   : > { %15080 = vst [vmem:[#allocation199_spill] sm:$0xff] %v9624_v21  ;;  %v9630_v20 = vadd.f32 %v15084_v43, %v15083_v47  ;;  %v15086_v0 = vld [vmem:[#allocation202_spill] sm:$0xff]  ;;  %v9638_v21 = vpop.eup %6745  ;;  %v2957_v49 = vmul.f32 1.442695, %v2548_v57  ;;  %v9644_v43 = vadd.f32 %v9191_v35, %v9183_v59  ;;  %6759 = vpow2.f32 %v2951_v45  ;;  %v15092_v63 = vld [vmem:[#allocation97_spill] sm:$0xff]  ;;  %v15095_v41 = vld [vmem:[#allocation99_spill] sm:$0xff]  ;;  %2285 = vmax.xlane.f32.xlu2 %v2284_v8 }
 0x5a0   : > { %15085 = vst [vmem:[#allocation200_spill] sm:$0xff] %v9632_v15  ;;  %v2549_v54 = vsub.f32 %v15086_v0, %v9489_v26  ;;  %v9646_v15 = vpop.eup %6747  ;;  %v2550_v0 = vsub.f32 %v15091_v6, %v9489_v26  ;;  %2387 = vmax.xlane.f32.xlu0 %v2386_v31  ;;  %3296 = vadd.xlane.f32.xlu1 %v9465_v9  ;;  %v15094_v1 = vld [vmem:[#allocation82_spill] sm:$0xff]  ;;  %6761 = vpow2.f32 %v2953_v36  ;;  %v15098_v59 = vld [vmem:[#allocation247_spill] sm:$0xff]  ;;  %v15099_v26 = vld [vmem:[#allocation116_spill] sm:$0xff] }
 0x5a1   : > { %15087 = vst [vmem:[#allocation202_spill] sm:$0xff] %v9638_v21  ;;  %v15093_v21 = vld [vmem:[#allocation215_spill] sm:$0xff]  ;;  %v9657_v57 = vadd.f32 %v15095_v41, %v15094_v1  ;;  %v9659_v25 = vpop.eup %6749  ;;  %v15097_v35 = vld [vmem:[#allocation6_spill] sm:$0xff]  ;;  %v9665_v31 = vadd.f32 %v15099_v26, %v15098_v59  ;;  %6763 = vpow2.f32 %v2955_v33  ;;  %v15104_v36 = vld [vmem:[#allocation117_spill] sm:$0xff] }
 0x5a2   : > { %15089 = vst [vmem:[#allocation266_spill] sm:$0xff] %v9644_v43  ;;  %v9653_v47 = vadd.f32 %v15093_v21, %v15092_v63  ;;  %v2551_v45 = vsub.f32 %v15097_v35, %v9437_v11  ;;  %v15100_v9 = vld [vmem:[#allocation83_spill] sm:$0xff]  ;;  %v9671_v21 = vpop.eup %6751  ;;  %v2959_v63 = vmul.f32 1.442695, %v2549_v54  ;;  %v15103_v41 = vld [vmem:[#allocation206_spill] sm:$0xff]  ;;  %6765 = vpow2.f32 %v2957_v49  ;;  %v15116_v34 = vld [vmem:[#allocation197_spill] sm:$0xff] }
 0x5a3   : > { %15090 = vst [vmem:[#allocation267_spill] sm:$0xff] %v9646_v15  ;;  %v15101_v6 = vld [vmem:[#allocation207_spill] sm:$0xff]  ;;  %v2552_v1 = vsub.f32 %v15103_v41, %v9437_v11  ;;  %v9679_v35 = vpop.eup %6753  ;;  %v3758_v8 = vmul.f32 %v9671_v21, %v9609_v42  ;;  %v9683_v26 = vpop.xlane.xlu1 %3206  ;;  %v9689_v54 = vadd.f32 %v9311_v28, %v9303_v13  ;;  %v9693_v11 = vadd.f32 %v9389_v56, %v9377_v7  ;;  %v15115_v13 = vld [vmem:[#allocation205_spill] sm:$0xff] }
 0x5a4   : > { %15096 = vst [vmem:[#allocation203_spill] sm:$0xff] %v9657_v57  ;;  %v9669_v15 = vadd.f32 %v15101_v6, %v15100_v9  ;;  %v15105_v57 = vld [vmem:[#allocation248_spill] sm:$0xff]  ;;  %v9685_v6 = vpop.xlane.xlu0 %3203  ;;  %v9695_v33 = vpop.eup %6755  ;;  %v2961_v41 = vmul.f32 1.442695, %v2550_v0  ;;  %v3702_v49 = vmul.f32 %v9659_v25, %v9585_v40  ;;  %6767 = vrcp.f32 %v9683_v26 }
 0x5a5   : > { %v9677_v2 = vadd.f32 %v15105_v57, %v15104_v36  ;;  %15106 = vst [vmem:[#allocation206_spill] sm:$0xff] %v9679_v35  ;;  %v9700_v9 = vpop.xlane.xlu2 %2264  ;;  %v9704_v35 = vadd.f32 %v9451_v37, %v9443_v24  ;;  %v9706_v57 = vpop.eup %6757  ;;  %v2963_v36 = vmul.f32 1.442695, %v2551_v45  ;;  %v3759_v59 = vsub.f32 1.0, %v3758_v8  ;;  %v15111_v45 = vld [vmem:[#allocation16_spill] sm:$0xff] }
 0x5a6   : > { %15102 = vst [vmem:[#allocation6_spill] sm:$0xff] %v9669_v15  ;;  %6769 = vrcp.f32 %v9685_v6  ;;  %v9711_v0 = vadd.f32 %v9467_v46, %v9459_v32  ;;  %v9713_v56 = vpop.eup %6759  ;;  %v2965_v7 = vmul.f32 1.442695, %v2552_v1  ;;  %v3337_v37 = vadd.f32 %v9493_v17, %v9481_v5  ;;  %v15114_v1 = vld [vmem:[#allocation192_spill] sm:$0xff] }
 0x5a7   : > { %15107 = vst [vmem:[#allocation268_spill] sm:$0xff] %v9695_v33  ;;  %6771 = vpow2.f32 %v2959_v63  ;;  %v3768_v33 = vand.u32 2147483648, %v9609_v42  ;;  %v9718_v24 = vpop.eup %6761  ;;  %v2553_v8 = vsub.f32 %v15111_v45, %v9491_v52  ;;  %vm3763_vm2 = vweird.f32 %v9671_v21  ;;  %v15113_v63 = vld [vmem:[#allocation151_spill] sm:$0xff]  ;;  %v15119_v45 = vld [vmem:[#allocation17_spill] sm:$0xff] }
 0x5a8   : > { %15108 = vst [vmem:[#allocation269_spill] sm:$0xff] %v9706_v57  ;;  %v3760_v57 = vmul.f32 %v9671_v21, %v3759_v59  ;;  %v3766_v46 = vand.u32 2147483647, %v9609_v42  ;;  %v9725_v32 = vpop.eup %6763  ;;  %6773 = vpow2.f32 %v2961_v41  ;;  %v3703_v17 = vsub.f32 1.0, %v3702_v49  ;;  %3236 = vadd.xlane.f32.xlu1 %v9622_v23  ;;  %3338 = vadd.xlane.f32.xlu2 %v3337_v37  ;;  %v15120_v41 = vld [vmem:[#allocation79_spill] sm:$0xff]  ;;  %v15121_v49 = vld [vmem:[#allocation14_spill] sm:$0xff]  ;;  %vm3764_vm4 = vmor %vm3762_vm3, %vm3763_vm2 }
 0x5a9   : > { %15109 = vst [vmem:[#allocation270_spill] sm:$0xff] %v9713_v56  ;;  %v15117_v5 = vmax.f32 %v15082_v10, %v15081_v44  ;;  %v9735_v59 = vpop.eup %6765  ;;  %6775 = vpow2.f32 %v2963_v36  ;;  %v2281_v56 = vmax.f32 %v15121_v49, %v15120_v41  ;;  %v15122_v44 = vld [vmem:[#allocation92_spill] sm:$0xff]  ;;  %v3769_v23 = vor.u32 1.1754944e-38, %v3768_v33  ;;  %v15125_v41 = vld [vmem:[#allocation27_spill] sm:$0xff] }
 0x5aa   : > { %15110 = vst [vmem:[#allocation271_spill] sm:$0xff] %v9718_v24  ;;  %v2554_v24 = vsub.f32 %v15119_v45, %v9491_v52  ;;  %v3761_v28 = vadd.f32 %v9671_v21, %v3760_v57  ;;  %v9741_v15 = vpop.eup %6767  ;;  %6777 = vpow2.f32 %v2965_v7  ;;  %v9751_v52 = vmul.f32 1.442695, %v2553_v8 }
 0x5ab   : > { %15112 = vst [vmem:[#allocation16_spill] sm:$0xff] %v9725_v32  ;;  %2342 = vmax.xlane.f32.xlu0 %v15117_v5  ;;  %v15123_v5 = vld [vmem:[#allocation98_spill] sm:$0xff]  ;;  %v3744_v37 = vmul.f32 %v9741_v15, %v9683_v26  ;;  %v9755_v42 = vpop.xlane.xlu1 %3200  ;;  %vm3767_vm5 = vcmp.eq.f32.partialorder %v3766_v46, 8.507059e+37  ;;  %vm3749_vm6 = vweird.f32 %v9741_v15  ;;  %vm3707_vm7 = vweird.f32 %v9659_v25 }
 0x5ac   : > { %15118 = vst [vmem:[#allocation151_spill] sm:$0xff] %v9735_v59  ;;  %v2383_v10 = vmax.f32 %v15123_v5, %v15122_v44  ;;  %v9749_v36 = vpop.eup %6769  ;;  %v9757_v57 = vpop.xlane.xlu0 %3188  ;;  %v3765_v45 = vsel %vm3764_vm4, %v9671_v21, %v3761_v28  ;;  %6779 = vrcp.f32 %v9755_v42  ;;  %v3704_v5 = vmul.f32 %v9659_v25, %v3703_v17  ;;  %vm9818_vm13 = vmor %vm3706_vm10, %vm3707_vm7 }
 0x5ad   : > { %v9760_v44 = vpop.eup %6771  ;;  %v3730_v7 = vmul.f32 %v9749_v36, %v9685_v6  ;;  %v9765_v33 = vpop.xlane.xlu2 %2267  ;;  %v3770_v8 = vsel %vm3767_vm5, %v3769_v23, %v3765_v45  ;;  %v9770_v59 = vmul.f32 1.442695, %v2554_v24  ;;  %v3745_v32 = vsub.f32 1.0, %v3744_v37 }
 0x5ae   : > { %15124 = vst [vmem:[#allocation192_spill] sm:$0xff] %v9760_v44  ;;  %v3712_v28 = vand.u32 2147483648, %v9585_v40  ;;  %v9773_v46 = vpop.eup %6773  ;;  %6781 = vrcp.f32 %v9757_v57  ;;  %v15127_v44 = vld [vmem:[#allocation85_spill] sm:$0xff]  ;;  %v5370_v38 = vmul.f32 %v15128_v27, %v3770_v8  ;;  %v3754_v24 = vand.u32 2147483648, %v9683_v26 }
 0x5af   : > { %15126 = vst [vmem:[#allocation205_spill] sm:$0xff] %v9773_v46  ;;  %v3731_v21 = vsub.f32 1.0, %v3730_v7  ;;  %v5369_v43 = vmul.f32 %v15127_v44, %v3770_v8  ;;  %v9778_v23 = vpop.eup %6775  ;;  %v3746_v17 = vmul.f32 %v9741_v15, %v3745_v32  ;;  %v3752_v45 = vand.u32 2147483647, %v9683_v26  ;;  %v15135_v46 = vld [vmem:[#allocation218_spill] sm:$0xff] }
 0x5b0   : > { %15129 = vst [vmem:[#allocation197_spill] sm:$0xff] %v9778_v23  ;;  %v9784_v37 = vpop.eup %6777  ;;  %5615 = vmatpush.xpose.msra.mxu3 %v5370_v38  ;;  %v3740_v27 = vand.u32 2147483648, %v9685_v6  ;;  %v3705_v7 = vadd.f32 %v9659_v25, %v3704_v5  ;;  %2282 = vmax.xlane.f32.xlu2 %v2281_v56  ;;  %vm3748_vm8 = vweird.f32 %v9683_v26  ;;  %vm3735_vm9 = vweird.f32 %v9749_v36  ;;  %v15136_v23 = vld [vmem:[#allocation220_spill] sm:$0xff] }
 0x5b1   : > { %15130 = vst [vmem:[#allocation17_spill] sm:$0xff] %v9784_v37  ;;  %5595 = vmatpush.xpose.msra.mxu2 %v5369_v43  ;;  %v3732_v44 = vmul.f32 %v9749_v36, %v3731_v21  ;;  %v3747_v32 = vadd.f32 %v9741_v15, %v3746_v17  ;;  %3293 = vadd.xlane.f32.xlu1 %v9689_v54  ;;  %vm9799_vm11 = vmor %vm3748_vm8, %vm3749_vm6  ;;  %v3710_v26 = vand.u32 2147483647, %v9585_v40  ;;  %v3713_v5 = vor.u32 1.1754944e-38, %v3712_v28 }
 0x5b2   : > { %v9794_v43 = vpop.eup %6779  ;;  %v3755_v49 = vor.u32 1.1754944e-38, %v3754_v24  ;;  %vm3734_vm12 = vweird.f32 %v9685_v6  ;;  %vm3753_vm14 = vcmp.eq.f32.partialorder %v3752_v45, 8.507059e+37  ;;  %v3726_v45 = vand.u32 2147483648, %v9755_v42 }
 0x5b3   : > { %2384 = vmax.xlane.f32.xlu0 %v2383_v10  ;;  %v3733_v56 = vadd.f32 %v9749_v36, %v3732_v44  ;;  %v3738_v10 = vand.u32 2147483647, %v9685_v6  ;;  %v3716_v8 = vmul.f32 %v9794_v43, %v9755_v42  ;;  %v9808_v21 = vpop.xlane.xlu1 %3194  ;;  %v3751_v54 = vsel %vm9799_vm11, %v9741_v15, %v3747_v32  ;;  %vm3736_vm15 = vmor %vm3734_vm12, %vm3735_vm9 }
 0x5b4   : > { %v9810_v17 = vpop.xlane.xlu0 %2270  ;;  %v9822_v40 = vpop.eup %6781  ;;  %6783 = vrcp.f32 %v9808_v21  ;;  %v3741_v15 = vor.u32 1.1754944e-38, %v3740_v27  ;;  %v3709_v6 = vsel %vm9818_vm13, %v9659_v25, %v3705_v7  ;;  %v3756_v32 = vsel %vm3753_vm14, %v3755_v49, %v3751_v54  ;;  %v15137_v7 = vld [vmem:[#allocation89_spill] sm:$0xff] }
 0x5b5   : > { %v9825_v28 = vpop.xlane.xlu2 %3191  ;;  %v3717_v24 = vsub.f32 1.0, %v3716_v8  ;;  %v3737_v38 = vsel %vm3736_vm15, %v9749_v36, %v3733_v56  ;;  %v5367_v37 = vmul.f32 %v15135_v46, %v3756_v32  ;;  %vm3739_vm1 = vcmp.eq.f32.partialorder %v3738_v10, 8.507059e+37  ;;  %v15138_v8 = vld [vmem:[#allocation73_spill] sm:$0xff] }
 0x5b6   : > { %6785 = vrcp.f32 %v9825_v28  ;;  %vm3721_vm2 = vweird.f32 %v9794_v43  ;;  %v3660_v27 = vmul.f32 %v9822_v40, %v9757_v57  ;;  %v5368_v50 = vmul.f32 %v15136_v23, %v3756_v32 }
 0x5b7   : > { %v3742_v44 = vsel %vm3739_vm1, %v3741_v15, %v3737_v38  ;;  %v3718_v25 = vmul.f32 %v9794_v43, %v3717_v24  ;;  %v2380_v49 = vmax.f32 %v15138_v8, %v15137_v7  ;;  %6787 = vpow2.f32 %v9751_v52  ;;  %5596 = vmatpush.xpose.msra.mxu2 %v5367_v37  ;;  %v15140_v52 = vld [vmem:[#allocation28_spill] sm:$0xff] }
 0x5b8   : > { %v3724_v36 = vand.u32 2147483647, %v9755_v42  ;;  %vm3711_vm3 = vcmp.eq.f32.partialorder %v3710_v26, 8.507059e+37  ;;  %6789 = vpow2.f32 %v9770_v59  ;;  %5616 = vmatpush.xpose.msra.mxu3 %v5368_v50  ;;  %v15139_v46 = vmax.f32 %v15077_v22, %v15076_v3  ;;  %3335 = vadd.xlane.f32.xlu2 %v9704_v35  ;;  %v15142_v50 = vld [vmem:[#allocation84_spill] sm:$0xff]  ;;  %v15159_v22 = vld [vmem:[#allocation214_spill] sm:$0xff] }
 0x5b9   : > { %v3719_v23 = vadd.f32 %v9794_v43, %v3718_v25  ;;  %vm3720_vm4 = vweird.f32 %v9755_v42  ;;  %v3714_v56 = vsel %vm3711_vm3, %v3713_v5, %v3709_v6  ;;  %v15141_v26 = vsub.f32 %v15125_v41, %v9549_v48  ;;  %3233 = vadd.xlane.f32.xlu1 %v9349_v62  ;;  %v15145_v35 = vld [vmem:[#allocation96_spill] sm:$0xff] }
 0x5ba   : > { %v9851_v10 = vpop.eup %6783  ;;  %v5365_v59 = vmul.f32 %v15142_v50, %v3742_v44  ;;  %vm9865_vm5 = vmor %vm3720_vm4, %vm3721_vm2  ;;  %v3727_v5 = vor.u32 1.1754944e-38, %v3726_v45  ;;  %v3661_v6 = vsub.f32 1.0, %v3660_v27  ;;  %v5366_v32 = vmul.f32 %v15145_v35, %v3742_v44  ;;  %v15146_v27 = vld [vmem:[#allocation65_spill] sm:$0xff]  ;;  %v15147_v50 = vld [vmem:[#allocation211_spill] sm:$0xff] }
 0x5bb   : > { %2339 = vmax.xlane.f32.xlu0 %v15139_v46  ;;  %v9858_v54 = vmul.f32 1.442695, %v15141_v26  ;;  %v3688_v41 = vmul.f32 %v9851_v10, %v9808_v21  ;;  %v9873_v24 = vpop.xlane.xlu1 %2273  ;;  %v3723_v38 = vsel %vm9865_vm5, %v9794_v43, %v3719_v23  ;;  %vm3725_vm6 = vcmp.eq.f32.partialorder %v3724_v36, 8.507059e+37  ;;  %v15149_v23 = vld [vmem:[#allocation217_spill] sm:$0xff]  ;;  %v15151_v36 = vld [vmem:[#allocation75_spill] sm:$0xff] }
 0x5bc   : > { %v9869_v15 = vpop.eup %6785  ;;  %v9876_v62 = vpop.xlane.xlu0 %3182  ;;  %5597 = vmatpush.xpose.msra.mxu2 %v5365_v59  ;;  %v5361_v46 = vmul.f32 %v15146_v27, %v3714_v56  ;;  %5617 = vmatpush.xpose.msra.mxu3 %v5366_v32  ;;  %v3728_v44 = vsel %vm3725_vm6, %v3727_v5, %v3723_v38  ;;  %v5362_v35 = vmul.f32 %v15147_v50, %v3714_v56  ;;  %v3696_v7 = vand.u32 2147483647, %v9808_v21 }
 0x5bd   : > { %v3674_v25 = vmul.f32 %v9869_v15, %v9825_v28  ;;  %v9883_v45 = vpop.xlane.xlu2 %3185  ;;  %6791 = vrcp.f32 %v9876_v62  ;;  %v3689_v26 = vsub.f32 1.0, %v3688_v41  ;;  %v9889_v42 = vpop.eup %6787  ;;  %v5363_v37 = vmul.f32 %v15149_v23, %v3728_v44 }
 0x5be   : > { %6793 = vrcp.f32 %v9883_v45  ;;  %15148 = vst [vmem:[#allocation27_spill] sm:$0xff] %v9889_v42  ;;  %v3698_v59 = vand.u32 2147483648, %v9808_v21  ;;  %v9894_v8 = vpop.eup %6789  ;;  %v5364_v27 = vmul.f32 %v15151_v36, %v3728_v44  ;;  %vm3693_vm7 = vweird.f32 %v9851_v10 }
 0x5bf   : > { %v3675_v43 = vsub.f32 1.0, %v3674_v25  ;;  %15150 = vst [vmem:[#allocation85_spill] sm:$0xff] %v9894_v8  ;;  %v3690_v41 = vmul.f32 %v9851_v10, %v3689_v26  ;;  %v3662_v5 = vmul.f32 %v9822_v40, %v3661_v6  ;;  %vm3679_vm8 = vweird.f32 %v9869_v15  ;;  %v15158_v25 = vld [vmem:[#allocation212_spill] sm:$0xff] }
 0x5c0   : > { %5598 = vmatpush.xpose.msra.mxu2 %v5363_v37  ;;  %vm3664_vm9 = vweird.f32 %v9757_v57  ;;  %v3668_v32 = vand.u32 2147483647, %v9757_v57  ;;  %5618 = vmatpush.xpose.msra.mxu3 %v5364_v27  ;;  %vm3692_vm10 = vweird.f32 %v9808_v21  ;;  %vm3678_vm11 = vweird.f32 %v9825_v28 }
 0x5c1   : > { %v3676_v56 = vmul.f32 %v9869_v15, %v3675_v43  ;;  %v3691_v38 = vadd.f32 %v9851_v10, %v3690_v41  ;;  %v3684_v6 = vand.u32 2147483648, %v9825_v28  ;;  %2381 = vmax.xlane.f32.xlu2 %v2380_v49  ;;  %3290 = vadd.xlane.f32.xlu1 %v9665_v31  ;;  %vm9914_vm12 = vmor %vm3692_vm10, %vm3693_vm7  ;;  %vm9918_vm13 = vcmp.eq.f32.partialorder %v3696_v7, 8.507059e+37 }
 0x5c2   : > { %v3699_v21 = vor.u32 1.1754944e-38, %v3698_v59  ;;  %v3682_v44 = vand.u32 2147483647, %v9825_v28  ;;  %vm9939_vm14 = vmor %vm3678_vm11, %vm3679_vm8  ;;  %v3663_v59 = vadd.f32 %v9822_v40, %v3662_v5  ;;  %vm3665_vm15 = vweird.f32 %v9822_v40 }
 0x5c3   : > { %3230 = vadd.xlane.f32.xlu0 %v9630_v20  ;;  %v9909_v37 = vpop.eup %6791  ;;  %v3677_v26 = vadd.f32 %v9869_v15, %v3676_v56  ;;  %v9928_v49 = vpop.xlane.xlu1 %3179  ;;  %v3695_v7 = vsel %vm9914_vm12, %v9851_v10, %v3691_v38  ;;  %v3685_v5 = vor.u32 1.1754944e-38, %v3684_v6  ;;  %v3670_v56 = vand.u32 2147483648, %v9757_v57  ;;  %vm9967_vm2 = vmor %vm3664_vm9, %vm3665_vm15  ;;  %v15174_v57 = vld [vmem:[#allocation55_spill] sm:$0xff] }
 0x5c4   : > { %v9924_v50 = vpop.eup %6793  ;;  %v3632_v31 = vmul.f32 %v9909_v37, %v9876_v62  ;;  %v9930_v43 = vpop.xlane.xlu0 %3176  ;;  %6795 = vrcp.f32 %v9928_v49  ;;  %5599 = vmatpush.xpose.msra.mxu2 %v5361_v46  ;;  %v3700_v10 = vsel %vm9918_vm13, %v3699_v21, %v3695_v7  ;;  %5619 = vmatpush.xpose.msra.mxu3 %v5362_v35  ;;  %vm3683_vm1 = vcmp.eq.f32.partialorder %v3682_v44, 8.507059e+37 }
 0x5c5   : > { %v3646_v36 = vmul.f32 %v9924_v50, %v9883_v45  ;;  %v9948_v27 = vpop.xlane.xlu2 %2276  ;;  %v3681_v28 = vsel %vm9939_vm14, %v9869_v15, %v3677_v26  ;;  %6797 = vrcp.f32 %v9930_v43  ;;  %v5359_v3 = vmul.f32 %v15158_v25, %v3700_v10 }
 0x5c6   : > { %v3633_v41 = vsub.f32 1.0, %v3632_v31  ;;  %v5360_v8 = vmul.f32 %v15159_v22, %v3700_v10  ;;  %6799 = vpow2.f32 %v9858_v54  ;;  %v15160_v46 = vsub.f32 %v15140_v52, %v9549_v48  ;;  %v15163_v22 = vld [vmem:[#allocation61_spill] sm:$0xff] }
 0x5c7   : > { %v3647_v38 = vsub.f32 1.0, %v3646_v36  ;;  %v3686_v15 = vsel %vm3683_vm1, %v3685_v5, %v3681_v28  ;;  %v3656_v6 = vand.u32 2147483648, %v9883_v45  ;;  %v2557_v21 = vsub.f32 %v15163_v22, %v9511_v29  ;;  %v15164_v54 = vld [vmem:[#allocation209_spill] sm:$0xff]  ;;  %v15169_v36 = vld [vmem:[#allocation70_spill] sm:$0xff] }
 0x5c8   : > { %v2973_v20 = vmul.f32 1.442695, %v15160_v46  ;;  %v2558_v26 = vsub.f32 %v15164_v54, %v9511_v29  ;;  %5600 = vmatpush.xpose.msra.mxu2 %v5359_v3  ;;  %v3667_v48 = vsel %vm9967_vm2, %v9822_v40, %v3663_v59  ;;  %5620 = vmatpush.xpose.msra.mxu3 %v5360_v8  ;;  %vm9981_vm3 = vcmp.eq.f32.partialorder %v3668_v32, 8.507059e+37  ;;  %v15168_v40 = vld [vmem:[#allocation56_spill] sm:$0xff] }
 0x5c9   : > { %v3648_v52 = vmul.f32 %v9924_v50, %v3647_v38  ;;  %v3671_v44 = vor.u32 1.1754944e-38, %v3670_v56  ;;  %vm3651_vm4 = vweird.f32 %v9924_v50  ;;  %v3634_v31 = vmul.f32 %v9909_v37, %v3633_v41  ;;  %3332 = vadd.xlane.f32.xlu1 %v9449_v55 }
 0x5ca   : > { %v9987_v29 = vpop.eup %6795  ;;  %v15167_v3 = vmax.f32 %v15065_v58, %v15064_v51  ;;  %v5357_v8 = vmul.f32 %v15168_v40, %v3686_v15  ;;  %vm3650_vm5 = vweird.f32 %v9883_v45  ;;  %v3654_v32 = vand.u32 2147483647, %v9883_v45 }
 0x5cb   : > { %3287 = vadd.xlane.f32.xlu0 %v9421_v14  ;;  %v3649_v14 = vadd.f32 %v9924_v50, %v3648_v52  ;;  %v9997_v7 = vpop.eup %6797  ;;  %v3618_v23 = vmul.f32 %v9987_v29, %v9928_v49  ;;  %v10001_v59 = vpop.xlane.xlu1 %3173  ;;  %v5358_v10 = vmul.f32 %v15169_v36, %v3686_v15  ;;  %v3672_v55 = vsel %vm9981_vm3, %v3671_v44, %v3667_v48  ;;  %vm10015_vm6 = vmor %vm3650_vm5, %vm3651_vm4 }
 0x5cc   : > { %2336 = vmax.xlane.f32.xlu2 %v15167_v3  ;;  %v10004_v28 = vpop.xlane.xlu0 %2279  ;;  %v3657_v41 = vor.u32 1.1754944e-38, %v3656_v6  ;;  %v3604_v5 = vmul.f32 %v9997_v7, %v9930_v43  ;;  %6801 = vrcp.f32 %v10001_v59  ;;  %5601 = vmatpush.xpose.msra.mxu2 %v5357_v8  ;;  %v3635_v38 = vadd.f32 %v9909_v37, %v3634_v31  ;;  %v10021_v25 = vpop.eup %6799  ;;  %v15173_v6 = vld [vmem:[#allocation52_spill] sm:$0xff] }
 0x5cd   : > { %v10011_v45 = vpop.xlane.xlu2 %3170  ;;  %vm3637_vm7 = vweird.f32 %v9909_v37  ;;  %15172 = vst [vmem:[#allocation95_spill] sm:$0xff] %v10021_v25  ;;  %v3619_v46 = vsub.f32 1.0, %v3618_v23  ;;  %5621 = vmatpush.xpose.msra.mxu3 %v5358_v10  ;;  %v3653_v15 = vsel %vm10015_vm6, %v9924_v50, %v3649_v14  ;;  %v3642_v35 = vand.u32 2147483648, %v9876_v62  ;;  %v15178_v23 = vld [vmem:[#allocation208_spill] sm:$0xff]  ;;  %v15229_v25 = vld [vmem:[#allocation174_spill] sm:$0xff] }
 0x5ce   : > { %6803 = vrcp.f32 %v10011_v45  ;;  %v5355_v22 = vmul.f32 %v15173_v6, %v3672_v55  ;;  %vm3655_vm8 = vcmp.eq.f32.partialorder %v3654_v32, 8.507059e+37  ;;  %vm3636_vm9 = vweird.f32 %v9876_v62  ;;  %v15182_v6 = vld [vmem:[#allocation74_spill] sm:$0xff] }
 0x5cf   : > { %v3640_v54 = vand.u32 2147483647, %v9876_v62  ;;  %v2975_v48 = vmul.f32 1.442695, %v2557_v21  ;;  %v3605_v52 = vsub.f32 1.0, %v3604_v5  ;;  %v5356_v44 = vmul.f32 %v15174_v57, %v3672_v55  ;;  %vm10034_vm10 = vmor %vm3636_vm9, %vm3637_vm7  ;;  %v15179_v55 = vld [vmem:[#allocation210_spill] sm:$0xff] }
 0x5d0   : > { %v3658_v31 = vsel %vm3655_vm8, %v3657_v41, %v3653_v15  ;;  %5602 = vmatpush.xpose.msra.mxu2 %v5355_v22  ;;  %v3639_v50 = vsel %vm10034_vm10, %v9909_v37, %v3635_v38  ;;  %v3620_v40 = vmul.f32 %v9987_v29, %v3619_v46  ;;  %vm3623_vm11 = vweird.f32 %v9987_v29  ;;  %v15183_v57 = vld [vmem:[#allocation47_spill] sm:$0xff] }
 0x5d1   : > { %v3628_v62 = vand.u32 2147483648, %v9928_v49  ;;  %6805 = vpow2.f32 %v2973_v20  ;;  %v2977_v21 = vmul.f32 1.442695, %v2558_v26  ;;  %5622 = vmatpush.xpose.msra.mxu3 %v5356_v44  ;;  %v3643_v8 = vor.u32 1.1754944e-38, %v3642_v35 }
 0x5d2   : > { %v3626_v14 = vand.u32 2147483647, %v9928_v49  ;;  %v10046_v32 = vpop.eup %6801  ;;  %v15177_v37 = vmax.f32 %v15116_v34, %v15115_v13  ;;  %v5353_v36 = vmul.f32 %v15178_v23, %v3658_v31  ;;  %vm3641_vm12 = vcmp.eq.f32.partialorder %v3640_v54, 8.507059e+37 }
 0x5d3   : > { %3329 = vadd.xlane.f32.xlu0 %v9711_v0  ;;  %v3621_v20 = vadd.f32 %v9987_v29, %v3620_v40  ;;  %vm3622_vm13 = vweird.f32 %v9928_v49  ;;  %v3590_v0 = vmul.f32 %v10046_v32, %v10001_v59  ;;  %v10059_v10 = vpop.xlane.xlu1 %3167  ;;  %v3644_v5 = vsel %vm3641_vm12, %v3643_v8, %v3639_v50  ;;  %v15185_v50 = vld [vmem:[#allocation51_spill] sm:$0xff]  ;;  %v15186_v40 = vld [vmem:[#allocation213_spill] sm:$0xff] }
 0x5d4   : > { %3227 = vadd.xlane.f32.xlu2 %v9600_v61  ;;  %2378 = vmax.xlane.f32.xlu1 %v15177_v37  ;;  %v10055_v26 = vpop.eup %6803  ;;  %v5354_v61 = vmul.f32 %v15179_v55, %v3658_v31  ;;  %v10062_v41 = vpop.xlane.xlu0 %3164  ;;  %vm10066_vm14 = vmor %vm3622_vm13, %vm3623_vm11  ;;  %v3606_v49 = vmul.f32 %v9997_v7, %v3605_v52  ;;  %6807 = vrcp.f32 %v10059_v10  ;;  %v3629_v35 = vor.u32 1.1754944e-38, %v3628_v62 }
 0x5d5   : > { %v3576_v38 = vmul.f32 %v10055_v26, %v10011_v45  ;;  %v10074_v46 = vpop.xlane.xlu2 %3257  ;;  %5603 = vmatpush.xpose.msra.mxu2 %v5353_v36  ;;  %v3625_v15 = vsel %vm10066_vm14, %v9987_v29, %v3621_v20  ;;  %6809 = vpow2.f32 %v2975_v48  ;;  %v2559_v22 = vsub.f32 %v15182_v6, %v9551_v19  ;;  %v15188_v36 = vld [vmem:[#allocation36_spill] sm:$0xff] }
 0x5d6   : > { %v3591_v54 = vsub.f32 1.0, %v3590_v0  ;;  %5623 = vmatpush.xpose.msra.mxu3 %v5354_v61  ;;  %vm3627_vm15 = vcmp.eq.f32.partialorder %v3626_v14, 8.507059e+37  ;;  %6811 = vrcp.f32 %v10074_v46  ;;  %v5351_v44 = vmul.f32 %v15183_v57, %v3644_v5  ;;  %v15195_v57 = vld [vmem:[#allocation106_spill] sm:$0xff] }
 0x5d7   : > { %v3577_v52 = vsub.f32 1.0, %v3576_v38  ;;  %v3630_v31 = vsel %vm3627_vm15, %v3629_v35, %v3625_v15  ;;  %v10083_v3 = vpop.eup %6805  ;;  %6813 = vrcp.f32 %v10062_v41  ;;  %v5352_v29 = vmul.f32 %v15185_v50, %v3644_v5  ;;  %v15193_v38 = vld [vmem:[#allocation37_spill] sm:$0xff] }
 0x5d8   : > { %15184 = vst [vmem:[#allocation218_spill] sm:$0xff] %v10083_v3  ;;  %v3607_v48 = vadd.f32 %v9997_v7, %v3606_v49  ;;  %vm3609_vm1 = vweird.f32 %v9997_v7  ;;  %6815 = vpow2.f32 %v2977_v21  ;;  %v2560_v62 = vsub.f32 %v15186_v40, %v9551_v19  ;;  %v15196_v40 = vld [vmem:[#allocation219_spill] sm:$0xff] }
 0x5d9   : > { %5604 = vmatpush.xpose.msra.mxu2 %v5351_v44  ;;  %v3614_v8 = vand.u32 2147483648, %v9930_v43  ;;  %v3592_v14 = vmul.f32 %v10046_v32, %v3591_v54  ;;  %v2979_v37 = vmul.f32 1.442695, %v2559_v22  ;;  %v15187_v23 = vmax.f32 %v15114_v1, %v15113_v63 }
 0x5da   : > { %5624 = vmatpush.xpose.msra.mxu3 %v5352_v29  ;;  %v5349_v20 = vmul.f32 %v15188_v36, %v3630_v31  ;;  %vm3608_vm2 = vweird.f32 %v9930_v43  ;;  %v3612_v21 = vand.u32 2147483647, %v9930_v43  ;;  %v10099_v0 = vpop.eup %6807  ;;  %v15189_v19 = vmax.f32 %v15061_v12, %v15060_v4  ;;  %v15198_v36 = vld [vmem:[#allocation41_spill] sm:$0xff] }
 0x5db   : > { %2375 = vmax.xlane.f32.xlu0 %v15187_v23  ;;  %vm10107_vm3 = vmor %vm3608_vm2, %vm3609_vm1  ;;  %v3593_v61 = vadd.f32 %v10046_v32, %v3592_v14  ;;  %vm3595_vm4 = vweird.f32 %v10046_v32  ;;  %v3600_v43 = vand.u32 2147483648, %v10001_v59  ;;  %v3578_v5 = vmul.f32 %v10055_v26, %v3577_v52  ;;  %v10115_v56 = vpop.eup %6809  ;;  %v10119_v49 = vpop.xlane.xlu1 %3254 }
 0x5dc   : > { %3284 = vadd.xlane.f32.xlu2 %v9677_v2  ;;  %2333 = vmax.xlane.f32.xlu1 %v15189_v19  ;;  %15192 = vst [vmem:[#allocation220_spill] sm:$0xff] %v10115_v56  ;;  %v3562_v2 = vmul.f32 %v10099_v0, %v10059_v10  ;;  %v5350_v15 = vmul.f32 %v15193_v38, %v3630_v31  ;;  %v10122_v35 = vpop.xlane.xlu0 %3353  ;;  %v3598_v22 = vand.u32 2147483647, %v10001_v59  ;;  %v10128_v54 = vpop.eup %6811  ;;  %v2981_v52 = vmul.f32 1.442695, %v2560_v62  ;;  %v15239_v56 = vld [vmem:[#allocation263_spill] sm:$0xff] }
 0x5dd   : > { %15194 = vst [vmem:[#allocation28_spill] sm:$0xff] %v10122_v35  ;;  %v3611_v6 = vsel %vm10107_vm3, %v9997_v7, %v3607_v48  ;;  %v2561_v44 = vsub.f32 %v15195_v57, %v9607_v60  ;;  %v10132_v50 = vpop.xlane.xlu2 %3251  ;;  %5605 = vmatpush.xpose.msra.mxu2 %v5349_v20  ;;  %v3615_v29 = vor.u32 1.1754944e-38, %v3614_v8  ;;  %vm3594_vm5 = vweird.f32 %v10001_v59  ;;  %v10135_v31 = vpop.eup %6813 }
 0x5de   : > { %v2562_v14 = vsub.f32 %v15196_v40, %v9607_v60  ;;  %v3563_v7 = vsub.f32 1.0, %v3562_v2  ;;  %5625 = vmatpush.xpose.msra.mxu3 %v5350_v15  ;;  %vm3613_vm6 = vcmp.eq.f32.partialorder %v3612_v21, 8.507059e+37  ;;  %vm3596_vm7 = vmor %vm3594_vm5, %vm3595_vm4  ;;  %vm3581_vm8 = vweird.f32 %v10055_v26  ;;  %v10142_v48 = vpop.eup %6815  ;;  %v15199_v60 = vld [vmem:[#allocation42_spill] sm:$0xff]  ;;  %v15202_v15 = vld [vmem:[#allocation76_spill] sm:$0xff] }
 0x5df   : > { %15197 = vst [vmem:[#allocation84_spill] sm:$0xff] %v10142_v48  ;;  %v3616_v62 = vsel %vm3613_vm6, %v3615_v29, %v3611_v6  ;;  %v3597_v8 = vsel %vm3596_vm7, %v10046_v32, %v3593_v61  ;;  %v3601_v23 = vor.u32 1.1754944e-38, %v3600_v43  ;;  %v3579_v59 = vadd.f32 %v10055_v26, %v3578_v5  ;;  %v15205_v40 = vld [vmem:[#allocation32_spill] sm:$0xff] }
 0x5e0   : > { %6817 = vpow2.f32 %v2979_v37  ;;  %v5347_v20 = vmul.f32 %v15198_v36, %v3616_v62  ;;  %v5348_v19 = vmul.f32 %v15199_v60, %v3616_v62  ;;  %vm3599_vm9 = vcmp.eq.f32.partialorder %v3598_v22, 8.507059e+37 }
 0x5e1   : > { %v3982_v21 = vmul.f32 %v10128_v54, %v10074_v46  ;;  %v3548_v55 = vmul.f32 %v10135_v31, %v10062_v41  ;;  %v3602_v2 = vsel %vm3599_vm9, %v3601_v23, %v3597_v8  ;;  %vm3580_vm10 = vweird.f32 %v10011_v45 }
 0x5e2   : > { %v2983_v38 = vmul.f32 1.442695, %v2561_v44  ;;  %5606 = vmatpush.xpose.msra.mxu2 %v5347_v20  ;;  %5626 = vmatpush.xpose.msra.mxu3 %v5348_v19  ;;  %vm10155_vm11 = vmor %vm3580_vm10, %vm3581_vm8  ;;  %v3584_v37 = vand.u32 2147483647, %v10011_v45  ;;  %v3586_v61 = vand.u32 2147483648, %v10011_v45  ;;  %v3564_v43 = vmul.f32 %v10099_v0, %v3563_v7  ;;  %v15204_v44 = vld [vmem:[#allocation25_spill] sm:$0xff] }
 0x5e3   : > { %v2985_v5 = vmul.f32 1.442695, %v2562_v14  ;;  %v2563_v6 = vsub.f32 %v15202_v15, %v9700_v9  ;;  %6819 = vrcp.f32 %v10119_v49  ;;  %v15203_v22 = vmax.f32 %v15059_v16, %v15058_v53  ;;  %v10173_v45 = vpop.xlane.xlu1 %3305  ;;  %v15208_v20 = vld [vmem:[#allocation77_spill] sm:$0xff] }
 0x5e4   : > { %3326 = vadd.xlane.f32.xlu2 %v9693_v11  ;;  %v3583_v57 = vsel %vm10155_vm11, %v10055_v26, %v3579_v59  ;;  %3224 = vadd.xlane.f32.xlu1 %v9341_v18  ;;  %v5345_v29 = vmul.f32 %v15204_v44, %v3602_v2  ;;  %v5346_v14 = vmul.f32 %v15205_v40, %v3602_v2  ;;  %v10177_v7 = vpop.xlane.xlu0 %3350  ;;  %vm3567_vm12 = vweird.f32 %v10099_v0  ;;  %v15211_v2 = vld [vmem:[#allocation111_spill] sm:$0xff]  ;;  %v15216_v44 = vld [vmem:[#allocation216_spill] sm:$0xff]  ;;  %v15217_v40 = vld [vmem:[#allocation113_spill] sm:$0xff] }
 0x5e5   : > { %2330 = vmax.xlane.f32.xlu0 %v15203_v22  ;;  %15206 = vst [vmem:[#allocation96_spill] sm:$0xff] %v10177_v7  ;;  %v3565_v62 = vadd.f32 %v10099_v0, %v3564_v43  ;;  %v3983_v8 = vsub.f32 1.0, %v3982_v21  ;;  %v3549_v11 = vsub.f32 1.0, %v3548_v55  ;;  %v10181_v23 = vpop.xlane.xlu2 %3248  ;;  %v3587_v36 = vor.u32 1.1754944e-38, %v3586_v61  ;;  %v15214_v43 = vld [vmem:[#allocation233_spill] sm:$0xff] }
 0x5e6   : > { %v3572_v26 = vand.u32 2147483648, %v10059_v10  ;;  %v10184_v18 = vpop.eup %6817  ;;  %6821 = vrcp.f32 %v10173_v45  ;;  %5607 = vmatpush.xpose.msra.mxu2 %v5345_v29  ;;  %5627 = vmatpush.xpose.msra.mxu3 %v5346_v14  ;;  %vm3585_vm13 = vcmp.eq.f32.partialorder %v3584_v37, 8.507059e+37  ;;  %vm3566_vm14 = vweird.f32 %v10059_v10  ;;  %v15212_v37 = vld [vmem:[#allocation101_spill] sm:$0xff] }
 0x5e7   : > { %15207 = vst [vmem:[#allocation65_spill] sm:$0xff] %v10184_v18  ;;  %v3570_v59 = vand.u32 2147483647, %v10059_v10  ;;  %6823 = vpow2.f32 %v2981_v52  ;;  %v2564_v60 = vsub.f32 %v15208_v20, %v9700_v9  ;;  %v2987_v19 = vmul.f32 1.442695, %v2563_v6  ;;  %vm10193_vm15 = vmor %vm3566_vm14, %vm3567_vm12  ;;  %v15213_v9 = vld [vmem:[#allocation236_spill] sm:$0xff] }
 0x5e8   : > { %v3588_v21 = vsel %vm3585_vm13, %v3587_v36, %v3583_v57  ;;  %6825 = vpow2.f32 %v2983_v38  ;;  %v3569_v10 = vsel %vm10193_vm15, %v10099_v0, %v3565_v62  ;;  %v2371_v15 = vmax.f32 %v15214_v43, %v15213_v9  ;;  %v15215_v38 = vld [vmem:[#allocation91_spill] sm:$0xff]  ;;  %v15384_v16 = vld [vmem:[#allocation121_spill] sm:$0xff] }
 0x5e9   : > { %v5343_v32 = vmul.f32 %v15211_v2, %v3588_v21  ;;  %v5344_v61 = vmul.f32 %v15212_v37, %v3588_v21  ;;  %v10202_v52 = vpop.eup %6819  ;;  %6827 = vpow2.f32 %v2985_v5  ;;  %v3573_v6 = vor.u32 1.1754944e-38, %v3572_v26  ;;  %v15241_v18 = vld [vmem:[#allocation127_spill] sm:$0xff] }
 0x5ea   : > { %v3550_v22 = vmul.f32 %v10135_v31, %v3549_v11  ;;  %v3984_v57 = vmul.f32 %v10128_v54, %v3983_v8  ;;  %6829 = vrcp.f32 %v10132_v50  ;;  %vm3571_vm1 = vcmp.eq.f32.partialorder %v3570_v59, 8.507059e+37  ;;  %v15218_v8 = vld [vmem:[#allocation225_spill] sm:$0xff]  ;;  %v15220_v59 = vld [vmem:[#allocation244_spill] sm:$0xff] }
 0x5eb   : > { %5608 = vmatpush.xpose.msra.mxu2 %v5343_v32  ;;  %5628 = vmatpush.xpose.msra.mxu3 %v5344_v61  ;;  %v10211_v29 = vadd.f32 %v15216_v44, %v15215_v38  ;;  %6831 = vpow2.f32 %v2987_v19  ;;  %v2989_v0 = vmul.f32 1.442695, %v2564_v60  ;;  %v2565_v14 = vsub.f32 %v15217_v40, %v9765_v33  ;;  %v10223_v26 = vpop.xlane.xlu1 %3347  ;;  %v15221_v60 = vld [vmem:[#allocation245_spill] sm:$0xff]  ;;  %v15257_v44 = vld [vmem:[#allocation232_spill] sm:$0xff] }
 0x5ec   : > { %2372 = vmax.xlane.f32.xlu2 %v2371_v15  ;;  %v3574_v5 = vsel %vm3571_vm1, %v3573_v6, %v3569_v10  ;;  %v10216_v62 = vpop.eup %6821  ;;  %v2566_v11 = vsub.f32 %v15218_v8, %v9765_v33  ;;  %v3968_v36 = vmul.f32 %v10202_v52, %v10119_v49  ;;  %3281 = vadd.xlane.f32.xlu1 %v9653_v47  ;;  %v10227_v21 = vpop.xlane.xlu0 %3245  ;;  %v3992_v55 = vand.u32 2147483648, %v10074_v46  ;;  %v15225_v8 = vld [vmem:[#allocation141_spill] sm:$0xff] }
 0x5ed   : > { %3221 = vadd.xlane.f32.xlu0 %v9613_v30  ;;  %15219 = vst [vmem:[#allocation211_spill] sm:$0xff] %v10223_v26  ;;  %v5341_v20 = vmul.f32 %v15220_v59, %v3574_v5  ;;  %v5342_v19 = vmul.f32 %v15221_v60, %v3574_v5  ;;  %v10229_v30 = vpop.eup %6823  ;;  %v10232_v2 = vpop.xlane.xlu2 %3302  ;;  %v3551_v33 = vadd.f32 %v10135_v31, %v3550_v22  ;;  %vm3553_vm2 = vweird.f32 %v10135_v31  ;;  %v15227_v60 = vld [vmem:[#allocation229_spill] sm:$0xff] }
 0x5ee   : > { %15222 = vst [vmem:[#allocation217_spill] sm:$0xff] %v10229_v30  ;;  %v3558_v47 = vand.u32 2147483648, %v10062_v41  ;;  %v10237_v32 = vpop.eup %6825  ;;  %vm3987_vm3 = vweird.f32 %v10128_v54  ;;  %v3556_v37 = vand.u32 2147483647, %v10062_v41  ;;  %v3985_v61 = vadd.f32 %v10128_v54, %v3984_v57 }
 0x5ef   : > { %15223 = vst [vmem:[#allocation75_spill] sm:$0xff] %v10237_v32  ;;  %5609 = vmatpush.xpose.msra.mxu2 %v5341_v20  ;;  %5629 = vmatpush.xpose.msra.mxu3 %v5342_v19  ;;  %v3990_v10 = vand.u32 2147483647, %v10074_v46  ;;  %v10243_v15 = vpop.eup %6827  ;;  %v2991_v6 = vmul.f32 1.442695, %v2565_v14  ;;  %v4206_v22 = vmul.f32 %v10216_v62, %v10173_v45  ;;  %6833 = vrcp.f32 %v10181_v23 }
 0x5f0   : > { %15224 = vst [vmem:[#allocation212_spill] sm:$0xff] %v10243_v15  ;;  %vm3552_vm4 = vweird.f32 %v10062_v41  ;;  %v10249_v40 = vpop.eup %6829  ;;  %v2993_v5 = vmul.f32 1.442695, %v2566_v11  ;;  %v2567_v59 = vsub.f32 %v15225_v8, %v9810_v17  ;;  %vm3986_vm5 = vweird.f32 %v10074_v46 }
 0x5f1   : > { %v3969_v57 = vsub.f32 1.0, %v3968_v36  ;;  %vm3554_vm6 = vmor %vm3552_vm4, %vm3553_vm2  ;;  %v10256_v14 = vpop.eup %6831  ;;  %v3993_v20 = vor.u32 1.1754944e-38, %v3992_v55  ;;  %6835 = vrcp.f32 %v10232_v2  ;;  %v3559_v11 = vor.u32 1.1754944e-38, %v3558_v47  ;;  %v15228_v55 = vld [vmem:[#allocation173_spill] sm:$0xff]  ;;  %v15232_v47 = vld [vmem:[#allocation24_spill] sm:$0xff] }
 0x5f2   : > { %15226 = vst [vmem:[#allocation214_spill] sm:$0xff] %v10256_v14  ;;  %vm3988_vm7 = vmor %vm3986_vm5, %vm3987_vm3  ;;  %v3555_v41 = vsel %vm3554_vm6, %v10135_v31, %v3551_v33  ;;  %v2568_v19 = vsub.f32 %v15227_v60, %v9810_v17  ;;  %vm3557_vm8 = vcmp.eq.f32.partialorder %v3556_v37, 8.507059e+37  ;;  %vm3991_vm9 = vcmp.eq.f32.partialorder %v3990_v10, 8.507059e+37  ;;  %v15231_v33 = vld [vmem:[#allocation22_spill] sm:$0xff] }
 0x5f3   : > { %v3989_v46 = vsel %vm3988_vm7, %v10128_v54, %v3985_v61  ;;  %v3954_v36 = vmul.f32 %v10249_v40, %v10132_v50  ;;  %v4207_v8 = vsub.f32 1.0, %v4206_v22  ;;  %v3560_v3 = vsel %vm3557_vm8, %v3559_v11, %v3555_v41  ;;  %v15233_v54 = vld [vmem:[#allocation262_spill] sm:$0xff]  ;;  %v10275_v61 = vpop.xlane.xlu1 %3299  ;;  %v15235_v11 = vld [vmem:[#allocation57_spill] sm:$0xff] }
 0x5f4   : > { %v15230_v48 = vmax.f32 %v15228_v55, %v15229_v25  ;;  %v3994_v31 = vsel %vm3991_vm9, %v3993_v20, %v3989_v46  ;;  %6837 = vrcp.f32 %v10227_v21  ;;  %v5339_v17 = vmul.f32 %v15231_v33, %v3560_v3  ;;  %3323 = vadd.xlane.f32.xlu1 %v15233_v54  ;;  %v10277_v10 = vpop.xlane.xlu0 %2291  ;;  %v15236_v33 = vld [vmem:[#allocation134_spill] sm:$0xff]  ;;  %v15238_v54 = vld [vmem:[#allocation167_spill] sm:$0xff] }
 0x5f5   : > { %3278 = vadd.xlane.f32.xlu0 %v9403_v39  ;;  %v5340_v37 = vmul.f32 %v15232_v47, %v3560_v3  ;;  %v3970_v22 = vmul.f32 %v10202_v52, %v3969_v57  ;;  %v10280_v39 = vpop.eup %6833  ;;  %6839 = vpow2.f32 %v2989_v0  ;;  %v2995_v41 = vmul.f32 1.442695, %v2567_v59  ;;  %v10284_v46 = vpop.xlane.xlu2 %2294  ;;  %v15237_v3 = vld [vmem:[#allocation128_spill] sm:$0xff]  ;;  %v15240_v57 = vld [vmem:[#allocation126_spill] sm:$0xff] }
 0x5f6   : > { %2327 = vmax.xlane.f32.xlu2 %v15230_v48  ;;  %v15234_v48 = vld [vmem:[#allocation13_spill] sm:$0xff]  ;;  %v5402_v60 = vmul.f32 %v15235_v11, %v3994_v31  ;;  %v2368_v47 = vmax.f32 %v15237_v3, %v15236_v33  ;;  %6841 = vpow2.f32 %v2991_v6  ;;  %5610 = vmatpush.xpose.msra.mxu2 %v5339_v17  ;;  %v3319_v30 = vadd.f32 %v15239_v56, %v15238_v54  ;;  %v15243_v11 = vld [vmem:[#allocation238_spill] sm:$0xff]  ;;  %v15249_v54 = vld [vmem:[#allocation131_spill] sm:$0xff] }
 0x5f7   : > { %v5401_v20 = vmul.f32 %v15234_v48, %v3994_v31  ;;  %5630 = vmatpush.xpose.msra.mxu3 %v5340_v37  ;;  %v10292_v15 = vadd.f32 %v15241_v18, %v15240_v57  ;;  %v10294_v0 = vpop.eup %6835  ;;  %6843 = vpow2.f32 %v2993_v5  ;;  %v10296_v59 = vmul.f32 1.442695, %v2568_v19  ;;  %v15242_v5 = vld [vmem:[#allocation81_spill] sm:$0xff]  ;;  %v15326_v33 = vld [vmem:[#allocation94_spill] sm:$0xff] }
 0x5f8   : > { %v4208_v31 = vmul.f32 %v10216_v62, %v4207_v8  ;;  %v4216_v48 = vand.u32 2147483648, %v10173_v45  ;;  %v3955_v6 = vsub.f32 1.0, %v3954_v36  ;;  %v10302_v17 = vmul.f32 %v10280_v39, %v10181_v23  ;;  %v15245_v36 = vld [vmem:[#allocation30_spill] sm:$0xff] }
 0x5f9   : > { %v3971_v37 = vadd.f32 %v10202_v52, %v3970_v22  ;;  %vm3973_vm10 = vweird.f32 %v10202_v52  ;;  %6845 = vpow2.f32 %v2995_v41  ;;  %v2569_v19 = vsub.f32 %v15242_v5, %v9873_v24 }
 0x5fa   : > { %5635 = vmatpush.xpose.msrb.mxu2 %v5401_v20  ;;  %v2570_v8 = vsub.f32 %v15243_v11, %v9873_v24  ;;  %vm4211_vm11 = vweird.f32 %v10216_v62  ;;  %v15244_v20 = vld [vmem:[#allocation171_spill] sm:$0xff]  ;;  %5631 = vmatmul.f32.vlgmr.msra.gmra.mxu3 %v15245_v36  ;;  %vm4210_vm12 = vweird.f32 %v10173_v45  ;;  %v4192_v22 = vmul.f32 %v10294_v0, %v10232_v2 }
 0x5fb   : > { %5655 = vmatpush.xpose.msrb.mxu3 %v5402_v60  ;;  %5611 = vmatmul.f32.vlgmr.msra.gmra.mxu2 %v15244_v20  ;;  %v10313_v60 = vpop.eup %6837  ;;  %vm3972_vm13 = vweird.f32 %v10119_v49  ;;  %v3976_v41 = vand.u32 2147483647, %v10119_v49  ;;  %v4217_v24 = vor.u32 1.1754944e-38, %v4216_v48  ;;  %v3978_v18 = vand.u32 2147483648, %v10119_v49  ;;  %vm10334_vm15 = vmor %vm4210_vm12, %vm4211_vm11 }
 0x5fc   : > { %v10320_v5 = vpop.eup %6839  ;;  %vm10322_vm14 = vmor %vm3972_vm13, %vm3973_vm10  ;;  %v4209_v57 = vadd.f32 %v10216_v62, %v4208_v31  ;;  %v4214_v56 = vand.u32 2147483647, %v10173_v45  ;;  %v3941_v48 = vsub.f32 1.0, %v10302_v17  ;;  %6847 = vrcp.f32 %v10275_v61  ;;  %2369 = vmax.xlane.f32.xlu1 %v2368_v47 }
 0x5fd   : > { %15246 = vst [vmem:[#allocation61_spill] sm:$0xff] %v10320_v5  ;;  %3320 = vadd.xlane.f32.xlu0 %v3319_v30  ;;  %v10330_v32 = vpop.eup %6841  ;;  %v3975_v49 = vsel %vm10322_vm14, %v10202_v52, %v3971_v37  ;;  %v3956_v45 = vmul.f32 %v10249_v40, %v3955_v6  ;;  %v10344_v30 = vpop.xlane.xlu1 %2297  ;;  %v3926_v14 = vmul.f32 %v10313_v60, %v10227_v21  ;;  %v4193_v52 = vsub.f32 1.0, %v4192_v22  ;;  %v15260_v22 = vld [vmem:[#allocation93_spill] sm:$0xff] }
 0x5fe   : > { %3218 = vadd.xlane.f32.xlu2 %v15249_v54  ;;  %15250 = vst [vmem:[#allocation209_spill] sm:$0xff] %v10330_v32  ;;  %v10346_v54 = vpop.xlane.xlu0 %3344  ;;  %v10348_v31 = vpop.eup %6843  ;;  %v3979_v32 = vor.u32 1.1754944e-38, %v3978_v18  ;;  %v4213_v17 = vsel %vm10334_vm15, %v10216_v62, %v4209_v57  ;;  %vm4215_vm1 = vcmp.eq.f32.partialorder %v4214_v56, 8.507059e+37  ;;  %vm3977_vm2 = vcmp.eq.f32.partialorder %v3976_v41, 8.507059e+37  ;;  %v15258_v18 = vld [vmem:[#allocation80_spill] sm:$0xff]  ;;  %v15259_v62 = vld [vmem:[#allocation19_spill] sm:$0xff] }
 0x5ff   : > { %15253 = vst [vmem:[#allocation56_spill] sm:$0xff] %v10346_v54  ;;  %v10355_v11 = vpop.xlane.xlu2 %3242  ;;  %v4218_v47 = vsel %vm4215_vm1, %v4217_v24, %v4213_v17  ;;  %v3957_v6 = vadd.f32 %v10249_v40, %v3956_v45  ;;  %v10358_v37 = vpop.eup %6845  ;;  %vm3959_vm3 = vweird.f32 %v10249_v40  ;;  %vm3958_vm4 = vweird.f32 %v10132_v50  ;;  %v15261_v41 = vld [vmem:[#allocation86_spill] sm:$0xff] }
 0x600   : > { %15254 = vst [vmem:[#allocation70_spill] sm:$0xff] %v10348_v31  ;;  %v3980_v36 = vsel %vm3977_vm2, %v3979_v32, %v3975_v49  ;;  %v15256_v31 = vld [vmem:[#allocation11_spill] sm:$0xff]  ;;  %v5434_v38 = vmul.f32 %v15257_v44, %v4218_v47  ;;  %v3962_v57 = vand.u32 2147483647, %v10132_v50  ;;  %v2365_v24 = vmax.f32 %v15261_v41, %v15260_v22  ;;  %vm10369_vm5 = vmor %vm3958_vm4, %vm3959_vm3 }
 0x601   : > { %15255 = vst [vmem:[#allocation52_spill] sm:$0xff] %v10358_v37  ;;  %v5433_v20 = vmul.f32 %v15256_v31, %v4218_v47  ;;  %v5399_v5 = vmul.f32 %v15258_v18, %v3980_v36  ;;  %v5400_v56 = vmul.f32 %v15259_v62, %v3980_v36  ;;  %v3927_v45 = vsub.f32 1.0, %v3926_v14  ;;  %v15264_v14 = vld [vmem:[#allocation204_spill] sm:$0xff] }
 0x602   : > { %5695 = vmatpush.xpose.msrb.mxu1 %v5434_v38  ;;  %v3964_v44 = vand.u32 2147483648, %v10132_v50  ;;  %6849 = vrcp.f32 %v10355_v11  ;;  %v10375_v49 = vpop.eup %6847  ;;  %v10378_v36 = vmul.f32 1.442695, %v2569_v19  ;;  %v10380_v31 = vmul.f32 1.442695, %v2570_v8  ;;  %v15265_v8 = vld [vmem:[#allocation12_spill] sm:$0xff] }
 0x603   : > { %5675 = vmatpush.xpose.msrb.mxu0 %v5433_v20  ;;  %6851 = vpow2.f32 %v10296_v59  ;;  %5636 = vmatpush.xpose.msrb.mxu2 %v5399_v5  ;;  %v3961_v38 = vsel %vm10369_vm5, %v10249_v40, %v3957_v6  ;;  %v4194_v50 = vmul.f32 %v10294_v0, %v4193_v52  ;;  %vm4196_vm6 = vweird.f32 %v10232_v2  ;;  %v15266_v40 = vld [vmem:[#allocation170_spill] sm:$0xff] }
 0x604   : > { %5656 = vmatpush.xpose.msrb.mxu3 %v5400_v56  ;;  %v3965_v17 = vor.u32 1.1754944e-38, %v3964_v44  ;;  %v4202_v59 = vand.u32 2147483648, %v10232_v2  ;;  %vm3930_vm7 = vweird.f32 %v10227_v21  ;;  %vm3963_vm8 = vcmp.eq.f32.partialorder %v3962_v57, 8.507059e+37  ;;  %v15268_v56 = vld [vmem:[#allocation104_spill] sm:$0xff] }
 0x605   : > { %2366 = vmax.xlane.f32.xlu0 %v2365_v24  ;;  %v3942_v19 = vmul.f32 %v10280_v39, %v3941_v48  ;;  %v15267_v47 = vmax.f32 %v15265_v8, %v15266_v40  ;;  %v10396_v6 = vpop.xlane.xlu1 %2393  ;;  %v3928_v18 = vmul.f32 %v10313_v60, %v3927_v45  ;;  %vm3945_vm9 = vweird.f32 %v10280_v39  ;;  %v15269_v57 = vld [vmem:[#allocation112_spill] sm:$0xff]  ;;  %v15319_v40 = vld [vmem:[#allocation66_spill] sm:$0xff] }
 0x606   : > { %3275 = vadd.xlane.f32.xlu2 %v10211_v29  ;;  %v10398_v52 = vpop.xlane.xlu0 %2390  ;;  %v4178_v29 = vmul.f32 %v10375_v49, %v10275_v61  ;;  %v3966_v5 = vsel %vm3963_vm8, %v3965_v17, %v3961_v38  ;;  %vm3944_vm10 = vweird.f32 %v10181_v23  ;;  %v3936_v45 = vand.u32 2147483648, %v10227_v21 }
 0x607   : > { %2324 = vmax.xlane.f32.xlu1 %v15267_v47  ;;  %v10404_v62 = vpop.xlane.xlu2 %2288  ;;  %v5397_v48 = vmul.f32 %v15268_v56, %v3966_v5  ;;  %v5398_v24 = vmul.f32 %v15269_v57, %v3966_v5  ;;  %v3943_v32 = vadd.f32 %v10280_v39, %v3942_v19  ;;  %vm10413_vm11 = vmor %vm3944_vm10, %vm3945_vm9  ;;  %v3948_v38 = vand.u32 2147483647, %v10181_v23 }
 0x608   : > { %v10410_v44 = vpop.eup %6849  ;;  %v3950_v17 = vand.u32 2147483648, %v10181_v23  ;;  %v4195_v56 = vadd.f32 %v10294_v0, %v4194_v50  ;;  %v4203_v5 = vor.u32 1.1754944e-38, %v4202_v59  ;;  %vm4197_vm12 = vweird.f32 %v10294_v0 }
 0x609   : > { %v10420_v20 = vpop.eup %6851  ;;  %5637 = vmatpush.xpose.msrb.mxu2 %v5397_v48  ;;  %5657 = vmatpush.xpose.msrb.mxu3 %v5398_v24  ;;  %v3947_v19 = vsel %vm10413_vm11, %v10280_v39, %v3943_v32  ;;  %v4200_v57 = vand.u32 2147483647, %v10232_v2  ;;  %v4179_v37 = vsub.f32 1.0, %v4178_v29  ;;  %vm4198_vm13 = vmor %vm4196_vm6, %vm4197_vm12  ;;  %v3929_v23 = vadd.f32 %v10313_v60, %v3928_v18  ;;  %v15275_v24 = vld [vmem:[#allocation145_spill] sm:$0xff]  ;;  %v15276_v32 = vld [vmem:[#allocation166_spill] sm:$0xff] }
 0x60a   : > { %15272 = vst [vmem:[#allocation55_spill] sm:$0xff] %v10420_v20  ;;  %v3951_v22 = vor.u32 1.1754944e-38, %v3950_v17  ;;  %vm3931_vm14 = vweird.f32 %v10313_v60  ;;  %v3912_v50 = vmul.f32 %v10410_v44, %v10355_v11  ;;  %vm3949_vm15 = vcmp.eq.f32.partialorder %v3948_v38, 8.507059e+37 }
 0x60b   : > { %v4199_v59 = vsel %vm4198_vm13, %v10294_v0, %v4195_v56  ;;  %vm4201_vm1 = vcmp.eq.f32.partialorder %v4200_v57, 8.507059e+37  ;;  %vm10436_vm2 = vmor %vm3930_vm7, %vm3931_vm14  ;;  %v3934_v48 = vand.u32 2147483647, %v10227_v21  ;;  %v15277_v47 = vmax.f32 %v15275_v24, %v15276_v32  ;;  %v15278_v0 = vld [vmem:[#allocation150_spill] sm:$0xff]  ;;  %v15279_v56 = vld [vmem:[#allocation72_spill] sm:$0xff] }
 0x60c   : > { %v3952_v29 = vsel %vm3949_vm15, %v3951_v22, %v3947_v19  ;;  %v4204_v2 = vsel %vm4201_vm1, %v4203_v5, %v4199_v59  ;;  %v3933_v18 = vsel %vm10436_vm2, %v10313_v60, %v3929_v23  ;;  %v2572_v38 = vsub.f32 %v15278_v0, %v9948_v27  ;;  %v15280_v22 = vld [vmem:[#allocation21_spill] sm:$0xff]  ;;  %v15284_v0 = vld [vmem:[#allocation252_spill] sm:$0xff] }
 0x60d   : > { %2321 = vmax.xlane.f32.xlu0 %v15277_v47  ;;  %v3937_v17 = vor.u32 1.1754944e-38, %v3936_v45  ;;  %v5395_v57 = vmul.f32 %v15279_v56, %v3952_v29  ;;  %v5396_v5 = vmul.f32 %v15280_v22, %v3952_v29  ;;  %v15281_v19 = vld [vmem:[#allocation253_spill] sm:$0xff]  ;;  %v10453_v59 = vpop.xlane.xlu1 %3239  ;;  %v4180_v21 = vmul.f32 %v10375_v49, %v4179_v37  ;;  %v15285_v56 = vld [vmem:[#allocation254_spill] sm:$0xff] }
 0x60e   : > { %3317 = vadd.xlane.f32.xlu2 %v10292_v15  ;;  %v10455_v60 = vpop.xlane.xlu0 %2345  ;;  %v15282_v23 = vld [vmem:[#allocation109_spill] sm:$0xff]  ;;  %vm3935_vm3 = vcmp.eq.f32.partialorder %v3934_v48, 8.507059e+37  ;;  %6853 = vpow2.f32 %v10378_v36  ;;  %v4188_v45 = vand.u32 2147483648, %v10275_v61  ;;  %v10466_v22 = vadd.f32 %v15285_v56, %v15284_v0  ;;  %v15286_v37 = vld [vmem:[#allocation54_spill] sm:$0xff]  ;;  %v15299_v0 = vld [vmem:[#allocation7_spill] sm:$0xff] }
 0x60f   : > { %3215 = vadd.xlane.f32.xlu1 %v15281_v19  ;;  %v5431_v39 = vmul.f32 %v15282_v23, %v4204_v2  ;;  %v15283_v47 = vld [vmem:[#allocation125_spill] sm:$0xff]  ;;  %v10460_v20 = vpop.xlane.xlu2 %3341  ;;  %5638 = vmatpush.xpose.msrb.mxu2 %v5395_v57  ;;  %v3938_v29 = vsel %vm3935_vm3, %v3937_v17, %v3933_v18  ;;  %v3913_v19 = vsub.f32 1.0, %v3912_v50  ;;  %vm4183_vm4 = vweird.f32 %v10375_v49  ;;  %v15291_v57 = vld [vmem:[#allocation256_spill] sm:$0xff]  ;;  %v15297_v56 = vld [vmem:[#allocation130_spill] sm:$0xff] }
 0x610   : > { %v5432_v15 = vmul.f32 %v15283_v47, %v4204_v2  ;;  %5658 = vmatpush.xpose.msrb.mxu3 %v5396_v5  ;;  %v5393_v23 = vmul.f32 %v15286_v37, %v3938_v29  ;;  %v15287_v2 = vld [vmem:[#allocation67_spill] sm:$0xff]  ;;  %v15288_v47 = vld [vmem:[#allocation118_spill] sm:$0xff]  ;;  %v15289_v36 = vld [vmem:[#allocation105_spill] sm:$0xff]  ;;  %6855 = vpow2.f32 %v10380_v31  ;;  %v15290_v18 = vsub.f32 %v15264_v14, %v9948_v27 }
 0x611   : > { %5676 = vmatpush.xpose.msrb.mxu0 %v5431_v39  ;;  %v5394_v48 = vmul.f32 %v15287_v2, %v3938_v29  ;;  %v2362_v32 = vmax.f32 %v15289_v36, %v15288_v47  ;;  %v15292_v5 = vld [vmem:[#allocation133_spill] sm:$0xff]  ;;  %v3005_v39 = vmul.f32 1.442695, %v2572_v38  ;;  %vm4182_vm5 = vweird.f32 %v10275_v61  ;;  %v15294_v2 = vld [vmem:[#allocation64_spill] sm:$0xff] }
 0x612   : > { %5696 = vmatpush.xpose.msrb.mxu1 %v5432_v15  ;;  %v3003_v17 = vmul.f32 1.442695, %v15290_v18  ;;  %v10479_v50 = vadd.f32 %v15292_v5, %v15291_v57  ;;  %v4181_v15 = vadd.f32 %v10375_v49, %v4180_v21  ;;  %v4186_v29 = vand.u32 2147483647, %v10275_v61  ;;  %v15293_v37 = vld [vmem:[#allocation201_spill] sm:$0xff]  ;;  %v15295_v27 = vld [vmem:[#allocation168_spill] sm:$0xff]  ;;  %vm4184_vm6 = vmor %vm4182_vm5, %vm4183_vm4 }
 0x613   : > { %6857 = vrcp.f32 %v10122_v35  ;;  %v4189_v31 = vor.u32 1.1754944e-38, %v4188_v45  ;;  %v2585_v14 = vsub.f32 %v15295_v27, %v10344_v30  ;;  %5639 = vmatpush.xpose.msrb.mxu2 %v5393_v23  ;;  %v3914_v38 = vmul.f32 %v10410_v44, %v3913_v19  ;;  %v15296_v21 = vld [vmem:[#allocation261_spill] sm:$0xff]  ;;  %v15302_v19 = vld [vmem:[#allocation266_spill] sm:$0xff] }
 0x614   : > { %5659 = vmatpush.xpose.msrb.mxu3 %v5394_v48  ;;  %v2586_v18 = vsub.f32 %v15296_v21, %v10344_v30  ;;  %v4185_v61 = vsel %vm4184_vm6, %v10375_v49, %v4181_v15  ;;  %vm4187_vm7 = vcmp.eq.f32.partialorder %v4186_v29, 8.507059e+37  ;;  %v10496_v45 = vpop.eup %6853  ;;  %v15300_v27 = vld [vmem:[#allocation69_spill] sm:$0xff]  ;;  %6859 = vpow2.f32 %v3003_v17  ;;  %v15301_v48 = vld [vmem:[#allocation115_spill] sm:$0xff]  ;;  %v15306_v23 = vld [vmem:[#allocation18_spill] sm:$0xff] }
 0x615   : > { %3212 = vadd.xlane.f32.xlu0 %v15297_v56  ;;  %15298 = vst [vmem:[#allocation208_spill] sm:$0xff] %v10496_v45  ;;  %v2573_v5 = vsub.f32 %v15301_v48, %v10004_v28  ;;  %v4190_v57 = vsel %vm4187_vm7, %v4189_v31, %v4185_v61  ;;  %v10503_v47 = vpop.xlane.xlu1 %3296  ;;  %6861 = vpow2.f32 %v3005_v39  ;;  %v3922_v49 = vand.u32 2147483648, %v10355_v11  ;;  %v15304_v15 = vld [vmem:[#allocation251_spill] sm:$0xff]  ;;  %v15307_v48 = vld [vmem:[#allocation78_spill] sm:$0xff]  ;;  %v15308_v61 = vld [vmem:[#allocation153_spill] sm:$0xff] }
 0x616   : > { %2363 = vmax.xlane.f32.xlu2 %v2362_v32  ;;  %v10505_v30 = vpop.xlane.xlu0 %2387  ;;  %v15303_v32 = vld [vmem:[#allocation249_spill] sm:$0xff]  ;;  %v5430_v29 = vmul.f32 %v15304_v15, %v4190_v57  ;;  %v10512_v17 = vpop.eup %6855  ;;  %6863 = vrcp.f32 %v10223_v26  ;;  %v3031_v36 = vmul.f32 1.442695, %v2585_v14  ;;  %vm3916_vm8 = vweird.f32 %v10355_v11  ;;  %v15310_v31 = vld [vmem:[#allocation132_spill] sm:$0xff] }
 0x617   : > { %3272 = vadd.xlane.f32.xlu1 %v15302_v19  ;;  %v5429_v56 = vmul.f32 %v15303_v32, %v4190_v57  ;;  %v10510_v21 = vpop.xlane.xlu2 %2285  ;;  %15305 = vst [vmem:[#allocation210_spill] sm:$0xff] %v10512_v17  ;;  %v2574_v19 = vsub.f32 %v15308_v61, %v10004_v28  ;;  %v3033_v39 = vmul.f32 1.442695, %v2586_v18  ;;  %v3915_v57 = vadd.f32 %v10410_v44, %v3914_v38  ;;  %v15313_v18 = vld [vmem:[#allocation255_spill] sm:$0xff]  ;;  %v15316_v61 = vld [vmem:[#allocation33_spill] sm:$0xff]  ;;  %v15321_v28 = vld [vmem:[#allocation144_spill] sm:$0xff] }
 0x618   : > { %5697 = vmatpush.xpose.msrb.mxu1 %v5430_v29  ;;  %vm3917_vm9 = vweird.f32 %v10410_v44  ;;  %v3007_v15 = vmul.f32 1.442695, %v2573_v5  ;;  %v2583_v24 = vsub.f32 %v15310_v31, %v10284_v46  ;;  %6865 = vrcp.f32 %v10453_v59  ;;  %v15315_v31 = vld [vmem:[#allocation46_spill] sm:$0xff] }
 0x619   : > { %5677 = vmatpush.xpose.msrb.mxu0 %v5429_v56  ;;  %v10522_v32 = vpop.eup %6857  ;;  %vm10527_vm10 = vmor %vm3916_vm8, %vm3917_vm9  ;;  %v3920_v14 = vand.u32 2147483647, %v10355_v11  ;;  %v2584_v56 = vsub.f32 %v15313_v18, %v10284_v46  ;;  %v3923_v38 = vor.u32 1.1754944e-38, %v3922_v49  ;;  %6867 = vrcp.f32 %v10503_v47  ;;  %v15318_v11 = vld [vmem:[#allocation71_spill] sm:$0xff]  ;;  %v15322_v18 = vld [vmem:[#allocation165_spill] sm:$0xff] }
 0x61a   : > { %15309 = vst [vmem:[#allocation74_spill] sm:$0xff] %v10522_v32  ;;  %v3919_v29 = vsel %vm10527_vm10, %v10410_v44, %v3915_v57  ;;  %v10538_v5 = vpop.eup %6859  ;;  %v3009_v45 = vmul.f32 1.442695, %v2574_v19  ;;  %6869 = vpow2.f32 %v3031_v36  ;;  %v2359_v46 = vmax.f32 %v15319_v40, %v15318_v11  ;;  %v15320_v57 = vld [vmem:[#allocation5_spill] sm:$0xff]  ;;  %v15325_v19 = vld [vmem:[#allocation38_spill] sm:$0xff]  ;;  %v15327_v11 = vld [vmem:[#allocation103_spill] sm:$0xff] }
 0x61b   : > { %15314 = vst [vmem:[#allocation47_spill] sm:$0xff] %v10538_v5  ;;  %vm3921_vm11 = vcmp.eq.f32.partialorder %v3920_v14, 8.507059e+37  ;;  %v10542_v41 = vpop.eup %6861  ;;  %v4430_v49 = vmul.f32 %v10522_v32, %v10122_v35  ;;  %6871 = vpow2.f32 %v3033_v39  ;;  %v15323_v8 = vmax.f32 %v15321_v28, %v15322_v18  ;;  %v15333_v28 = vld [vmem:[#allocation270_spill] sm:$0xff] }
 0x61c   : > { %15317 = vst [vmem:[#allocation51_spill] sm:$0xff] %v10542_v41  ;;  %v3924_v44 = vsel %vm3921_vm11, %v3923_v38, %v3919_v29  ;;  %v10552_v17 = vpop.eup %6863  ;;  %v3027_v36 = vmul.f32 1.442695, %v2583_v24  ;;  %v2581_v14 = vsub.f32 %v15325_v19, %v10277_v10  ;;  %v15328_v41 = vld [vmem:[#allocation10_spill] sm:$0xff]  ;;  %6873 = vpow2.f32 %v3007_v15 }
 0x61d   : > { %3269 = vadd.xlane.f32.xlu0 %v15320_v57  ;;  %15324 = vst [vmem:[#allocation213_spill] sm:$0xff] %v10552_v17  ;;  %v5391_v3 = vmul.f32 %v15326_v33, %v3924_v44  ;;  %v5392_v40 = vmul.f32 %v15327_v11, %v3924_v44  ;;  %v10559_v39 = vpop.xlane.xlu1 %3236  ;;  %v4440_v29 = vand.u32 2147483648, %v10122_v35  ;;  %v15329_v57 = vld [vmem:[#allocation137_spill] sm:$0xff]  ;;  %6875 = vpow2.f32 %v3009_v45  ;;  %v15331_v11 = vld [vmem:[#allocation16_spill] sm:$0xff]  ;;  %v15332_v44 = vld [vmem:[#allocation151_spill] sm:$0xff] }
 0x61e   : > { %2318 = vmax.xlane.f32.xlu2 %v15323_v8  ;;  %v10561_v38 = vpop.xlane.xlu0 %2342  ;;  %v3029_v8 = vmul.f32 1.442695, %v2584_v56  ;;  %v2582_v24 = vsub.f32 %v15329_v57, %v10277_v10  ;;  %v10568_v19 = vpop.eup %6865  ;;  %v15330_v33 = vld [vmem:[#allocation85_spill] sm:$0xff]  ;;  %v10576_v15 = vadd.f32 %v15332_v44, %v15331_v11  ;;  %v15334_v56 = vld [vmem:[#allocation271_spill] sm:$0xff]  ;;  %6877 = vrcp.f32 %v10177_v7 }
 0x61f   : > { %3314 = vadd.xlane.f32.xlu1 %v15328_v41  ;;  %v10566_v18 = vpop.xlane.xlu2 %3338  ;;  %5640 = vmatpush.xpose.msrb.mxu2 %v5391_v3  ;;  %v10572_v41 = vadd.f32 %v15330_v33, %v9889_v42  ;;  %v10580_v35 = vadd.f32 %v15334_v56, %v15333_v28  ;;  %v10582_v10 = vpop.eup %6867  ;;  %v3898_v3 = vmul.f32 %v10568_v19, %v10453_v59  ;;  %v15337_v45 = vld [vmem:[#allocation17_spill] sm:$0xff]  ;;  %v15338_v33 = vld [vmem:[#allocation192_spill] sm:$0xff]  ;;  %v4431_v11 = vsub.f32 1.0, %v4430_v49 }
 0x620   : > { %5660 = vmatpush.xpose.msrb.mxu3 %v5392_v40  ;;  %v15336_v40 = vld [vmem:[#allocation197_spill] sm:$0xff]  ;;  %v10595_v44 = vpop.eup %6869  ;;  %6879 = vpow2.f32 %v3027_v36  ;;  %v3023_v56 = vmul.f32 1.442695, %v2581_v14  ;;  %v4164_v28 = vmul.f32 %v10582_v10, %v10503_v47  ;;  %v10601_v55 = vor.u32 1.1754944e-38, %v4440_v29 }
 0x621   : > { %15335 = vst [vmem:[#allocation36_spill] sm:$0xff] %v10580_v35  ;;  %v10589_v57 = vadd.f32 %v15337_v45, %v15336_v40  ;;  %v15339_v42 = vld [vmem:[#allocation205_spill] sm:$0xff]  ;;  %v10599_v25 = vpop.eup %6871  ;;  %6881 = vpow2.f32 %v3029_v8  ;;  %v3025_v9 = vmul.f32 1.442695, %v2582_v24  ;;  %v3899_v45 = vsub.f32 1.0, %v3898_v3  ;;  %v15343_v40 = vld [vmem:[#allocation107_spill] sm:$0xff] }
 0x622   : > { %v10593_v5 = vadd.f32 %v15339_v42, %v15338_v33  ;;  %15340 = vst [vmem:[#allocation37_spill] sm:$0xff] %v10595_v44  ;;  %v2579_v43 = vsub.f32 %v15343_v40, %v10404_v62  ;;  %v15344_v42 = vld [vmem:[#allocation108_spill] sm:$0xff]  ;;  %v3908_v49 = vand.u32 2147483648, %v10453_v59  ;;  %6883 = vrcp.f32 %v10559_v39  ;;  %v10609_v36 = vpop.eup %6873 }
 0x623   : > { %15341 = vst [vmem:[#allocation106_spill] sm:$0xff] %v10599_v25  ;;  %v2580_v33 = vsub.f32 %v15344_v42, %v10404_v62  ;;  %v3900_v14 = vmul.f32 %v10568_v19, %v3899_v45  ;;  %v4165_v53 = vsub.f32 1.0, %v4164_v28  ;;  %vm3903_vm12 = vweird.f32 %v10568_v19  ;;  %v10615_v8 = vpop.eup %6875  ;;  %v15361_v35 = vld [vmem:[#allocation164_spill] sm:$0xff] }
 0x624   : > { %15342 = vst [vmem:[#allocation219_spill] sm:$0xff] %v10601_v55  ;;  %v3906_v29 = vand.u32 2147483647, %v10453_v59  ;;  %v10618_v24 = vmul.f32 %v10522_v32, %v4431_v11  ;;  %v4412_v42 = vand.u32 2147483648, %v10223_v26  ;;  %6885 = vpow2.f32 %v3023_v56  ;;  %v10623_v3 = vpop.eup %6877  ;;  %v15353_v32 = vld [vmem:[#allocation68_spill] sm:$0xff] }
 0x625   : > { %15345 = vst [vmem:[#allocation41_spill] sm:$0xff] %v10609_v36  ;;  %v3448_v62 = vadd.f32 %v10599_v25, %v10595_v44  ;;  %v10627_v28 = vmul.f32 %v10552_v17, %v10223_v26  ;;  %6887 = vpow2.f32 %v3025_v9  ;;  %vm3902_vm13 = vweird.f32 %v10453_v59  ;;  %v15350_v25 = vld [vmem:[#allocation29_spill] sm:$0xff]  ;;  %v10641_v9 = vpop.xlane.xlu1 %3293 }
 0x626   : > { %3311 = vadd.xlane.f32.xlu2 %v10479_v50  ;;  %15346 = vst [vmem:[#allocation42_spill] sm:$0xff] %v10615_v8  ;;  %v3901_v50 = vadd.f32 %v10568_v19, %v3900_v14  ;;  %v10633_v40 = vpop.xlane.xlu0 %2384  ;;  %v10635_v56 = vpop.eup %6879  ;;  %v3021_v45 = vmul.f32 1.442695, %v2580_v33  ;;  %v2649_v44 = vsub.f32 %v15350_v25, %v10396_v6  ;;  %v3909_v55 = vor.u32 1.1754944e-38, %v3908_v49  ;;  %vm3904_vm14 = vmor %vm3902_vm13, %vm3903_vm12  ;;  %v15352_v25 = vld [vmem:[#allocation20_spill] sm:$0xff]  ;;  %v15354_v8 = vld [vmem:[#allocation58_spill] sm:$0xff] }
 0x627   : > { %15347 = vst [vmem:[#allocation76_spill] sm:$0xff] %v10618_v24  ;;  %2360 = vmax.xlane.f32.xlu1 %v2359_v46  ;;  %v10631_v11 = vpop.xlane.xlu2 %2282  ;;  %v3019_v46 = vmul.f32 1.442695, %v2579_v43  ;;  %3449 = vadd.xlane.f32.xlu0 %v3448_v62  ;;  %v10643_v59 = vpop.eup %6881  ;;  %v4166_v14 = vmul.f32 %v10582_v10, %v4165_v53  ;;  %vm3907_vm15 = vcmp.eq.f32.partialorder %v3906_v29, 8.507059e+37  ;;  %6889 = vrcp.f32 %v10641_v9 }
 0x628   : > { %15348 = vst [vmem:[#allocation25_spill] sm:$0xff] %v10623_v3  ;;  %v3905_v26 = vsel %vm3904_vm14, %v10568_v19, %v3901_v50  ;;  %v10648_v43 = vpop.eup %6883  ;;  %v2650_v33 = vsub.f32 %v15352_v25, %v10396_v6  ;;  %v4174_v49 = vand.u32 2147483648, %v10503_v47  ;;  %vm4169_vm1 = vweird.f32 %v10582_v10 }
 0x629   : > { %15349 = vst [vmem:[#allocation32_spill] sm:$0xff] %v10635_v56  ;;  %v3910_v24 = vsel %vm3907_vm15, %v3909_v55, %v3905_v26  ;;  %v3884_v62 = vmul.f32 %v10648_v43, %v10559_v39  ;;  %v4172_v29 = vand.u32 2147483647, %v10503_v47  ;;  %v10663_v36 = vmul.f32 %v10623_v3, %v10177_v7  ;;  %v15357_v26 = vld [vmem:[#allocation147_spill] sm:$0xff]  ;;  %v15359_v3 = vld [vmem:[#allocation6_spill] sm:$0xff] }
 0x62a   : > { %15351 = vst [vmem:[#allocation77_spill] sm:$0xff] %v10643_v59  ;;  %v5389_v53 = vmul.f32 %v15353_v32, %v3910_v24  ;;  %v5390_v19 = vmul.f32 %v15354_v8, %v3910_v24  ;;  %v10659_v50 = vpop.eup %6885  ;;  %v10665_v6 = vor.u32 1.1754944e-38, %v4412_v42  ;;  %6891 = vrcp.f32 %v10346_v54 }
 0x62b   : > { %15355 = vst [vmem:[#allocation111_spill] sm:$0xff] %v10659_v50  ;;  %v2647_v55 = vsub.f32 %v15357_v26, %v10398_v52  ;;  %v10670_v25 = vpop.eup %6887  ;;  %v3159_v32 = vmul.f32 1.442695, %v2649_v44  ;;  %vm4168_vm2 = vweird.f32 %v10503_v47  ;;  %v3885_v8 = vsub.f32 1.0, %v3884_v62  ;;  %v15360_v26 = vld [vmem:[#allocation143_spill] sm:$0xff]  ;;  %v15363_v62 = vld [vmem:[#allocation257_spill] sm:$0xff] }
 0x62c   : > { %15356 = vst [vmem:[#allocation101_spill] sm:$0xff] %v10665_v6  ;;  %5641 = vmatpush.xpose.msrb.mxu2 %v5389_v53  ;;  %5661 = vmatpush.xpose.msrb.mxu3 %v5390_v19  ;;  %v4167_v24 = vadd.f32 %v10582_v10, %v4166_v14  ;;  %6893 = vpow2.f32 %v3019_v46  ;;  %v3161_v42 = vmul.f32 1.442695, %v2650_v33  ;;  %v4175_v6 = vor.u32 1.1754944e-38, %v4174_v49  ;;  %vm4170_vm3 = vmor %vm4168_vm2, %vm4169_vm1 }
 0x62d   : > { %15358 = vst [vmem:[#allocation113_spill] sm:$0xff] %v10670_v25  ;;  %v15362_v44 = vmax.f32 %v15360_v26, %v15361_v35  ;;  %v10681_v47 = vpop.eup %6889  ;;  %6895 = vpow2.f32 %v3021_v45  ;;  %v2648_v14 = vsub.f32 %v15363_v62, %v10398_v52  ;;  %vm4173_vm4 = vcmp.eq.f32.partialorder %v4172_v29, 8.507059e+37  ;;  %v10696_v7 = vpop.xlane.xlu1 %3233 }
 0x62e   : > { %3266 = vadd.xlane.f32.xlu2 %v15359_v3  ;;  %v4171_v53 = vsel %vm4170_vm3, %v10582_v10, %v4167_v24  ;;  %v10686_v46 = vpop.xlane.xlu0 %2339  ;;  %v3155_v33 = vmul.f32 1.442695, %v2647_v55  ;;  %v3886_v49 = vmul.f32 %v10648_v43, %v3885_v8  ;;  %v4150_v3 = vmul.f32 %v10681_v47, %v10641_v9  ;;  %v15365_v10 = vld [vmem:[#allocation230_spill] sm:$0xff]  ;;  %v15366_v55 = vld [vmem:[#allocation231_spill] sm:$0xff] }
 0x62f   : > { %2315 = vmax.xlane.f32.xlu1 %v15362_v44  ;;  %v4176_v19 = vsel %vm4173_vm4, %v4175_v6, %v4171_v53  ;;  %v15364_v44 = vmax.f32 %v15316_v61, %v15315_v31  ;;  %v10694_v45 = vpop.xlane.xlu2 %3335  ;;  %6897 = vpow2.f32 %v3159_v32  ;;  %v3894_v52 = vand.u32 2147483648, %v10559_v39  ;;  %v15367_v31 = vld [vmem:[#allocation196_spill] sm:$0xff] }
 0x630   : > { %v5427_v29 = vmul.f32 %v15365_v10, %v4176_v19  ;;  %v5428_v24 = vmul.f32 %v15366_v55, %v4176_v19  ;;  %v10701_v8 = vpop.eup %6891  ;;  %6899 = vpow2.f32 %v3161_v42  ;;  %v4151_v62 = vsub.f32 1.0, %v4150_v3 }
 0x631   : > { %2357 = vmax.xlane.f32.xlu0 %v15364_v44  ;;  %vm3889_vm5 = vweird.f32 %v10648_v43  ;;  %v3892_v6 = vand.u32 2147483647, %v10559_v39  ;;  %v3157_v44 = vmul.f32 1.442695, %v2648_v14  ;;  %v2617_v32 = vsub.f32 %v15367_v31, %v10455_v60  ;;  %v15370_v31 = vld [vmem:[#allocation198_spill] sm:$0xff] }
 0x632   : > { %5678 = vmatpush.xpose.msrb.mxu0 %v5427_v29  ;;  %5698 = vmatpush.xpose.msrb.mxu1 %v5428_v24  ;;  %6901 = vrcp.f32 %v10696_v7  ;;  %v10709_v10 = vpop.eup %6893  ;;  %vm3888_vm6 = vweird.f32 %v10559_v39  ;;  %v4152_v42 = vmul.f32 %v10681_v47, %v4151_v62  ;;  %v3887_v3 = vadd.f32 %v10648_v43, %v3886_v49  ;;  %v15371_v29 = vld [vmem:[#allocation138_spill] sm:$0xff]  ;;  %v15372_v39 = vld [vmem:[#allocation139_spill] sm:$0xff] }
 0x633   : > { %15368 = vst [vmem:[#allocation225_spill] sm:$0xff] %v10709_v10  ;;  %v3445_v19 = vadd.f32 %v10643_v59, %v10635_v56  ;;  %v10716_v55 = vpop.eup %6895  ;;  %6903 = vpow2.f32 %v3155_v33  ;;  %v2618_v14 = vsub.f32 %v15370_v31, %v10455_v60  ;;  %v2577_v24 = vsub.f32 %v15371_v29, %v10510_v21  ;;  %vm3890_vm7 = vmor %vm3888_vm6, %vm3889_vm5  ;;  %v15375_v56 = vld [vmem:[#allocation59_spill] sm:$0xff] }
 0x634   : > { %15369 = vst [vmem:[#allocation244_spill] sm:$0xff] %v10716_v55  ;;  %v3895_v53 = vor.u32 1.1754944e-38, %v3894_v52  ;;  %v2578_v62 = vsub.f32 %v15372_v39, %v10510_v21  ;;  %v4160_v49 = vand.u32 2147483648, %v10641_v9  ;;  %v3891_v59 = vsel %vm3890_vm7, %v10648_v43, %v3887_v3 }
 0x635   : > { %vm3893_vm8 = vcmp.eq.f32.partialorder %v3892_v6, 8.507059e+37  ;;  %v10729_v33 = vpop.eup %6897  ;;  %v4153_v52 = vadd.f32 %v10681_v47, %v4152_v42  ;;  %vm4155_vm9 = vweird.f32 %v10681_v47  ;;  %v4158_v29 = vand.u32 2147483647, %v10641_v9  ;;  %v15376_v6 = vld [vmem:[#allocation114_spill] sm:$0xff] }
 0x636   : > { %3446 = vadd.xlane.f32.xlu2 %v3445_v19  ;;  %15373 = vst [vmem:[#allocation245_spill] sm:$0xff] %v10729_v33  ;;  %v3896_v60 = vsel %vm3893_vm8, %v3895_v53, %v3891_v59  ;;  %v10731_v31 = vpop.xlane.xlu0 %3230  ;;  %v10736_v21 = vpop.eup %6899  ;;  %v3095_v39 = vmul.f32 1.442695, %v2617_v32  ;;  %v15377_v19 = vld [vmem:[#allocation142_spill] sm:$0xff]  ;;  %v10752_v35 = vmul.f32 %v10701_v8, %v10346_v54  ;;  %v3097_v32 = vmul.f32 1.442695, %v2618_v14 }
 0x637   : > { %3308 = vadd.xlane.f32.xlu1 %v10466_v22  ;;  %15374 = vst [vmem:[#allocation141_spill] sm:$0xff] %v10736_v21  ;;  %v5387_v43 = vmul.f32 %v15375_v56, %v3896_v60  ;;  %v5388_v3 = vmul.f32 %v15376_v6, %v3896_v60  ;;  %v15378_v22 = vld [vmem:[#allocation163_spill] sm:$0xff]  ;;  %v10743_v59 = vpop.xlane.xlu2 %2381  ;;  %v10745_v53 = vpop.xlane.xlu1 %3290  ;;  %6905 = vrcp.f32 %v10731_v31  ;;  %vm4154_vm10 = vweird.f32 %v10641_v9 }
 0x638   : > { %v15379_v61 = vmax.f32 %v15377_v19, %v15378_v22  ;;  %v10748_v42 = vpop.eup %6901  ;;  %6907 = vrcp.f32 %v10745_v53  ;;  %v3015_v56 = vmul.f32 1.442695, %v2577_v24  ;;  %vm4156_vm11 = vmor %vm4154_vm10, %vm4155_vm9  ;;  %v3017_v14 = vmul.f32 1.442695, %v2578_v62  ;;  %v15383_v19 = vld [vmem:[#allocation120_spill] sm:$0xff] }
 0x639   : > { %6909 = vpow2.f32 %v3157_v44  ;;  %v3870_v60 = vmul.f32 %v10748_v42, %v10696_v7  ;;  %5642 = vmatpush.xpose.msrb.mxu2 %v5387_v43  ;;  %5662 = vmatpush.xpose.msrb.mxu3 %v5388_v3  ;;  %v10760_v6 = vpop.eup %6903  ;;  %v4157_v9 = vsel %vm4156_vm11, %v10681_v47, %v4153_v52  ;;  %vm4159_vm12 = vcmp.eq.f32.partialorder %v4158_v29, 8.507059e+37  ;;  %v15381_v44 = vld [vmem:[#allocation136_spill] sm:$0xff]  ;;  %v15382_v43 = vld [vmem:[#allocation250_spill] sm:$0xff] }
 0x63a   : > { %2312 = vmax.xlane.f32.xlu0 %v15379_v61  ;;  %v4161_v61 = vor.u32 1.1754944e-38, %v4160_v49  ;;  %15380 = vst [vmem:[#allocation229_spill] sm:$0xff] %v10760_v6  ;;  %6911 = vrcp.f32 %v10460_v20  ;;  %v2645_v24 = vsub.f32 %v15381_v44, %v10505_v30  ;;  %v2646_v3 = vsub.f32 %v15382_v43, %v10505_v30  ;;  %v15393_v43 = vld [vmem:[#allocation191_spill] sm:$0xff] }
 0x63b   : > { %6913 = vpow2.f32 %v3095_v39  ;;  %v3871_v49 = vsub.f32 1.0, %v3870_v60  ;;  %v15385_v47 = vsub.f32 1.0, %v10627_v28  ;;  %v15387_v29 = vand.u32 2147483648, %v10346_v54 }
 0x63c   : > { %v4162_v22 = vsel %vm4159_vm12, %v4161_v61, %v4157_v9  ;;  %6915 = vpow2.f32 %v3097_v32  ;;  %v15389_v32 = vld [vmem:[#allocation203_spill] sm:$0xff]  ;;  %v3151_v60 = vmul.f32 1.442695, %v2645_v24  ;;  %vm3875_vm13 = vweird.f32 %v10748_v42 }
 0x63d   : > { %v5425_v26 = vmul.f32 %v15383_v19, %v4162_v22  ;;  %v5426_v4 = vmul.f32 %v15384_v16, %v4162_v22  ;;  %v10770_v12 = vpop.eup %6905  ;;  %v10776_v52 = vmul.f32 %v10552_v17, %v15385_v47  ;;  %v10780_v39 = vor.u32 1.1754944e-38, %v15387_v29 }
 0x63e   : > { %6917 = vpow2.f32 %v3015_v56  ;;  %3401 = vadd.xlane.f32.xlu2 %v10572_v41  ;;  %v10784_v30 = vpop.eup %6907  ;;  %v3872_v16 = vmul.f32 %v10748_v42, %v3871_v49  ;;  %v3880_v19 = vand.u32 2147483648, %v10696_v7  ;;  %v3856_v28 = vmul.f32 %v10770_v12, %v10731_v31  ;;  %v10790_v22 = vpop.xlane.xlu0 %3287 }
 0x63f   : > { %15386 = vst [vmem:[#allocation22_spill] sm:$0xff] %v10776_v52  ;;  %3263 = vadd.xlane.f32.xlu1 %v15389_v32  ;;  %6919 = vpow2.f32 %v3017_v14  ;;  %5679 = vmatpush.xpose.msrb.mxu0 %v5425_v26  ;;  %v10792_v61 = vpop.eup %6909  ;;  %v4389_v56 = vsub.f32 1.0, %v10752_v35  ;;  %v4136_v41 = vmul.f32 %v10784_v30, %v10745_v53  ;;  %v15391_v14 = vmax.f32 %v15307_v48, %v15306_v23  ;;  %v10800_v9 = vpop.xlane.xlu2 %2336 }
 0x640   : > { %15388 = vst [vmem:[#allocation24_spill] sm:$0xff] %v10780_v39  ;;  %5699 = vmatpush.xpose.msrb.mxu1 %v5426_v4  ;;  %v10802_v44 = vpop.xlane.xlu1 %3332  ;;  %6921 = vrcp.f32 %v10790_v22  ;;  %v10805_v4 = vpop.eup %6911  ;;  %v3153_v26 = vmul.f32 1.442695, %v2646_v3  ;;  %v3857_v49 = vsub.f32 1.0, %v3856_v28  ;;  %v3878_v35 = vand.u32 2147483647, %v10696_v7 }
 0x641   : > { %15390 = vst [vmem:[#allocation262_spill] sm:$0xff] %v10792_v61  ;;  %v10809_v24 = vpop.eup %6913  ;;  %6923 = vrcp.f32 %v10566_v18  ;;  %v2615_v47 = vsub.f32 %v15393_v43, %v10561_v38  ;;  %vm3874_vm14 = vweird.f32 %v10696_v7  ;;  %v4137_v29 = vsub.f32 1.0, %v4136_v41 }
 0x642   : > { %2354 = vmax.xlane.f32.xlu0 %v15391_v14  ;;  %15392 = vst [vmem:[#allocation13_spill] sm:$0xff] %v10809_v24  ;;  %v10815_v32 = vpop.eup %6915  ;;  %v3881_v14 = vor.u32 1.1754944e-38, %v3880_v19  ;;  %v3858_v3 = vmul.f32 %v10770_v12, %v3857_v49  ;;  %v3873_v28 = vadd.f32 %v10748_v42, %v3872_v16  ;;  %v3544_v62 = vadd.f32 %v10736_v21, %v10729_v33  ;;  %vm3876_vm1 = vmor %vm3874_vm14, %vm3875_vm13 }
 0x643   : > { %15394 = vst [vmem:[#allocation57_spill] sm:$0xff] %v10815_v32  ;;  %v4138_v48 = vmul.f32 %v10784_v30, %v4137_v29  ;;  %vm3860_vm15 = vweird.f32 %v10731_v31  ;;  %v3442_v7 = vadd.f32 %v10670_v25, %v10659_v50  ;;  %vm3861_vm2 = vweird.f32 %v10770_v12  ;;  %v15397_v50 = vld [vmem:[#allocation87_spill] sm:$0xff] }
 0x644   : > { %v10821_v23 = vpop.eup %6917  ;;  %v3866_v16 = vand.u32 2147483648, %v10731_v31  ;;  %v3877_v41 = vsel %vm3876_vm1, %v10748_v42, %v3873_v28  ;;  %vm3879_vm3 = vcmp.eq.f32.partialorder %v3878_v35, 8.507059e+37  ;;  %v3859_v49 = vadd.f32 %v10770_v12, %v3858_v3  ;;  %v15398_v42 = vld [vmem:[#allocation224_spill] sm:$0xff]  ;;  %vm10850_vm5 = vmor %vm3860_vm15, %vm3861_vm2 }
 0x645   : > { %15395 = vst [vmem:[#allocation81_spill] sm:$0xff] %v10821_v23  ;;  %v10830_v19 = vpop.eup %6919  ;;  %v4146_v29 = vand.u32 2147483648, %v10745_v53  ;;  %v3882_v21 = vsel %vm3879_vm3, %v3881_v14, %v3877_v41  ;;  %v3864_v33 = vand.u32 2147483647, %v10731_v31  ;;  %vm4141_vm4 = vweird.f32 %v10784_v30  ;;  %v15403_v41 = vld [vmem:[#allocation161_spill] sm:$0xff] }
 0x646   : > { %15396 = vst [vmem:[#allocation238_spill] sm:$0xff] %v10830_v19  ;;  %v10835_v43 = vpop.eup %6921  ;;  %3545 = vadd.xlane.f32.xlu2 %v3544_v62  ;;  %v5385_v39 = vmul.f32 %v15397_v50, %v3882_v21  ;;  %v5386_v35 = vmul.f32 %v15398_v42, %v3882_v21  ;;  %v10844_v28 = vpop.xlane.xlu0 %3329  ;;  %v4139_v14 = vadd.f32 %v10784_v30, %v4138_v48  ;;  %6925 = vpow2.f32 %v3151_v60  ;;  %v15404_v21 = vld [vmem:[#allocation162_spill] sm:$0xff] }
 0x647   : > { %3443 = vadd.xlane.f32.xlu1 %v3442_v7  ;;  %v4122_v25 = vmul.f32 %v10835_v43, %v10790_v22  ;;  %15399 = vst [vmem:[#allocation131_spill] sm:$0xff] %v10844_v28  ;;  %v10855_v3 = vpop.eup %6923  ;;  %v15402_v7 = vld [vmem:[#allocation194_spill] sm:$0xff]  ;;  %v15405_v42 = vmax.f32 %v15403_v41, %v15404_v21  ;;  %v10862_v17 = vpop.xlane.xlu2 %3227  ;;  %v3863_v31 = vsel %vm10850_vm5, %v10770_v12, %v3859_v49  ;;  %v4144_v48 = vand.u32 2147483647, %v10745_v53 }
 0x648   : > { %v2616_v50 = vsub.f32 %v15402_v7, %v10561_v38  ;;  %v10864_v52 = vpop.xlane.xlu1 %2378  ;;  %vm4140_vm6 = vweird.f32 %v10745_v53  ;;  %v3867_v60 = vor.u32 1.1754944e-38, %v3866_v16  ;;  %5643 = vmatpush.xpose.msrb.mxu2 %v5385_v39  ;;  %5663 = vmatpush.xpose.msrb.mxu3 %v5386_v35  ;;  %6927 = vrcp.f32 %v10862_v17  ;;  %v15406_v16 = vld [vmem:[#allocation154_spill] sm:$0xff] }
 0x649   : > { %v4123_v54 = vsub.f32 1.0, %v4122_v25  ;;  %v10873_v38 = vmul.f32 %v10701_v8, %v4389_v56  ;;  %6929 = vpow2.f32 %v3153_v26  ;;  %v3091_v7 = vmul.f32 1.442695, %v2615_v47  ;;  %vm4142_vm8 = vmor %vm4140_vm6, %vm4141_vm4  ;;  %v15407_v56 = vld [vmem:[#allocation53_spill] sm:$0xff] }
 0x64a   : > { %2309 = vmax.xlane.f32.xlu0 %v15405_v42  ;;  %vm3865_vm7 = vcmp.eq.f32.partialorder %v3864_v33, 8.507059e+37  ;;  %v4147_v12 = vor.u32 1.1754944e-38, %v4146_v29  ;;  %v4143_v53 = vsel %vm4142_vm8, %v10784_v30, %v4139_v14  ;;  %v3093_v25 = vmul.f32 1.442695, %v2616_v50  ;;  %v15410_v29 = vld [vmem:[#allocation116_spill] sm:$0xff] }
 0x64b   : > { %v4124_v49 = vmul.f32 %v10835_v43, %v4123_v54  ;;  %v3868_v62 = vsel %vm3865_vm7, %v3867_v60, %v3863_v31  ;;  %v4132_v39 = vand.u32 2147483648, %v10790_v22  ;;  %vm4145_vm9 = vcmp.eq.f32.partialorder %v4144_v48, 8.507059e+37  ;;  %v15409_v54 = vld [vmem:[#allocation247_spill] sm:$0xff]  ;;  %v15411_v60 = vld [vmem:[#allocation14_spill] sm:$0xff] }
 0x64c   : > { %v5383_v35 = vmul.f32 %v15406_v16, %v3868_v62  ;;  %v5384_v42 = vmul.f32 %v15407_v56, %v3868_v62  ;;  %v4148_v26 = vsel %vm4145_vm9, %v4147_v12, %v4143_v53  ;;  %vm4127_vm10 = vweird.f32 %v10835_v43  ;;  %v10884_v47 = vpop.eup %6925  ;;  %v15413_v53 = vld [vmem:[#allocation258_spill] sm:$0xff] }
 0x64d   : > { %v4125_v33 = vadd.f32 %v10835_v43, %v4124_v49  ;;  %15408 = vst [vmem:[#allocation11_spill] sm:$0xff] %v10884_v47  ;;  %vm4126_vm11 = vweird.f32 %v10790_v22  ;;  %v5423_v30 = vmul.f32 %v15409_v54, %v4148_v26  ;;  %v5424_v14 = vmul.f32 %v15410_v29, %v4148_v26  ;;  %v15412_v49 = vld [vmem:[#allocation79_spill] sm:$0xff] }
 0x64e   : > { %5644 = vmatpush.xpose.msrb.mxu2 %v5383_v35  ;;  %3398 = vadd.xlane.f32.xlu2 %v10589_v57  ;;  %v4130_v50 = vand.u32 2147483647, %v10790_v22  ;;  %v10891_v31 = vpop.eup %6927  ;;  %v4384_v48 = vand.u32 2147483648, %v10460_v20  ;;  %6931 = vpow2.f32 %v3091_v7  ;;  %v2575_v12 = vsub.f32 %v15411_v60, %v10631_v11  ;;  %v10899_v16 = vpop.xlane.xlu0 %2375  ;;  %vm10903_vm12 = vmor %vm4126_vm11, %vm4127_vm10  ;;  %v15417_v7 = vld [vmem:[#allocation98_spill] sm:$0xff] }
 0x64f   : > { %v2576_v62 = vsub.f32 %v15412_v49, %v10631_v11  ;;  %5664 = vmatpush.xpose.msrb.mxu3 %v5384_v42  ;;  %3260 = vadd.xlane.f32.xlu1 %v15413_v53  ;;  %v10907_v22 = vpop.eup %6929  ;;  %6933 = vpow2.f32 %v3093_v25  ;;  %v2643_v35 = vsub.f32 %v15417_v7, %v10633_v40  ;;  %v3842_v11 = vmul.f32 %v10891_v31, %v10862_v17  ;;  %v10913_v56 = vpop.xlane.xlu2 %3284  ;;  %v15419_v49 = vld [vmem:[#allocation92_spill] sm:$0xff] }
 0x650   : > { %15416 = vst [vmem:[#allocation232_spill] sm:$0xff] %v10907_v22  ;;  %5680 = vmatpush.xpose.msrb.mxu0 %v5423_v30  ;;  %5700 = vmatpush.xpose.msrb.mxu1 %v5424_v14  ;;  %v10915_v42 = vpop.xlane.xlu1 %2333  ;;  %v4129_v26 = vsel %vm10903_vm12, %v10835_v43, %v4125_v33  ;;  %v10922_v54 = vmul.f32 %v10805_v4, %v10460_v20  ;;  %v4370_v25 = vand.u32 2147483648, %v10566_v18  ;;  %v4133_v29 = vor.u32 1.1754944e-38, %v4132_v39  ;;  %v15420_v7 = vld [vmem:[#allocation188_spill] sm:$0xff] }
 0x651   : > { %v15418_v60 = vmax.f32 %v15300_v27, %v15299_v0  ;;  %6935 = vrcp.f32 %v10913_v56  ;;  %v10931_v30 = vmul.f32 %v10855_v3, %v10566_v18  ;;  %v3843_v43 = vsub.f32 1.0, %v3842_v11  ;;  %v15423_v11 = vld [vmem:[#allocation140_spill] sm:$0xff] }
 0x652   : > { %6937 = vrcp.f32 %v10694_v45  ;;  %vm4131_vm13 = vcmp.eq.f32.partialorder %v4130_v50, 8.507059e+37  ;;  %v3011_v33 = vmul.f32 1.442695, %v2575_v12  ;;  %v3013_v14 = vmul.f32 1.442695, %v2576_v62  ;;  %v15422_v12 = vld [vmem:[#allocation135_spill] sm:$0xff] }
 0x653   : > { %2351 = vmax.xlane.f32.xlu0 %v15418_v60  ;;  %v2644_v53 = vsub.f32 %v15419_v49, %v10633_v40  ;;  %v4134_v39 = vsel %vm4131_vm13, %v4133_v29, %v4129_v26  ;;  %v3147_v57 = vmul.f32 1.442695, %v2643_v35  ;;  %v2613_v60 = vsub.f32 %v15420_v7, %v10686_v46 }
 0x654   : > { %v3844_v0 = vmul.f32 %v10891_v31, %v3843_v43  ;;  %vm3847_vm14 = vweird.f32 %v10891_v31  ;;  %v10940_v27 = vpop.eup %6931  ;;  %vm3846_vm15 = vweird.f32 %v10862_v17  ;;  %v3852_v50 = vand.u32 2147483648, %v10862_v17 }
 0x655   : > { %15421 = vst [vmem:[#allocation80_spill] sm:$0xff] %v10940_v27  ;;  %v5421_v62 = vmul.f32 %v15422_v12, %v4134_v39  ;;  %v5422_v21 = vmul.f32 %v15423_v11, %v4134_v39  ;;  %v10946_v40 = vpop.eup %6933  ;;  %v3439_v35 = vadd.f32 %v10716_v55, %v10709_v10  ;;  %v3541_v26 = vadd.f32 %v10792_v61, %v10760_v6  ;;  %v15425_v39 = vld [vmem:[#allocation189_spill] sm:$0xff]  ;;  %vm10965_vm1 = vmor %vm3846_vm15, %vm3847_vm14  ;;  %v15435_v55 = vld [vmem:[#allocation102_spill] sm:$0xff] }
 0x656   : > { %15424 = vst [vmem:[#allocation19_spill] sm:$0xff] %v10946_v40  ;;  %v3845_v29 = vadd.f32 %v10891_v31, %v3844_v0  ;;  %v3850_v43 = vand.u32 2147483647, %v10862_v17  ;;  %v4375_v7 = vsub.f32 1.0, %v10922_v54  ;;  %v10957_v41 = vor.u32 1.1754944e-38, %v4384_v48 }
 0x657   : > { %v10954_v49 = vpop.eup %6935  ;;  %6939 = vpow2.f32 %v3011_v33  ;;  %v2614_v12 = vsub.f32 %v15425_v39, %v10686_v46  ;;  %5681 = vmatpush.xpose.msrb.mxu0 %v5421_v62  ;;  %5701 = vmatpush.xpose.msrb.mxu1 %v5422_v21  ;;  %v10971_v61 = vor.u32 1.1754944e-38, %v4370_v25  ;;  %v10975_v46 = vpop.xlane.xlu2 %3326  ;;  %v4361_v54 = vsub.f32 1.0, %v10931_v30  ;;  %v15430_v62 = vld [vmem:[#allocation159_spill] sm:$0xff]  ;;  %v15433_v30 = vld [vmem:[#allocation73_spill] sm:$0xff] }
 0x658   : > { %v10969_v11 = vpop.eup %6937  ;;  %6941 = vpow2.f32 %v3013_v14  ;;  %v4108_v48 = vmul.f32 %v10954_v49, %v10913_v56  ;;  %3440 = vadd.xlane.f32.xlu1 %v3439_v35  ;;  %3542 = vadd.xlane.f32.xlu2 %v3541_v26  ;;  %15429 = vst [vmem:[#allocation104_spill] sm:$0xff] %v10975_v46  ;;  %v10977_v21 = vpop.xlane.xlu0 %2330  ;;  %v3849_v17 = vsel %vm10965_vm1, %v10891_v31, %v3845_v29  ;;  %v3149_v33 = vmul.f32 1.442695, %v2644_v53  ;;  %v15431_v14 = vld [vmem:[#allocation160_spill] sm:$0xff] }
 0x659   : > { %15428 = vst [vmem:[#allocation204_spill] sm:$0xff] %v10969_v11  ;;  %6943 = vpow2.f32 %v3147_v57  ;;  %v3853_v25 = vor.u32 1.1754944e-38, %v3852_v50  ;;  %v15432_v39 = vmax.f32 %v15430_v62, %v15431_v14  ;;  %v10986_v6 = vpop.xlane.xlu1 %3224  ;;  %v3087_v35 = vmul.f32 1.442695, %v2613_v60  ;;  %v15434_v50 = vld [vmem:[#allocation89_spill] sm:$0xff] }
 0x65a   : > { %v4109_v26 = vsub.f32 1.0, %v4108_v48  ;;  %6945 = vrcp.f32 %v10986_v6  ;;  %vm3851_vm2 = vcmp.eq.f32.partialorder %v3850_v43, 8.507059e+37  ;;  %v4346_v0 = vmul.f32 %v10969_v11, %v10694_v45  ;;  %v15436_v60 = vld [vmem:[#allocation193_spill] sm:$0xff] }
 0x65b   : > { %2306 = vmax.xlane.f32.xlu0 %v15432_v39  ;;  %v3089_v31 = vmul.f32 1.442695, %v2614_v12  ;;  %v2641_v57 = vsub.f32 %v15433_v30, %v10743_v59  ;;  %v3854_v53 = vsel %vm3851_vm2, %v3853_v25, %v3849_v17  ;;  %v2642_v29 = vsub.f32 %v15434_v50, %v10743_v59 }
 0x65c   : > { %v4110_v39 = vmul.f32 %v10954_v49, %v4109_v26  ;;  %v5381_v10 = vmul.f32 %v15435_v55, %v3854_v53  ;;  %v5382_v48 = vmul.f32 %v15436_v60, %v3854_v53  ;;  %v11001_v43 = vmul.f32 %v10805_v4, %v4375_v7 }
 0x65d   : > { %v10998_v14 = vpop.eup %6939  ;;  %6947 = vpow2.f32 %v3149_v33  ;;  %v4356_v12 = vand.u32 2147483648, %v10694_v45  ;;  %vm4113_vm3 = vweird.f32 %v10954_v49  ;;  %v4118_v59 = vand.u32 2147483648, %v10913_v56 }
 0x65e   : > { %15437 = vst [vmem:[#allocation112_spill] sm:$0xff] %v10998_v14  ;;  %v11005_v17 = vpop.eup %6941  ;;  %6949 = vrcp.f32 %v10802_v44  ;;  %5645 = vmatpush.xpose.msrb.mxu2 %v5381_v10  ;;  %5665 = vmatpush.xpose.msrb.mxu3 %v5382_v48  ;;  %v3496_v55 = vadd.f32 %v10815_v32, %v10809_v24  ;;  %v4111_v25 = vadd.f32 %v10954_v49, %v4110_v39  ;;  %v3143_v33 = vmul.f32 1.442695, %v2641_v57 }
 0x65f   : > { %15438 = vst [vmem:[#allocation150_spill] sm:$0xff] %v11005_v17  ;;  %v11012_v7 = vpop.eup %6943  ;;  %6951 = vpow2.f32 %v3087_v35  ;;  %vm4112_vm4 = vweird.f32 %v10913_v56  ;;  %v4116_v26 = vand.u32 2147483647, %v10913_v56  ;;  %v11019_v53 = vmul.f32 %v10855_v3, %v4361_v54  ;;  %v11022_v39 = vpop.xlane.xlu2 %2372  ;;  %v15448_v35 = vld [vmem:[#allocation248_spill] sm:$0xff] }
 0x660   : > { %15439 = vst [vmem:[#allocation72_spill] sm:$0xff] %v11012_v7  ;;  %v11016_v30 = vpop.eup %6945  ;;  %v4347_v10 = vsub.f32 1.0, %v4346_v0  ;;  %6953 = vpow2.f32 %v3089_v31  ;;  %v3145_v50 = vmul.f32 1.442695, %v2642_v29  ;;  %3395 = vadd.xlane.f32.xlu1 %v10593_v5  ;;  %3497 = vadd.xlane.f32.xlu2 %v3496_v55  ;;  %v11024_v60 = vpop.xlane.xlu0 %3221  ;;  %vm11028_vm5 = vmor %vm4112_vm4, %vm4113_vm3  ;;  %v11032_v56 = vor.u32 1.1754944e-38, %v4356_v12 }
 0x661   : > { %v3828_v54 = vmul.f32 %v11016_v30, %v10986_v6  ;;  %v15443_v0 = vmax.f32 %v15294_v2, %v15293_v37  ;;  %v11039_v5 = vpop.xlane.xlu1 %3281  ;;  %6955 = vrcp.f32 %v11024_v60  ;;  %v4115_v31 = vsel %vm11028_vm5, %v10954_v49, %v4111_v25 }
 0x662   : > { %15442 = vst [vmem:[#allocation21_spill] sm:$0xff] %v11032_v56  ;;  %v2611_v57 = vsub.f32 %v15065_v58, %v10800_v9  ;;  %v2612_v29 = vsub.f32 %v15064_v51, %v10800_v9  ;;  %v4119_v48 = vor.u32 1.1754944e-38, %v4118_v59  ;;  %6957 = vrcp.f32 %v11039_v5 }
 0x663   : > { %2348 = vmax.xlane.f32.xlu0 %v15443_v0  ;;  %v11050_v12 = vpop.eup %6947  ;;  %6959 = vpow2.f32 %v3143_v33  ;;  %v2639_v55 = vsub.f32 %v15116_v34, %v10864_v52  ;;  %v3829_v0 = vsub.f32 1.0, %v3828_v54  ;;  %vm4117_vm6 = vcmp.eq.f32.partialorder %v4116_v26, 8.507059e+37  ;;  %v15447_v33 = vld [vmem:[#allocation117_spill] sm:$0xff] }
 0x664   : > { %15444 = vst [vmem:[#allocation253_spill] sm:$0xff] %v11050_v12  ;;  %v11054_v32 = vpop.eup %6949  ;;  %v11057_v49 = vmul.f32 %v10969_v11, %v4347_v10  ;;  %6961 = vpow2.f32 %v3145_v50  ;;  %v4342_v58 = vand.u32 2147483648, %v10802_v44  ;;  %v4120_v51 = vsel %vm4117_vm6, %v4119_v48, %v4115_v31 }
 0x665   : > { %15445 = vst [vmem:[#allocation109_spill] sm:$0xff] %v11054_v32  ;;  %v11060_v9 = vpop.eup %6951  ;;  %v2640_v59 = vsub.f32 %v15115_v13, %v10864_v52  ;;  %v3830_v25 = vmul.f32 %v11016_v30, %v3829_v0  ;;  %v5419_v34 = vmul.f32 %v15447_v33, %v4120_v51  ;;  %v5420_v26 = vmul.f32 %v15448_v35, %v4120_v51 }
 0x666   : > { %15446 = vst [vmem:[#allocation125_spill] sm:$0xff] %v11060_v9  ;;  %v11067_v54 = vpop.eup %6953  ;;  %v3083_v24 = vmul.f32 1.442695, %v2611_v57  ;;  %v3085_v10 = vmul.f32 1.442695, %v2612_v29  ;;  %v3436_v50 = vadd.f32 %v10830_v19, %v10821_v23  ;;  %v3538_v31 = vadd.f32 %v10907_v22, %v10884_v47 }
 0x667   : > { %15449 = vst [vmem:[#allocation54_spill] sm:$0xff] %v11067_v54  ;;  %v11073_v48 = vpop.eup %6955  ;;  %v11077_v13 = vmul.f32 %v11054_v32, %v10802_v44  ;;  %v3139_v52 = vmul.f32 1.442695, %v2639_v55  ;;  %6963 = vrcp.f32 %v10844_v28  ;;  %v3838_v0 = vand.u32 2147483648, %v10986_v6  ;;  %5682 = vmatpush.xpose.msrb.mxu0 %v5419_v34  ;;  %5702 = vmatpush.xpose.msrb.mxu1 %v5420_v26 }
 0x668   : > { %v11081_v57 = vpop.eup %6957  ;;  %v3814_v29 = vmul.f32 %v11073_v48, %v11024_v60  ;;  %3437 = vadd.xlane.f32.xlu1 %v3436_v50  ;;  %3539 = vadd.xlane.f32.xlu2 %v3538_v31  ;;  %v11087_v33 = vpop.xlane.xlu0 %3278  ;;  %v3831_v35 = vadd.f32 %v11016_v30, %v3830_v25  ;;  %vm3833_vm7 = vweird.f32 %v11016_v30  ;;  %v3836_v55 = vand.u32 2147483647, %v10986_v6  ;;  %v15451_v50 = vld [vmem:[#allocation157_spill] sm:$0xff]  ;;  %v15452_v31 = vld [vmem:[#allocation158_spill] sm:$0xff] }
 0x669   : > { %v11085_v51 = vpop.xlane.xlu2 %2327  ;;  %v11092_v22 = vpop.eup %6959  ;;  %v3141_v34 = vmul.f32 1.442695, %v2640_v59  ;;  %v4328_v26 = vand.u32 2147483648, %v10844_v28  ;;  %v4094_v47 = vmul.f32 %v11081_v57, %v11039_v5  ;;  %v15453_v19 = vmax.f32 %v15451_v50, %v15452_v31 }
 0x66a   : > { %15450 = vst [vmem:[#allocation67_spill] sm:$0xff] %v11092_v22  ;;  %v11100_v23 = vpop.xlane.xlu1 %3323  ;;  %6965 = vrcp.f32 %v11087_v33  ;;  %v11103_v25 = vpop.eup %6961  ;;  %v11105_v37 = vor.u32 1.1754944e-38, %v4342_v58  ;;  %vm3832_vm8 = vweird.f32 %v10986_v6  ;;  %v3815_v59 = vsub.f32 1.0, %v3814_v29 }
 0x66b   : > { %2303 = vmax.xlane.f32.xlu0 %v15453_v19  ;;  %15454 = vst [vmem:[#allocation168_spill] sm:$0xff] %v11103_v25  ;;  %6967 = vpow2.f32 %v3083_v24  ;;  %v3839_v62 = vor.u32 1.1754944e-38, %v3838_v0  ;;  %v4095_v56 = vsub.f32 1.0, %v4094_v47  ;;  %vm3834_vm9 = vmor %vm3832_vm8, %vm3833_vm7  ;;  %vm3837_vm10 = vcmp.eq.f32.partialorder %v3836_v55, 8.507059e+37 }
 0x66c   : > { %15455 = vst [vmem:[#allocation261_spill] sm:$0xff] %v11105_v37  ;;  %6969 = vpow2.f32 %v3085_v10  ;;  %v3816_v19 = vmul.f32 %v11073_v48, %v3815_v59  ;;  %v3835_v31 = vsel %vm3834_vm9, %v11016_v30, %v3831_v35  ;;  %v11115_v58 = vor.u32 1.1754944e-38, %v4328_v26  ;;  %v15459_v59 = vld [vmem:[#allocation223_spill] sm:$0xff] }
 0x66d   : > { %6971 = vpow2.f32 %v3139_v52  ;;  %v11113_v24 = vpop.eup %6963  ;;  %v4096_v6 = vmul.f32 %v11081_v57, %v4095_v56  ;;  %v3840_v10 = vsel %vm3837_vm10, %v3839_v62, %v3835_v31  ;;  %v2637_v47 = vsub.f32 %v15114_v1, %v10899_v16  ;;  %v15458_v52 = vld [vmem:[#allocation222_spill] sm:$0xff] }
 0x66e   : > { %15456 = vst [vmem:[#allocation130_spill] sm:$0xff] %v11113_v24  ;;  %6973 = vpow2.f32 %v3141_v34  ;;  %v2638_v0 = vsub.f32 %v15113_v63, %v10899_v16  ;;  %v5379_v29 = vmul.f32 %v15458_v52, %v3840_v10  ;;  %v5380_v2 = vmul.f32 %v15459_v59, %v3840_v10 }
 0x66f   : > { %15457 = vst [vmem:[#allocation115_spill] sm:$0xff] %v11115_v58  ;;  %v4104_v35 = vand.u32 2147483648, %v11039_v5  ;;  %v3824_v55 = vand.u32 2147483648, %v11024_v60  ;;  %v3433_v56 = vadd.f32 %v11005_v17, %v10998_v14  ;;  %v3493_v62 = vadd.f32 %v10946_v40, %v10940_v27 }
 0x670   : > { %v11124_v30 = vpop.eup %6965  ;;  %5646 = vmatpush.xpose.msrb.mxu2 %v5379_v29  ;;  %5666 = vmatpush.xpose.msrb.mxu3 %v5380_v2  ;;  %v11138_v34 = vpop.xlane.xlu0 %3320  ;;  %v3817_v26 = vadd.f32 %v11073_v48, %v3816_v19  ;;  %vm3819_vm11 = vweird.f32 %v11073_v48  ;;  %v3822_v31 = vand.u32 2147483647, %v11024_v60  ;;  %v4097_v2 = vadd.f32 %v11081_v57, %v4096_v6  ;;  %v15465_v6 = vld [vmem:[#allocation26_spill] sm:$0xff] }
 0x671   : > { %v11132_v1 = vpop.eup %6967  ;;  %v4080_v63 = vmul.f32 %v11124_v30, %v11087_v33  ;;  %v11136_v16 = vpop.xlane.xlu2 %3218  ;;  %3392 = vadd.xlane.f32.xlu1 %v10576_v15  ;;  %vm4099_vm12 = vweird.f32 %v11081_v57  ;;  %v4102_v29 = vand.u32 2147483647, %v11039_v5  ;;  %v11156_v59 = vmul.f32 %v11113_v24, %v10844_v28  ;;  %3494 = vadd.xlane.f32.xlu2 %v3493_v62 }
 0x672   : > { %15460 = vst [vmem:[#allocation266_spill] sm:$0xff] %v11132_v1  ;;  %v11143_v10 = vpop.eup %6969  ;;  %6975 = vrcp.f32 %v11136_v16  ;;  %v11147_v52 = vpop.xlane.xlu1 %2369  ;;  %vm3818_vm13 = vweird.f32 %v11024_v60  ;;  %v2610_v17 = vsub.f32 %v15465_v6, %v10915_v42  ;;  %v3135_v14 = vmul.f32 1.442695, %v2637_v47  ;;  %v15466_v47 = vld [vmem:[#allocation148_spill] sm:$0xff] }
 0x673   : > { %15461 = vst [vmem:[#allocation249_spill] sm:$0xff] %v11143_v10  ;;  %3434 = vadd.xlane.f32.xlu0 %v3433_v56  ;;  %v11152_v19 = vpop.eup %6971  ;;  %v15463_v56 = vld [vmem:[#allocation181_spill] sm:$0xff]  ;;  %v4081_v15 = vsub.f32 1.0, %v4080_v63  ;;  %vm4098_vm14 = vweird.f32 %v11039_v5  ;;  %v3825_v50 = vor.u32 1.1754944e-38, %v3824_v55  ;;  %vm3820_vm15 = vmor %vm3818_vm13, %vm3819_vm11  ;;  %v4105_v58 = vor.u32 1.1754944e-38, %v4104_v35 }
 0x674   : > { %15462 = vst [vmem:[#allocation251_spill] sm:$0xff] %v11152_v19  ;;  %v2609_v40 = vsub.f32 %v15463_v56, %v10915_v42  ;;  %v11161_v27 = vpop.eup %6973  ;;  %v3821_v56 = vsel %vm3820_vm15, %v11073_v48, %v3817_v26  ;;  %vm3823_vm1 = vcmp.eq.f32.partialorder %v3822_v31, 8.507059e+37  ;;  %vm4100_vm2 = vmor %vm4098_vm14, %vm4099_vm12  ;;  %v3137_v60 = vmul.f32 1.442695, %v2638_v0  ;;  %v15467_v63 = vld [vmem:[#allocation149_spill] sm:$0xff]  ;;  %v15469_v26 = vld [vmem:[#allocation215_spill] sm:$0xff] }
 0x675   : > { %15464 = vst [vmem:[#allocation153_spill] sm:$0xff] %v11161_v27  ;;  %v4082_v37 = vmul.f32 %v11124_v30, %v4081_v15  ;;  %v3826_v62 = vsel %vm3823_vm1, %v3825_v50, %v3821_v56  ;;  %v4101_v42 = vsel %vm4100_vm2, %v11081_v57, %v4097_v2  ;;  %vm4103_vm3 = vcmp.eq.f32.partialorder %v4102_v29, 8.507059e+37  ;;  %v15468_v15 = vld [vmem:[#allocation97_spill] sm:$0xff] }
 0x676   : > { %v4090_v5 = vand.u32 2147483648, %v11087_v33  ;;  %v5377_v55 = vmul.f32 %v15466_v47, %v3826_v62  ;;  %v5378_v6 = vmul.f32 %v15467_v63, %v3826_v62  ;;  %v4106_v35 = vsel %vm4103_vm3, %v4105_v58, %v4101_v42  ;;  %v15470_v29 = vld [vmem:[#allocation177_spill] sm:$0xff]  ;;  %v15473_v63 = vld [vmem:[#allocation36_spill] sm:$0xff] }
 0x677   : > { %v5417_v48 = vmul.f32 %v15468_v15, %v4106_v35  ;;  %v5418_v31 = vmul.f32 %v15469_v26, %v4106_v35  ;;  %v4083_v11 = vadd.f32 %v11124_v30, %v4082_v37  ;;  %vm4085_vm4 = vweird.f32 %v11124_v30 }
 0x678   : > { %v11176_v28 = vpop.eup %6975  ;;  %v3079_v50 = vmul.f32 1.442695, %v2609_v40  ;;  %6977 = vrcp.f32 %v10975_v46  ;;  %5647 = vmatpush.xpose.msrb.mxu2 %v5377_v55  ;;  %5667 = vmatpush.xpose.msrb.mxu3 %v5378_v6  ;;  %v11187_v58 = vpop.xlane.xlu0 %2366  ;;  %v4088_v2 = vand.u32 2147483647, %v11087_v33  ;;  %v2607_v56 = vsub.f32 %v15470_v29, %v10977_v21  ;;  %v15475_v6 = vld [vmem:[#allocation156_spill] sm:$0xff] }
 0x679   : > { %v3800_v57 = vmul.f32 %v11176_v28, %v11136_v16  ;;  %v11185_v0 = vpop.xlane.xlu2 %3275  ;;  %vm4084_vm5 = vweird.f32 %v11087_v33  ;;  %5683 = vmatpush.xpose.msrb.mxu0 %v5417_v48  ;;  %5703 = vmatpush.xpose.msrb.mxu1 %v5418_v31  ;;  %v3535_v37 = vadd.f32 %v11050_v12, %v11012_v7  ;;  %v15471_v62 = vsub.f32 1.0, %v11077_v13  ;;  %v15474_v33 = vld [vmem:[#allocation155_spill] sm:$0xff] }
 0x67a   : > { %6979 = vrcp.f32 %v11185_v0  ;;  %v11196_v40 = vpop.xlane.xlu1 %2324  ;;  %v4319_v47 = vsub.f32 1.0, %v11156_v59  ;;  %v15476_v35 = vmax.f32 %v15474_v33, %v15475_v6  ;;  %vm4086_vm6 = vmor %vm4084_vm5, %vm4085_vm4  ;;  %v3081_v15 = vmul.f32 1.442695, %v2610_v17  ;;  %v15477_v59 = vld [vmem:[#allocation179_spill] sm:$0xff]  ;;  %v15511_v33 = vld [vmem:[#allocation216_spill] sm:$0xff] }
 0x67b   : > { %v11201_v42 = vmul.f32 %v11054_v32, %v15471_v62  ;;  %6981 = vpow2.f32 %v3135_v14  ;;  %v3801_v55 = vsub.f32 1.0, %v3800_v57  ;;  %3389 = vadd.xlane.f32.xlu0 %v15473_v63  ;;  %v4091_v48 = vor.u32 1.1754944e-38, %v4090_v5  ;;  %3536 = vadd.xlane.f32.xlu1 %v3535_v37  ;;  %v15497_v7 = vld [vmem:[#allocation63_spill] sm:$0xff] }
 0x67c   : > { %2300 = vmax.xlane.f32.xlu2 %v15476_v35  ;;  %6983 = vpow2.f32 %v3137_v60  ;;  %v4087_v13 = vsel %vm4086_vm6, %v11124_v30, %v4083_v11  ;;  %v2608_v14 = vsub.f32 %v15477_v59, %v10977_v21  ;;  %vm4089_vm7 = vcmp.eq.f32.partialorder %v4088_v2, 8.507059e+37  ;;  %v15479_v60 = vld [vmem:[#allocation129_spill] sm:$0xff]  ;;  %v15480_v11 = vld [vmem:[#allocation228_spill] sm:$0xff] }
 0x67d   : > { %15472 = vst [vmem:[#allocation132_spill] sm:$0xff] %v11201_v42  ;;  %6985 = vpow2.f32 %v3079_v50  ;;  %v3802_v26 = vmul.f32 %v11176_v28, %v3801_v55  ;;  %v4314_v31 = vand.u32 2147483648, %v10975_v46  ;;  %v3075_v57 = vmul.f32 1.442695, %v2607_v56 }
 0x67e   : > { %v4092_v29 = vsel %vm4089_vm7, %v4091_v48, %v4087_v13  ;;  %vm3805_vm8 = vweird.f32 %v11176_v28  ;;  %v11216_v62 = vpop.eup %6977  ;;  %v3810_v17 = vand.u32 2147483648, %v11136_v16  ;;  %v11225_v2 = vmul.f32 %v11113_v24, %v4319_v47  ;;  %v15483_v48 = vld [vmem:[#allocation41_spill] sm:$0xff]  ;;  %v15484_v13 = vld [vmem:[#allocation42_spill] sm:$0xff] }
 0x67f   : > { %15478 = vst [vmem:[#allocation255_spill] sm:$0xff] %v11216_v62  ;;  %v5415_v5 = vmul.f32 %v15479_v60, %v4092_v29  ;;  %v5416_v30 = vmul.f32 %v15480_v11, %v4092_v29  ;;  %v3803_v50 = vadd.f32 %v11176_v28, %v3802_v26  ;;  %6987 = vpow2.f32 %v3081_v15 }
 0x680   : > { %v11222_v21 = vpop.eup %6979  ;;  %15481 = vst [vmem:[#allocation5_spill] sm:$0xff] %v11225_v2  ;;  %vm3804_vm9 = vweird.f32 %v11136_v16  ;;  %v3808_v56 = vand.u32 2147483647, %v11136_v16  ;;  %v3077_v55 = vmul.f32 1.442695, %v2608_v14  ;;  %v3532_v35 = vadd.f32 %v11103_v25, %v11092_v22  ;;  %v11239_v15 = vpop.xlane.xlu0 %2321  ;;  %v15491_v22 = vld [vmem:[#allocation233_spill] sm:$0xff] }
 0x681   : > { %v11229_v37 = vpop.eup %6981  ;;  %v4066_v63 = vmul.f32 %v11222_v21, %v11185_v0  ;;  %5684 = vmatpush.xpose.msrb.mxu0 %v5415_v5  ;;  %5704 = vmatpush.xpose.msrb.mxu1 %v5416_v30  ;;  %v3430_v47 = vadd.f32 %v15484_v13, %v15483_v48  ;;  %v11237_v59 = vpop.xlane.xlu2 %3317  ;;  %vm11243_vm10 = vmor %vm3804_vm9, %vm3805_vm8  ;;  %v11249_v26 = vor.u32 1.1754944e-38, %v4314_v31  ;;  %6989 = vrcp.f32 %v11100_v23 }
 0x682   : > { %15482 = vst [vmem:[#allocation38_spill] sm:$0xff] %v11229_v37  ;;  %v11247_v14 = vpop.eup %6983  ;;  %v3490_v29 = vadd.f32 %v11067_v54, %v11060_v9  ;;  %v11254_v60 = vpop.xlane.xlu1 %3215  ;;  %v3807_v5 = vsel %vm11243_vm10, %v11176_v28, %v3803_v50  ;;  %v4304_v30 = vmul.f32 %v11216_v62, %v10975_v46  ;;  %6991 = vpow2.f32 %v3075_v57  ;;  %v15492_v54 = vld [vmem:[#allocation236_spill] sm:$0xff]  ;;  %v15493_v28 = vld [vmem:[#allocation173_spill] sm:$0xff] }
 0x683   : > { %15485 = vst [vmem:[#allocation94_spill] sm:$0xff] %v11237_v59  ;;  %v11259_v11 = vpop.eup %6985  ;;  %v3811_v25 = vor.u32 1.1754944e-38, %v3810_v17  ;;  %v4067_v31 = vsub.f32 1.0, %v4066_v63  ;;  %3533 = vadd.xlane.f32.xlu0 %v3532_v35  ;;  %v2635_v12 = vsub.f32 %v15491_v22, %v11022_v39  ;;  %v2636_v9 = vsub.f32 %v15492_v54, %v11022_v39  ;;  %v15495_v35 = vld [vmem:[#allocation174_spill] sm:$0xff]  ;;  %v15526_v46 = vld [vmem:[#allocation49_spill] sm:$0xff] }
 0x684   : > { %15488 = vst [vmem:[#allocation103_spill] sm:$0xff] %v11247_v14  ;;  %3431 = vadd.xlane.f32.xlu2 %v3430_v47  ;;  %3491 = vadd.xlane.f32.xlu1 %v3490_v29  ;;  %6993 = vrcp.f32 %v11254_v60  ;;  %vm3809_vm11 = vcmp.eq.f32.partialorder %v3808_v56, 8.507059e+37  ;;  %v2605_v50 = vsub.f32 %v15493_v28, %v11085_v51  ;;  %v2606_v47 = vsub.f32 %v15495_v35, %v11085_v51  ;;  %v15496_v22 = vld [vmem:[#allocation62_spill] sm:$0xff]  ;;  %v15499_v29 = vld [vmem:[#allocation51_spill] sm:$0xff]  ;;  %v15502_v35 = vld [vmem:[#allocation268_spill] sm:$0xff] }
 0x685   : > { %15489 = vst [vmem:[#allocation10_spill] sm:$0xff] %v11249_v26  ;;  %6995 = vpow2.f32 %v3077_v55  ;;  %v4068_v57 = vmul.f32 %v11222_v21, %v4067_v31  ;;  %v3812_v17 = vsel %vm3809_vm11, %v3811_v25, %v3807_v5  ;;  %v11271_v63 = vpop.eup %6987  ;;  %vm4071_vm12 = vweird.f32 %v11222_v21  ;;  %v15498_v55 = vld [vmem:[#allocation47_spill] sm:$0xff] }
 0x686   : > { %15490 = vst [vmem:[#allocation137_spill] sm:$0xff] %v11259_v11  ;;  %v5375_v16 = vmul.f32 %v15496_v22, %v3812_v17  ;;  %v5376_v39 = vmul.f32 %v15497_v7, %v3812_v17  ;;  %v4305_v54 = vsub.f32 1.0, %v4304_v30  ;;  %v4076_v56 = vand.u32 2147483648, %v11185_v0 }
 0x687   : > { %15494 = vst [vmem:[#allocation107_spill] sm:$0xff] %v11271_v63  ;;  %v3427_v28 = vadd.f32 %v15499_v29, %v15498_v55  ;;  %v4069_v31 = vadd.f32 %v11222_v21, %v4068_v57  ;;  %v11282_v25 = vpop.eup %6989  ;;  %v3131_v5 = vmul.f32 1.442695, %v2635_v12  ;;  %v3133_v13 = vmul.f32 1.442695, %v2636_v9  ;;  %v15503_v57 = vld [vmem:[#allocation269_spill] sm:$0xff] }
 0x688   : > { %15500 = vst [vmem:[#allocation108_spill] sm:$0xff] %v11282_v25  ;;  %vm4070_vm13 = vweird.f32 %v11185_v0  ;;  %5648 = vmatpush.xpose.msrb.mxu2 %v5375_v16  ;;  %5668 = vmatpush.xpose.msrb.mxu3 %v5376_v39  ;;  %v4074_v7 = vand.u32 2147483647, %v11185_v0  ;;  %v11286_v51 = vpop.eup %6991  ;;  %v3071_v30 = vmul.f32 1.442695, %v2605_v50  ;;  %6997 = vrcp.f32 %v11138_v34  ;;  %v11295_v12 = vpop.xlane.xlu0 %3212  ;;  %v15506_v16 = vld [vmem:[#allocation128_spill] sm:$0xff] }
 0x689   : > { %15501 = vst [vmem:[#allocation29_spill] sm:$0xff] %v11286_v51  ;;  %v3487_v17 = vadd.f32 %v11143_v10, %v11132_v1  ;;  %v3385_v22 = vadd.f32 %v15503_v57, %v15502_v35  ;;  %v11293_v29 = vpop.xlane.xlu2 %2363  ;;  %vm11299_vm14 = vmor %vm4070_vm13, %vm4071_vm12  ;;  %v3073_v50 = vmul.f32 1.442695, %v2606_v47  ;;  %v2633_v39 = vsub.f32 %v15506_v16, %v11147_v52 }
 0x68a   : > { %v11303_v0 = vpop.eup %6993  ;;  %v11307_v10 = vpop.xlane.xlu1 %3272  ;;  %6999 = vrcp.f32 %v11295_v12  ;;  %v4073_v1 = vsel %vm11299_vm14, %v11222_v21, %v4069_v31  ;;  %v11317_v57 = vmul.f32 %v11282_v25, %v11100_v23  ;;  %v4077_v35 = vor.u32 1.1754944e-38, %v4076_v56  ;;  %v15509_v21 = vld [vmem:[#allocation134_spill] sm:$0xff] }
 0x68b   : > { %v11313_v55 = vpop.eup %6995  ;;  %v3786_v47 = vmul.f32 %v11303_v0, %v11254_v60  ;;  %3428 = vadd.xlane.f32.xlu0 %v3427_v28  ;;  %7001 = vrcp.f32 %v11307_v10  ;;  %v11323_v16 = vmul.f32 %v11216_v62, %v4305_v54  ;;  %v2634_v31 = vsub.f32 %v15509_v21, %v11147_v52  ;;  %v15510_v28 = vld [vmem:[#allocation91_spill] sm:$0xff] }
 0x68c   : > { %15507 = vst [vmem:[#allocation20_spill] sm:$0xff] %v11313_v55  ;;  %3488 = vadd.xlane.f32.xlu2 %v3487_v17  ;;  %7003 = vpow2.f32 %v3131_v5  ;;  %3386 = vadd.xlane.f32.xlu1 %v3385_v22  ;;  %vm4075_vm15 = vcmp.eq.f32.partialorder %v4074_v7, 8.507059e+37  ;;  %v3127_v6 = vmul.f32 1.442695, %v2633_v39  ;;  %v15513_v5 = vld [vmem:[#allocation267_spill] sm:$0xff]  ;;  %v15514_v7 = vld [vmem:[#allocation206_spill] sm:$0xff]  ;;  %vm3791_vm1 = vweird.f32 %v11303_v0 }
 0x68d   : > { %15508 = vst [vmem:[#allocation68_spill] sm:$0xff] %v11323_v16  ;;  %7005 = vpow2.f32 %v3133_v13  ;;  %v3787_v56 = vsub.f32 1.0, %v3786_v47  ;;  %v4078_v48 = vsel %vm4075_vm15, %v4077_v35, %v4073_v1  ;;  %v3382_v13 = vadd.f32 %v15514_v7, %v15513_v5  ;;  %v15525_v16 = vld [vmem:[#allocation48_spill] sm:$0xff] }
 0x68e   : > { %7007 = vpow2.f32 %v3071_v30  ;;  %v5413_v17 = vmul.f32 %v15510_v28, %v4078_v48  ;;  %v5414_v26 = vmul.f32 %v15511_v33, %v4078_v48  ;;  %v11330_v24 = vpop.eup %6997  ;;  %v11338_v47 = vmul.f32 1.442695, %v2634_v31 }
 0x68f   : > { %15512 = vst [vmem:[#allocation58_spill] sm:$0xff] %v11330_v24  ;;  %7009 = vpow2.f32 %v3073_v50  ;;  %v3788_v52 = vmul.f32 %v11303_v0, %v3787_v56  ;;  %v3796_v30 = vand.u32 2147483648, %v11254_v60  ;;  %v3484_v33 = vadd.f32 %v11271_v63, %v11259_v11  ;;  %v15518_v63 = vld [vmem:[#allocation170_spill] sm:$0xff] }
 0x690   : > { %v11336_v22 = vpop.eup %6999  ;;  %5685 = vmatpush.xpose.msrb.mxu0 %v5413_v17  ;;  %5705 = vmatpush.xpose.msrb.mxu1 %v5414_v26  ;;  %v11350_v39 = vpop.xlane.xlu0 %3269  ;;  %v3794_v31 = vand.u32 2147483647, %v11254_v60  ;;  %7011 = vpow2.f32 %v3127_v6  ;;  %v15516_v26 = vld [vmem:[#allocation12_spill] sm:$0xff]  ;;  %v3529_v1 = vadd.f32 %v11161_v27, %v11152_v19  ;;  %v2604_v6 = vsub.f32 %v15518_v63, %v11196_v40  ;;  %v15520_v27 = vld [vmem:[#allocation86_spill] sm:$0xff] }
 0x691   : > { %v11344_v48 = vpop.eup %7001  ;;  %v3772_v35 = vmul.f32 %v11336_v22, %v11295_v12  ;;  %v11348_v50 = vpop.xlane.xlu2 %2318  ;;  %v3789_v21 = vadd.f32 %v11303_v0, %v3788_v52  ;;  %v2603_v28 = vsub.f32 %v15516_v26, %v11196_v40  ;;  %v11369_v52 = vmul.f32 %v11330_v24, %v11138_v34  ;;  %v15522_v40 = vld [vmem:[#allocation74_spill] sm:$0xff] }
 0x692   : > { %v11355_v56 = vpop.eup %7003  ;;  %v4052_v17 = vmul.f32 %v11344_v48, %v11307_v10  ;;  %v11363_v54 = vpop.xlane.xlu1 %3314  ;;  %vm3790_vm2 = vweird.f32 %v11254_v60  ;;  %v2631_v19 = vsub.f32 %v15520_v27, %v11187_v58  ;;  %v3797_v7 = vor.u32 1.1754944e-38, %v3796_v30  ;;  %v15523_v60 = vld [vmem:[#allocation93_spill] sm:$0xff] }
 0x693   : > { %15515 = vst [vmem:[#allocation147_spill] sm:$0xff] %v11355_v56  ;;  %v11365_v9 = vpop.eup %7005  ;;  %v3773_v26 = vsub.f32 1.0, %v3772_v35  ;;  %3485 = vadd.xlane.f32.xlu0 %v3484_v33  ;;  %7013 = vrcp.f32 %v11350_v39  ;;  %vm3792_vm3 = vmor %vm3790_vm2, %vm3791_vm1  ;;  %vm4435_vm4 = vweird.f32 %v15522_v40  ;;  %v2632_v63 = vsub.f32 %v15523_v60, %v11187_v58 }
 0x694   : > { %15517 = vst [vmem:[#allocation6_spill] sm:$0xff] %v11365_v9  ;;  %3383 = vadd.xlane.f32.xlu2 %v3382_v13  ;;  %v11374_v11 = vpop.eup %7007  ;;  %v4053_v5 = vsub.f32 1.0, %v4052_v17  ;;  %3530 = vadd.xlane.f32.xlu1 %v3529_v1  ;;  %v3793_v33 = vsel %vm3792_vm3, %v11303_v0, %v3789_v21  ;;  %vm3795_vm5 = vcmp.eq.f32.partialorder %v3794_v31, 8.507059e+37  ;;  %v3067_v27 = vmul.f32 1.442695, %v2603_v28  ;;  %v15524_v17 = vld [vmem:[#allocation28_spill] sm:$0xff] }
 0x695   : > { %15519 = vst [vmem:[#allocation257_spill] sm:$0xff] %v11374_v11  ;;  %v11381_v62 = vpop.eup %7009  ;;  %v3774_v13 = vmul.f32 %v11336_v22, %v3773_v26  ;;  %v3782_v30 = vand.u32 2147483648, %v11295_v12  ;;  %v3798_v35 = vsel %vm3795_vm5, %v3797_v7, %v3793_v33  ;;  %vm4434_vm6 = vweird.f32 %v15524_v17  ;;  %v15530_v33 = vld [vmem:[#allocation208_spill] sm:$0xff] }
 0x696   : > { %15521 = vst [vmem:[#allocation230_spill] sm:$0xff] %v11381_v62  ;;  %v4054_v1 = vmul.f32 %v11344_v48, %v4053_v5  ;;  %v5373_v2 = vmul.f32 %v15525_v16, %v3798_v35  ;;  %v5374_v32 = vmul.f32 %v15526_v46, %v3798_v35  ;;  %vm3777_vm7 = vweird.f32 %v11336_v22  ;;  %v11395_v26 = vpop.eup %7011  ;;  %v15528_v46 = vld [vmem:[#allocation200_spill] sm:$0xff]  ;;  %v15529_v16 = vld [vmem:[#allocation202_spill] sm:$0xff]  ;;  %vm11446_vm15 = vmor %vm4434_vm6, %vm4435_vm4 }
 0x697   : > { %v3780_v58 = vand.u32 2147483647, %v11295_v12  ;;  %15527 = vst [vmem:[#allocation231_spill] sm:$0xff] %v11395_v26  ;;  %v3069_v0 = vmul.f32 1.442695, %v2604_v6  ;;  %v3775_v21 = vadd.f32 %v11336_v22, %v3774_v13  ;;  %vm4057_vm8 = vweird.f32 %v11344_v48 }
 0x698   : > { %v4055_v5 = vadd.f32 %v11344_v48, %v4054_v1  ;;  %v4062_v7 = vand.u32 2147483648, %v11307_v10  ;;  %vm3776_vm9 = vweird.f32 %v11295_v12  ;;  %5649 = vmatpush.xpose.msrb.mxu2 %v5373_v2  ;;  %5669 = vmatpush.xpose.msrb.mxu3 %v5374_v32  ;;  %v3379_v31 = vadd.f32 %v15529_v16, %v15528_v46  ;;  %v15531_v1 = vld [vmem:[#allocation210_spill] sm:$0xff] }
 0x699   : > { %v3526_v28 = vadd.f32 %v11247_v14, %v11229_v37  ;;  %v11406_v60 = vpop.xlane.xlu2 %3311  ;;  %v11408_v6 = vpop.eup %7013  ;;  %vm4056_vm10 = vweird.f32 %v11307_v10  ;;  %v3783_v13 = vor.u32 1.1754944e-38, %v3782_v30  ;;  %v3424_v35 = vadd.f32 %v15531_v1, %v15530_v33  ;;  %vm3778_vm11 = vmor %vm3776_vm9, %vm3777_vm7  ;;  %v15541_v30 = vld [vmem:[#allocation246_spill] sm:$0xff] }
 0x69a   : > { %v11413_v42 = vpop.xlane.xlu1 %2360  ;;  %v4060_v32 = vand.u32 2147483647, %v11307_v10  ;;  %7015 = vpow2.f32 %v11338_v47  ;;  %v4277_v2 = vsub.f32 1.0, %v11369_v52  ;;  %v3779_v12 = vsel %vm3778_vm11, %v11336_v22, %v3775_v21  ;;  %vm11423_vm13 = vmor %vm4056_vm10, %vm4057_vm8  ;;  %v11427_v37 = vpop.xlane.xlu0 %3449  ;;  %v15572_v1 = vld [vmem:[#allocation118_spill] sm:$0xff] }
 0x69b   : > { %3380 = vadd.xlane.f32.xlu0 %v3379_v31  ;;  %vm3781_vm12 = vcmp.eq.f32.partialorder %v3780_v58, 8.507059e+37  ;;  %7017 = vpow2.f32 %v3067_v27  ;;  %v3123_v14 = vmul.f32 1.442695, %v2631_v19  ;;  %v4059_v47 = vsel %vm11423_vm13, %v11344_v48, %v4055_v5  ;;  %v15534_v58 = vld [vmem:[#allocation76_spill] sm:$0xff]  ;;  %v15535_v19 = vld [vmem:[#allocation145_spill] sm:$0xff]  ;;  %v15537_v48 = vld [vmem:[#allocation119_spill] sm:$0xff] }
 0x69c   : > { %3527 = vadd.xlane.f32.xlu2 %v3526_v28  ;;  %3425 = vadd.xlane.f32.xlu1 %v3424_v35  ;;  %v3784_v10 = vsel %vm3781_vm12, %v3783_v13, %v3779_v12  ;;  %v4063_v52 = vor.u32 1.1754944e-38, %v4062_v7  ;;  %v4038_v22 = vmul.f32 %v11408_v6, %v11350_v39  ;;  %v4433_v21 = vadd.f32 %v15522_v40, %v15534_v58  ;;  %v15536_v13 = vld [vmem:[#allocation221_spill] sm:$0xff] }
 0x69d   : > { %v4438_v31 = vand.u32 2147483647, %v15524_v17  ;;  %7019 = vpow2.f32 %v3069_v0  ;;  %v3125_v27 = vmul.f32 1.442695, %v2632_v63  ;;  %v2601_v28 = vsub.f32 %v15535_v19, %v11239_v15  ;;  %v15540_v63 = vld [vmem:[#allocation166_spill] sm:$0xff]  ;;  %v15545_v17 = vld [vmem:[#allocation100_spill] sm:$0xff] }
 0x69e   : > { %vm4061_vm14 = vcmp.eq.f32.partialorder %v4060_v32, 8.507059e+37  ;;  %7021 = vrcp.f32 %v11237_v59  ;;  %v5371_v35 = vmul.f32 %v15536_v13, %v3784_v10  ;;  %v5372_v5 = vmul.f32 %v15537_v48, %v3784_v10  ;;  %v15543_v10 = vld [vmem:[#allocation25_spill] sm:$0xff] }
 0x69f   : > { %v4064_v7 = vsel %vm4061_vm14, %v4063_v52, %v4059_v47  ;;  %v2602_v0 = vsub.f32 %v15540_v63, %v11239_v15  ;;  %v3523_v58 = vadd.f32 %v11365_v9, %v11355_v56  ;;  %v15542_v19 = vsub.f32 1.0, %v10663_v36  ;;  %v15547_v9 = vld [vmem:[#allocation52_spill] sm:$0xff]  ;;  %v15548_v36 = vld [vmem:[#allocation55_spill] sm:$0xff] }
 0x6a0   : > { %v5411_v32 = vmul.f32 %v15541_v30, %v4064_v7  ;;  %v11458_v52 = vpop.eup %7015  ;;  %v4039_v13 = vsub.f32 1.0, %v4038_v22  ;;  %5650 = vmatpush.xpose.msrb.mxu2 %v5371_v35  ;;  %5670 = vmatpush.xpose.msrb.mxu3 %v5372_v5  ;;  %v5412_v48 = vmul.f32 %v15545_v17, %v4064_v7  ;;  %v4437_v15 = vsel %vm11446_vm15, %v15522_v40, %v4433_v21  ;;  %v15549_v22 = vld [vmem:[#allocation219_spill] sm:$0xff]  ;;  %v15552_v21 = vld [vmem:[#allocation88_spill] sm:$0xff] }
 0x6a1   : > { %v4418_v47 = vmul.f32 %v15543_v10, %v15542_v19  ;;  %15544 = vst [vmem:[#allocation196_spill] sm:$0xff] %v11458_v52  ;;  %vm4439_vm1 = vcmp.eq.f32.partialorder %v4438_v31, 8.507059e+37  ;;  %v11464_v63 = vpop.eup %7017  ;;  %v3063_v30 = vmul.f32 1.442695, %v2601_v28  ;;  %v3421_v56 = vadd.f32 %v15548_v36, %v15547_v9  ;;  %v11471_v5 = vpop.xlane.xlu2 %3266  ;;  %v15553_v28 = vld [vmem:[#allocation60_spill] sm:$0xff] }
 0x6a2   : > { %15546 = vst [vmem:[#allocation198_spill] sm:$0xff] %v11464_v63  ;;  %5686 = vmatpush.xpose.msrb.mxu0 %v5411_v32  ;;  %v3481_v19 = vadd.f32 %v11313_v55, %v11286_v51  ;;  %v4442_v35 = vsel %vm4439_vm1, %v15549_v22, %v4437_v15  ;;  %v11473_v7 = vpop.xlane.xlu1 %2315  ;;  %v15550_v12 = vand.u32 2147483648, %v11100_v23  ;;  %7023 = vpow2.f32 %v3123_v14  ;;  %5706 = vmatpush.xpose.msrb.mxu1 %v5412_v48  ;;  %v15571_v9 = vld [vmem:[#allocation56_spill] sm:$0xff] }
 0x6a3   : > { %3524 = vadd.xlane.f32.xlu0 %v3523_v58  ;;  %v5465_v31 = vmul.f32 %v15552_v21, %v4442_v35  ;;  %v5466_v32 = vmul.f32 %v15553_v28, %v4442_v35  ;;  %v11481_v17 = vpop.eup %7019  ;;  %v15555_v55 = vsub.f32 1.0, %v11317_v57  ;;  %v11489_v22 = vmul.f32 %v11330_v24, %v4277_v2  ;;  %v15560_v2 = vld [vmem:[#allocation211_spill] sm:$0xff]  ;;  %v15563_v28 = vld [vmem:[#allocation30_spill] sm:$0xff] }
 0x6a4   : > { %v11477_v40 = vor.u32 1.1754944e-38, %v15550_v12  ;;  %15554 = vst [vmem:[#allocation139_spill] sm:$0xff] %v11481_v17  ;;  %v15558_v12 = vand.u32 2147483648, %v11138_v34  ;;  %7025 = vpow2.f32 %v3125_v27  ;;  %3422 = vadd.xlane.f32.xlu2 %v3421_v56  ;;  %3482 = vadd.xlane.f32.xlu1 %v3481_v19  ;;  %v11495_v14 = vpop.xlane.xlu0 %2357  ;;  %v11497_v58 = vpop.eup %7021  ;;  %v4272_v48 = vand.u32 2147483648, %v11237_v59  ;;  %v15561_v56 = vld [vmem:[#allocation105_spill] sm:$0xff]  ;;  %v15562_v21 = vld [vmem:[#allocation171_spill] sm:$0xff] }
 0x6a5   : > { %v11486_v15 = vmul.f32 %v11282_v25, %v15555_v55  ;;  %15557 = vst [vmem:[#allocation114_spill] sm:$0xff] %v11489_v22  ;;  %v4040_v57 = vmul.f32 %v11408_v6, %v4039_v13  ;;  %5715 = vmatpush.xpose.msra.mxu2 %v5465_v31  ;;  %5735 = vmatpush.xpose.msra.mxu3 %v5466_v32  ;;  %vm4421_vm2 = vweird.f32 %v15543_v10  ;;  %vm4406_vm3 = vweird.f32 %v15560_v2  ;;  %v15564_v13 = vld [vmem:[#allocation96_spill] sm:$0xff]  ;;  %v15565_v31 = vld [vmem:[#allocation195_spill] sm:$0xff] }
 0x6a6   : > { %15551 = vst [vmem:[#allocation138_spill] sm:$0xff] %v11477_v40  ;;  %v11493_v51 = vor.u32 1.1754944e-38, %v15558_v12  ;;  %v4419_v55 = vadd.f32 %v15543_v10, %v4418_v47  ;;  %7027 = vpow2.f32 %v3063_v30  ;;  %v3065_v27 = vmul.f32 1.442695, %v2602_v0  ;;  %5651 = vmatmul.f32.vlgmr.msrb.gmra.mxu2 %v15562_v21  ;;  %5671 = vmatmul.f32.vlgmr.msrb.gmra.mxu3 %v15563_v28  ;;  %v15566_v32 = vld [vmem:[#allocation199_spill] sm:$0xff]  ;;  %v15573_v30 = vld [vmem:[#allocation209_spill] sm:$0xff] }
 0x6a7   : > { %15556 = vst [vmem:[#allocation59_spill] sm:$0xff] %v11486_v15  ;;  %v2629_v19 = vsub.f32 %v15561_v56, %v11293_v29  ;;  %v4048_v35 = vand.u32 2147483648, %v11350_v39  ;;  %7029 = vrcp.f32 %v11363_v54  ;;  %vm4420_vm4 = vweird.f32 %v15564_v13 }
 0x6a8   : > { %15559 = vst [vmem:[#allocation136_spill] sm:$0xff] %v11493_v51  ;;  %v4424_v47 = vand.u32 2147483647, %v15564_v13  ;;  %v3376_v12 = vadd.f32 %v15566_v32, %v15565_v31  ;;  %v11516_v0 = vmul.f32 %v11497_v58, %v11237_v59  ;;  %vm4042_vm5 = vweird.f32 %v11350_v39  ;;  %vm11522_vm6 = vmor %vm4420_vm4, %vm4421_vm2  ;;  %v11527_v21 = vpop.eup %7023  ;;  %v15574_v51 = vld [vmem:[#allocation70_spill] sm:$0xff]  ;;  %v15581_v59 = vld [vmem:[#allocation227_spill] sm:$0xff] }
 0x6a9   : > { %7031 = vrcp.f32 %v11471_v5  ;;  %v4426_v56 = vand.u32 2147483648, %v15564_v13  ;;  %15569 = vst [vmem:[#allocation250_spill] sm:$0xff] %v11527_v21  ;;  %v4423_v28 = vsel %vm11522_vm6, %v15543_v10, %v4419_v55  ;;  %v4041_v32 = vadd.f32 %v11408_v6, %v4040_v57  ;;  %v11542_v10 = vpop.xlane.xlu2 %3446 }
 0x6aa   : > { %vm4043_vm7 = vweird.f32 %v11408_v6  ;;  %v4046_v31 = vand.u32 2147483647, %v11350_v39  ;;  %v11535_v36 = vpop.eup %7025  ;;  %vm4392_vm8 = vweird.f32 %v15571_v9  ;;  %v2630_v33 = vsub.f32 %v15572_v1, %v11293_v29  ;;  %v11544_v57 = vpop.xlane.xlu1 %3308  ;;  %v15576_v29 = vld [vmem:[#allocation144_spill] sm:$0xff] }
 0x6ab   : > { %15570 = vst [vmem:[#allocation120_spill] sm:$0xff] %v11535_v36  ;;  %v3119_v13 = vmul.f32 1.442695, %v2629_v19  ;;  %v4049_v16 = vor.u32 1.1754944e-38, %v4048_v35  ;;  %v4427_v46 = vor.u32 1.1754944e-38, %v4426_v56  ;;  %vm4044_vm9 = vmor %vm4042_vm5, %vm4043_vm7  ;;  %vm4425_vm10 = vcmp.eq.f32.partialorder %v4424_v47, 8.507059e+37 }
 0x6ac   : > { %v4045_v55 = vsel %vm4044_vm9, %v11408_v6, %v4041_v32  ;;  %vm4047_vm11 = vcmp.eq.f32.partialorder %v4046_v31, 8.507059e+37  ;;  %v3418_v24 = vadd.f32 %v15574_v51, %v15573_v30  ;;  %v11549_v22 = vpop.eup %7027  ;;  %v2599_v1 = vsub.f32 %v15576_v29, %v11348_v50  ;;  %v15577_v19 = vld [vmem:[#allocation165_spill] sm:$0xff]  ;;  %3377 = vadd.xlane.f32.xlu1 %v3376_v12  ;;  %v15578_v6 = vld [vmem:[#allocation90_spill] sm:$0xff]  ;;  %v15579_v32 = vld [vmem:[#allocation243_spill] sm:$0xff] }
 0x6ad   : > { %15575 = vst [vmem:[#allocation121_spill] sm:$0xff] %v11549_v22  ;;  %v2600_v39 = vsub.f32 %v15577_v19, %v11348_v50  ;;  %v4428_v35 = vsel %vm4425_vm10, %v4427_v46, %v4423_v28  ;;  %v4050_v56 = vsel %vm4047_vm11, %v4049_v16, %v4045_v55  ;;  %v11555_v40 = vpop.xlane.xlu0 %2312  ;;  %v11557_v47 = vpop.eup %7029  ;;  %vm4378_vm12 = vweird.f32 %v10460_v20  ;;  %v15580_v30 = vld [vmem:[#allocation123_spill] sm:$0xff]  ;;  %v15582_v46 = vld [vmem:[#allocation22_spill] sm:$0xff]  ;;  %v15583_v16 = vld [vmem:[#allocation213_spill] sm:$0xff] }
 0x6ae   : > { %v5463_v31 = vmul.f32 %v15578_v6, %v4428_v35  ;;  %v5464_v51 = vmul.f32 %v15579_v32, %v4428_v35  ;;  %v5409_v15 = vmul.f32 %v15580_v30, %v4050_v56  ;;  %v5410_v29 = vmul.f32 %v15581_v59, %v4050_v56  ;;  %3419 = vadd.xlane.f32.xlu0 %v3418_v24 }
 0x6af   : > { %v11564_v25 = vpop.eup %7031  ;;  %v11566_v50 = vor.u32 1.1754944e-38, %v4272_v48  ;;  %7033 = vpow2.f32 %v3065_v27  ;;  %v4405_v12 = vadd.f32 %v15583_v16, %v15582_v46  ;;  %vm4407_vm13 = vweird.f32 %v15583_v16  ;;  %v15586_v48 = vld [vmem:[#allocation186_spill] sm:$0xff]  ;;  %v15587_v27 = vld [vmem:[#allocation31_spill] sm:$0xff] }
 0x6b0   : > { %v4263_v28 = vsub.f32 1.0, %v11516_v0  ;;  %5716 = vmatpush.xpose.msra.mxu2 %v5463_v31  ;;  %5736 = vmatpush.xpose.msra.mxu3 %v5464_v51  ;;  %v3478_v55 = vadd.f32 %v11381_v62, %v11374_v11  ;;  %vm11576_vm14 = vmor %vm4406_vm3, %vm4407_vm13  ;;  %v4410_v59 = vand.u32 2147483647, %v15560_v2  ;;  %v3373_v30 = vadd.f32 %v15587_v27, %v15586_v48  ;;  %v15598_v62 = vld [vmem:[#allocation260_spill] sm:$0xff] }
 0x6b1   : > { %7035 = vpow2.f32 %v3119_v13  ;;  %v3121_v19 = vmul.f32 1.442695, %v2630_v33  ;;  %v4258_v0 = vand.u32 2147483648, %v11363_v54  ;;  %5687 = vmatpush.xpose.msrb.mxu0 %v5409_v15  ;;  %5707 = vmatpush.xpose.msrb.mxu1 %v5410_v29  ;;  %v4409_v51 = vsel %vm11576_vm14, %v15583_v16, %v4405_v12  ;;  %v15588_v13 = vld [vmem:[#allocation101_spill] sm:$0xff]  ;;  %v11597_v32 = vpop.xlane.xlu2 %3401  ;;  %v15590_v29 = vld [vmem:[#allocation110_spill] sm:$0xff]  ;;  %v15591_v16 = vld [vmem:[#allocation124_spill] sm:$0xff] }
 0x6b2   : > { %v3059_v35 = vmul.f32 1.442695, %v2599_v1  ;;  %v3061_v56 = vmul.f32 1.442695, %v2600_v39  ;;  %v4248_v6 = vmul.f32 %v11557_v47, %v11363_v54  ;;  %3479 = vadd.xlane.f32.xlu2 %v3478_v55  ;;  %vm4411_vm15 = vcmp.eq.f32.partialorder %v4410_v59, 8.507059e+37  ;;  %v11595_v31 = vpop.xlane.xlu1 %3263  ;;  %v15589_v1 = vld [vmem:[#allocation66_spill] sm:$0xff] }
 0x6b3   : > { %v4024_v2 = vmul.f32 %v11564_v25, %v11471_v5  ;;  %v4414_v33 = vsel %vm4411_vm15, %v15588_v13, %v4409_v51  ;;  %v4391_v15 = vadd.f32 %v10701_v8, %v10873_v38  ;;  %vm4393_vm1 = vweird.f32 %v10701_v8 }
 0x6b4   : > { %v2627_v39 = vsub.f32 %v15589_v1, %v11413_v42  ;;  %7037 = vrcp.f32 %v11427_v37  ;;  %v5461_v46 = vmul.f32 %v15590_v29, %v4414_v33  ;;  %v5462_v12 = vmul.f32 %v15591_v16, %v4414_v33  ;;  %vm11606_vm2 = vmor %vm4392_vm8, %vm4393_vm1  ;;  %v15596_v29 = vld [vmem:[#allocation71_spill] sm:$0xff] }
 0x6b5   : > { %v11610_v38 = vpop.eup %7033  ;;  %vm4364_vm3 = vweird.f32 %v10566_v18  ;;  %v4395_v24 = vsel %vm11606_vm2, %v10701_v8, %v4391_v15  ;;  %v4396_v59 = vand.u32 2147483647, %v15571_v9  ;;  %v3475_v51 = vadd.f32 %v11481_v17, %v11464_v63  ;;  %v11621_v33 = vpop.xlane.xlu0 %2354 }
 0x6b6   : > { %15594 = vst [vmem:[#allocation203_spill] sm:$0xff] %v11610_v38  ;;  %v3520_v13 = vadd.f32 %v11458_v52, %v11395_v26  ;;  %7039 = vrcp.f32 %v11406_v60  ;;  %5717 = vmatpush.xpose.msra.mxu2 %v5461_v46  ;;  %5737 = vmatpush.xpose.msra.mxu3 %v5462_v12  ;;  %v4377_v1 = vadd.f32 %v10805_v4, %v11001_v43  ;;  %vm4379_vm4 = vweird.f32 %v10805_v4  ;;  %v15597_v12 = vld [vmem:[#allocation24_spill] sm:$0xff] }
 0x6b7   : > { %v4382_v8 = vand.u32 2147483647, %v10460_v20  ;;  %v11628_v9 = vpop.eup %7035  ;;  %v4244_v15 = vand.u32 2147483648, %v11406_v60  ;;  %v2628_v16 = vsub.f32 %v15596_v29, %v11413_v42  ;;  %v4025_v55 = vsub.f32 1.0, %v4024_v2  ;;  %3476 = vadd.xlane.f32.xlu0 %v3475_v51  ;;  %vm4380_vm6 = vmor %vm4378_vm12, %vm4379_vm4  ;;  %v15599_v52 = vld [vmem:[#allocation8_spill] sm:$0xff] }
 0x6b8   : > { %15595 = vst [vmem:[#allocation191_spill] sm:$0xff] %v11628_v9  ;;  %vm4397_vm5 = vcmp.eq.f32.partialorder %v4396_v59, 8.507059e+37  ;;  %3521 = vadd.xlane.f32.xlu1 %v3520_v13  ;;  %v4249_v46 = vsub.f32 1.0, %v4248_v6  ;;  %v3115_v43 = vmul.f32 1.442695, %v2627_v39  ;;  %v4381_v63 = vsel %vm4380_vm6, %v10805_v4, %v4377_v1  ;;  %v15600_v6 = vld [vmem:[#allocation190_spill] sm:$0xff] }
 0x6b9   : > { %v4400_v17 = vsel %vm4397_vm5, %v15597_v12, %v4395_v24  ;;  %7041 = vpow2.f32 %v3121_v19  ;;  %vm4383_vm7 = vcmp.eq.f32.partialorder %v4382_v8, 8.507059e+37  ;;  %v11642_v2 = vmul.f32 %v11497_v58, %v4263_v28  ;;  %v15601_v39 = vld [vmem:[#allocation50_spill] sm:$0xff] }
 0x6ba   : > { %v5459_v11 = vmul.f32 %v15598_v62, %v4400_v17  ;;  %v5460_v26 = vmul.f32 %v15599_v52, %v4400_v17  ;;  %v11639_v42 = vpop.eup %7037  ;;  %7043 = vpow2.f32 %v3059_v35  ;;  %3374 = vadd.xlane.f32.xlu2 %v3373_v30  ;;  %v4386_v20 = vsel %vm4383_vm7, %v10957_v41, %v4381_v63  ;;  %v11652_v52 = vpop.xlane.xlu2 %3545  ;;  %v15611_v12 = vld [vmem:[#allocation214_spill] sm:$0xff]  ;;  %v15617_v30 = vld [vmem:[#allocation176_spill] sm:$0xff] }
 0x6bb   : > { %v3370_v24 = vadd.f32 %v15601_v39, %v15600_v6  ;;  %7045 = vpow2.f32 %v3061_v56  ;;  %v11647_v4 = vor.u32 1.1754944e-38, %v4258_v0  ;;  %v11649_v19 = vor.u32 1.1754944e-38, %v4244_v15  ;;  %v11654_v17 = vpop.xlane.xlu1 %3443  ;;  %v15602_v0 = vld [vmem:[#allocation241_spill] sm:$0xff]  ;;  %v15603_v56 = vld [vmem:[#allocation242_spill] sm:$0xff]  ;;  %v15607_v15 = vld [vmem:[#allocation143_spill] sm:$0xff] }
 0x6bc   : > { %v4026_v62 = vmul.f32 %v11564_v25, %v4025_v55  ;;  %5718 = vmatpush.xpose.msra.mxu2 %v5459_v11  ;;  %5738 = vmatpush.xpose.msra.mxu3 %v5460_v26  ;;  %v11656_v28 = vpop.eup %7039  ;;  %vm4350_vm8 = vweird.f32 %v10694_v45  ;;  %v11660_v41 = vmul.f32 %v11557_v47, %v4249_v46  ;;  %7047 = vpow2.f32 %v3115_v43 }
 0x6bd   : > { %v3117_v63 = vmul.f32 1.442695, %v2628_v16  ;;  %v5457_v35 = vmul.f32 %v15602_v0, %v4386_v20  ;;  %v5458_v11 = vmul.f32 %v15603_v56, %v4386_v20  ;;  %v4363_v26 = vadd.f32 %v10855_v3, %v11019_v53  ;;  %v11668_v59 = vpop.xlane.xlu0 %2309  ;;  %v15612_v20 = vld [vmem:[#allocation61_spill] sm:$0xff] }
 0x6be   : > { %vm4365_vm9 = vweird.f32 %v10855_v3  ;;  %v11672_v51 = vmul.f32 %v11639_v42, %v11427_v37  ;;  %vm4028_vm10 = vweird.f32 %v11471_v5  ;;  %v4034_v13 = vand.u32 2147483648, %v11471_v5 }
 0x6bf   : > { %vm11678_vm11 = vmor %vm4364_vm3, %vm4365_vm9  ;;  %v4368_v53 = vand.u32 2147483647, %v10566_v18  ;;  %v11683_v8 = vpop.eup %7041  ;;  %v2597_v29 = vsub.f32 %v15607_v15, %v11473_v7  ;;  %v4027_v55 = vadd.f32 %v11564_v25, %v4026_v62  ;;  %vm4029_vm12 = vweird.f32 %v11564_v25  ;;  %3371 = vadd.xlane.f32.xlu0 %v3370_v24 }
 0x6c0   : > { %15606 = vst [vmem:[#allocation87_spill] sm:$0xff] %v11683_v8  ;;  %5719 = vmatpush.xpose.msra.mxu2 %v5457_v35  ;;  %5739 = vmatpush.xpose.msra.mxu3 %v5458_v11  ;;  %v4367_v16 = vsel %vm11678_vm11, %v10855_v3, %v4363_v26  ;;  %v11692_v46 = vpop.eup %7043  ;;  %7049 = vrcp.f32 %v11595_v31  ;;  %vm11695_vm14 = vmor %vm4028_vm10, %vm4029_vm12  ;;  %v4032_v43 = vand.u32 2147483647, %v11471_v5  ;;  %v3415_v0 = vadd.f32 %v15612_v20, %v15611_v12  ;;  %v15614_v35 = vld [vmem:[#allocation164_spill] sm:$0xff] }
 0x6c1   : > { %15608 = vst [vmem:[#allocation224_spill] sm:$0xff] %v11692_v46  ;;  %vm4369_vm13 = vcmp.eq.f32.partialorder %v4368_v53, 8.507059e+37  ;;  %v11702_v3 = vpop.eup %7045  ;;  %v11706_v62 = vmul.f32 %v11656_v28, %v11406_v60  ;;  %v2598_v56 = vsub.f32 %v15614_v35, %v11473_v7  ;;  %v4031_v26 = vsel %vm11695_vm14, %v11564_v25, %v4027_v55  ;;  %v15616_v53 = vld [vmem:[#allocation265_spill] sm:$0xff]  ;;  %v15619_v25 = vld [vmem:[#allocation204_spill] sm:$0xff] }
 0x6c2   : > { %15613 = vst [vmem:[#allocation194_spill] sm:$0xff] %v11702_v3  ;;  %v4372_v11 = vsel %vm4369_vm13, %v10971_v61, %v4367_v16  ;;  %v11714_v5 = vpop.eup %7047  ;;  %vm4336_vm15 = vweird.f32 %v10802_v44  ;;  %v4879_v24 = vsub.f32 1.0, %v11672_v51  ;;  %v4035_v1 = vor.u32 1.1754944e-38, %v4034_v13  ;;  %3416 = vadd.xlane.f32.xlu1 %v3415_v0  ;;  %v15618_v7 = vld [vmem:[#allocation33_spill] sm:$0xff]  ;;  %v15645_v12 = vld [vmem:[#allocation240_spill] sm:$0xff] }
 0x6c3   : > { %15615 = vst [vmem:[#allocation154_spill] sm:$0xff] %v11714_v5  ;;  %v5455_v15 = vmul.f32 %v15616_v53, %v4372_v11  ;;  %v5456_v20 = vmul.f32 %v15617_v30, %v4372_v11  ;;  %v2625_v35 = vsub.f32 %v15618_v7, %v11495_v14  ;;  %vm4033_vm1 = vcmp.eq.f32.partialorder %v4032_v43, 8.507059e+37  ;;  %v11728_v30 = vpop.xlane.xlu2 %3398  ;;  %v11730_v18 = vpop.xlane.xlu1 %3260  ;;  %v15620_v43 = vld [vmem:[#allocation83_spill] sm:$0xff] }
 0x6c4   : > { %v3517_v61 = vadd.f32 %v11535_v36, %v11527_v21  ;;  %v4349_v16 = vadd.f32 %v15619_v25, %v11057_v49  ;;  %v3055_v55 = vmul.f32 1.442695, %v2597_v29  ;;  %v4036_v51 = vsel %vm4033_vm1, %v4035_v1, %v4031_v26  ;;  %v15621_v53 = vld [vmem:[#allocation207_spill] sm:$0xff]  ;;  %v15623_v1 = vld [vmem:[#allocation46_spill] sm:$0xff] }
 0x6c5   : > { %5720 = vmatpush.xpose.msra.mxu2 %v5455_v15  ;;  %5740 = vmatpush.xpose.msra.mxu3 %v5456_v20  ;;  %vm4351_vm2 = vweird.f32 %v15619_v25  ;;  %v4354_v13 = vand.u32 2147483647, %v10694_v45  ;;  %v3057_v0 = vmul.f32 1.442695, %v2598_v56  ;;  %7051 = vrcp.f32 %v11542_v10  ;;  %v15622_v56 = vld [vmem:[#allocation131_spill] sm:$0xff]  ;;  %v15624_v45 = vld [vmem:[#allocation21_spill] sm:$0xff] }
 0x6c6   : > { %v5407_v11 = vmul.f32 %v15620_v43, %v4036_v51  ;;  %v5408_v7 = vmul.f32 %v15621_v53, %v4036_v51  ;;  %3518 = vadd.xlane.f32.xlu2 %v3517_v61  ;;  %vm4352_vm3 = vmor %vm4350_vm8, %vm4351_vm2  ;;  %v11737_v49 = vpop.eup %7049  ;;  %7053 = vpow2.f32 %v3117_v63  ;;  %v11741_v26 = vpop.xlane.xlu0 %2351  ;;  %vm4322_vm5 = vweird.f32 %v15622_v56  ;;  %v15639_v36 = vld [vmem:[#allocation130_spill] sm:$0xff] }
 0x6c7   : > { %v4353_v20 = vsel %vm4352_vm3, %v15619_v25, %v4349_v16  ;;  %vm4355_vm4 = vcmp.eq.f32.partialorder %v4354_v13, 8.507059e+37  ;;  %v2626_v15 = vsub.f32 %v15623_v1, %v11495_v14  ;;  %v3111_v51 = vmul.f32 1.442695, %v2625_v35  ;;  %v15627_v25 = vld [vmem:[#allocation264_spill] sm:$0xff]  ;;  %v15628_v13 = vld [vmem:[#allocation169_spill] sm:$0xff] }
 0x6c8   : > { %7055 = vrcp.f32 %v11544_v57  ;;  %5688 = vmatpush.xpose.msrb.mxu0 %v5407_v11  ;;  %5708 = vmatpush.xpose.msrb.mxu1 %v5408_v7  ;;  %v4358_v61 = vsel %vm4355_vm4, %v15624_v45, %v4353_v20  ;;  %v15625_v63 = vand.u32 2147483648, %v11427_v37  ;;  %v4235_v29 = vsub.f32 1.0, %v11706_v62  ;;  %v15629_v11 = vld [vmem:[#allocation142_spill] sm:$0xff]  ;;  %v15630_v20 = vld [vmem:[#allocation132_spill] sm:$0xff]  ;;  %v15631_v1 = vld [vmem:[#allocation109_spill] sm:$0xff] }
 0x6c9   : > { %7057 = vpow2.f32 %v3055_v55  ;;  %v5453_v16 = vmul.f32 %v15627_v25, %v4358_v61  ;;  %v5454_v53 = vmul.f32 %v15628_v13, %v4358_v61  ;;  %v4880_v14 = vmul.f32 %v11639_v42, %v4879_v24  ;;  %v15635_v25 = vld [vmem:[#allocation212_spill] sm:$0xff] }
 0x6ca   : > { %v11750_v43 = vor.u32 1.1754944e-38, %v15625_v63  ;;  %7059 = vpow2.f32 %v3057_v0  ;;  %v4010_v35 = vmul.f32 %v11737_v49, %v11595_v31  ;;  %v2595_v7 = vsub.f32 %v15629_v11, %v11555_v40  ;;  %v15634_v63 = vld [vmem:[#allocation75_spill] sm:$0xff] }
 0x6cb   : > { %5721 = vmatpush.xpose.msra.mxu2 %v5453_v16  ;;  %5741 = vmatpush.xpose.msra.mxu3 %v5454_v53  ;;  %v4335_v55 = vadd.f32 %v15631_v1, %v15630_v20  ;;  %vm4337_vm6 = vweird.f32 %v15631_v1  ;;  %v4340_v45 = vand.u32 2147483647, %v10802_v44  ;;  %v11764_v61 = vpop.eup %7051  ;;  %7061 = vpow2.f32 %v3111_v51  ;;  %v15637_v53 = vld [vmem:[#allocation104_spill] sm:$0xff] }
 0x6cc   : > { %15626 = vst [vmem:[#allocation53_spill] sm:$0xff] %v11750_v43  ;;  %v3113_v62 = vmul.f32 1.442695, %v2626_v15  ;;  %vm11768_vm7 = vmor %vm4336_vm15, %vm4337_vm6  ;;  %v3514_v0 = vadd.f32 %v11683_v8, %v11628_v9  ;;  %v3412_v16 = vadd.f32 %v15635_v25, %v15634_v63  ;;  %v11776_v13 = vpop.eup %7053  ;;  %vm4308_vm8 = vweird.f32 %v15637_v53  ;;  %v15638_v9 = vld [vmem:[#allocation5_spill] sm:$0xff]  ;;  %v11791_v25 = vpop.xlane.xlu1 %3440 }
 0x6cd   : > { %15636 = vst [vmem:[#allocation247_spill] sm:$0xff] %v11776_v13  ;;  %v4874_v11 = vand.u32 2147483648, %v11542_v10  ;;  %v4230_v15 = vand.u32 2147483648, %v11544_v57  ;;  %7063 = vrcp.f32 %v11597_v32  ;;  %v4339_v44 = vsel %vm11768_vm7, %v15631_v1, %v4335_v55  ;;  %v15641_v1 = vld [vmem:[#allocation163_spill] sm:$0xff] }
 0x6ce   : > { %v11785_v51 = vpop.eup %7055  ;;  %v4011_v20 = vsub.f32 1.0, %v4010_v35  ;;  %vm4341_vm9 = vcmp.eq.f32.partialorder %v4340_v45, 8.507059e+37  ;;  %3515 = vadd.xlane.f32.xlu0 %v3514_v0  ;;  %3413 = vadd.xlane.f32.xlu2 %v3412_v16  ;;  %v3472_v8 = vadd.f32 %v11610_v38, %v11549_v22  ;;  %v4321_v21 = vadd.f32 %v15639_v36, %v15638_v9  ;;  %v15642_v45 = vld [vmem:[#allocation261_spill] sm:$0xff]  ;;  %v11802_v16 = vpop.xlane.xlu2 %3542  ;;  %v15644_v22 = vld [vmem:[#allocation239_spill] sm:$0xff] }
 0x6cf   : > { %v11793_v63 = vpop.eup %7057  ;;  %v11797_v24 = vmul.f32 %v11764_v61, %v11542_v10  ;;  %v2596_v35 = vsub.f32 %v15641_v1, %v11555_v40  ;;  %v3051_v55 = vmul.f32 1.442695, %v2595_v7  ;;  %v4344_v0 = vsel %vm4341_vm9, %v15642_v45, %v4339_v44  ;;  %v15650_v1 = vld [vmem:[#allocation115_spill] sm:$0xff] }
 0x6d0   : > { %15640 = vst [vmem:[#allocation116_spill] sm:$0xff] %v11793_v63  ;;  %v11804_v38 = vpop.eup %7059  ;;  %v5451_v9 = vmul.f32 %v15644_v22, %v4344_v0  ;;  %v5452_v39 = vmul.f32 %v15645_v12, %v4344_v0  ;;  %3473 = vadd.xlane.f32.xlu1 %v3472_v8  ;;  %vm4323_vm10 = vweird.f32 %v15639_v36  ;;  %v4326_v6 = vand.u32 2147483647, %v15622_v56  ;;  %v11822_v22 = vpop.xlane.xlu0 %2306 }
 0x6d1   : > { %15643 = vst [vmem:[#allocation14_spill] sm:$0xff] %v11804_v38  ;;  %v11811_v27 = vmul.f32 %v11656_v28, %v4235_v29  ;;  %v11814_v40 = vadd.f32 %v11639_v42, %v4880_v14  ;;  %7065 = vpow2.f32 %v3113_v62  ;;  %v11818_v7 = vmul.f32 %v11785_v51, %v11544_v57  ;;  %vm4324_vm11 = vmor %vm4322_vm5, %vm4323_vm10  ;;  %v11824_v8 = vpop.eup %7061 }
 0x6d2   : > { %15647 = vst [vmem:[#allocation258_spill] sm:$0xff] %v11824_v8  ;;  %v11826_v12 = vor.u32 1.1754944e-38, %v4874_v11  ;;  %v4012_v29 = vmul.f32 %v11737_v49, %v4011_v20  ;;  %5722 = vmatpush.xpose.msra.mxu2 %v5451_v9  ;;  %5742 = vmatpush.xpose.msra.mxu3 %v5452_v39  ;;  %v4325_v14 = vsel %vm4324_vm11, %v15639_v36, %v4321_v21  ;;  %vm4327_vm12 = vcmp.eq.f32.partialorder %v4326_v6, 8.507059e+37  ;;  %v15651_v11 = vld [vmem:[#allocation15_spill] sm:$0xff]  ;;  %v15652_v20 = vld [vmem:[#allocation172_spill] sm:$0xff] }
 0x6d3   : > { %15646 = vst [vmem:[#allocation79_spill] sm:$0xff] %v11814_v40  ;;  %v11830_v62 = vpop.eup %7063  ;;  %v11832_v44 = vor.u32 1.1754944e-38, %v4230_v15  ;;  %7067 = vpow2.f32 %v3051_v55  ;;  %v3053_v56 = vmul.f32 1.442695, %v2596_v35  ;;  %v4330_v45 = vsel %vm4327_vm12, %v15650_v1, %v4325_v14  ;;  %v15653_v6 = vld [vmem:[#allocation68_spill] sm:$0xff]  ;;  %v15654_v39 = vld [vmem:[#allocation255_spill] sm:$0xff] }
 0x6d4   : > { %15648 = vst [vmem:[#allocation98_spill] sm:$0xff] %v11826_v12  ;;  %v4865_v0 = vsub.f32 1.0, %v11797_v24  ;;  %vm4014_vm13 = vweird.f32 %v11595_v31  ;;  %v5449_v48 = vmul.f32 %v15651_v11, %v4330_v45  ;;  %v5450_v9 = vmul.f32 %v15652_v20, %v4330_v45  ;;  %v15655_v35 = vld [vmem:[#allocation78_spill] sm:$0xff] }
 0x6d5   : > { %15649 = vst [vmem:[#allocation92_spill] sm:$0xff] %v11832_v44  ;;  %vm4294_vm14 = vweird.f32 %v11100_v23  ;;  %v4221_v36 = vsub.f32 1.0, %v11818_v7  ;;  %v4020_v21 = vand.u32 2147483648, %v11595_v31  ;;  %v4307_v15 = vadd.f32 %v15654_v39, %v15653_v6  ;;  %v15662_v6 = vld [vmem:[#allocation217_spill] sm:$0xff]  ;;  %v15664_v55 = vld [vmem:[#allocation18_spill] sm:$0xff] }
 0x6d6   : > { %vm4309_vm15 = vweird.f32 %v15654_v39  ;;  %v2623_v24 = vsub.f32 %v15655_v35, %v11621_v33  ;;  %5723 = vmatpush.xpose.msra.mxu2 %v5449_v48  ;;  %5743 = vmatpush.xpose.msra.mxu3 %v5450_v9  ;;  %v4312_v7 = vand.u32 2147483647, %v15637_v53  ;;  %v4013_v14 = vadd.f32 %v11737_v49, %v4012_v29  ;;  %v11871_v29 = vpop.xlane.xlu1 %3395  ;;  %v15661_v9 = vld [vmem:[#allocation65_spill] sm:$0xff]  ;;  %v11885_v44 = vpop.xlane.xlu2 %3497  ;;  %v15667_v11 = vld [vmem:[#allocation146_spill] sm:$0xff] }
 0x6d7   : > { %vm11849_vm1 = vmor %vm4308_vm8, %vm4309_vm15  ;;  %vm4015_vm2 = vweird.f32 %v11737_v49  ;;  %v11856_v1 = vpop.eup %7065  ;;  %v4654_v45 = vmul.f32 %v11830_v62, %v11597_v32  ;;  %7069 = vrcp.f32 %v11730_v18  ;;  %v4018_v53 = vand.u32 2147483647, %v11595_v31  ;;  %v15665_v31 = vld [vmem:[#allocation10_spill] sm:$0xff]  ;;  %15666 = vst [vmem:[#allocation140_spill] sm:$0xff] %v11885_v44 }
 0x6d8   : > { %15658 = vst [vmem:[#allocation188_spill] sm:$0xff] %v11856_v1  ;;  %v4311_v48 = vsel %vm11849_vm1, %v15654_v39, %v4307_v15  ;;  %vm11866_vm3 = vmor %vm4014_vm13, %vm4015_vm2  ;;  %7071 = vrcp.f32 %v11652_v52  ;;  %vm4313_vm4 = vcmp.eq.f32.partialorder %v4312_v7, 8.507059e+37  ;;  %v3409_v39 = vadd.f32 %v15662_v6, %v15661_v9  ;;  %v15670_v9 = vld [vmem:[#allocation45_spill] sm:$0xff] }
 0x6d9   : > { %v4017_v20 = vsel %vm11866_vm3, %v11737_v49, %v4013_v14  ;;  %v11879_v15 = vpop.eup %7067  ;;  %v4021_v35 = vor.u32 1.1754944e-38, %v4020_v21  ;;  %v2624_v12 = vsub.f32 %v15664_v55, %v11621_v33  ;;  %7073 = vrcp.f32 %v11654_v17  ;;  %v15668_v14 = vld [vmem:[#allocation259_spill] sm:$0xff] }
 0x6da   : > { %15663 = vst [vmem:[#allocation135_spill] sm:$0xff] %v11879_v15  ;;  %v4316_v43 = vsel %vm4313_vm4, %v15665_v31, %v4311_v48  ;;  %vm4280_vm5 = vweird.f32 %v11138_v34  ;;  %v3107_v7 = vmul.f32 1.442695, %v2623_v24  ;;  %vm4019_vm6 = vcmp.eq.f32.partialorder %v4018_v53, 8.507059e+37  ;;  %3410 = vadd.xlane.f32.xlu0 %v3409_v39  ;;  %v15669_v55 = vld [vmem:[#allocation187_spill] sm:$0xff]  ;;  %v11894_v48 = vpop.xlane.xlu0 %2348  ;;  %v15671_v24 = vld [vmem:[#allocation82_spill] sm:$0xff] }
 0x6db   : > { %v5447_v49 = vmul.f32 %v15667_v11, %v4316_v43  ;;  %v5448_v40 = vmul.f32 %v15668_v14, %v4316_v43  ;;  %v4655_v6 = vsub.f32 1.0, %v4654_v45  ;;  %v4022_v21 = vsel %vm4019_vm6, %v4021_v35, %v4017_v20  ;;  %v15672_v11 = vld [vmem:[#allocation99_spill] sm:$0xff]  ;;  %v15673_v43 = vld [vmem:[#allocation108_spill] sm:$0xff]  ;;  %v15674_v45 = vld [vmem:[#allocation94_spill] sm:$0xff] }
 0x6dc   : > { %v3469_v33 = vadd.f32 %v11702_v3, %v11692_v46  ;;  %v3367_v15 = vadd.f32 %v15670_v9, %v15669_v55  ;;  %7075 = vpow2.f32 %v3053_v56  ;;  %v5405_v31 = vmul.f32 %v15671_v24, %v4022_v21  ;;  %v15676_v56 = vld [vmem:[#allocation59_spill] sm:$0xff] }
 0x6dd   : > { %5724 = vmatpush.xpose.msra.mxu2 %v5447_v49  ;;  %5744 = vmatpush.xpose.msra.mxu3 %v5448_v40  ;;  %v5406_v44 = vmul.f32 %v15672_v11, %v4022_v21  ;;  %vm4295_vm7 = vweird.f32 %v15673_v43  ;;  %v11899_v53 = vpop.eup %7069  ;;  %vm4266_vm8 = vweird.f32 %v15674_v45  ;;  %v11903_v20 = vmul.f32 %v11764_v61, %v4865_v0  ;;  %v15682_v46 = vld [vmem:[#allocation235_spill] sm:$0xff] }
 0x6de   : > { %v11906_v39 = vmul.f32 %v11785_v51, %v4221_v36  ;;  %3470 = vadd.xlane.f32.xlu2 %v3469_v33  ;;  %3368 = vadd.xlane.f32.xlu1 %v3367_v15  ;;  %v4293_v40 = vadd.f32 %v15673_v43, %v15676_v56  ;;  %v4298_v35 = vand.u32 2147483647, %v11100_v23  ;;  %v11911_v49 = vpop.eup %7071  ;;  %v4664_v21 = vand.u32 2147483648, %v11597_v32  ;;  %vm4296_vm9 = vmor %vm4294_vm14, %vm4295_vm7  ;;  %v15677_v15 = vld [vmem:[#allocation161_spill] sm:$0xff]  ;;  %v15679_v56 = vld [vmem:[#allocation114_spill] sm:$0xff]  ;;  %v11939_v9 = vpop.xlane.xlu1 %3437 }
 0x6df   : > { %15675 = vst [vmem:[#allocation189_spill] sm:$0xff] %v11903_v20  ;;  %7077 = vpow2.f32 %v3107_v7  ;;  %v3109_v24 = vmul.f32 1.442695, %v2624_v12  ;;  %5689 = vmatpush.xpose.msrb.mxu0 %v5405_v31  ;;  %5709 = vmatpush.xpose.msrb.mxu1 %v5406_v44  ;;  %v11919_v0 = vpop.eup %7073  ;;  %v4656_v36 = vmul.f32 %v11830_v62, %v4655_v6  ;;  %v2593_v33 = vsub.f32 %v15677_v15, %v11668_v59  ;;  %v15678_v44 = vld [vmem:[#allocation138_spill] sm:$0xff]  ;;  %v11958_v20 = vpop.xlane.xlu2 %3539 }
 0x6e0   : > { %v4297_v11 = vsel %vm4296_vm9, %v15673_v43, %v4293_v40  ;;  %vm4299_vm10 = vcmp.eq.f32.partialorder %v4298_v35, 8.507059e+37  ;;  %v4860_v7 = vand.u32 2147483648, %v11654_v17  ;;  %v3996_v12 = vmul.f32 %v11899_v53, %v11730_v18  ;;  %v15680_v23 = vld [vmem:[#allocation58_spill] sm:$0xff]  ;;  %v15683_v40 = vld [vmem:[#allocation237_spill] sm:$0xff] }
 0x6e1   : > { %v4302_v31 = vsel %vm4299_vm10, %v15678_v44, %v4297_v11  ;;  %v4279_v14 = vadd.f32 %v15680_v23, %v15679_v56  ;;  %v11933_v3 = vmul.f32 %v11911_v49, %v11652_v52  ;;  %v15681_v6 = vld [vmem:[#allocation162_spill] sm:$0xff]  ;;  %v4850_v11 = vmul.f32 %v11919_v0, %v11654_v17 }
 0x6e2   : > { %v2594_v15 = vsub.f32 %v15681_v6, %v11668_v59  ;;  %v5445_v43 = vmul.f32 %v15682_v46, %v4302_v31  ;;  %v5446_v35 = vmul.f32 %v15683_v40, %v4302_v31  ;;  %v11941_v55 = vpop.eup %7075  ;;  %vm4281_vm11 = vweird.f32 %v15680_v23  ;;  %v15685_v46 = vld [vmem:[#allocation34_spill] sm:$0xff]  ;;  %v15686_v31 = vld [vmem:[#allocation35_spill] sm:$0xff] }
 0x6e3   : > { %15684 = vst [vmem:[#allocation73_spill] sm:$0xff] %v11941_v55  ;;  %v4284_v44 = vand.u32 2147483647, %v11138_v34  ;;  %v3466_v56 = vadd.f32 %v11804_v38, %v11793_v63  ;;  %vm4252_vm12 = vweird.f32 %v11363_v54  ;;  %v3047_v59 = vmul.f32 1.442695, %v2593_v33  ;;  %vm4282_vm13 = vmor %vm4280_vm5, %vm4281_vm11 }
 0x6e4   : > { %5725 = vmatpush.xpose.msra.mxu2 %v5445_v43  ;;  %5745 = vmatpush.xpose.msra.mxu3 %v5446_v35  ;;  %v3364_v6 = vadd.f32 %v15686_v31, %v15685_v46  ;;  %v3511_v40 = vadd.f32 %v11776_v13, %v11714_v5  ;;  %v4265_v55 = vadd.f32 %v11497_v58, %v11642_v2  ;;  %7079 = vrcp.f32 %v11728_v30  ;;  %v15688_v35 = vld [vmem:[#allocation136_spill] sm:$0xff]  ;;  %v11967_v13 = vpop.xlane.xlu0 %2303  ;;  %v15689_v31 = vld [vmem:[#allocation167_spill] sm:$0xff] }
 0x6e5   : > { %v11960_v38 = vpop.eup %7077  ;;  %v3997_v33 = vsub.f32 1.0, %v3996_v12  ;;  %v4283_v43 = vsel %vm4282_vm13, %v15680_v23, %v4279_v14  ;;  %vm4285_vm14 = vcmp.eq.f32.partialorder %v4284_v44, 8.507059e+37  ;;  %3467 = vadd.xlane.f32.xlu0 %v3466_v56  ;;  %v3049_v34 = vmul.f32 1.442695, %v2594_v15  ;;  %v15690_v46 = vld [vmem:[#allocation263_spill] sm:$0xff] }
 0x6e6   : > { %15687 = vst [vmem:[#allocation89_spill] sm:$0xff] %v11960_v38  ;;  %v4288_v63 = vsel %vm4285_vm14, %v15688_v35, %v4283_v43  ;;  %3365 = vadd.xlane.f32.xlu2 %v3364_v6  ;;  %3512 = vadd.xlane.f32.xlu1 %v3511_v40  ;;  %vm4267_vm15 = vweird.f32 %v11497_v58  ;;  %v4270_v2 = vand.u32 2147483647, %v15674_v45  ;;  %v11969_v5 = vor.u32 1.1754944e-38, %v4664_v21  ;;  %v12006_v43 = vpop.xlane.xlu1 %3392 }
 0x6e7   : > { %7081 = vpow2.f32 %v3109_v24  ;;  %v5443_v12 = vmul.f32 %v15689_v31, %v4288_v63  ;;  %v5444_v14 = vmul.f32 %v15690_v46, %v4288_v63  ;;  %vm4268_vm1 = vmor %vm4266_vm8, %vm4267_vm15  ;;  %vm4659_vm2 = vweird.f32 %v11830_v62  ;;  %v15692_v46 = vld [vmem:[#allocation127_spill] sm:$0xff] }
 0x6e8   : > { %7083 = vpow2.f32 %v3047_v59  ;;  %v4269_v23 = vsel %vm4268_vm1, %v11497_v58, %v4265_v55  ;;  %vm4271_vm3 = vcmp.eq.f32.partialorder %v4270_v2, 8.507059e+37  ;;  %v5327_v15 = vsub.f32 1.0, %v11933_v3 }
 0x6e9   : > { %v4851_v44 = vsub.f32 1.0, %v4850_v11  ;;  %v3998_v21 = vmul.f32 %v11899_v53, %v3997_v33  ;;  %5726 = vmatpush.xpose.msra.mxu2 %v5443_v12  ;;  %5746 = vmatpush.xpose.msra.mxu3 %v5444_v14  ;;  %v4274_v24 = vsel %vm4271_vm3, %v11566_v50, %v4269_v23  ;;  %v11981_v63 = vadd.f32 %v11830_v62, %v4656_v36  ;;  %v15691_v11 = vld [vmem:[#allocation126_spill] sm:$0xff]  ;;  %v15699_v23 = vld [vmem:[#allocation7_spill] sm:$0xff] }
 0x6ea   : > { %vm4658_vm4 = vweird.f32 %v11597_v32  ;;  %v11985_v56 = vor.u32 1.1754944e-38, %v4860_v7  ;;  %7085 = vpow2.f32 %v3049_v34  ;;  %v11987_v58 = vpop.eup %7079  ;;  %v4650_v3 = vand.u32 2147483648, %v11728_v30  ;;  %v15696_v7 = vld [vmem:[#allocation69_spill] sm:$0xff] }
 0x6eb   : > { %v4006_v55 = vand.u32 2147483648, %v11730_v18  ;;  %v5441_v59 = vmul.f32 %v15691_v11, %v4274_v24  ;;  %v5442_v50 = vmul.f32 %v15692_v46, %v4274_v24  ;;  %vm4238_vm5 = vweird.f32 %v11406_v60  ;;  %v12027_v24 = vpop.xlane.xlu2 %3494  ;;  %vm12054_vm3 = vmor %vm4658_vm4, %vm4659_vm2 }
 0x6ec   : > { %v15693_v36 = vand.u32 2147483647, %v11597_v32  ;;  %v2621_v6 = vsub.f32 %v15696_v7, %v11741_v26  ;;  %v4251_v40 = vadd.f32 %v11557_v47, %v11660_v41  ;;  %vm4253_vm7 = vweird.f32 %v11557_v47  ;;  %15700 = vst [vmem:[#allocation117_spill] sm:$0xff] %v12027_v24  ;;  %v15712_v32 = vld [vmem:[#allocation84_spill] sm:$0xff] }
 0x6ed   : > { %v4256_v33 = vand.u32 2147483647, %v11363_v54  ;;  %v12008_v34 = vpop.eup %7081  ;;  %v12011_v35 = vmul.f32 %v11911_v49, %v5327_v15  ;;  %v12014_v2 = vmul.f32 %v11919_v0, %v4851_v44  ;;  %vm4000_vm8 = vweird.f32 %v11730_v18  ;;  %5727 = vmatpush.xpose.msra.mxu2 %v5441_v59  ;;  %5747 = vmatpush.xpose.msra.mxu3 %v5442_v50  ;;  %vm4254_vm9 = vmor %vm4252_vm12, %vm4253_vm7 }
 0x6ee   : > { %vm11996_vm6 = vcmp.eq.f32.partialorder %v15693_v36, 8.507059e+37  ;;  %15697 = vst [vmem:[#allocation102_spill] sm:$0xff] %v12008_v34  ;;  %v3999_v41 = vadd.f32 %v11899_v53, %v3998_v21  ;;  %v12020_v12 = vpop.eup %7083  ;;  %v4640_v14 = vmul.f32 %v11987_v58, %v11728_v30  ;;  %v2622_v15 = vsub.f32 %v15699_v23, %v11741_v26  ;;  %v15703_v36 = vld [vmem:[#allocation234_spill] sm:$0xff]  ;;  %v15705_v23 = vld [vmem:[#allocation185_spill] sm:$0xff] }
 0x6ef   : > { %15698 = vst [vmem:[#allocation193_spill] sm:$0xff] %v12020_v12  ;;  %v4255_v44 = vsel %vm4254_vm9, %v11557_v47, %v4251_v40  ;;  %vm4257_vm10 = vcmp.eq.f32.partialorder %v4256_v33, 8.507059e+37  ;;  %vm4883_vm11 = vweird.f32 %v11639_v42  ;;  %7087 = vrcp.f32 %v11791_v25  ;;  %v12041_v47 = vpop.xlane.xlu0 %3434  ;;  %v15704_v33 = vld [vmem:[#allocation184_spill] sm:$0xff] }
 0x6f0   : > { %v4260_v54 = vsel %vm4257_vm10, %v11647_v4, %v4255_v44  ;;  %vm4001_vm12 = vweird.f32 %v11899_v53  ;;  %v4004_v21 = vand.u32 2147483647, %v11730_v18  ;;  %v12034_v11 = vpop.eup %7085  ;;  %v12036_v59 = vor.u32 1.1754944e-38, %v4650_v3  ;;  %v15702_v4 = vld [vmem:[#allocation9_spill] sm:$0xff] }
 0x6f1   : > { %15701 = vst [vmem:[#allocation248_spill] sm:$0xff] %v12034_v11  ;;  %v4007_v26 = vor.u32 1.1754944e-38, %v4006_v55  ;;  %v3103_v46 = vmul.f32 1.442695, %v2621_v6  ;;  %7089 = vrcp.f32 %v11871_v29  ;;  %vm4002_vm13 = vmor %vm4000_vm8, %vm4001_vm12  ;;  %vm4882_vm14 = vweird.f32 %v11427_v37 }
 0x6f2   : > { %v5439_v50 = vmul.f32 %v15702_v4, %v4260_v54  ;;  %v5440_v7 = vmul.f32 %v15703_v36, %v4260_v54  ;;  %v4003_v40 = vsel %vm4002_vm13, %v11899_v53, %v3999_v41  ;;  %vm4005_vm15 = vcmp.eq.f32.partialorder %v4004_v21, 8.507059e+37  ;;  %v15708_v53 = vld [vmem:[#allocation159_spill] sm:$0xff]  ;;  %v15710_v54 = vld [vmem:[#allocation122_spill] sm:$0xff] }
 0x6f3   : > { %vm4224_vm1 = vweird.f32 %v11544_v57  ;;  %v4641_v3 = vsub.f32 1.0, %v4640_v14  ;;  %v3105_v55 = vmul.f32 1.442695, %v2622_v15  ;;  %v4008_v6 = vsel %vm4005_vm15, %v4007_v26, %v4003_v40  ;;  %v15709_v14 = vld [vmem:[#allocation226_spill] sm:$0xff]  ;;  %v15711_v26 = vld [vmem:[#allocation220_spill] sm:$0xff] }
 0x6f4   : > { %v3361_v18 = vadd.f32 %v15705_v23, %v15704_v33  ;;  %vm4644_vm7 = vweird.f32 %v11728_v30  ;;  %v2591_v41 = vsub.f32 %v15708_v53, %v11822_v22  ;;  %5728 = vmatpush.xpose.msra.mxu2 %v5439_v50  ;;  %5748 = vmatpush.xpose.msra.mxu3 %v5440_v7  ;;  %v5403_v15 = vmul.f32 %v15709_v14, %v4008_v6  ;;  %v12097_v14 = vpop.xlane.xlu1 %3536 }
 0x6f5   : > { %v5404_v21 = vmul.f32 %v15710_v54, %v4008_v6  ;;  %vm4239_vm8 = vweird.f32 %v11656_v28  ;;  %v3406_v4 = vadd.f32 %v15712_v32, %v15711_v26  ;;  %v4237_v36 = vadd.f32 %v11656_v28, %v11811_v27  ;;  %v12073_v7 = vpop.eup %7087  ;;  %v15713_v6 = vld [vmem:[#allocation160_spill] sm:$0xff] }
 0x6f6   : > { %3362 = vadd.xlane.f32.xlu0 %v3361_v18  ;;  %v4242_v40 = vand.u32 2147483647, %v11406_v60  ;;  %v4661_v50 = vsel %vm12054_vm3, %v11830_v62, %v11981_v63  ;;  %7091 = vpow2.f32 %v3103_v46  ;;  %v2592_v53 = vsub.f32 %v15713_v6, %v11822_v22  ;;  %5690 = vmatpush.xpose.msrb.mxu0 %v5403_v15  ;;  %vm4240_vm2 = vmor %vm4238_vm5, %vm4239_vm8  ;;  %v15717_v46 = vld [vmem:[#allocation27_spill] sm:$0xff]  ;;  %v15741_v63 = vld [vmem:[#allocation37_spill] sm:$0xff] }
 0x6f7   : > { %5710 = vmatpush.xpose.msrb.mxu1 %v5404_v21  ;;  %v4666_v27 = vsel %vm11996_vm6, %v11969_v5, %v4661_v50  ;;  %v3508_v18 = vadd.f32 %v11856_v1, %v11824_v8  ;;  %v12084_v44 = vpop.eup %7089  ;;  %v15714_v62 = vand.u32 2147483647, %v11427_v37  ;;  %v4642_v22 = vmul.f32 %v11987_v58, %v4641_v3  ;;  %3407 = vadd.xlane.f32.xlu1 %v3406_v4  ;;  %v12095_v5 = vpop.xlane.xlu2 %2300  ;;  %v15718_v21 = vld [vmem:[#allocation85_spill] sm:$0xff]  ;;  %v15719_v3 = vld [vmem:[#allocation256_spill] sm:$0xff]  ;;  %vm12118_vm6 = vmor %vm4882_vm14, %vm4883_vm11 }
 0x6f8   : > { %v4241_v60 = vsel %vm4240_vm2, %v11656_v28, %v4237_v36  ;;  %vm4243_vm5 = vcmp.eq.f32.partialorder %v4242_v40, 8.507059e+37  ;;  %v5497_v31 = vmul.f32 %v15717_v46, %v4666_v27  ;;  %7093 = vpow2.f32 %v3105_v55  ;;  %v15720_v4 = vld [vmem:[#allocation133_spill] sm:$0xff]  ;;  %v15721_v40 = vld [vmem:[#allocation40_spill] sm:$0xff] }
 0x6f9   : > { %vm12088_vm4 = vcmp.eq.f32.partialorder %v15714_v62, 8.507059e+37  ;;  %v3043_v15 = vmul.f32 1.442695, %v2591_v41  ;;  %v4246_v54 = vsel %vm4243_vm5, %v11649_v19, %v4241_v60  ;;  %v5498_v50 = vmul.f32 %v15718_v21, %v4666_v27  ;;  %3509 = vadd.xlane.f32.xlu2 %v3508_v18  ;;  %v15722_v19 = vld [vmem:[#allocation178_spill] sm:$0xff]  ;;  %v12128_v60 = vpop.xlane.xlu0 %3389  ;;  %v15739_v1 = vld [vmem:[#allocation17_spill] sm:$0xff] }
 0x6fa   : > { %v4846_v6 = vand.u32 2147483648, %v11791_v25  ;;  %7095 = vrcp.f32 %v11802_v16  ;;  %v5437_v28 = vmul.f32 %v15719_v3, %v4246_v54  ;;  %v5438_v36 = vmul.f32 %v15720_v4, %v4246_v54  ;;  %5755 = vmatpush.xpose.msra.mxu0 %v5497_v31  ;;  %5711 = vmatmul.f32.vlgmr.msrb.gmra.mxu1 %v15721_v40  ;;  %v15726_v54 = vld [vmem:[#allocation64_spill] sm:$0xff] }
 0x6fb   : > { %v12108_v55 = vmul.f32 %v12073_v7, %v11791_v25  ;;  %v3045_v41 = vmul.f32 1.442695, %v2592_v53  ;;  %5775 = vmatpush.xpose.msra.mxu1 %v5498_v50  ;;  %5691 = vmatmul.f32.vlgmr.msrb.gmra.mxu0 %v15722_v19  ;;  %7097 = vrcp.f32 %v11939_v9  ;;  %v4223_v27 = vadd.f32 %v11785_v51, %v11906_v39  ;;  %v15731_v4 = vld [vmem:[#allocation92_spill] sm:$0xff] }
 0x6fc   : > { %vm4868_vm9 = vweird.f32 %v11542_v10  ;;  %v4626_v53 = vmul.f32 %v12084_v44, %v11871_v29  ;;  %5729 = vmatpush.xpose.msra.mxu2 %v5437_v28  ;;  %5749 = vmatpush.xpose.msra.mxu3 %v5438_v36  ;;  %vm4225_vm10 = vweird.f32 %v11785_v51  ;;  %v4228_v62 = vand.u32 2147483647, %v11544_v57  ;;  %v12130_v37 = vpop.eup %7091 }
 0x6fd   : > { %v4643_v39 = vadd.f32 %v11987_v58, %v4642_v22  ;;  %15725 = vst [vmem:[#allocation222_spill] sm:$0xff] %v12130_v37  ;;  %7099 = vpow2.f32 %v3043_v15  ;;  %vm4226_vm11 = vmor %vm4224_vm1, %vm4225_vm10  ;;  %vm4645_vm12 = vweird.f32 %v11987_v58  ;;  %v4648_v31 = vand.u32 2147483647, %v11728_v30  ;;  %v15729_v15 = vld [vmem:[#allocation79_spill] sm:$0xff]  ;;  %v15736_v22 = vld [vmem:[#allocation218_spill] sm:$0xff] }
 0x6fe   : > { %v2619_v21 = vsub.f32 %v15726_v54, %v11894_v48  ;;  %v4227_v50 = vsel %vm4226_vm11, %v11785_v51, %v4223_v27  ;;  %vm4229_vm13 = vcmp.eq.f32.partialorder %v4228_v62, 8.507059e+37  ;;  %vm12142_vm14 = vmor %vm4644_vm7, %vm4645_vm12  ;;  %v4885_v57 = vsel %vm12118_vm6, %v11639_v42, %v15729_v15  ;;  %v12150_v3 = vpop.eup %7093  ;;  %v15732_v54 = vld [vmem:[#allocation252_spill] sm:$0xff] }
 0x6ff   : > { %15730 = vst [vmem:[#allocation223_spill] sm:$0xff] %v12150_v3  ;;  %v12152_v28 = vor.u32 1.1754944e-38, %v4846_v6  ;;  %7101 = vpow2.f32 %v3045_v41  ;;  %v4232_v36 = vsel %vm4229_vm13, %v15731_v4, %v4227_v50  ;;  %v4647_v30 = vsel %vm12142_vm14, %v11987_v58, %v4643_v39  ;;  %v15733_v6 = vld [vmem:[#allocation254_spill] sm:$0xff]  ;;  %v15734_v50 = vld [vmem:[#allocation53_spill] sm:$0xff]  ;;  %v15735_v39 = vld [vmem:[#allocation95_spill] sm:$0xff] }
 0x700   : > { %v12158_v51 = vpop.eup %7095  ;;  %v4837_v27 = vsub.f32 1.0, %v12108_v55  ;;  %v4627_v62 = vsub.f32 1.0, %v4626_v53  ;;  %v5435_v46 = vmul.f32 %v15732_v54, %v4232_v36  ;;  %vm4649_vm15 = vcmp.eq.f32.partialorder %v4648_v31, 8.507059e+37  ;;  %v12172_v55 = vpop.xlane.xlu2 %3431  ;;  %v15737_v53 = vld [vmem:[#allocation201_spill] sm:$0xff] }
 0x701   : > { %v12162_v42 = vpop.eup %7097  ;;  %vm4854_vm1 = vweird.f32 %v11654_v17  ;;  %v5436_v41 = vmul.f32 %v15733_v6, %v4232_v36  ;;  %v4652_v18 = vsel %vm4649_vm15, %v12036_v59, %v4647_v30  ;;  %v4890_v58 = vsel %vm12088_vm4, %v15734_v50, %v4885_v57  ;;  %v15738_v54 = vld [vmem:[#allocation197_spill] sm:$0xff]  ;;  %v12178_v6 = vpop.xlane.xlu1 %3491  ;;  %v15742_v30 = vld [vmem:[#allocation106_spill] sm:$0xff] }
 0x702   : > { %v3403_v15 = vadd.f32 %v15736_v22, %v15735_v39  ;;  %v2620_v31 = vsub.f32 %v15737_v53, %v11894_v48  ;;  %v3099_v4 = vmul.f32 1.442695, %v2619_v21  ;;  %5730 = vmatpush.xpose.msra.mxu2 %v5435_v46  ;;  %v5495_v45 = vmul.f32 %v15738_v54, %v4652_v18 }
 0x703   : > { %v5496_v36 = vmul.f32 %v15739_v1, %v4652_v18  ;;  %v12180_v59 = vpop.eup %7099  ;;  %vm4630_vm3 = vweird.f32 %v11871_v29  ;;  %5750 = vmatpush.xpose.msra.mxu3 %v5436_v41  ;;  %v5529_v57 = vmul.f32 %v15741_v63, %v4890_v58  ;;  %v5530_v50 = vmul.f32 %v15742_v30, %v4890_v58  ;;  %v15743_v1 = vld [vmem:[#allocation189_spill] sm:$0xff]  ;;  %v15745_v58 = vld [vmem:[#allocation135_spill] sm:$0xff] }
 0x704   : > { %15740 = vst [vmem:[#allocation181_spill] sm:$0xff] %v12180_v59  ;;  %3404 = vadd.xlane.f32.xlu2 %v3403_v15  ;;  %vm4869_vm7 = vweird.f32 %v11764_v61  ;;  %v4636_v48 = vand.u32 2147483648, %v11871_v29  ;;  %v4822_v46 = vmul.f32 %v12162_v42, %v11939_v9  ;;  %5756 = vmatpush.xpose.msra.mxu0 %v5495_v45  ;;  %v4867_v21 = vadd.f32 %v11764_v61, %v15743_v1  ;;  %v15746_v15 = vld [vmem:[#allocation73_spill] sm:$0xff]  ;;  %v12202_v45 = vpop.xlane.xlu0 %3533 }
 0x705   : > { %5776 = vmatpush.xpose.msra.mxu1 %v5496_v36  ;;  %v4872_v18 = vand.u32 2147483647, %v11542_v10  ;;  %v12192_v41 = vpop.eup %7101  ;;  %v4628_v53 = vmul.f32 %v12084_v44, %v4627_v62  ;;  %v3463_v54 = vadd.f32 %v15746_v15, %v15745_v58  ;;  %v3505_v63 = vadd.f32 %v12008_v34, %v11960_v38  ;;  %vm4870_vm8 = vmor %vm4868_vm9, %vm4869_vm7  ;;  %5731 = vmatmul.f32.vlgmr.msra.gmra.mxu2 %v15722_v19  ;;  %v15747_v10 = vld [vmem:[#allocation157_spill] sm:$0xff]  ;;  %v15749_v19 = vld [vmem:[#allocation158_spill] sm:$0xff] }
 0x706   : > { %15744 = vst [vmem:[#allocation26_spill] sm:$0xff] %v12192_v41  ;;  %5795 = vmatpush.xpose.msrb.mxu2 %v5529_v57  ;;  %7103 = vrcp.f32 %v12006_v43  ;;  %v3101_v36 = vmul.f32 1.442695, %v2620_v31  ;;  %5751 = vmatmul.f32.vlgmr.msra.gmra.mxu3 %v15721_v40  ;;  %v4871_v62 = vsel %vm4870_vm8, %v11764_v61, %v4867_v21  ;;  %v4838_v57 = vmul.f32 %v12073_v7, %v4837_v27  ;;  %v15751_v21 = vld [vmem:[#allocation77_spill] sm:$0xff] }
 0x707   : > { %5815 = vmatpush.xpose.msrb.mxu3 %v5530_v50  ;;  %7105 = vpow2.f32 %v3099_v4  ;;  %vm4873_vm2 = vcmp.eq.f32.partialorder %v4872_v18, 8.507059e+37  ;;  %vm4840_vm4 = vweird.f32 %v11791_v25  ;;  %v2589_v30 = vsub.f32 %v15747_v10, %v11967_v13  ;;  %3464 = vadd.xlane.f32.xlu1 %v3463_v54  ;;  %v15748_v50 = vld [vmem:[#allocation98_spill] sm:$0xff]  ;;  %v15750_v4 = vld [vmem:[#allocation32_spill] sm:$0xff] }
 0x708   : > { %3506 = vadd.xlane.f32.xlu0 %v3505_v63  ;;  %v4876_v1 = vsel %vm4873_vm2, %v15748_v50, %v4871_v62  ;;  %7107 = vrcp.f32 %v12041_v47  ;;  %v4823_v31 = vsub.f32 1.0, %v4822_v46  ;;  %v2590_v40 = vsub.f32 %v15749_v19, %v11967_v13  ;;  %v12222_v62 = vpop.xlane.xlu2 %3488 }
 0x709   : > { %v5527_v61 = vmul.f32 %v15750_v4, %v4876_v1  ;;  %v5528_v18 = vmul.f32 %v15751_v21, %v4876_v1  ;;  %v4853_v27 = vadd.f32 %v11919_v0, %v12014_v2  ;;  %vm4855_vm5 = vweird.f32 %v11919_v0  ;;  %15752 = vst [vmem:[#allocation148_spill] sm:$0xff] %v12222_v62  ;;  %v12239_v19 = vpop.xlane.xlu1 %3386  ;;  %v15754_v4 = vld [vmem:[#allocation111_spill] sm:$0xff] }
 0x70a   : > { %v4858_v54 = vand.u32 2147483647, %v11654_v17  ;;  %v4629_v63 = vadd.f32 %v12084_v44, %v4628_v53  ;;  %v4637_v10 = vor.u32 1.1754944e-38, %v4636_v48  ;;  %7109 = vpow2.f32 %v3101_v36  ;;  %vm4856_vm6 = vmor %vm4854_vm1, %vm4855_vm5 }
 0x70b   : > { %5796 = vmatpush.xpose.msrb.mxu2 %v5527_v61  ;;  %5816 = vmatpush.xpose.msrb.mxu3 %v5528_v18  ;;  %vm4631_vm9 = vweird.f32 %v12084_v44  ;;  %v4634_v13 = vand.u32 2147483647, %v11871_v29  ;;  %v3039_v46 = vmul.f32 1.442695, %v2589_v30  ;;  %v4857_v50 = vsel %vm4856_vm6, %v11919_v0, %v4853_v27  ;;  %v15755_v61 = vld [vmem:[#allocation113_spill] sm:$0xff]  ;;  %v15756_v27 = vld [vmem:[#allocation192_spill] sm:$0xff] }
 0x70c   : > { %v12228_v2 = vpop.eup %7103  ;;  %vm4859_vm10 = vcmp.eq.f32.partialorder %v4858_v54, 8.507059e+37  ;;  %vm4632_vm11 = vmor %vm4630_vm3, %vm4631_vm9  ;;  %v3460_v48 = vadd.f32 %v12034_v11, %v12020_v12  ;;  %v3041_v17 = vmul.f32 1.442695, %v2590_v40  ;;  %v4824_v0 = vmul.f32 %v12162_v42, %v4823_v31  ;;  %v15757_v54 = vld [vmem:[#allocation205_spill] sm:$0xff] }
 0x70d   : > { %v12235_v53 = vpop.eup %7105  ;;  %v4862_v36 = vsel %vm4859_vm10, %v11985_v56, %v4857_v50  ;;  %v4633_v1 = vsel %vm4632_vm11, %v12084_v44, %v4629_v63  ;;  %vm4635_vm12 = vcmp.eq.f32.partialorder %v4634_v13, 8.507059e+37  ;;  %v4612_v40 = vmul.f32 %v12228_v2, %v12006_v43  ;;  %v15758_v63 = vld [vmem:[#allocation182_spill] sm:$0xff]  ;;  %v15759_v13 = vld [vmem:[#allocation183_spill] sm:$0xff] }
 0x70e   : > { %15753 = vst [vmem:[#allocation149_spill] sm:$0xff] %v12235_v53  ;;  %v12241_v30 = vpop.eup %7107  ;;  %v5525_v29 = vmul.f32 %v15754_v4, %v4862_v36  ;;  %v5526_v21 = vmul.f32 %v15755_v61, %v4862_v36  ;;  %v4638_v18 = vsel %vm4635_vm12, %v4637_v10, %v4633_v1  ;;  %3461 = vadd.xlane.f32.xlu2 %v3460_v48  ;;  %vm4841_vm13 = vweird.f32 %v12073_v7  ;;  %v12257_v48 = vpop.xlane.xlu0 %3428  ;;  %v15761_v1 = vld [vmem:[#allocation140_spill] sm:$0xff] }
 0x70f   : > { %v5493_v56 = vmul.f32 %v15756_v27, %v4638_v18  ;;  %v5494_v44 = vmul.f32 %v15757_v54, %v4638_v18  ;;  %v3358_v50 = vadd.f32 %v15759_v13, %v15758_v63  ;;  %v3502_v31 = vadd.f32 %v12150_v3, %v12130_v37  ;;  %vm4842_vm14 = vmor %vm4840_vm4, %vm4841_vm13  ;;  %v15784_v3 = vld [vmem:[#allocation16_spill] sm:$0xff] }
 0x710   : > { %5797 = vmatpush.xpose.msrb.mxu2 %v5525_v29  ;;  %5817 = vmatpush.xpose.msrb.mxu3 %v5526_v21  ;;  %v4839_v4 = vadd.f32 %v12073_v7, %v4838_v57  ;;  %v4844_v10 = vand.u32 2147483647, %v11791_v25  ;;  %v12259_v36 = vpop.eup %7109  ;;  %7111 = vrcp.f32 %v15761_v1  ;;  %v4808_v61 = vmul.f32 %v12241_v30, %v12041_v47  ;;  %v15762_v57 = vld [vmem:[#allocation155_spill] sm:$0xff]  ;;  %v15763_v21 = vld [vmem:[#allocation156_spill] sm:$0xff]  ;;  %v12273_v12 = vpop.xlane.xlu2 %3383 }
 0x711   : > { %15760 = vst [vmem:[#allocation97_spill] sm:$0xff] %v12259_v36  ;;  %5757 = vmatpush.xpose.msra.mxu0 %v5493_v56  ;;  %5777 = vmatpush.xpose.msra.mxu1 %v5494_v44  ;;  %v2587_v29 = vsub.f32 %v15762_v57, %v12095_v5  ;;  %v2588_v18 = vsub.f32 %v15763_v21, %v12095_v5  ;;  %v4832_v27 = vand.u32 2147483648, %v11939_v9  ;;  %7113 = vpow2.f32 %v3039_v46  ;;  %v15764_v5 = vld [vmem:[#allocation225_spill] sm:$0xff]  ;;  %v15765_v46 = vld [vmem:[#allocation244_spill] sm:$0xff] }
 0x712   : > { %3359 = vadd.xlane.f32.xlu1 %v3358_v50  ;;  %3503 = vadd.xlane.f32.xlu0 %v3502_v31  ;;  %v4843_v54 = vsel %vm4842_vm14, %v12073_v7, %v4839_v4  ;;  %vm4845_vm15 = vcmp.eq.f32.partialorder %v4844_v10, 8.507059e+37  ;;  %v4613_v11 = vsub.f32 1.0, %v4612_v40  ;;  %v12277_v57 = vmul.f32 %v12158_v51, %v11802_v16  ;;  %v12285_v4 = vpop.xlane.xlu1 %3530 }
 0x713   : > { %v4848_v56 = vsel %vm4845_vm15, %v12152_v28, %v4843_v54  ;;  %v3035_v44 = vmul.f32 1.442695, %v2587_v29  ;;  %v3037_v25 = vmul.f32 1.442695, %v2588_v18  ;;  %7115 = vpow2.f32 %v3041_v17  ;;  %v15767_v29 = vld [vmem:[#allocation180_spill] sm:$0xff] }
 0x714   : > { %v5523_v21 = vmul.f32 %v15764_v5, %v4848_v56  ;;  %v5524_v50 = vmul.f32 %v15765_v46, %v4848_v56  ;;  %vm4826_vm1 = vweird.f32 %v11939_v9  ;;  %v4809_v7 = vsub.f32 1.0, %v4808_v61  ;;  %v15766_v61 = vld [vmem:[#allocation23_spill] sm:$0xff] }
 0x715   : > { %7117 = vpow2.f32 %v3035_v44  ;;  %v4825_v40 = vadd.f32 %v12162_v42, %v4824_v0  ;;  %v4833_v28 = vor.u32 1.1754944e-38, %v4832_v27  ;;  %vm4827_vm3 = vweird.f32 %v12162_v42 }
 0x716   : > { %5798 = vmatpush.xpose.msrb.mxu2 %v5523_v21  ;;  %5818 = vmatpush.xpose.msrb.mxu3 %v5524_v50  ;;  %7119 = vpow2.f32 %v3037_v25  ;;  %v4830_v31 = vand.u32 2147483647, %v11939_v9  ;;  %v12287_v17 = vpop.eup %7111  ;;  %v4614_v10 = vmul.f32 %v12228_v2, %v4613_v11  ;;  %vm4828_vm7 = vmor %vm4826_vm1, %vm4827_vm3  ;;  %v3355_v0 = vadd.f32 %v15767_v29, %v15766_v61  ;;  %v12301_v11 = vpop.xlane.xlu0 %3485  ;;  %v15772_v50 = vld [vmem:[#allocation81_spill] sm:$0xff] }
 0x717   : > { %7121 = vrcp.f32 %v12128_v60  ;;  %v3457_v18 = vadd.f32 %v12192_v41, %v12180_v59  ;;  %v12295_v27 = vpop.eup %7113  ;;  %v4829_v54 = vsel %vm4828_vm7, %v12162_v42, %v4825_v40  ;;  %v3499_v9 = vadd.f32 %v12259_v36, %v12235_v53  ;;  %15769 = vst [vmem:[#allocation177_spill] sm:$0xff] %v12301_v11 }
 0x718   : > { %15768 = vst [vmem:[#allocation215_spill] sm:$0xff] %v12295_v27  ;;  %vm4831_vm8 = vcmp.eq.f32.partialorder %v4830_v31, 8.507059e+37  ;;  %7123 = vrcp.f32 %v12172_v55  ;;  %v4622_v56 = vand.u32 2147483648, %v12006_v43  ;;  %v4810_v44 = vmul.f32 %v12241_v30, %v4809_v7  ;;  %v15773_v31 = vld [vmem:[#allocation238_spill] sm:$0xff]  ;;  %v12343_v42 = vpop.xlane.xlu2 %3527 }
 0x719   : > { %7125 = vrcp.f32 %v11958_v20  ;;  %v4834_v25 = vsel %vm4831_vm8, %v4833_v28, %v4829_v54  ;;  %3458 = vadd.xlane.f32.xlu2 %v3457_v18  ;;  %v12306_v5 = vpop.eup %7115  ;;  %v15771_v21 = vand.u32 2147483648, %v11652_v52  ;;  %v12319_v7 = vadd.f32 %v11911_v49, %v12011_v35  ;;  %15780 = vst [vmem:[#allocation233_spill] sm:$0xff] %v12343_v42 }
 0x71a   : > { %15770 = vst [vmem:[#allocation36_spill] sm:$0xff] %v12306_v5  ;;  %v5521_v40 = vmul.f32 %v15772_v50, %v4834_v25  ;;  %v5522_v41 = vmul.f32 %v15773_v31, %v4834_v25  ;;  %3356 = vadd.xlane.f32.xlu1 %v3355_v0  ;;  %3500 = vadd.xlane.f32.xlu0 %v3499_v9  ;;  %v15775_v28 = vand.u32 2147483648, %v11802_v16  ;;  %7127 = vrcp.f32 %v12027_v24 }
 0x71b   : > { %v12311_v46 = vor.u32 1.1754944e-38, %v15771_v21  ;;  %v12315_v59 = vpop.eup %7117  ;;  %v5102_v54 = vmul.f32 %v12287_v17, %v15761_v1  ;;  %v5313_v0 = vsub.f32 1.0, %v12277_v57  ;;  %vm4616_vm2 = vweird.f32 %v12006_v43 }
 0x71c   : > { %15774 = vst [vmem:[#allocation179_spill] sm:$0xff] %v12315_v59  ;;  %v12323_v18 = vor.u32 1.1754944e-38, %v15775_v28  ;;  %v12328_v21 = vpop.eup %7119  ;;  %5799 = vmatpush.xpose.msrb.mxu2 %v5521_v40  ;;  %5819 = vmatpush.xpose.msrb.mxu3 %v5522_v41  ;;  %v4615_v35 = vadd.f32 %v12228_v2, %v4614_v10  ;;  %vm4617_vm4 = vweird.f32 %v12228_v2  ;;  %v4623_v25 = vor.u32 1.1754944e-38, %v4622_v56 }
 0x71d   : > { %15777 = vst [vmem:[#allocation228_spill] sm:$0xff] %v12328_v21  ;;  %v12334_v9 = vpop.eup %7121  ;;  %v4818_v50 = vand.u32 2147483648, %v12041_v47  ;;  %vm12337_vm5 = vmor %vm4616_vm2, %vm4617_vm4  ;;  %v4620_v28 = vand.u32 2147483647, %v12006_v43  ;;  %v4811_v57 = vadd.f32 %v12241_v30, %v4810_v44  ;;  %vm4812_vm6 = vweird.f32 %v12041_v47 }
 0x71e   : > { %15776 = vst [vmem:[#allocation129_spill] sm:$0xff] %v12323_v18  ;;  %v12345_v41 = vpop.eup %7123  ;;  %v4598_v10 = vmul.f32 %v12334_v9, %v12128_v60  ;;  %v4619_v56 = vsel %vm12337_vm5, %v12228_v2, %v4615_v35  ;;  %vm4813_vm9 = vweird.f32 %v12241_v30  ;;  %v5103_v43 = vsub.f32 1.0, %v5102_v54  ;;  %v12368_v54 = vpop.xlane.xlu1 %3425 }
 0x71f   : > { %v12354_v40 = vpop.eup %7125  ;;  %vm4621_vm10 = vcmp.eq.f32.partialorder %v4620_v28, 8.507059e+37  ;;  %vm12356_vm11 = vmor %vm4812_vm6, %vm4813_vm9  ;;  %v4816_v36 = vand.u32 2147483647, %v12041_v47  ;;  %v3454_v53 = vadd.f32 %v12306_v5, %v12295_v27  ;;  %v3451_v35 = vadd.f32 %v12328_v21, %v12315_v59  ;;  %v15785_v5 = vld [vmem:[#allocation151_spill] sm:$0xff]  ;;  %v15787_v21 = vld [vmem:[#allocation150_spill] sm:$0xff] }
 0x720   : > { %v4599_v15 = vsub.f32 1.0, %v4598_v10  ;;  %v4624_v58 = vsel %vm4621_vm10, %v4623_v25, %v4619_v56  ;;  %v4815_v2 = vsel %vm12356_vm11, %v12241_v30, %v4811_v57  ;;  %v12370_v31 = vpop.eup %7127  ;;  %v4819_v28 = vor.u32 1.1754944e-38, %v4818_v50  ;;  %v12376_v25 = vpop.xlane.xlu0 %3380 }
 0x721   : > { %15783 = vst [vmem:[#allocation236_spill] sm:$0xff] %v12370_v31  ;;  %v4794_v47 = vmul.f32 %v12345_v41, %v12172_v55  ;;  %v5491_v37 = vmul.f32 %v15784_v3, %v4624_v58  ;;  %v5492_v10 = vmul.f32 %v15785_v5, %v4624_v58  ;;  %v12379_v56 = vmul.f32 %v12158_v51, %v5313_v0  ;;  %v15786_v0 = vld [vmem:[#allocation112_spill] sm:$0xff] }
 0x722   : > { %v5298_v30 = vmul.f32 %v12354_v40, %v11958_v20  ;;  %7129 = vrcp.f32 %v12097_v14  ;;  %vm4817_vm12 = vcmp.eq.f32.partialorder %v4816_v36, 8.507059e+37  ;;  %3455 = vadd.xlane.f32.xlu1 %v3454_v53  ;;  %3452 = vadd.xlane.f32.xlu2 %v3451_v35  ;;  %v5112_v57 = vand.u32 2147483648, %v15761_v1 }
 0x723   : > { %v4600_v3 = vmul.f32 %v12334_v9, %v4599_v15  ;;  %5758 = vmatpush.xpose.msra.mxu0 %v5491_v37  ;;  %5778 = vmatpush.xpose.msra.mxu1 %v5492_v10  ;;  %v4820_v58 = vsel %vm4817_vm12, %v4819_v28, %v4815_v2  ;;  %v5088_v5 = vmul.f32 %v12370_v31, %v12027_v24  ;;  %7131 = vrcp.f32 %v12178_v6 }
 0x724   : > { %v5519_v44 = vmul.f32 %v15786_v0, %v4820_v58  ;;  %v5520_v36 = vmul.f32 %v15787_v21, %v4820_v58  ;;  %v5104_v53 = vmul.f32 %v12287_v17, %v5103_v43  ;;  %v4608_v35 = vand.u32 2147483648, %v12128_v60  ;;  %v12402_v43 = vpop.xlane.xlu2 %3422 }
 0x725   : > { %v4795_v50 = vsub.f32 1.0, %v4794_v47  ;;  %7133 = vrcp.f32 %v12239_v19  ;;  %v5299_v15 = vsub.f32 1.0, %v5298_v30  ;;  %v5308_v37 = vand.u32 2147483648, %v11958_v20 }
 0x726   : > { %v5098_v2 = vand.u32 2147483648, %v12027_v24  ;;  %5800 = vmatpush.xpose.msrb.mxu2 %v5519_v44  ;;  %5820 = vmatpush.xpose.msrb.mxu3 %v5520_v36  ;;  %7135 = vrcp.f32 %v12257_v48  ;;  %vm4602_vm13 = vweird.f32 %v12128_v60  ;;  %v4601_v21 = vadd.f32 %v12334_v9, %v4600_v3  ;;  %v12429_v27 = vpop.xlane.xlu1 %3482 }
 0x727   : > { %7137 = vrcp.f32 %v12202_v45  ;;  %vm4603_vm14 = vweird.f32 %v12334_v9  ;;  %v12406_v47 = vor.u32 1.1754944e-38, %v5112_v57  ;;  %v5089_v10 = vsub.f32 1.0, %v5088_v5  ;;  %15795 = vst [vmem:[#allocation134_spill] sm:$0xff] %v12429_v27 }
 0x728   : > { %v12404_v28 = vpop.eup %7129  ;;  %vm12408_vm15 = vmor %vm4602_vm13, %vm4603_vm14  ;;  %v4606_v58 = vand.u32 2147483647, %v12128_v60  ;;  %7139 = vrcp.f32 %v12273_v12  ;;  %v5294_v0 = vand.u32 2147483648, %v12097_v14  ;;  %v4609_v3 = vor.u32 1.1754944e-38, %v4608_v35 }
 0x729   : > { %15788 = vst [vmem:[#allocation173_spill] sm:$0xff] %v12404_v28  ;;  %v4796_v44 = vmul.f32 %v12345_v41, %v4795_v50  ;;  %v4605_v36 = vsel %vm12408_vm15, %v12334_v9, %v4601_v21  ;;  %v12419_v57 = vpop.eup %7131  ;;  %v12422_v5 = vadd.f32 %v12287_v17, %v5104_v53  ;;  %v12425_v59 = vmul.f32 %v12354_v40, %v5299_v15  ;;  %v12438_v53 = vpop.xlane.xlu0 %3524 }
 0x72a   : > { %15789 = vst [vmem:[#allocation174_spill] sm:$0xff] %v12406_v47  ;;  %v12427_v60 = vor.u32 1.1754944e-38, %v5308_v37  ;;  %vm4607_vm1 = vcmp.eq.f32.partialorder %v4606_v58, 8.507059e+37  ;;  %v12433_v50 = vor.u32 1.1754944e-38, %v5098_v2  ;;  %v5284_v9 = vmul.f32 %v12404_v28, %v12097_v14  ;;  %v15798_v58 = vld [vmem:[#allocation270_spill] sm:$0xff]  ;;  %v15799_v2 = vld [vmem:[#allocation271_spill] sm:$0xff] }
 0x72b   : > { %15792 = vst [vmem:[#allocation62_spill] sm:$0xff] %v12419_v57  ;;  %v12431_v35 = vpop.eup %7133  ;;  %v4804_v21 = vand.u32 2147483648, %v12172_v55  ;;  %v4610_v30 = vsel %vm4607_vm1, %v4609_v3, %v4605_v36  ;;  %v12443_v15 = vmul.f32 %v12370_v31, %v5089_v10  ;;  %v12454_v3 = vor.u32 1.1754944e-38, %v5294_v0 }
 0x72c   : > { %15793 = vst [vmem:[#allocation63_spill] sm:$0xff] %v12422_v5  ;;  %v12440_v34 = vpop.eup %7135  ;;  %v4584_v37 = vmul.f32 %v12431_v35, %v12239_v19  ;;  %v5489_v38 = vmul.f32 %v15798_v58, %v4610_v30  ;;  %v5490_v8 = vmul.f32 %v15799_v2, %v4610_v30  ;;  %7141 = vrcp.f32 %v12222_v62  ;;  %v15804_v5 = vld [vmem:[#allocation42_spill] sm:$0xff] }
 0x72d   : > { %15794 = vst [vmem:[#allocation128_spill] sm:$0xff] %v12427_v60  ;;  %v12452_v29 = vpop.eup %7137  ;;  %v4780_v10 = vmul.f32 %v12440_v34, %v12257_v48  ;;  %v4797_v36 = vadd.f32 %v12345_v41, %v4796_v44  ;;  %vm4798_vm3 = vweird.f32 %v12172_v55  ;;  %vm4799_vm7 = vweird.f32 %v12345_v41  ;;  %v15803_v44 = vld [vmem:[#allocation41_spill] sm:$0xff] }
 0x72e   : > { %15796 = vst [vmem:[#allocation91_spill] sm:$0xff] %v12433_v50  ;;  %v5919_v50 = vld [vmem:[%s13694_s4] sm:$0xff]  ;;  %v12460_v61 = vpop.eup %7139  ;;  %v4585_v30 = vsub.f32 1.0, %v4584_v37  ;;  %5759 = vmatpush.xpose.msra.mxu0 %v5489_v38  ;;  %5779 = vmatpush.xpose.msra.mxu1 %v5490_v8  ;;  %v4802_v58 = vand.u32 2147483647, %v12172_v55  ;;  %v5285_v0 = vsub.f32 1.0, %v5284_v9  ;;  %v12467_v31 = vmul.f32 %v12419_v57, %v12178_v6  ;;  %vm4800_vm8 = vmor %vm4798_vm3, %vm4799_vm7 }
 0x72f   : > { %15797 = vst [vmem:[#allocation216_spill] sm:$0xff] %v12443_v15  ;;  %v4805_v2 = vor.u32 1.1754944e-38, %v4804_v21  ;;  %v4781_v15 = vsub.f32 1.0, %v4780_v10  ;;  %5925 = vperm.xlu0 %6452, %v5919_v50   ;;  %v12472_v37 = vmul.f32 %v12452_v29, %v12202_v45  ;;  %v4801_v38 = vsel %vm4800_vm8, %v12345_v41, %v4797_v36  ;;  %v12479_v10 = vpop.xlane.xlu2 %3479 }
 0x730   : > { %15800 = vst [vmem:[#allocation12_spill] sm:$0xff] %v12452_v29  ;;  %vm4803_vm2 = vcmp.eq.f32.partialorder %v4802_v58, 8.507059e+37  ;;  %v4586_v8 = vmul.f32 %v12431_v35, %v4585_v30  ;;  %v4594_v55 = vand.u32 2147483648, %v12239_v19  ;;  %v4570_v9 = vmul.f32 %v12460_v61, %v12273_v12 }
 0x731   : > { %15801 = vst [vmem:[#allocation170_spill] sm:$0xff] %v12454_v3  ;;  %v4806_v21 = vsel %vm4803_vm2, %v4805_v2, %v4801_v38  ;;  %7143 = vrcp.f32 %v12368_v54  ;;  %v12488_v36 = vmul.f32 %v12404_v28, %v5285_v0  ;;  %v5075_v30 = vsub.f32 1.0, %v12467_v31  ;;  %v12500_v0 = vpop.xlane.xlu1 %3377  ;;  %v15810_v28 = vld [vmem:[#allocation269_spill] sm:$0xff] }
 0x732   : > { %15802 = vst [vmem:[#allocation86_spill] sm:$0xff] %v12479_v10  ;;  %v5517_v47 = vmul.f32 %v15803_v44, %v4806_v21  ;;  %v5518_v3 = vmul.f32 %v15804_v5, %v4806_v21  ;;  %v12485_v41 = vpop.eup %7141  ;;  %v4782_v58 = vmul.f32 %v12440_v34, %v4781_v15  ;;  %v4790_v2 = vand.u32 2147483648, %v12257_v48  ;;  %v5922_v5 = vld [vmem:[%s13694_s4 + $0x18] sm:$0xff] }
 0x733   : > { %15805 = vst [vmem:[#allocation74_spill] sm:$0xff] %v12485_v41  ;;  %v5271_v38 = vsub.f32 1.0, %v12472_v37  ;;  %v5070_v50 = vand.u32 2147483648, %v12222_v62  ;;  %vm4588_vm4 = vweird.f32 %v12239_v19  ;;  %7145 = vrcp.f32 %v12376_v25  ;;  %v12504_v37 = vpop.xlane.xlu0 %3419 }
 0x734   : > { %15806 = vst [vmem:[#allocation93_spill] sm:$0xff] %v12488_v36  ;;  %5801 = vmatpush.xpose.msrb.mxu2 %v5517_v47  ;;  %5821 = vmatpush.xpose.msrb.mxu3 %v5518_v3  ;;  %v4595_v31 = vor.u32 1.1754944e-38, %v4594_v55  ;;  %vm4784_vm5 = vweird.f32 %v12257_v48  ;;  %v4571_v15 = vsub.f32 1.0, %v4570_v9  ;;  %v4587_v44 = vadd.f32 %v12431_v35, %v4586_v8  ;;  %v5921_v55 = vld [vmem:[%s13694_s4 + $0x10] sm:$0xff] }
 0x735   : > { %v5060_v47 = vmul.f32 %v12485_v41, %v12222_v62  ;;  %v4580_v3 = vand.u32 2147483648, %v12273_v12  ;;  %vm4589_vm6 = vweird.f32 %v12431_v35  ;;  %v4592_v21 = vand.u32 2147483647, %v12239_v19 }
 0x736   : > { %v4791_v60 = vor.u32 1.1754944e-38, %v4790_v2  ;;  %7147 = vrcp.f32 %v12285_v4  ;;  %vm4590_vm9 = vmor %vm4588_vm4, %vm4589_vm6  ;;  %v4783_v8 = vadd.f32 %v12440_v34, %v4782_v58  ;;  %vm4785_vm10 = vweird.f32 %v12440_v34 }
 0x737   : > { %5940 = vperm.xlu0 %6452, %v5922_v5   ;;  %v12519_v9 = vpop.eup %7143  ;;  %v5266_v62 = vand.u32 2147483648, %v12285_v4  ;;  %v4591_v2 = vsel %vm4590_vm9, %v12431_v35, %v4587_v44  ;;  %vm4593_vm11 = vcmp.eq.f32.partialorder %v4592_v21, 8.507059e+37  ;;  %vm12525_vm12 = vmor %vm4784_vm5, %vm4785_vm10  ;;  %v4788_v58 = vand.u32 2147483647, %v12257_v48  ;;  %v5920_v5 = vld [vmem:[%s13694_s4 + $0x8] sm:$0xff]  ;;  %v15809_v21 = vld [vmem:[#allocation268_spill] sm:$0xff] }
 0x738   : > { %v4572_v24 = vmul.f32 %v12460_v61, %v4571_v15  ;;  %7149 = vrcp.f32 %v12301_v11  ;;  %v4596_v13 = vsel %vm4593_vm11, %v4595_v31, %v4591_v2  ;;  %v4787_v35 = vsel %vm12525_vm12, %v12440_v34, %v4783_v8  ;;  %v12547_v34 = vpop.xlane.xlu2 %3374 }
 0x739   : > { %v12538_v44 = vpop.eup %7145  ;;  %v5487_v63 = vmul.f32 %v15809_v21, %v4596_v13  ;;  %v5488_v36 = vmul.f32 %v15810_v28, %v4596_v13  ;;  %vm4789_vm13 = vcmp.eq.f32.partialorder %v4788_v58, 8.507059e+37  ;;  %7151 = vrcp.f32 %v12402_v43  ;;  %v15811_v13 = vld [vmem:[#allocation47_spill] sm:$0xff] }
 0x73a   : > { %5935 = vperm.xlu2 %6454, %v5921_v55   ;;  %v5061_v48 = vsub.f32 1.0, %v5060_v47  ;;  %v4766_v15 = vmul.f32 %v12519_v9, %v12368_v54  ;;  %v4556_v31 = vmul.f32 %v12538_v44, %v12376_v25  ;;  %v4792_v2 = vsel %vm4789_vm13, %v4791_v60, %v4787_v35  ;;  %v15812_v55 = vld [vmem:[#allocation51_spill] sm:$0xff] }
 0x73b   : > { %5930 = vperm.xlu1 %6453, %v5920_v5   ;;  %v5056_v8 = vand.u32 2147483648, %v12301_v11  ;;  %7153 = vrcp.f32 %v12343_v42  ;;  %5760 = vmatpush.xpose.msra.mxu0 %v5487_v63  ;;  %v5515_v28 = vmul.f32 %v15811_v13, %v4792_v2  ;;  %v5516_v47 = vmul.f32 %v15812_v55, %v4792_v2  ;;  %v12573_v2 = vpop.xlane.xlu1 %3521 }
 0x73c   : > { %5780 = vmatpush.xpose.msra.mxu1 %v5488_v36  ;;  %v12553_v19 = vpop.eup %7147  ;;  %v12556_v58 = vmul.f32 %v12419_v57, %v5075_v30  ;;  %v15814_v60 = vand.u32 2147483648, %v12178_v6  ;;  %v15816_v35 = vand.u32 2147483648, %v12202_v45  ;;  %v4557_v18 = vsub.f32 1.0, %v4556_v31  ;;  %15820 = vst [vmem:[#allocation221_spill] sm:$0xff] %v12573_v2 }
 0x73d   : > { %v12567_v63 = vmul.f32 %v12452_v29, %v5271_v38  ;;  %v12569_v36 = vor.u32 1.1754944e-38, %v5070_v50  ;;  %vm4574_vm14 = vweird.f32 %v12273_v12  ;;  %5802 = vmatpush.xpose.msrb.mxu2 %v5515_v28  ;;  %5822 = vmatpush.xpose.msrb.mxu3 %v5516_v47  ;;  %v4573_v30 = vadd.f32 %v12460_v61, %v4572_v24  ;;  %v12580_v38 = vpop.xlane.xlu0 %3476 }
 0x73e   : > { %15813 = vst [vmem:[#allocation28_spill] sm:$0xff] %v12556_v58  ;;  %v12560_v5 = vor.u32 1.1754944e-38, %v15814_v60  ;;  %v12564_v21 = vor.u32 1.1754944e-38, %v15816_v35  ;;  %v12575_v13 = vpop.eup %7149  ;;  %v4581_v55 = vor.u32 1.1754944e-38, %v4580_v3  ;;  %v12577_v60 = vor.u32 1.1754944e-38, %v5266_v62 }
 0x73f   : > { %15818 = vst [vmem:[#allocation76_spill] sm:$0xff] %v12567_v63  ;;  %v4767_v35 = vsub.f32 1.0, %v4766_v15  ;;  %vm4575_vm15 = vweird.f32 %v12460_v61  ;;  %v12582_v50 = vpop.eup %7151  ;;  %v12585_v31 = vmul.f32 %v12485_v41, %v5061_v48  ;;  %v5256_v24 = vmul.f32 %v12553_v19, %v12285_v4  ;;  %v15828_v41 = vld [vmem:[#allocation206_spill] sm:$0xff] }
 0x740   : > { %15815 = vst [vmem:[#allocation48_spill] sm:$0xff] %v12560_v5  ;;  %v12589_v28 = vor.u32 1.1754944e-38, %v5056_v8  ;;  %vm4576_vm1 = vmor %vm4574_vm14, %vm4575_vm15  ;;  %v4578_v62 = vand.u32 2147483647, %v12273_v12  ;;  %v4776_v3 = vand.u32 2147483648, %v12368_v54  ;;  %v4558_v15 = vmul.f32 %v12538_v44, %v4557_v18  ;;  %v15834_v63 = vld [vmem:[#allocation202_spill] sm:$0xff] }
 0x741   : > { %15817 = vst [vmem:[#allocation49_spill] sm:$0xff] %v12564_v21  ;;  %v4577_v47 = vsel %vm4576_vm1, %v12460_v61, %v4573_v30  ;;  %7155 = vrcp.f32 %v12500_v0  ;;  %v12598_v48 = vpop.eup %7153  ;;  %v4566_v8 = vand.u32 2147483648, %v12376_v25  ;;  %v4768_v12 = vmul.f32 %v12519_v9, %v4767_v35  ;;  %v15827_v61 = vld [vmem:[#allocation267_spill] sm:$0xff]  ;;  %v15833_v21 = vld [vmem:[#allocation200_spill] sm:$0xff] }
 0x742   : > { %15819 = vst [vmem:[#allocation145_spill] sm:$0xff] %v12569_v36  ;;  %v5046_v36 = vmul.f32 %v12575_v13, %v12301_v11  ;;  %7157 = vrcp.f32 %v12429_v27  ;;  %vm4579_vm3 = vcmp.eq.f32.partialorder %v4578_v62, 8.507059e+37  ;;  %vm4770_vm7 = vweird.f32 %v12368_v54  ;;  %v12615_v11 = vpop.xlane.xlu2 %3518 }
 0x743   : > { %15821 = vst [vmem:[#allocation119_spill] sm:$0xff] %v12575_v13  ;;  %v4582_v18 = vsel %vm4579_vm3, %v4581_v55, %v4577_v47  ;;  %7159 = vrcp.f32 %v12504_v37  ;;  %v5257_v5 = vsub.f32 1.0, %v5256_v24  ;;  %v5242_v62 = vmul.f32 %v12598_v48, %v12343_v42 }
 0x744   : > { %15822 = vst [vmem:[#allocation166_spill] sm:$0xff] %v12577_v60  ;;  %7161 = vrcp.f32 %v12438_v53  ;;  %v5485_v30 = vmul.f32 %v15827_v61, %v4582_v18  ;;  %v4777_v60 = vor.u32 1.1754944e-38, %v4776_v3  ;;  %v4559_v35 = vadd.f32 %v12538_v44, %v4558_v15 }
 0x745   : > { %15823 = vst [vmem:[#allocation246_spill] sm:$0xff] %v12580_v38  ;;  %v5047_v55 = vsub.f32 1.0, %v5046_v36  ;;  %vm4560_vm8 = vweird.f32 %v12376_v25  ;;  %vm4561_vm2 = vweird.f32 %v12538_v44  ;;  %v4564_v47 = vand.u32 2147483647, %v12376_v25 }
 0x746   : > { %15824 = vst [vmem:[#allocation25_spill] sm:$0xff] %v12585_v31  ;;  %v5486_v31 = vmul.f32 %v15828_v41, %v4582_v18  ;;  %5761 = vmatpush.xpose.msra.mxu0 %v5485_v30  ;;  %v4567_v41 = vor.u32 1.1754944e-38, %v4566_v8  ;;  %vm4562_vm4 = vmor %vm4560_vm8, %vm4561_vm2  ;;  %v4769_v3 = vadd.f32 %v12519_v9, %v4768_v12  ;;  %vm4771_vm5 = vweird.f32 %v12519_v9 }
 0x747   : > { %15825 = vst [vmem:[#allocation100_spill] sm:$0xff] %v12589_v28  ;;  %v4752_v28 = vmul.f32 %v12582_v50, %v12402_v43  ;;  %v12620_v61 = vpop.eup %7155  ;;  %v5252_v36 = vand.u32 2147483648, %v12343_v42  ;;  %v4762_v18 = vand.u32 2147483648, %v12402_v43  ;;  %vm4565_vm6 = vcmp.eq.f32.partialorder %v4564_v47, 8.507059e+37  ;;  %vm12631_vm9 = vmor %vm4770_vm7, %vm4771_vm5 }
 0x748   : > { %15826 = vst [vmem:[#allocation219_spill] sm:$0xff] %v12598_v48  ;;  %5781 = vmatpush.xpose.msra.mxu1 %v5486_v31  ;;  %v12624_v15 = vpop.eup %7157  ;;  %v4563_v31 = vsel %vm4562_vm4, %v12538_v44, %v4559_v35  ;;  %v5243_v12 = vsub.f32 1.0, %v5242_v62  ;;  %v4773_v57 = vsel %vm12631_vm9, %v12519_v9, %v4769_v3  ;;  %v4774_v58 = vand.u32 2147483647, %v12368_v54  ;;  %v12643_v44 = vpop.xlane.xlu0 %3371 }
 0x749   : > { %v4753_v24 = vsub.f32 1.0, %v4752_v28  ;;  %15829 = vst [vmem:[#allocation88_spill] sm:$0xff] %v12624_v15  ;;  %v12635_v28 = vpop.xlane.xlu1 %3416  ;;  %v12637_v8 = vpop.eup %7159  ;;  %v4568_v30 = vsel %vm4565_vm6, %v4567_v41, %v4563_v31  ;;  %7163 = vrcp.f32 %v12479_v10  ;;  %v4542_v47 = vmul.f32 %v12620_v61, %v12500_v0 }
 0x74a   : > { %v12645_v35 = vpop.eup %7161  ;;  %v5483_v42 = vmul.f32 %v15833_v21, %v4568_v30  ;;  %v5484_v62 = vmul.f32 %v15834_v63, %v4568_v30  ;;  %v4738_v9 = vmul.f32 %v12637_v8, %v12504_v37  ;;  %vm4775_vm10 = vcmp.eq.f32.partialorder %v4774_v58, 8.507059e+37  ;;  %v15836_v58 = vld [vmem:[#allocation208_spill] sm:$0xff]  ;;  %v15837_v30 = vld [vmem:[#allocation210_spill] sm:$0xff] }
 0x74b   : > { %15832 = vst [vmem:[#allocation60_spill] sm:$0xff] %v12645_v35  ;;  %v4754_v41 = vmul.f32 %v12582_v50, %v4753_v24  ;;  %7165 = vrcp.f32 %v12547_v34  ;;  %v12657_v54 = vmul.f32 %v12553_v19, %v5257_v5  ;;  %v12660_v3 = vmul.f32 %v12575_v13, %v5047_v55  ;;  %v12677_v13 = vpop.xlane.xlu2 %3413 }
 0x74c   : > { %v5042_v31 = vand.u32 2147483648, %v12429_v27  ;;  %5762 = vmatpush.xpose.msra.mxu0 %v5483_v42  ;;  %5782 = vmatpush.xpose.msra.mxu1 %v5484_v62  ;;  %v4778_v21 = vsel %vm4775_vm10, %v4777_v60, %v4773_v57  ;;  %v5032_v63 = vmul.f32 %v12624_v15, %v12429_v27  ;;  %v5228_v24 = vmul.f32 %v12645_v35, %v12438_v53 }
 0x74d   : > { %15835 = vst [vmem:[#allocation211_spill] sm:$0xff] %v12660_v3  ;;  %v5513_v25 = vmul.f32 %v15836_v58, %v4778_v21  ;;  %v5514_v29 = vmul.f32 %v15837_v30, %v4778_v21  ;;  %v12669_v5 = vor.u32 1.1754944e-38, %v5252_v36  ;;  %vm4756_vm11 = vweird.f32 %v12402_v43 }
 0x74e   : > { %v4763_v55 = vor.u32 1.1754944e-38, %v4762_v18  ;;  %v4543_v3 = vsub.f32 1.0, %v4542_v47  ;;  %v12673_v42 = vmul.f32 %v12598_v48, %v5243_v12  ;;  %v5238_v57 = vand.u32 2147483648, %v12438_v53 }
 0x74f   : > { %15838 = vst [vmem:[#allocation105_spill] sm:$0xff] %v12669_v5  ;;  %v4739_v60 = vsub.f32 1.0, %v4738_v9  ;;  %5803 = vmatpush.xpose.msrb.mxu2 %v5513_v25  ;;  %5823 = vmatpush.xpose.msrb.mxu3 %v5514_v29  ;;  %v4755_v62 = vadd.f32 %v12582_v50, %v4754_v41  ;;  %v12679_v58 = vpop.eup %7163  ;;  %v12681_v36 = vor.u32 1.1754944e-38, %v5042_v31  ;;  %v4552_v21 = vand.u32 2147483648, %v12500_v0 }
 0x750   : > { %15839 = vst [vmem:[#allocation171_spill] sm:$0xff] %v12673_v42  ;;  %vm4757_vm12 = vweird.f32 %v12582_v50  ;;  %v4760_v18 = vand.u32 2147483647, %v12402_v43  ;;  %v5033_v47 = vsub.f32 1.0, %v5032_v63  ;;  %v5229_v9 = vsub.f32 1.0, %v5228_v24 }
 0x751   : > { %15840 = vst [vmem:[#allocation30_spill] sm:$0xff] %v12679_v58  ;;  %v12686_v12 = vpop.eup %7165  ;;  %v4748_v29 = vand.u32 2147483648, %v12504_v37  ;;  %7167 = vrcp.f32 %v12573_v2  ;;  %vm4758_vm13 = vmor %vm4756_vm11, %vm4757_vm12  ;;  %v4544_v41 = vmul.f32 %v12620_v61, %v4543_v3  ;;  %v12695_v25 = vpop.xlane.xlu1 %3473  ;;  %v5018_v63 = vmul.f32 %v12679_v58, %v12479_v10 }
 0x752   : > { %15841 = vst [vmem:[#allocation96_spill] sm:$0xff] %v12681_v36  ;;  %v4759_v31 = vsel %vm4758_vm13, %v12582_v50, %v4755_v62  ;;  %vm4761_vm14 = vcmp.eq.f32.partialorder %v4760_v18, 8.507059e+37  ;;  %7169 = vrcp.f32 %v12635_v28  ;;  %v4740_v24 = vmul.f32 %v12637_v8, %v4739_v60  ;;  %v12701_v36 = vpop.xlane.xlu0 %3515  ;;  %v15844_v50 = vld [vmem:[#allocation52_spill] sm:$0xff]  ;;  %v15845_v62 = vld [vmem:[#allocation55_spill] sm:$0xff] }
 0x753   : > { %15842 = vst [vmem:[#allocation56_spill] sm:$0xff] %v12695_v25  ;;  %v4764_v30 = vsel %vm4761_vm14, %v4763_v55, %v4759_v31  ;;  %7171 = vrcp.f32 %v12643_v44  ;;  %v4528_v43 = vmul.f32 %v12686_v12, %v12547_v34  ;;  %v12708_v5 = vor.u32 1.1754944e-38, %v5238_v57 }
 0x754   : > { %15843 = vst [vmem:[#allocation118_spill] sm:$0xff] %v12701_v36  ;;  %7173 = vrcp.f32 %v12580_v38  ;;  %v5511_v3 = vmul.f32 %v15844_v50, %v4764_v30  ;;  %v5512_v18 = vmul.f32 %v15845_v62, %v4764_v30  ;;  %v5028_v27 = vand.u32 2147483648, %v12479_v10 }
 0x755   : > { %15846 = vst [vmem:[#allocation144_spill] sm:$0xff] %v12708_v5  ;;  %vm4546_vm15 = vweird.f32 %v12500_v0  ;;  %v4553_v55 = vor.u32 1.1754944e-38, %v4552_v21  ;;  %v12713_v60 = vmul.f32 %v12624_v15, %v5033_v47  ;;  %vm4742_vm1 = vweird.f32 %v12504_v37  ;;  %v15856_v5 = vld [vmem:[#allocation195_spill] sm:$0xff] }
 0x756   : > { %5804 = vmatpush.xpose.msrb.mxu2 %v5511_v3  ;;  %5824 = vmatpush.xpose.msrb.mxu3 %v5512_v18  ;;  %v4545_v31 = vadd.f32 %v12620_v61, %v4544_v41  ;;  %vm4547_vm3 = vweird.f32 %v12620_v61  ;;  %v12721_v57 = vmul.f32 %v12645_v35, %v5229_v9  ;;  %v5019_v30 = vsub.f32 1.0, %v5018_v63  ;;  %v15857_v35 = vld [vmem:[#allocation199_spill] sm:$0xff] }
 0x757   : > { %15847 = vst [vmem:[#allocation165_spill] sm:$0xff] %v12713_v60  ;;  %v12718_v50 = vpop.eup %7167  ;;  %v4749_v62 = vor.u32 1.1754944e-38, %v4748_v29  ;;  %vm12723_vm7 = vmor %vm4546_vm15, %vm4547_vm3  ;;  %v4550_v47 = vand.u32 2147483647, %v12500_v0  ;;  %v4529_v3 = vsub.f32 1.0, %v4528_v43  ;;  %v4538_v41 = vand.u32 2147483648, %v12547_v34  ;;  %v12740_v0 = vpop.xlane.xlu2 %3470 }
 0x758   : > { %15848 = vst [vmem:[#allocation90_spill] sm:$0xff] %v12718_v50  ;;  %v12728_v15 = vpop.eup %7169  ;;  %v4549_v18 = vsel %vm12723_vm7, %v12620_v61, %v4545_v31  ;;  %v4741_v9 = vadd.f32 %v12637_v8, %v4740_v24  ;;  %v5224_v29 = vand.u32 2147483648, %v12573_v2  ;;  %v5014_v63 = vand.u32 2147483648, %v12580_v38  ;;  %v15861_v24 = vld [vmem:[#allocation70_spill] sm:$0xff] }
 0x759   : > { %15849 = vst [vmem:[#allocation243_spill] sm:$0xff] %v12721_v57  ;;  %v12735_v60 = vpop.eup %7171  ;;  %vm4551_vm8 = vcmp.eq.f32.partialorder %v4550_v47, 8.507059e+37  ;;  %vm4743_vm2 = vweird.f32 %v12637_v8  ;;  %7175 = vrcp.f32 %v12615_v11  ;;  %v4746_v21 = vand.u32 2147483647, %v12504_v37  ;;  %v12766_v37 = vpop.xlane.xlu1 %3368 }
 0x75a   : > { %15852 = vst [vmem:[#allocation123_spill] sm:$0xff] %v12740_v0  ;;  %v12742_v43 = vpop.eup %7173  ;;  %v4514_v61 = vmul.f32 %v12735_v60, %v12643_v44  ;;  %v4554_v31 = vsel %vm4551_vm8, %v4553_v55, %v4549_v18  ;;  %vm12749_vm4 = vmor %vm4742_vm1, %vm4743_vm2  ;;  %v4724_v47 = vmul.f32 %v12728_v15, %v12635_v28  ;;  %v12762_v55 = vmul.f32 %v12679_v58, %v5019_v30  ;;  %v12774_v30 = vpop.xlane.xlu0 %3410 }
 0x75b   : > { %15853 = vst [vmem:[#allocation227_spill] sm:$0xff] %v12742_v43  ;;  %v5481_v10 = vmul.f32 %v15856_v5, %v4554_v31  ;;  %v5482_v57 = vmul.f32 %v15857_v35, %v4554_v31  ;;  %v4745_v42 = vsel %vm12749_vm4, %v12637_v8, %v4741_v9  ;;  %v4530_v18 = vmul.f32 %v12686_v12, %v4529_v3  ;;  %v15860_v9 = vld [vmem:[#allocation209_spill] sm:$0xff] }
 0x75c   : > { %15858 = vst [vmem:[#allocation22_spill] sm:$0xff] %v12762_v55  ;;  %vm4747_vm5 = vcmp.eq.f32.partialorder %v4746_v21, 8.507059e+37  ;;  %7177 = vrcp.f32 %v12677_v13  ;;  %v12768_v48 = vor.u32 1.1754944e-38, %v5028_v27  ;;  %v5214_v5 = vmul.f32 %v12718_v50, %v12573_v2 }
 0x75d   : > { %v5004_v35 = vmul.f32 %v12742_v43, %v12580_v38  ;;  %5763 = vmatpush.xpose.msra.mxu0 %v5481_v10  ;;  %5783 = vmatpush.xpose.msra.mxu1 %v5482_v57  ;;  %v4750_v8 = vsel %vm4747_vm5, %v4749_v62, %v4745_v42  ;;  %vm4532_vm6 = vweird.f32 %v12547_v34  ;;  %v4515_v3 = vsub.f32 1.0, %v4514_v61 }
 0x75e   : > { %15859 = vst [vmem:[#allocation213_spill] sm:$0xff] %v12768_v48  ;;  %v5509_v31 = vmul.f32 %v15860_v9, %v4750_v8  ;;  %v5510_v21 = vmul.f32 %v15861_v24, %v4750_v8  ;;  %v4539_v27 = vor.u32 1.1754944e-38, %v4538_v41  ;;  %v12779_v48 = vor.u32 1.1754944e-38, %v5224_v29 }
 0x75f   : > { %v12781_v58 = vor.u32 1.1754944e-38, %v5014_v63  ;;  %v4725_v55 = vsub.f32 1.0, %v4724_v47  ;;  %v12783_v2 = vpop.eup %7175  ;;  %v4734_v10 = vand.u32 2147483648, %v12635_v28  ;;  %v4531_v42 = vadd.f32 %v12686_v12, %v4530_v18  ;;  %v12802_v9 = vpop.xlane.xlu2 %3365 }
 0x760   : > { %15862 = vst [vmem:[#allocation101_spill] sm:$0xff] %v12779_v48  ;;  %5805 = vmatpush.xpose.msrb.mxu2 %v5509_v31  ;;  %5825 = vmatpush.xpose.msrb.mxu3 %v5510_v21  ;;  %vm4533_vm9 = vweird.f32 %v12686_v12  ;;  %v4536_v57 = vand.u32 2147483647, %v12547_v34  ;;  %v5215_v62 = vsub.f32 1.0, %v5214_v5  ;;  %v5005_v61 = vsub.f32 1.0, %v5004_v35  ;;  %v15866_v31 = vld [vmem:[#allocation31_spill] sm:$0xff] }
 0x761   : > { %15863 = vst [vmem:[#allocation66_spill] sm:$0xff] %v12781_v58  ;;  %v5210_v41 = vand.u32 2147483648, %v12615_v11  ;;  %v4524_v29 = vand.u32 2147483648, %v12643_v44  ;;  %vm4534_vm10 = vmor %vm4532_vm6, %vm4533_vm9  ;;  %v4516_v47 = vmul.f32 %v12735_v60, %v4515_v3  ;;  %7179 = vrcp.f32 %v12766_v37  ;;  %v15865_v3 = vld [vmem:[#allocation186_spill] sm:$0xff] }
 0x762   : > { %15864 = vst [vmem:[#allocation110_spill] sm:$0xff] %v12783_v2  ;;  %v12793_v63 = vpop.eup %7177  ;;  %v4535_v8 = vsel %vm4534_vm10, %v12686_v12, %v4531_v42  ;;  %vm4537_vm11 = vcmp.eq.f32.partialorder %v4536_v57, 8.507059e+37  ;;  %v4726_v18 = vmul.f32 %v12728_v15, %v4725_v55  ;;  %v5200_v5 = vmul.f32 %v12783_v2, %v12615_v11 }
 0x763   : > { %7181 = vrcp.f32 %v12695_v25  ;;  %v4540_v35 = vsel %vm4537_vm11, %v4539_v27, %v4535_v8  ;;  %v4710_v34 = vmul.f32 %v12793_v63, %v12677_v13  ;;  %vm4728_vm12 = vweird.f32 %v12635_v28  ;;  %v12818_v8 = vpop.xlane.xlu1 %3512 }
 0x764   : > { %7183 = vrcp.f32 %v12701_v36  ;;  %v5479_v12 = vmul.f32 %v15865_v3, %v4540_v35  ;;  %v5480_v24 = vmul.f32 %v15866_v31, %v4540_v35  ;;  %v4735_v55 = vor.u32 1.1754944e-38, %v4734_v10  ;;  %15868 = vst [vmem:[#allocation71_spill] sm:$0xff] %v12818_v8 }
 0x765   : > { %v12810_v21 = vor.u32 1.1754944e-38, %v5210_v41  ;;  %7185 = vrcp.f32 %v12774_v30  ;;  %v12814_v27 = vmul.f32 %v12718_v50, %v5215_v62  ;;  %vm4518_vm13 = vweird.f32 %v12643_v44  ;;  %v12826_v62 = vpop.xlane.xlu0 %3467 }
 0x766   : > { %v4525_v42 = vor.u32 1.1754944e-38, %v4524_v29  ;;  %5764 = vmatpush.xpose.msra.mxu0 %v5479_v12  ;;  %5784 = vmatpush.xpose.msra.mxu1 %v5480_v24  ;;  %v4517_v57 = vadd.f32 %v12735_v60, %v4516_v47  ;;  %v12821_v35 = vmul.f32 %v12742_v43, %v5005_v61  ;;  %7187 = vrcp.f32 %v12740_v0  ;;  %15870 = vst [vmem:[#allocation260_spill] sm:$0xff] %v12826_v62 }
 0x767   : > { %15867 = vst [vmem:[#allocation124_spill] sm:$0xff] %v12810_v21  ;;  %vm4519_vm14 = vweird.f32 %v12735_v60  ;;  %v4522_v10 = vand.u32 2147483647, %v12643_v44  ;;  %v12828_v41 = vpop.eup %7179  ;;  %v5201_v29 = vsub.f32 1.0, %v5200_v5  ;;  %v4711_v3 = vsub.f32 1.0, %v4710_v34  ;;  %v15876_v21 = vld [vmem:[#allocation50_spill] sm:$0xff] }
 0x768   : > { %15869 = vst [vmem:[#allocation24_spill] sm:$0xff] %v12821_v35  ;;  %v4720_v12 = vand.u32 2147483648, %v12677_v13  ;;  %vm4520_vm15 = vmor %vm4518_vm13, %vm4519_vm14  ;;  %v4727_v61 = vadd.f32 %v12728_v15, %v4726_v18  ;;  %v5000_v31 = vand.u32 2147483648, %v12695_v25  ;;  %vm4729_vm3 = vweird.f32 %v12728_v15 }
 0x769   : > { %v12834_v47 = vpop.eup %7181  ;;  %v4521_v24 = vsel %vm4520_vm15, %v12735_v60, %v4517_v57  ;;  %vm4523_vm1 = vcmp.eq.f32.partialorder %v4522_v10, 8.507059e+37  ;;  %v5196_v5 = vand.u32 2147483648, %v12701_v36  ;;  %v4986_v34 = vand.u32 2147483648, %v12740_v0  ;;  %vm12845_vm7 = vmor %vm4728_vm12, %vm4729_vm3  ;;  %v15875_v57 = vld [vmem:[#allocation190_spill] sm:$0xff] }
 0x76a   : > { %15871 = vst [vmem:[#allocation8_spill] sm:$0xff] %v12834_v47  ;;  %v12839_v58 = vpop.eup %7183  ;;  %v4526_v35 = vsel %vm4523_vm1, %v4525_v42, %v4521_v24  ;;  %v4732_v18 = vand.u32 2147483647, %v12635_v28  ;;  %v4500_v60 = vmul.f32 %v12828_v41, %v12766_v37  ;;  %v4731_v42 = vsel %vm12845_vm7, %v12728_v15, %v4727_v61  ;;  %v15880_v61 = vld [vmem:[#allocation214_spill] sm:$0xff] }
 0x76b   : > { %15872 = vst [vmem:[#allocation241_spill] sm:$0xff] %v12839_v58  ;;  %v12850_v43 = vpop.eup %7185  ;;  %v5477_v10 = vmul.f32 %v15875_v57, %v4526_v35  ;;  %v5478_v48 = vmul.f32 %v15876_v21, %v4526_v35  ;;  %v12860_v24 = vmul.f32 %v12783_v2, %v5201_v29  ;;  %v4712_v38 = vmul.f32 %v12793_v63, %v4711_v3 }
 0x76c   : > { %vm4733_vm8 = vcmp.eq.f32.partialorder %v4732_v18, 8.507059e+37  ;;  %7189 = vrcp.f32 %v12802_v9  ;;  %v12864_v28 = vpop.eup %7187  ;;  %vm4714_vm2 = vweird.f32 %v12677_v13  ;;  %v4721_v50 = vor.u32 1.1754944e-38, %v4720_v12  ;;  %v12869_v15 = vpop.xlane.xlu2 %3509  ;;  %v15881_v18 = vld [vmem:[#allocation61_spill] sm:$0xff] }
 0x76d   : > { %15877 = vst [vmem:[#allocation242_spill] sm:$0xff] %v12860_v24  ;;  %v4696_v21 = vmul.f32 %v12850_v43, %v12774_v30  ;;  %5765 = vmatpush.xpose.msra.mxu0 %v5477_v10  ;;  %5785 = vmatpush.xpose.msra.mxu1 %v5478_v48  ;;  %v4736_v35 = vsel %vm4733_vm8, %v4735_v55, %v4731_v42  ;;  %v12877_v24 = vor.u32 1.1754944e-38, %v5000_v31  ;;  %v12879_v12 = vor.u32 1.1754944e-38, %v5196_v5 }
 0x76e   : > { %15878 = vst [vmem:[#allocation143_spill] sm:$0xff] %v12864_v28  ;;  %v4990_v29 = vmul.f32 %v12834_v47, %v12695_v25  ;;  %v5186_v3 = vmul.f32 %v12839_v58, %v12701_v36  ;;  %v5507_v44 = vmul.f32 %v15880_v61, %v4736_v35  ;;  %v5508_v57 = vmul.f32 %v15881_v18, %v4736_v35  ;;  %v12888_v61 = vpop.xlane.xlu1 %3407 }
 0x76f   : > { %15879 = vst [vmem:[#allocation164_spill] sm:$0xff] %v12869_v15  ;;  %v12881_v2 = vor.u32 1.1754944e-38, %v4986_v34  ;;  %v4501_v48 = vsub.f32 1.0, %v4500_v60  ;;  %v4976_v55 = vmul.f32 %v12864_v28, %v12740_v0  ;;  %vm4504_vm4 = vweird.f32 %v12766_v37  ;;  %v12893_v34 = vpop.xlane.xlu0 %3362  ;;  %v15886_v0 = vld [vmem:[#allocation212_spill] sm:$0xff] }
 0x770   : > { %15882 = vst [vmem:[#allocation265_spill] sm:$0xff] %v12877_v24  ;;  %v4510_v10 = vand.u32 2147483648, %v12766_v37  ;;  %5806 = vmatpush.xpose.msrb.mxu2 %v5507_v44  ;;  %5826 = vmatpush.xpose.msrb.mxu3 %v5508_v57  ;;  %v4713_v42 = vadd.f32 %v12793_v63, %v4712_v38  ;;  %v4697_v31 = vsub.f32 1.0, %v4696_v21  ;;  %7191 = vrcp.f32 %v12818_v8 }
 0x771   : > { %15883 = vst [vmem:[#allocation176_spill] sm:$0xff] %v12879_v12  ;;  %vm4715_vm5 = vweird.f32 %v12793_v63  ;;  %v4718_v5 = vand.u32 2147483647, %v12677_v13  ;;  %v4991_v35 = vsub.f32 1.0, %v4990_v29  ;;  %v5187_v18 = vsub.f32 1.0, %v5186_v3  ;;  %v15885_v13 = vld [vmem:[#allocation75_spill] sm:$0xff] }
 0x772   : > { %15884 = vst [vmem:[#allocation33_spill] sm:$0xff] %v12881_v2  ;;  %v12895_v60 = vpop.eup %7189  ;;  %v4706_v44 = vand.u32 2147483648, %v12774_v30  ;;  %7193 = vrcp.f32 %v12826_v62  ;;  %vm4716_vm6 = vmor %vm4714_vm2, %vm4715_vm5  ;;  %v4502_v38 = vmul.f32 %v12828_v41, %v4501_v48  ;;  %v4977_v57 = vsub.f32 1.0, %v4976_v55 }
 0x773   : > { %v4717_v21 = vsel %vm4716_vm6, %v12793_v63, %v4713_v42  ;;  %vm4719_vm9 = vcmp.eq.f32.partialorder %v4718_v5, 8.507059e+37  ;;  %7195 = vrcp.f32 %v12888_v61  ;;  %v4496_v2 = vand.u32 2147483648, %v12802_v9 }
 0x774   : > { %v4722_v24 = vsel %vm4719_vm9, %v4721_v50, %v4717_v21  ;;  %7197 = vrcp.f32 %v12893_v34  ;;  %v4698_v29 = vmul.f32 %v12850_v43, %v4697_v31  ;;  %v4486_v3 = vmul.f32 %v12895_v60, %v12802_v9 }
 0x775   : > { %v5505_v12 = vmul.f32 %v15885_v13, %v4722_v24  ;;  %v5506_v48 = vmul.f32 %v15886_v0, %v4722_v24  ;;  %v4511_v25 = vor.u32 1.1754944e-38, %v4510_v10  ;;  %vm4700_vm10 = vweird.f32 %v12774_v30 }
 0x776   : > { %v5182_v63 = vand.u32 2147483648, %v12818_v8  ;;  %7199 = vrcp.f32 %v12869_v15  ;;  %v12914_v55 = vpop.eup %7191  ;;  %v12917_v50 = vmul.f32 %v12834_v47, %v4991_v35  ;;  %v4707_v42 = vor.u32 1.1754944e-38, %v4706_v44 }
 0x777   : > { %5807 = vmatpush.xpose.msrb.mxu2 %v5505_v12  ;;  %5827 = vmatpush.xpose.msrb.mxu3 %v5506_v48  ;;  %v4503_v31 = vadd.f32 %v12828_v41, %v4502_v38  ;;  %vm4505_vm11 = vweird.f32 %v12828_v41  ;;  %v12921_v0 = vpop.xlane.xlu2 %3404  ;;  %v12926_v10 = vmul.f32 %v12839_v58, %v5187_v18  ;;  %v12929_v5 = vmul.f32 %v12864_v28, %v4977_v57 }
 0x778   : > { %15887 = vst [vmem:[#allocation204_spill] sm:$0xff] %v12917_v50  ;;  %v12923_v24 = vpop.eup %7193  ;;  %v12931_v21 = vor.u32 1.1754944e-38, %v4496_v2  ;;  %vm12935_vm12 = vmor %vm4504_vm4, %vm4505_vm11  ;;  %v4508_v35 = vand.u32 2147483647, %v12766_v37  ;;  %v4487_v38 = vsub.f32 1.0, %v4486_v3  ;;  %vm4490_vm13 = vweird.f32 %v12802_v9 }
 0x779   : > { %15888 = vst [vmem:[#allocation83_spill] sm:$0xff] %v12923_v24  ;;  %v12940_v44 = vpop.eup %7195  ;;  %v4972_v18 = vand.u32 2147483648, %v12826_v62  ;;  %v4507_v2 = vsel %vm12935_vm12, %v12828_v41, %v4503_v31  ;;  %v4699_v57 = vadd.f32 %v12850_v43, %v4698_v29  ;;  %v12950_v48 = vor.u32 1.1754944e-38, %v5182_v63 }
 0x77a   : > { %15889 = vst [vmem:[#allocation207_spill] sm:$0xff] %v12926_v10  ;;  %v12948_v13 = vpop.eup %7197  ;;  %v4692_v28 = vand.u32 2147483648, %v12888_v61  ;;  %vm4509_vm14 = vcmp.eq.f32.partialorder %v4508_v35, 8.507059e+37  ;;  %vm4701_vm15 = vweird.f32 %v12850_v43  ;;  %v5168_v37 = vand.u32 2147483648, %v12869_v15  ;;  %v12964_v63 = vpop.xlane.xlu1 %3464 }
 0x77b   : > { %15890 = vst [vmem:[#allocation131_spill] sm:$0xff] %v12929_v5  ;;  %v4472_v3 = vmul.f32 %v12948_v13, %v12893_v34  ;;  %v4512_v5 = vsel %vm4509_vm14, %v4511_v25, %v4507_v2  ;;  %vm12959_vm1 = vmor %vm4700_vm10, %vm4701_vm15  ;;  %v4704_v29 = vand.u32 2147483647, %v12774_v30  ;;  %v12966_v31 = vpop.xlane.xlu0 %3506  ;;  %v4682_v35 = vmul.f32 %v12940_v44, %v12888_v61  ;;  %v15899_v25 = vld [vmem:[#allocation45_spill] sm:$0xff] }
 0x77c   : > { %15893 = vst [vmem:[#allocation46_spill] sm:$0xff] %v12950_v48  ;;  %v12968_v12 = vpop.eup %7199  ;;  %v15898_v48 = vld [vmem:[#allocation187_spill] sm:$0xff]  ;;  %v5476_v2 = vmul.f32 %v15899_v25, %v4512_v5  ;;  %v4703_v50 = vsel %vm12959_vm1, %v12850_v43, %v4699_v57  ;;  %v4488_v58 = vmul.f32 %v12895_v60, %v4487_v38  ;;  %7201 = vrcp.f32 %v12921_v0  ;;  %v15901_v38 = vld [vmem:[#allocation65_spill] sm:$0xff] }
 0x77d   : > { %15896 = vst [vmem:[#allocation21_spill] sm:$0xff] %v12964_v63  ;;  %v5475_v47 = vmul.f32 %v15898_v48, %v4512_v5  ;;  %v4473_v30 = vsub.f32 1.0, %v4472_v3  ;;  %vm4705_vm3 = vcmp.eq.f32.partialorder %v4704_v29, 8.507059e+37  ;;  %v5172_v10 = vmul.f32 %v12914_v55, %v12818_v8  ;;  %v15902_v3 = vld [vmem:[#allocation217_spill] sm:$0xff] }
 0x77e   : > { %15897 = vst [vmem:[#allocation264_spill] sm:$0xff] %v12968_v12  ;;  %v12981_v36 = vor.u32 1.1754944e-38, %v4972_v18  ;;  %5786 = vmatpush.xpose.msra.mxu1 %v5476_v2  ;;  %v4708_v48 = vsel %vm4705_vm3, %v4707_v42, %v4703_v50  ;;  %7203 = vrcp.f32 %v12964_v63  ;;  %v4962_v5 = vmul.f32 %v12923_v24, %v12826_v62 }
 0x77f   : > { %5766 = vmatpush.xpose.msra.mxu0 %v5475_v47  ;;  %v5158_v43 = vmul.f32 %v12968_v12, %v12869_v15  ;;  %v5503_v57 = vmul.f32 %v15901_v38, %v4708_v48  ;;  %v5504_v41 = vmul.f32 %v15902_v3, %v4708_v48  ;;  %v4683_v29 = vsub.f32 1.0, %v4682_v35 }
 0x780   : > { %15900 = vst [vmem:[#allocation169_spill] sm:$0xff] %v12981_v36  ;;  %v4474_v25 = vmul.f32 %v12948_v13, %v4473_v30  ;;  %v4482_v18 = vand.u32 2147483648, %v12893_v34  ;;  %7205 = vrcp.f32 %v12966_v31  ;;  %v12993_v47 = vor.u32 1.1754944e-38, %v4692_v28 }
 0x781   : > { %v12995_v50 = vor.u32 1.1754944e-38, %v5168_v37  ;;  %5808 = vmatpush.xpose.msrb.mxu2 %v5503_v57  ;;  %5828 = vmatpush.xpose.msrb.mxu3 %v5504_v41  ;;  %v4489_v42 = vadd.f32 %v12895_v60, %v4488_v58  ;;  %vm4491_vm7 = vweird.f32 %v12895_v60  ;;  %v12999_v2 = vpop.xlane.xlu2 %3461  ;;  %v5173_v48 = vsub.f32 1.0, %v5172_v10 }
 0x782   : > { %15904 = vst [vmem:[#allocation132_spill] sm:$0xff] %v12999_v2  ;;  %vm4686_vm8 = vweird.f32 %v12888_v61  ;;  %vm4476_vm2 = vweird.f32 %v12893_v34  ;;  %vm4492_vm4 = vmor %vm4490_vm13, %vm4491_vm7  ;;  %v4494_v28 = vand.u32 2147483647, %v12802_v9  ;;  %7207 = vrcp.f32 %v12999_v2  ;;  %v13007_v37 = vpop.eup %7201 }
 0x783   : > { %15903 = vst [vmem:[#allocation142_spill] sm:$0xff] %v12995_v50  ;;  %v4963_v35 = vsub.f32 1.0, %v4962_v5  ;;  %v5159_v58 = vsub.f32 1.0, %v5158_v43  ;;  %v4678_v30 = vand.u32 2147483648, %v12921_v0  ;;  %v4493_v38 = vsel %vm4492_vm4, %v12895_v60, %v4489_v42  ;;  %v15906_v42 = vld [vmem:[#allocation35_spill] sm:$0xff] }
 0x784   : > { %v13011_v10 = vpop.eup %7203  ;;  %v4684_v57 = vmul.f32 %v12940_v44, %v4683_v29  ;;  %v4483_v3 = vor.u32 1.1754944e-38, %v4482_v18  ;;  %vm4495_vm5 = vcmp.eq.f32.partialorder %v4494_v28, 8.507059e+37  ;;  %v4475_v41 = vadd.f32 %v12948_v13, %v4474_v25  ;;  %v15905_v18 = vld [vmem:[#allocation34_spill] sm:$0xff] }
 0x785   : > { %v4668_v9 = vmul.f32 %v13007_v37, %v12921_v0  ;;  %v4498_v36 = vsel %vm4495_vm5, %v12931_v21, %v4493_v38  ;;  %v13018_v50 = vpop.xlane.xlu1 %3359  ;;  %v13020_v5 = vpop.xlane.xlu0 %3503  ;;  %vm4477_vm6 = vweird.f32 %v12948_v13  ;;  %v4480_v60 = vand.u32 2147483647, %v12893_v34 }
 0x786   : > { %v13024_v43 = vpop.eup %7205  ;;  %v4948_v29 = vmul.f32 %v13011_v10, %v12964_v63  ;;  %v5473_v25 = vmul.f32 %v15905_v18, %v4498_v36  ;;  %v5474_v28 = vmul.f32 %v15906_v42, %v4498_v36  ;;  %7209 = vrcp.f32 %v13018_v50  ;;  %vm4478_vm11 = vmor %vm4476_vm2, %vm4477_vm6 }
 0x787   : > { %vm5331_vm9 = vweird.f32 %v11911_v49  ;;  %v13033_v21 = vmul.f32 %v12914_v55, %v5173_v48  ;;  %v13036_v38 = vmul.f32 %v12923_v24, %v4963_v35  ;;  %v13039_v62 = vmul.f32 %v12968_v12, %v5159_v58 }
 0x788   : > { %v13041_v15 = vor.u32 1.1754944e-38, %v4678_v30  ;;  %v13043_v8 = vpop.eup %7207  ;;  %v4958_v18 = vand.u32 2147483648, %v12964_v63  ;;  %v5144_v36 = vmul.f32 %v13024_v43, %v12966_v31  ;;  %5767 = vmatpush.xpose.msra.mxu0 %v5473_v25  ;;  %5787 = vmatpush.xpose.msra.mxu1 %v5474_v28  ;;  %7211 = vrcp.f32 %v13020_v5 }
 0x789   : > { %15907 = vst [vmem:[#allocation109_spill] sm:$0xff] %v13036_v38  ;;  %v4685_v48 = vadd.f32 %v12940_v44, %v4684_v57  ;;  %vm5330_vm10 = vweird.f32 %v11652_v52  ;;  %v4669_v35 = vsub.f32 1.0, %v4668_v9  ;;  %v5154_v58 = vand.u32 2147483648, %v12966_v31 }
 0x78a   : > { %15908 = vst [vmem:[#allocation104_spill] sm:$0xff] %v13039_v62  ;;  %v4934_v30 = vmul.f32 %v13043_v8, %v12999_v2  ;;  %v4944_v42 = vand.u32 2147483648, %v12999_v2  ;;  %vm4672_vm12 = vweird.f32 %v12921_v0  ;;  %v4949_v25 = vsub.f32 1.0, %v4948_v29 }
 0x78b   : > { %v4479_v57 = vsel %vm4478_vm11, %v12948_v13, %v4475_v41  ;;  %vm4481_vm13 = vcmp.eq.f32.partialorder %v4480_v60, 8.507059e+37  ;;  %vm4687_vm14 = vweird.f32 %v12940_v44  ;;  %v15909_v9 = vand.u32 2147483647, %v11652_v52 }
 0x78c   : > { %v4468_v38 = vand.u32 2147483648, %v13018_v50  ;;  %v5140_v2 = vand.u32 2147483648, %v13020_v5  ;;  %v4484_v34 = vsel %vm4481_vm13, %v4483_v3, %v4479_v57  ;;  %vm13072_vm1 = vmor %vm4686_vm8, %vm4687_vm14  ;;  %v4690_v13 = vand.u32 2147483647, %v12888_v61  ;;  %v13077_v41 = vpop.eup %7209  ;;  %v13084_v3 = vpop.xlane.xlu2 %3458 }
 0x78d   : > { %vm13064_vm15 = vcmp.eq.f32.partialorder %v15909_v9, 8.507059e+37  ;;  %v5145_v60 = vsub.f32 1.0, %v5144_v36  ;;  %v5471_v9 = vmul.f32 %v15704_v33, %v4484_v34  ;;  %v5472_v24 = vmul.f32 %v15705_v23, %v4484_v34  ;;  %v13088_v12 = vpop.xlane.xlu1 %3356  ;;  %v13091_v61 = vpop.xlane.xlu0 %3500  ;;  %vm13127_vm8 = vmor %vm5330_vm10, %vm5331_vm9 }
 0x78e   : > { %v4689_v63 = vsel %vm13072_vm1, %v12940_v44, %v4685_v48  ;;  %v4458_v57 = vmul.f32 %v13077_v41, %v13018_v50  ;;  %v4935_v62 = vsub.f32 1.0, %v4934_v30  ;;  %vm4691_vm3 = vcmp.eq.f32.partialorder %v4690_v13, 8.507059e+37  ;;  %v13093_v33 = vpop.eup %7211 }
 0x78f   : > { %7213 = vrcp.f32 %v13084_v3  ;;  %v4670_v23 = vmul.f32 %v13007_v37, %v4669_v35  ;;  %v13096_v36 = vor.u32 1.1754944e-38, %v4958_v18  ;;  %5768 = vmatpush.xpose.msra.mxu0 %v5471_v9  ;;  %5788 = vmatpush.xpose.msra.mxu1 %v5472_v24  ;;  %v4694_v44 = vsel %vm4691_vm3, %v12993_v47, %v4689_v63 }
 0x790   : > { %7215 = vrcp.f32 %v13088_v12  ;;  %v4459_v48 = vsub.f32 1.0, %v4458_v57  ;;  %v5130_v30 = vmul.f32 %v13093_v33, %v13020_v5  ;;  %v5501_v34 = vmul.f32 %v15711_v26, %v4694_v44 }
 0x791   : > { %v5502_v29 = vmul.f32 %v15712_v32, %v4694_v44  ;;  %v13105_v13 = vmul.f32 %v13011_v10, %v4949_v25  ;;  %v13107_v35 = vor.u32 1.1754944e-38, %v5154_v58  ;;  %v13109_v18 = vor.u32 1.1754944e-38, %v4944_v42 }
 0x792   : > { %7217 = vrcp.f32 %v13091_v61  ;;  %vm5316_vm7 = vweird.f32 %v11802_v16  ;;  %v13114_v24 = vmul.f32 %v13024_v43, %v5145_v60  ;;  %v13116_v63 = vor.u32 1.1754944e-38, %v4468_v38  ;;  %5809 = vmatpush.xpose.msrb.mxu2 %v5501_v34 }
 0x793   : > { %15914 = vst [vmem:[#allocation5_spill] sm:$0xff] %v13109_v18  ;;  %v13119_v26 = vmul.f32 %v13043_v8, %v4935_v62  ;;  %v13121_v32 = vor.u32 1.1754944e-38, %v5140_v2  ;;  %5829 = vmatpush.xpose.msrb.mxu3 %v5502_v29  ;;  %vm4462_vm2 = vweird.f32 %v13018_v50  ;;  %v4454_v38 = vand.u32 2147483648, %v13088_v12 }
 0x794   : > { %v4671_v58 = vadd.f32 %v13007_v37, %v4670_v23  ;;  %vm4673_vm4 = vweird.f32 %v13007_v37  ;;  %v4676_v62 = vand.u32 2147483647, %v12921_v0  ;;  %v4460_v42 = vmul.f32 %v13077_v41, %v4459_v48 }
 0x795   : > { %v13136_v2 = vpop.eup %7213  ;;  %v5131_v25 = vsub.f32 1.0, %v5130_v30  ;;  %v4930_v52 = vand.u32 2147483648, %v13084_v3  ;;  %vm4674_vm5 = vmor %vm4672_vm12, %vm4673_vm4  ;;  %v5333_v60 = vsel %vm13127_vm8, %v11911_v49, %v12319_v7  ;;  %vm5302_vm6 = vweird.f32 %v11958_v20  ;;  %v13159_v7 = vpop.xlane.xlu1 %3455 }
 0x796   : > { %15917 = vst [vmem:[#allocation130_spill] sm:$0xff] %v13136_v2  ;;  %v13146_v9 = vpop.eup %7215  ;;  %v4920_v57 = vmul.f32 %v13136_v2, %v13084_v3  ;;  %v4675_v23 = vsel %vm4674_vm5, %v13007_v37, %v4671_v58  ;;  %vm4677_vm9 = vcmp.eq.f32.partialorder %v4676_v62, 8.507059e+37  ;;  %v5338_v0 = vsel %vm13064_vm15, %v12311_v46, %v5333_v60  ;;  %v13161_v30 = vpop.xlane.xlu2 %3452  ;;  %v15919_v58 = vld [vmem:[#allocation245_spill] sm:$0xff] }
 0x797   : > { %v4444_v44 = vmul.f32 %v13146_v9, %v13088_v12  ;;  %v5126_v48 = vand.u32 2147483648, %v13091_v61  ;;  %v4680_v49 = vsel %vm4677_vm9, %v13041_v15, %v4675_v23  ;;  %15918 = vst [vmem:[#allocation163_spill] sm:$0xff] %v13159_v7  ;;  %v5315_v34 = vadd.f32 %v12158_v51, %v12379_v56  ;;  %v15920_v60 = vld [vmem:[#allocation141_spill] sm:$0xff] }
 0x798   : > { %v13165_v37 = vpop.eup %7217  ;;  %v4921_v29 = vsub.f32 1.0, %v4920_v57  ;;  %v5499_v28 = vmul.f32 %v15735_v39, %v4680_v49  ;;  %v5500_v46 = vmul.f32 %v15736_v22, %v4680_v49  ;;  %7219 = vrcp.f32 %v13159_v7 }
 0x799   : > { %v4445_v47 = vsub.f32 1.0, %v4444_v44  ;;  %v5116_v15 = vmul.f32 %v13165_v37, %v13091_v61  ;;  %v5593_v62 = vmul.f32 %v15919_v58, %v5338_v0  ;;  %v5594_v23 = vmul.f32 %v15920_v60, %v5338_v0 }
 0x79a   : > { %vm5107_vm10 = vweird.f32 %v12287_v17  ;;  %vm5288_vm11 = vweird.f32 %v12097_v14  ;;  %v13177_v56 = vmul.f32 %v13093_v33, %v5131_v25  ;;  %v13179_v39 = vor.u32 1.1754944e-38, %v4454_v38  ;;  %5810 = vmatpush.xpose.msrb.mxu2 %v5499_v28  ;;  %5830 = vmatpush.xpose.msrb.mxu3 %v5500_v46  ;;  %v15926_v28 = vld [vmem:[#allocation39_spill] sm:$0xff] }
 0x79b   : > { %v13181_v22 = vor.u32 1.1754944e-38, %v4930_v52  ;;  %7221 = vrcp.f32 %v13161_v30  ;;  %vm4448_vm12 = vweird.f32 %v13088_v12  ;;  %v13186_v57 = vmul.f32 %v13136_v2, %v4921_v29  ;;  %v15925_v29 = vld [vmem:[#allocation152_spill] sm:$0xff]  ;;  %v15941_v2 = vld [vmem:[#allocation117_spill] sm:$0xff] }
 0x79c   : > { %v5117_v0 = vsub.f32 1.0, %v5116_v15  ;;  %v13188_v44 = vor.u32 1.1754944e-38, %v5126_v48  ;;  %vm5317_vm13 = vweird.f32 %v12158_v51  ;;  %vm5106_vm14 = vweird.f32 %v15761_v1 }
 0x79d   : > { %15921 = vst [vmem:[#allocation261_spill] sm:$0xff] %v13181_v22  ;;  %v4446_v38 = vmul.f32 %v13146_v9, %v4445_v47  ;;  %vm13195_vm15 = vmor %vm5316_vm7, %vm5317_vm13  ;;  %v5320_v52 = vand.u32 2147483647, %v11802_v16  ;;  %v4461_v49 = vadd.f32 %v13077_v41, %v4460_v42  ;;  %vm4463_vm1 = vweird.f32 %v13077_v41  ;;  %5811 = vmatmul.f32.vlgmr.msrb.gmra.mxu2 %v15925_v29  ;;  %5831 = vmatmul.f32.vlgmr.msrb.gmra.mxu3 %v15926_v28 }
 0x79e   : > { %15922 = vst [vmem:[#allocation239_spill] sm:$0xff] %v13188_v44  ;;  %5875 = vmatpush.xpose.msra.mxu2 %v5593_v62  ;;  %5895 = vmatpush.xpose.msra.mxu3 %v5594_v23  ;;  %v13203_v48 = vmul.f32 %v13165_v37, %v5117_v0  ;;  %v5319_v46 = vsel %vm13195_vm15, %v12158_v51, %v5315_v34  ;;  %vm13212_vm3 = vmor %vm4462_vm2, %vm4463_vm1  ;;  %v4466_v16 = vand.u32 2147483647, %v13018_v50  ;;  %v13219_v15 = vpop.eup %7219  ;;  %v15929_v58 = vand.u32 2147483647, %v15761_v1  ;;  %v15932_v34 = vld [vmem:[#allocation129_spill] sm:$0xff] }
 0x79f   : > { %v5301_v42 = vadd.f32 %v12354_v40, %v12425_v59  ;;  %vm5321_vm8 = vcmp.eq.f32.partialorder %v5320_v52, 8.507059e+37  ;;  %v4465_v51 = vsel %vm13212_vm3, %v13077_v41, %v4461_v49  ;;  %vm5303_vm2 = vweird.f32 %v12354_v40  ;;  %v15935_v0 = vld [vmem:[#allocation93_spill] sm:$0xff]  ;;  %v15940_v44 = vld [vmem:[#allocation183_spill] sm:$0xff] }
 0x7a0   : > { %vm13223_vm7 = vcmp.eq.f32.partialorder %v15929_v58, 8.507059e+37  ;;  %v5306_v50 = vand.u32 2147483647, %v11958_v20  ;;  %vm5274_vm4 = vweird.f32 %v12202_v45  ;;  %v4906_v59 = vmul.f32 %v13219_v15, %v13159_v7  ;;  %vm13238_vm9 = vmor %vm5302_vm6, %vm5303_vm2  ;;  %v15936_v41 = vld [vmem:[#allocation173_spill] sm:$0xff]  ;;  %v15938_v58 = vld [vmem:[#allocation262_spill] sm:$0xff] }
 0x7a1   : > { %v5324_v60 = vsel %vm5321_vm8, %v15932_v34, %v5319_v46  ;;  %vm4467_vm5 = vcmp.eq.f32.partialorder %v4466_v16, 8.507059e+37  ;;  %v5287_v25 = vadd.f32 %v15936_v41, %v15935_v0  ;;  %v13244_v52 = vpop.eup %7221  ;;  %v15937_v49 = vld [vmem:[#allocation229_spill] sm:$0xff]  ;;  %v5305_v46 = vsel %vm13238_vm9, %v12354_v40, %v5301_v42  ;;  %v15939_v34 = vld [vmem:[#allocation182_spill] sm:$0xff]  ;;  %v15960_v23 = vld [vmem:[#allocation23_spill] sm:$0xff] }
 0x7a2   : > { %v5591_v47 = vmul.f32 %v15937_v49, %v5324_v60  ;;  %v5592_v22 = vmul.f32 %v15938_v58, %v5324_v60  ;;  %v4470_v7 = vsel %vm4467_vm5, %v13116_v63, %v4465_v51  ;;  %v4907_v20 = vsub.f32 1.0, %v4906_v59  ;;  %v15944_v59 = vld [vmem:[#allocation232_spill] sm:$0xff] }
 0x7a3   : > { %v4892_v16 = vmul.f32 %v13244_v52, %v13161_v30  ;;  %v5469_v18 = vmul.f32 %v15939_v34, %v4470_v7  ;;  %v5470_v0 = vmul.f32 %v15940_v44, %v4470_v7  ;;  %vm5092_vm6 = vweird.f32 %v15941_v2  ;;  %v15942_v7 = vld [vmem:[#allocation128_spill] sm:$0xff] }
 0x7a4   : > { %5876 = vmatpush.xpose.msra.mxu2 %v5591_v47  ;;  %5896 = vmatpush.xpose.msra.mxu3 %v5592_v22  ;;  %vm5307_vm13 = vcmp.eq.f32.partialorder %v5306_v50, 8.507059e+37  ;;  %vm5289_vm15 = vweird.f32 %v15936_v41  ;;  %v5292_v63 = vand.u32 2147483647, %v12097_v14  ;;  %v4447_v51 = vadd.f32 %v13146_v9, %v4446_v38  ;;  %v15943_v22 = vld [vmem:[#allocation11_spill] sm:$0xff]  ;;  %v15948_v47 = vld [vmem:[#allocation72_spill] sm:$0xff] }
 0x7a5   : > { %vm5260_vm1 = vweird.f32 %v12285_v4  ;;  %v13262_v40 = vmul.f32 %v13219_v15, %v4907_v20  ;;  %v4893_v42 = vsub.f32 1.0, %v4892_v16  ;;  %5769 = vmatpush.xpose.msra.mxu0 %v5469_v18  ;;  %5789 = vmatpush.xpose.msra.mxu1 %v5470_v0  ;;  %v5310_v44 = vsel %vm5307_vm13, %v15942_v7, %v5305_v46  ;;  %vm5290_vm3 = vmor %vm5288_vm11, %vm5289_vm15  ;;  %v15947_v18 = vld [vmem:[#allocation170_spill] sm:$0xff]  ;;  %v15949_v46 = vld [vmem:[#allocation253_spill] sm:$0xff] }
 0x7a6   : > { %vm4449_vm8 = vweird.f32 %v13146_v9  ;;  %v5589_v50 = vmul.f32 %v15943_v22, %v5310_v44  ;;  %v5590_v60 = vmul.f32 %v15944_v59, %v5310_v44  ;;  %v5291_v38 = vsel %vm5290_vm3, %v15936_v41, %v5287_v25  ;;  %vm5108_vm11 = vmor %vm5106_vm14, %vm5107_vm10  ;;  %v15950_v20 = vld [vmem:[#allocation63_spill] sm:$0xff]  ;;  %v15951_v34 = vld [vmem:[#allocation12_spill] sm:$0xff] }
 0x7a7   : > { %vm5293_vm2 = vcmp.eq.f32.partialorder %v5292_v63, 8.507059e+37  ;;  %vm13273_vm5 = vmor %vm4448_vm12, %vm4449_vm8  ;;  %vm5078_vm9 = vweird.f32 %v12178_v6  ;;  %v13283_v14 = vmul.f32 %v13244_v52, %v4893_v42  ;;  %v4452_v25 = vand.u32 2147483647, %v13088_v12  ;;  %v15952_v0 = vld [vmem:[#allocation174_spill] sm:$0xff]  ;;  %v15953_v42 = vld [vmem:[#allocation76_spill] sm:$0xff] }
 0x7a8   : > { %v5296_v49 = vsel %vm5293_vm2, %v15947_v18, %v5291_v38  ;;  %v4451_v41 = vsel %vm13273_vm5, %v13146_v9, %v4447_v51  ;;  %5877 = vmatpush.xpose.msra.mxu2 %v5589_v50  ;;  %5897 = vmatpush.xpose.msra.mxu3 %v5590_v60  ;;  %v5109_v16 = vsel %vm5108_vm11, %v12287_v17, %v15950_v20  ;;  %vm5275_vm10 = vweird.f32 %v15951_v34  ;;  %v15954_v51 = vld [vmem:[#allocation233_spill] sm:$0xff]  ;;  %v15957_v59 = vld [vmem:[#allocation216_spill] sm:$0xff]  ;;  %v15963_v20 = vld [vmem:[#allocation67_spill] sm:$0xff] }
 0x7a9   : > { %v5587_v58 = vmul.f32 %v15948_v47, %v5296_v49  ;;  %v5588_v1 = vmul.f32 %v15949_v46, %v5296_v49  ;;  %vm4453_vm12 = vcmp.eq.f32.partialorder %v4452_v25, 8.507059e+37  ;;  %v5114_v63 = vsel %vm13223_vm7, %v15952_v0, %v5109_v16  ;;  %v15955_v44 = vld [vmem:[#allocation13_spill] sm:$0xff]  ;;  %vm5276_vm13 = vmor %vm5274_vm4, %vm5275_vm10  ;;  %v15958_v60 = vld [vmem:[#allocation236_spill] sm:$0xff] }
 0x7aa   : > { %v5273_v9 = vadd.f32 %v15951_v34, %v15953_v42  ;;  %v5278_v12 = vand.u32 2147483647, %v12202_v45  ;;  %vm5246_vm14 = vweird.f32 %v15954_v51  ;;  %v4456_v7 = vsel %vm4453_vm12, %v13179_v39, %v4451_v41  ;;  %v15956_v50 = vld [vmem:[#allocation57_spill] sm:$0xff]  ;;  %v15959_v38 = vld [vmem:[#allocation148_spill] sm:$0xff] }
 0x7ab   : > { %v5561_v22 = vmul.f32 %v15955_v44, %v5114_v63  ;;  %v5562_v17 = vmul.f32 %v15956_v50, %v5114_v63  ;;  %v5091_v62 = vadd.f32 %v15958_v60, %v15957_v59  ;;  %vm5064_vm7 = vweird.f32 %v15959_v38  ;;  %v15961_v49 = vld [vmem:[#allocation180_spill] sm:$0xff]  ;;  %v15962_v39 = vld [vmem:[#allocation49_spill] sm:$0xff]  ;;  %v15966_v63 = vld [vmem:[#allocation62_spill] sm:$0xff] }
 0x7ac   : > { %v5467_v18 = vmul.f32 %v15960_v23, %v4456_v7  ;;  %v5468_v25 = vmul.f32 %v15961_v49, %v4456_v7  ;;  %v5277_v47 = vsel %vm5276_vm13, %v15951_v34, %v5273_v9  ;;  %vm5279_vm15 = vcmp.eq.f32.partialorder %v5278_v12, 8.507059e+37  ;;  %5878 = vmatpush.xpose.msra.mxu2 %v5587_v58  ;;  %5898 = vmatpush.xpose.msra.mxu3 %v5588_v1  ;;  %v15964_v0 = vld [vmem:[#allocation168_spill] sm:$0xff]  ;;  %v15967_v9 = vld [vmem:[#allocation91_spill] sm:$0xff]  ;;  %v15968_v44 = vld [vmem:[#allocation177_spill] sm:$0xff] }
 0x7ad   : > { %v5282_v41 = vsel %vm5279_vm15, %v15962_v39, %v5277_v47  ;;  %vm5093_vm3 = vweird.f32 %v15958_v60  ;;  %v5096_v45 = vand.u32 2147483647, %v15941_v2  ;;  %v5259_v46 = vadd.f32 %v12553_v19, %v12657_v54  ;;  %v15965_v54 = vld [vmem:[#allocation28_spill] sm:$0xff]  ;;  %v15971_v59 = vld [vmem:[#allocation166_spill] sm:$0xff]  ;;  %v15973_v23 = vld [vmem:[#allocation221_spill] sm:$0xff] }
 0x7ae   : > { %vm5232_vm4 = vweird.f32 %v12438_v53  ;;  %5770 = vmatpush.xpose.msra.mxu0 %v5467_v18  ;;  %5790 = vmatpush.xpose.msra.mxu1 %v5468_v25  ;;  %v5585_v16 = vmul.f32 %v15963_v20, %v5282_v41  ;;  %v5586_v34 = vmul.f32 %v15964_v0, %v5282_v41  ;;  %vm5094_vm8 = vmor %vm5092_vm6, %vm5093_vm3  ;;  %vm5261_vm2 = vweird.f32 %v12553_v19  ;;  %v15975_v49 = vld [vmem:[#allocation153_spill] sm:$0xff]  ;;  %v15976_v39 = vld [vmem:[#allocation48_spill] sm:$0xff] }
 0x7af   : > { %v5264_v58 = vand.u32 2147483647, %v12285_v4  ;;  %v5095_v1 = vsel %vm5094_vm8, %v15958_v60, %v5091_v62  ;;  %vm5097_vm5 = vcmp.eq.f32.partialorder %v5096_v45, 8.507059e+37  ;;  %vm5262_vm11 = vmor %vm5260_vm1, %vm5261_vm2  ;;  %v5077_v42 = vadd.f32 %v15966_v63, %v15965_v54  ;;  %v15970_v4 = vld [vmem:[#allocation19_spill] sm:$0xff]  ;;  %v15978_v20 = vld [vmem:[#allocation25_spill] sm:$0xff] }
 0x7b0   : > { %vm5079_vm10 = vweird.f32 %v15966_v63  ;;  %v5100_v2 = vsel %vm5097_vm5, %v15967_v9, %v5095_v1  ;;  %v5263_v12 = vsel %vm5262_vm11, %v12553_v19, %v5259_v46  ;;  %v5082_v7 = vand.u32 2147483647, %v12178_v6  ;;  %5879 = vmatpush.xpose.msra.mxu2 %v5585_v16  ;;  %5899 = vmatpush.xpose.msra.mxu3 %v5586_v34  ;;  %v15972_v62 = vld [vmem:[#allocation219_spill] sm:$0xff]  ;;  %v15981_v0 = vld [vmem:[#allocation125_spill] sm:$0xff]  ;;  %v15984_v9 = vld [vmem:[#allocation60_spill] sm:$0xff] }
 0x7b1   : > { %vm5265_vm6 = vcmp.eq.f32.partialorder %v5264_v58, 8.507059e+37  ;;  %vm5050_vm12 = vweird.f32 %v15968_v44  ;;  %vm5080_vm1 = vmor %vm5078_vm9, %vm5079_vm10  ;;  %vm5247_vm13 = vweird.f32 %v15972_v62  ;;  %vm5218_vm15 = vweird.f32 %v15973_v23  ;;  %5771 = vmatmul.f32.vlgmr.msra.gmra.mxu0 %v15925_v29  ;;  %5791 = vmatmul.f32.vlgmr.msra.gmra.mxu1 %v15926_v28  ;;  %v15974_v19 = vld [vmem:[#allocation251_spill] sm:$0xff]  ;;  %v15979_v29 = vld [vmem:[#allocation74_spill] sm:$0xff] }
 0x7b2   : > { %5835 = vmatpush.xpose.msrb.mxu0 %v5561_v22  ;;  %5855 = vmatpush.xpose.msrb.mxu1 %v5562_v17  ;;  %v15969_v22 = vld [vmem:[#allocation80_spill] sm:$0xff]  ;;  %v5560_v17 = vmul.f32 %v15970_v4, %v5100_v2  ;;  %v5268_v60 = vsel %vm5265_vm6, %v15971_v59, %v5263_v12  ;;  %v5081_v47 = vsel %vm5080_vm1, %v15966_v63, %v5077_v42  ;;  %vm5083_vm3 = vcmp.eq.f32.partialorder %v5082_v7, 8.507059e+37  ;;  %v15977_v41 = vld [vmem:[#allocation171_spill] sm:$0xff]  ;;  %v15980_v28 = vld [vmem:[#allocation134_spill] sm:$0xff] }
 0x7b3   : > { %v5559_v50 = vmul.f32 %v15969_v22, %v5100_v2  ;;  %v5583_v18 = vmul.f32 %v15974_v19, %v5268_v60  ;;  %v5584_v25 = vmul.f32 %v15975_v49, %v5268_v60  ;;  %v5086_v6 = vsel %vm5083_vm3, %v15976_v39, %v5081_v47  ;;  %v15982_v58 = vld [vmem:[#allocation54_spill] sm:$0xff]  ;;  %vm5248_vm8 = vmor %vm5246_vm14, %vm5247_vm13  ;;  %v15983_v42 = vld [vmem:[#allocation243_spill] sm:$0xff] }
 0x7b4   : > { %v5245_v45 = vadd.f32 %v15972_v62, %v15977_v41  ;;  %v5250_v46 = vand.u32 2147483647, %v15954_v51  ;;  %v5063_v16 = vadd.f32 %v15979_v29, %v15978_v20  ;;  %vm5036_vm9 = vweird.f32 %v15980_v28  ;;  %v15985_v12 = vld [vmem:[#allocation105_spill] sm:$0xff]  ;;  %v15990_v19 = vld [vmem:[#allocation86_spill] sm:$0xff] }
 0x7b5   : > { %v5557_v34 = vmul.f32 %v15981_v0, %v5086_v6  ;;  %v5558_v1 = vmul.f32 %v15982_v58, %v5086_v6  ;;  %vm5065_vm2 = vweird.f32 %v15979_v29  ;;  %v5068_v54 = vand.u32 2147483647, %v15959_v38  ;;  %5880 = vmatpush.xpose.msra.mxu2 %v5583_v18  ;;  %5900 = vmatpush.xpose.msra.mxu3 %v5584_v25  ;;  %v15987_v38 = vld [vmem:[#allocation103_spill] sm:$0xff]  ;;  %v15988_v59 = vld [vmem:[#allocation145_spill] sm:$0xff]  ;;  %v15991_v18 = vld [vmem:[#allocation266_spill] sm:$0xff] }
 0x7b6   : > { %5836 = vmatpush.xpose.msrb.mxu0 %v5559_v50  ;;  %5856 = vmatpush.xpose.msrb.mxu1 %v5560_v17  ;;  %v5249_v63 = vsel %vm5248_vm8, %v15972_v62, %v5245_v45  ;;  %vm5251_vm5 = vcmp.eq.f32.partialorder %v5250_v46, 8.507059e+37  ;;  %vm5066_vm11 = vmor %vm5064_vm7, %vm5065_vm2  ;;  %v5231_v2 = vadd.f32 %v15984_v9, %v15983_v42  ;;  %vm5233_vm10 = vweird.f32 %v15984_v9  ;;  %v15986_v50 = vld [vmem:[#allocation38_spill] sm:$0xff]  ;;  %v15989_v62 = vld [vmem:[#allocation119_spill] sm:$0xff] }
 0x7b7   : > { %v5254_v51 = vsel %vm5251_vm5, %v15985_v12, %v5249_v63  ;;  %v5067_v7 = vsel %vm5066_vm11, %v15979_v29, %v5063_v16  ;;  %vm5069_vm14 = vcmp.eq.f32.partialorder %v5068_v54, 8.507059e+37  ;;  %v5236_v22 = vand.u32 2147483647, %v12438_v53  ;;  %vm5234_vm7 = vmor %vm5232_vm4, %vm5233_vm10  ;;  %v15992_v25 = vld [vmem:[#allocation249_spill] sm:$0xff]  ;;  %v15993_v6 = vld [vmem:[#allocation144_spill] sm:$0xff] }
 0x7b8   : > { %vm5204_vm6 = vweird.f32 %v12615_v11  ;;  %v5581_v4 = vmul.f32 %v15986_v50, %v5254_v51  ;;  %v5582_v17 = vmul.f32 %v15987_v38, %v5254_v51  ;;  %v5072_v60 = vsel %vm5069_vm14, %v15988_v59, %v5067_v7  ;;  %v15994_v45 = vld [vmem:[#allocation211_spill] sm:$0xff]  ;;  %v15995_v20 = vld [vmem:[#allocation90_spill] sm:$0xff]  ;;  %v16000_v42 = vld [vmem:[#allocation88_spill] sm:$0xff] }
 0x7b9   : > { %vm5051_vm1 = vweird.f32 %v15989_v62  ;;  %vm5022_vm13 = vweird.f32 %v15990_v19  ;;  %v5555_v49 = vmul.f32 %v15991_v18, %v5072_v60  ;;  %v5556_v47 = vmul.f32 %v15992_v25, %v5072_v60  ;;  %v15996_v16 = vld [vmem:[#allocation118_spill] sm:$0xff]  ;;  %v15997_v0 = vld [vmem:[#allocation147_spill] sm:$0xff]  ;;  %v16005_v38 = vld [vmem:[#allocation101_spill] sm:$0xff] }
 0x7ba   : > { %5837 = vmatpush.xpose.msrb.mxu0 %v5557_v34  ;;  %5857 = vmatpush.xpose.msrb.mxu1 %v5558_v1  ;;  %v5235_v39 = vsel %vm5234_vm7, %v15984_v9, %v5231_v2  ;;  %vm5237_vm3 = vcmp.eq.f32.partialorder %v5236_v22, 8.507059e+37  ;;  %v5049_v46 = vadd.f32 %v15989_v62, %v15994_v45  ;;  %v5054_v53 = vand.u32 2147483647, %v15968_v44  ;;  %v15998_v58 = vld [vmem:[#allocation6_spill] sm:$0xff]  ;;  %vm5052_vm8 = vmor %vm5050_vm12, %vm5051_vm1  ;;  %v16001_v2 = vld [vmem:[#allocation100_spill] sm:$0xff] }
 0x7bb   : > { %5881 = vmatpush.xpose.msra.mxu2 %v5581_v4  ;;  %5901 = vmatpush.xpose.msra.mxu3 %v5582_v17  ;;  %v5240_v41 = vsel %vm5237_vm3, %v15993_v6, %v5235_v39  ;;  %v5217_v29 = vadd.f32 %v15995_v20, %v12814_v27  ;;  %vm5190_vm4 = vweird.f32 %v15996_v16  ;;  %vm5219_vm2 = vweird.f32 %v15995_v20  ;;  %v15999_v27 = vld [vmem:[#allocation165_spill] sm:$0xff]  ;;  %v16002_v7 = vld [vmem:[#allocation246_spill] sm:$0xff]  ;;  %v16007_v60 = vld [vmem:[#allocation71_spill] sm:$0xff] }
 0x7bc   : > { %v5579_v34 = vmul.f32 %v15997_v0, %v5240_v41  ;;  %v5580_v1 = vmul.f32 %v15998_v58, %v5240_v41  ;;  %v5222_v54 = vand.u32 2147483647, %v15973_v23  ;;  %v5053_v63 = vsel %vm5052_vm8, %v15989_v62, %v5049_v46  ;;  %vm5220_vm11 = vmor %vm5218_vm15, %vm5219_vm2  ;;  %v16003_v22 = vld [vmem:[#allocation137_spill] sm:$0xff]  ;;  %v16004_v23 = vld [vmem:[#allocation107_spill] sm:$0xff] }
 0x7bd   : > { %vm5055_vm5 = vcmp.eq.f32.partialorder %v5054_v53, 8.507059e+37  ;;  %v5035_v9 = vadd.f32 %v16000_v42, %v15999_v27  ;;  %vm5037_vm10 = vweird.f32 %v16000_v42  ;;  %v5221_v12 = vsel %vm5220_vm11, %v15995_v20, %v5217_v29  ;;  %v16006_v59 = vld [vmem:[#allocation110_spill] sm:$0xff]  ;;  %v16008_v62 = vld [vmem:[#allocation231_spill] sm:$0xff]  ;;  %v16010_v39 = vld [vmem:[#allocation96_spill] sm:$0xff] }
 0x7be   : > { %5838 = vmatpush.xpose.msrb.mxu0 %v5555_v49  ;;  %5858 = vmatpush.xpose.msrb.mxu1 %v5556_v47  ;;  %v5058_v44 = vsel %vm5055_vm5, %v16001_v2, %v5053_v63  ;;  %vm5223_vm12 = vcmp.eq.f32.partialorder %v5222_v54, 8.507059e+37  ;;  %v5040_v51 = vand.u32 2147483647, %v15980_v28  ;;  %vm5008_vm14 = vweird.f32 %v16002_v7  ;;  %vm5038_vm15 = vmor %vm5036_vm9, %vm5037_vm10  ;;  %v16009_v49 = vld [vmem:[#allocation196_spill] sm:$0xff]  ;;  %v16011_v41 = vld [vmem:[#allocation242_spill] sm:$0xff] }
 0x7bf   : > { %5882 = vmatpush.xpose.msra.mxu2 %v5579_v34  ;;  %5902 = vmatpush.xpose.msra.mxu3 %v5580_v1  ;;  %v5553_v50 = vmul.f32 %v16003_v22, %v5058_v44  ;;  %v5554_v4 = vmul.f32 %v16004_v23, %v5058_v44  ;;  %v5226_v17 = vsel %vm5223_vm12, %v16005_v38, %v5221_v12  ;;  %vm5205_vm7 = vweird.f32 %v16006_v59  ;;  %v16012_v46 = vld [vmem:[#allocation22_spill] sm:$0xff]  ;;  %v16014_v29 = vld [vmem:[#allocation56_spill] sm:$0xff]  ;;  %v16015_v0 = vld [vmem:[#allocation29_spill] sm:$0xff] }
 0x7c0   : > { %vm5176_vm1 = vweird.f32 %v16007_v60  ;;  %v5577_v18 = vmul.f32 %v16008_v62, %v5226_v17  ;;  %v5578_v25 = vmul.f32 %v16009_v49, %v5226_v17  ;;  %v5039_v47 = vsel %vm5038_vm15, %v16000_v42, %v5035_v9  ;;  %v16013_v53 = vld [vmem:[#allocation30_spill] sm:$0xff]  ;;  %v16016_v58 = vld [vmem:[#allocation20_spill] sm:$0xff]  ;;  %vm5206_vm8 = vmor %vm5204_vm6, %vm5205_vm7 }
 0x7c1   : > { %vm5041_vm3 = vcmp.eq.f32.partialorder %v5040_v51, 8.507059e+37  ;;  %v5203_v45 = vadd.f32 %v16006_v59, %v16011_v41  ;;  %v5208_v28 = vand.u32 2147483647, %v12615_v11  ;;  %v5021_v20 = vadd.f32 %v16013_v53, %v16012_v46  ;;  %v16017_v27 = vld [vmem:[#allocation207_spill] sm:$0xff]  ;;  %v16018_v42 = vld [vmem:[#allocation241_spill] sm:$0xff]  ;;  %v16019_v2 = vld [vmem:[#allocation124_spill] sm:$0xff] }
 0x7c2   : > { %5839 = vmatpush.xpose.msrb.mxu0 %v5553_v50  ;;  %5859 = vmatpush.xpose.msrb.mxu1 %v5554_v4  ;;  %v5044_v6 = vsel %vm5041_vm3, %v16010_v39, %v5039_v47  ;;  %vm4994_vm9 = vweird.f32 %v16014_v29  ;;  %vm5023_vm2 = vweird.f32 %v16013_v53  ;;  %v5026_v54 = vand.u32 2147483647, %v15990_v19  ;;  %v16020_v51 = vld [vmem:[#allocation164_spill] sm:$0xff]  ;;  %v16021_v22 = vld [vmem:[#allocation250_spill] sm:$0xff]  ;;  %v16023_v4 = vld [vmem:[#allocation213_spill] sm:$0xff] }
 0x7c3   : > { %v5551_v34 = vmul.f32 %v16015_v0, %v5044_v6  ;;  %v5552_v1 = vmul.f32 %v16016_v58, %v5044_v6  ;;  %5883 = vmatpush.xpose.msra.mxu2 %v5577_v18  ;;  %5903 = vmatpush.xpose.msra.mxu3 %v5578_v25  ;;  %v5207_v63 = vsel %vm5206_vm8, %v16006_v59, %v5203_v45  ;;  %vm5209_vm5 = vcmp.eq.f32.partialorder %v5208_v28, 8.507059e+37  ;;  %vm5024_vm11 = vmor %vm5022_vm13, %vm5023_vm2  ;;  %v16022_v19 = vld [vmem:[#allocation120_spill] sm:$0xff]  ;;  %v16024_v17 = vld [vmem:[#allocation227_spill] sm:$0xff] }
 0x7c4   : > { %v5189_v9 = vadd.f32 %v16018_v42, %v16017_v27  ;;  %vm5191_vm10 = vweird.f32 %v16018_v42  ;;  %v5212_v11 = vsel %vm5209_vm5, %v16019_v2, %v5207_v63  ;;  %v5025_v44 = vsel %vm5024_vm11, %v16013_v53, %v5021_v20  ;;  %v16025_v59 = vld [vmem:[#allocation123_spill] sm:$0xff]  ;;  %v16026_v62 = vld [vmem:[#allocation257_spill] sm:$0xff]  ;;  %v16027_v49 = vld [vmem:[#allocation230_spill] sm:$0xff] }
 0x7c5   : > { %vm5027_vm6 = vcmp.eq.f32.partialorder %v5026_v54, 8.507059e+37  ;;  %v5194_v12 = vand.u32 2147483647, %v15996_v16  ;;  %vm5162_vm12 = vweird.f32 %v16020_v51  ;;  %v5575_v50 = vmul.f32 %v16021_v22, %v5212_v11  ;;  %vm5192_vm13 = vmor %vm5190_vm4, %vm5191_vm10  ;;  %v16028_v39 = vld [vmem:[#allocation176_spill] sm:$0xff]  ;;  %v16030_v46 = vld [vmem:[#allocation191_spill] sm:$0xff] }
 0x7c6   : > { %5840 = vmatpush.xpose.msrb.mxu0 %v5551_v34  ;;  %5860 = vmatpush.xpose.msrb.mxu1 %v5552_v1  ;;  %v5576_v23 = vmul.f32 %v16022_v19, %v5212_v11  ;;  %v5030_v38 = vsel %vm5027_vm6, %v16023_v4, %v5025_v44  ;;  %vm5009_vm15 = vweird.f32 %v16024_v17  ;;  %vm4980_vm7 = vweird.f32 %v16025_v59  ;;  %v16029_v41 = vld [vmem:[#allocation24_spill] sm:$0xff]  ;;  %v16031_v20 = vld [vmem:[#allocation87_spill] sm:$0xff]  ;;  %v16034_v63 = vld [vmem:[#allocation66_spill] sm:$0xff] }
 0x7c7   : > { %v5549_v18 = vmul.f32 %v16026_v62, %v5030_v38  ;;  %v5550_v25 = vmul.f32 %v16027_v49, %v5030_v38  ;;  %v5193_v47 = vsel %vm5192_vm13, %v16018_v42, %v5189_v9  ;;  %vm5195_vm3 = vcmp.eq.f32.partialorder %v5194_v12, 8.507059e+37  ;;  %5884 = vmatpush.xpose.msra.mxu2 %v5575_v50  ;;  %vm5010_vm8 = vmor %vm5008_vm14, %vm5009_vm15  ;;  %v16033_v1 = vld [vmem:[#allocation8_spill] sm:$0xff]  ;;  %v16036_v2 = vld [vmem:[#allocation198_spill] sm:$0xff] }
 0x7c8   : > { %5904 = vmatpush.xpose.msra.mxu3 %v5576_v23  ;;  %v5198_v6 = vsel %vm5195_vm3, %v16028_v39, %v5193_v47  ;;  %v5007_v45 = vadd.f32 %v16024_v17, %v16029_v41  ;;  %v5012_v16 = vand.u32 2147483647, %v16002_v7  ;;  %v5175_v28 = vadd.f32 %v12914_v55, %v13033_v21  ;;  %v16032_v21 = vld [vmem:[#allocation204_spill] sm:$0xff]  ;;  %v16038_v12 = vld [vmem:[#allocation46_spill] sm:$0xff]  ;;  %v16041_v23 = vld [vmem:[#allocation247_spill] sm:$0xff] }
 0x7c9   : > { %vm5148_vm4 = vweird.f32 %v12966_v31  ;;  %v5573_v53 = vmul.f32 %v16030_v46, %v5198_v6  ;;  %v5574_v0 = vmul.f32 %v16031_v20, %v5198_v6  ;;  %vm5177_vm2 = vweird.f32 %v12914_v55  ;;  %v16035_v9 = vld [vmem:[#allocation260_spill] sm:$0xff]  ;;  %v16045_v47 = vld [vmem:[#allocation143_spill] sm:$0xff]  ;;  %v16046_v6 = vld [vmem:[#allocation21_spill] sm:$0xff] }
 0x7ca   : > { %v5180_v34 = vand.u32 2147483647, %v16007_v60  ;;  %5841 = vmatpush.xpose.msrb.mxu0 %v5549_v18  ;;  %5861 = vmatpush.xpose.msrb.mxu1 %v5550_v25  ;;  %v5011_v58 = vsel %vm5010_vm8, %v16024_v17, %v5007_v45  ;;  %vm5013_vm5 = vcmp.eq.f32.partialorder %v5012_v16, 8.507059e+37  ;;  %vm5178_vm11 = vmor %vm5176_vm1, %vm5177_vm2  ;;  %v4993_v54 = vadd.f32 %v16033_v1, %v16032_v21  ;;  %v16037_v60 = vld [vmem:[#allocation139_spill] sm:$0xff]  ;;  %v16039_v50 = vld [vmem:[#allocation264_spill] sm:$0xff] }
 0x7cb   : > { %vm4995_vm10 = vweird.f32 %v16033_v1  ;;  %v5016_v7 = vsel %vm5013_vm5, %v16034_v63, %v5011_v58  ;;  %v5179_v27 = vsel %vm5178_vm11, %v12914_v55, %v5175_v28  ;;  %v4998_v42 = vand.u32 2147483647, %v16014_v29  ;;  %5885 = vmatpush.xpose.msra.mxu2 %v5573_v53  ;;  %v16040_v55 = vld [vmem:[#allocation154_spill] sm:$0xff]  ;;  %v16042_v17 = vld [vmem:[#allocation265_spill] sm:$0xff]  ;;  %v16043_v18 = vld [vmem:[#allocation104_spill] sm:$0xff] }
 0x7cc   : > { %vm5181_vm14 = vcmp.eq.f32.partialorder %v5180_v34, 8.507059e+37  ;;  %vm4966_vm6 = vweird.f32 %v16035_v9  ;;  %5905 = vmatpush.xpose.msra.mxu3 %v5574_v0  ;;  %v5547_v11 = vmul.f32 %v16036_v2, %v5016_v7  ;;  %v5548_v44 = vmul.f32 %v16037_v60, %v5016_v7  ;;  %vm4996_vm1 = vmor %vm4994_vm9, %vm4995_vm10  ;;  %v16044_v25 = vld [vmem:[#allocation131_spill] sm:$0xff]  ;;  %v16047_v41 = vld [vmem:[#allocation121_spill] sm:$0xff] }
 0x7cd   : > { %v5184_v22 = vsel %vm5181_vm14, %v16038_v12, %v5179_v27  ;;  %vm5163_vm13 = vweird.f32 %v16039_v50  ;;  %vm5134_vm15 = vweird.f32 %v13020_v5  ;;  %v4997_v38 = vsel %vm4996_vm1, %v16033_v1, %v4993_v54  ;;  %v16048_v16 = vld [vmem:[#allocation203_spill] sm:$0xff]  ;;  %v16049_v0 = vld [vmem:[#allocation142_spill] sm:$0xff]  ;;  %v16052_v63 = vld [vmem:[#allocation33_spill] sm:$0xff] }
 0x7ce   : > { %v5571_v19 = vmul.f32 %v16040_v55, %v5184_v22  ;;  %v5572_v4 = vmul.f32 %v16041_v23, %v5184_v22  ;;  %vm4999_vm3 = vcmp.eq.f32.partialorder %v4998_v42, 8.507059e+37  ;;  %5842 = vmatpush.xpose.msrb.mxu0 %v5547_v11  ;;  %5862 = vmatpush.xpose.msrb.mxu1 %v5548_v44  ;;  %v5161_v49 = vadd.f32 %v16039_v50, %v16043_v18  ;;  %vm5164_vm8 = vmor %vm5162_vm12, %vm5163_vm13  ;;  %v16050_v21 = vld [vmem:[#allocation258_spill] sm:$0xff]  ;;  %v16054_v27 = vld [vmem:[#allocation132_spill] sm:$0xff] }
 0x7cf   : > { %v5002_v62 = vsel %vm4999_vm3, %v16042_v17, %v4997_v38  ;;  %v5166_v29 = vand.u32 2147483647, %v16020_v51  ;;  %v4979_v39 = vadd.f32 %v16045_v47, %v16044_v25  ;;  %vm4952_vm9 = vweird.f32 %v16046_v6  ;;  %v16055_v42 = vld [vmem:[#allocation224_spill] sm:$0xff]  ;;  %v16056_v11 = vld [vmem:[#allocation194_spill] sm:$0xff]  ;;  %v16057_v22 = vld [vmem:[#allocation109_spill] sm:$0xff] }
 0x7d0   : > { %v5545_v45 = vmul.f32 %v16047_v41, %v5002_v62  ;;  %v5546_v28 = vmul.f32 %v16048_v16, %v5002_v62  ;;  %vm4981_vm2 = vweird.f32 %v16045_v47  ;;  %v4984_v46 = vand.u32 2147483647, %v16025_v59  ;;  %5886 = vmatpush.xpose.msra.mxu2 %v5571_v19  ;;  %5906 = vmatpush.xpose.msra.mxu3 %v5572_v4  ;;  %v16051_v59 = vld [vmem:[#allocation188_spill] sm:$0xff]  ;;  %v16058_v19 = vld [vmem:[#allocation89_spill] sm:$0xff]  ;;  %v16059_v4 = vld [vmem:[#allocation102_spill] sm:$0xff] }
 0x7d1   : > { %v5165_v53 = vsel %vm5164_vm8, %v16039_v50, %v5161_v49  ;;  %vm5167_vm5 = vcmp.eq.f32.partialorder %v5166_v29, 8.507059e+37  ;;  %vm4982_vm11 = vmor %vm4980_vm7, %vm4981_vm2  ;;  %v5147_v20 = vadd.f32 %v13024_v43, %v13114_v24  ;;  %vm5149_vm10 = vweird.f32 %v13024_v43  ;;  %v16053_v24 = vld [vmem:[#allocation83_spill] sm:$0xff]  ;;  %v16060_v17 = vld [vmem:[#allocation169_spill] sm:$0xff] }
 0x7d2   : > { %v5170_v51 = vsel %vm5167_vm5, %v16049_v0, %v5165_v53  ;;  %v4983_v34 = vsel %vm4982_vm11, %v16045_v47, %v4979_v39  ;;  %vm4985_vm12 = vcmp.eq.f32.partialorder %v4984_v46, 8.507059e+37  ;;  %v5152_v58 = vand.u32 2147483647, %v12966_v31  ;;  %5843 = vmatpush.xpose.msrb.mxu0 %v5545_v45  ;;  %5863 = vmatpush.xpose.msrb.mxu1 %v5546_v28  ;;  %vm5150_vm7 = vmor %vm5148_vm4, %vm5149_vm10  ;;  %v16061_v49 = vld [vmem:[#allocation116_spill] sm:$0xff]  ;;  %v16062_v25 = vld [vmem:[#allocation14_spill] sm:$0xff] }
 0x7d3   : > { %vm5120_vm14 = vweird.f32 %v13091_v61  ;;  %v5569_v1 = vmul.f32 %v16050_v21, %v5170_v51  ;;  %v5570_v54 = vmul.f32 %v16051_v59, %v5170_v51  ;;  %v4988_v7 = vsel %vm4985_vm12, %v16052_v63, %v4983_v34  ;;  %v16064_v41 = vld [vmem:[#allocation223_spill] sm:$0xff]  ;;  %v16069_v21 = vld [vmem:[#allocation149_spill] sm:$0xff] }
 0x7d4   : > { %vm4967_vm1 = vweird.f32 %v16053_v24  ;;  %vm4938_vm13 = vweird.f32 %v16054_v27  ;;  %v5543_v2 = vmul.f32 %v16055_v42, %v4988_v7  ;;  %v5544_v60 = vmul.f32 %v16056_v11, %v4988_v7  ;;  %v16065_v46 = vld [vmem:[#allocation135_spill] sm:$0xff]  ;;  %v16073_v7 = vld [vmem:[#allocation193_spill] sm:$0xff]  ;;  %v16074_v42 = vld [vmem:[#allocation248_spill] sm:$0xff] }
 0x7d5   : > { %v5151_v44 = vsel %vm5150_vm7, %v13024_v43, %v5147_v20  ;;  %vm5153_vm3 = vcmp.eq.f32.partialorder %v5152_v58, 8.507059e+37  ;;  %5887 = vmatpush.xpose.msra.mxu2 %v5569_v1  ;;  %5907 = vmatpush.xpose.msra.mxu3 %v5570_v54  ;;  %v4965_v50 = vadd.f32 %v16053_v24, %v16057_v22  ;;  %v4970_v31 = vand.u32 2147483647, %v16035_v9  ;;  %vm4968_vm8 = vmor %vm4966_vm6, %vm4967_vm1  ;;  %v16066_v20 = vld [vmem:[#allocation73_spill] sm:$0xff]  ;;  %v16068_v51 = vld [vmem:[#allocation239_spill] sm:$0xff] }
 0x7d6   : > { %v5156_v12 = vsel %vm5153_vm3, %v13107_v35, %v5151_v44  ;;  %v5133_v55 = vadd.f32 %v13093_v33, %v13177_v56  ;;  %vm4924_vm4 = vweird.f32 %v13084_v3  ;;  %vm5135_vm2 = vweird.f32 %v13093_v33  ;;  %5844 = vmatpush.xpose.msrb.mxu0 %v5543_v2  ;;  %5864 = vmatpush.xpose.msrb.mxu1 %v5544_v60  ;;  %v16070_v1 = vld [vmem:[#allocation97_spill] sm:$0xff]  ;;  %v16075_v60 = vld [vmem:[#allocation175_spill] sm:$0xff]  ;;  %v16077_v22 = vld [vmem:[#allocation44_spill] sm:$0xff] }
 0x7d7   : > { %v5567_v23 = vmul.f32 %v16058_v19, %v5156_v12  ;;  %v5568_v38 = vmul.f32 %v16059_v4, %v5156_v12  ;;  %v5138_v43 = vand.u32 2147483647, %v13020_v5  ;;  %v4969_v35 = vsel %vm4968_vm8, %v16053_v24, %v4965_v50  ;;  %vm5136_vm11 = vmor %vm5134_vm15, %vm5135_vm2  ;;  %v16071_v54 = vld [vmem:[#allocation5_spill] sm:$0xff]  ;;  %v16076_v44 = vld [vmem:[#allocation43_spill] sm:$0xff]  ;;  %v5936_v19 = vpop.permute.xlu2 %5935 }
 0x7d8   : > { %vm4971_vm5 = vcmp.eq.f32.partialorder %v4970_v31, 8.507059e+37  ;;  %v4951_v56 = vadd.f32 %v13011_v10, %v13105_v13  ;;  %vm4953_vm10 = vweird.f32 %v13011_v10  ;;  %v5137_v62 = vsel %vm5136_vm11, %v13093_v33, %v5133_v55  ;;  %v16063_v13 = vld [vmem:[#allocation222_spill] sm:$0xff]  ;;  %v16078_v31 = vld [vmem:[#allocation261_spill] sm:$0xff] }
 0x7d9   : > { %v4974_v9 = vsel %vm4971_vm5, %v16060_v17, %v4969_v35  ;;  %vm5139_vm6 = vcmp.eq.f32.partialorder %v5138_v43, 8.507059e+37  ;;  %v4956_v18 = vand.u32 2147483647, %v16046_v6  ;;  %5888 = vmatpush.xpose.msra.mxu2 %v5567_v23  ;;  %5908 = vmatpush.xpose.msra.mxu3 %v5568_v38  ;;  %vm4954_vm15 = vmor %vm4952_vm9, %vm4953_vm10  ;;  %vm5121_vm12 = vweird.f32 %v13165_v37  ;;  %v16081_v43 = vld [vmem:[#allocation181_spill] sm:$0xff] }
 0x7da   : > { %v5541_v29 = vmul.f32 %v16061_v49, %v4974_v9  ;;  %v5542_v47 = vmul.f32 %v16062_v25, %v4974_v9  ;;  %v5142_v5 = vsel %vm5139_vm6, %v13121_v32, %v5137_v62  ;;  %v4955_v45 = vsel %vm4954_vm15, %v13011_v10, %v4951_v56  ;;  %vm5122_vm9 = vmor %vm5120_vm14, %vm5121_vm12  ;;  %v16082_v56 = vld [vmem:[#allocation26_spill] sm:$0xff] }
 0x7db   : > { %v5565_v39 = vmul.f32 %v16063_v13, %v5142_v5  ;;  %v5566_v33 = vmul.f32 %v16064_v41, %v5142_v5  ;;  %vm4957_vm7 = vcmp.eq.f32.partialorder %v4956_v18, 8.507059e+37  ;;  %v5119_v28 = vadd.f32 %v13165_v37, %v13203_v48  ;;  %v16083_v18 = vld [vmem:[#allocation215_spill] sm:$0xff] }
 0x7dc   : > { %5845 = vmatpush.xpose.msrb.mxu0 %v5541_v29  ;;  %5865 = vmatpush.xpose.msrb.mxu1 %v5542_v47  ;;  %v4960_v16 = vsel %vm4957_vm7, %v13096_v36, %v4955_v45  ;;  %v5124_v32 = vand.u32 2147483647, %v13091_v61  ;;  %v4937_v6 = vadd.f32 %v13043_v8, %v13119_v26  ;;  %vm4939_vm1 = vweird.f32 %v13043_v8  ;;  %v16067_v26 = vld [vmem:[#allocation130_spill] sm:$0xff]  ;;  %v16084_v29 = vld [vmem:[#allocation36_spill] sm:$0xff]  ;;  %v16085_v5 = vld [vmem:[#allocation179_spill] sm:$0xff] }
 0x7dd   : > { %v5539_v53 = vmul.f32 %v16065_v46, %v4960_v16  ;;  %v5540_v0 = vmul.f32 %v16066_v20, %v4960_v16  ;;  %v4942_v10 = vand.u32 2147483647, %v16054_v27  ;;  %5889 = vmatpush.xpose.msra.mxu2 %v5565_v39  ;;  %5909 = vmatpush.xpose.msra.mxu3 %v5566_v33  ;;  %v5123_v36 = vsel %vm5122_vm9, %v13165_v37, %v5119_v28  ;;  %vm4940_vm8 = vmor %vm4938_vm13, %vm4939_vm1  ;;  %v16086_v39 = vld [vmem:[#allocation228_spill] sm:$0xff]  ;;  %v5632_v33 = vpop.f32.mrf.mxu3 }
 0x7de   : > { %vm5125_vm3 = vcmp.eq.f32.partialorder %v5124_v32, 8.507059e+37  ;;  %v4923_v48 = vadd.f32 %v16067_v26, %v13186_v57  ;;  %vm4925_vm2 = vweird.f32 %v16067_v26  ;;  %v4941_v34 = vsel %vm4940_vm8, %v13043_v8, %v4937_v6  ;;  %v16072_v57 = vld [vmem:[#allocation163_spill] sm:$0xff]  ;;  %v5692_v32 = vpop.f32.mrf.mxu0  ;;  %v5712_v6 = vpop.f32.mrf.mxu1 }
 0x7df   : > { %v5128_v61 = vsel %vm5125_vm3, %v16068_v51, %v5123_v36  ;;  %vm4943_vm14 = vcmp.eq.f32.partialorder %v4942_v10, 8.507059e+37  ;;  %v4928_v58 = vand.u32 2147483647, %v13084_v3  ;;  %vm4926_vm13 = vmor %vm4924_vm4, %vm4925_vm2  ;;  %vm4911_vm5 = vweird.f32 %v13219_v15 }
 0x7e0   : > { %5846 = vmatpush.xpose.msrb.mxu0 %v5539_v53  ;;  %5866 = vmatpush.xpose.msrb.mxu1 %v5540_v0  ;;  %v5563_v37 = vmul.f32 %v16069_v21, %v5128_v61  ;;  %v5564_v59 = vmul.f32 %v16070_v1, %v5128_v61  ;;  %v4946_v63 = vsel %vm4943_vm14, %v16071_v54, %v4941_v34  ;;  %vm4910_vm11 = vweird.f32 %v16072_v57  ;;  %v5915_v34 = vld [vmem:[%s13693_s3] sm:$0xff] }
 0x7e1   : > { %v4916_v8 = vand.u32 2147483648, %v16072_v57  ;;  %v5537_v24 = vmul.f32 %v16073_v7, %v4946_v63  ;;  %v4927_v27 = vsel %vm4926_vm13, %v16067_v26, %v4923_v48  ;;  %v5538_v2 = vmul.f32 %v16074_v42, %v4946_v63  ;;  %vm13595_vm4 = vmor %vm4910_vm11, %vm4911_vm5  ;;  %v5916_v63 = vld [vmem:[%s13693_s3 + $0x8] sm:$0xff]  ;;  %v5926_v7 = vpop.permute.xlu0 %5925 }
 0x7e2   : > { %5890 = vmatpush.xpose.msra.mxu2 %v5563_v37  ;;  %5910 = vmatpush.xpose.msra.mxu3 %v5564_v59  ;;  %vm4929_vm10 = vcmp.eq.f32.partialorder %v4928_v58, 8.507059e+37  ;;  %v4909_v11 = vadd.f32 %v13219_v15, %v13262_v40  ;;  %v4914_v3 = vand.u32 2147483647, %v16072_v57  ;;  %v403_v12 = vadd.f32 %v16076_v44, %v16075_v60  ;;  %v5917_v57 = vld [vmem:[%s13693_s3 + $0x10] sm:$0xff]  ;;  %v7223_v42 = vld [vmem:[%s7390_s15 + $0x8] sm:$0xff] }
 0x7e3   : > { %v456_v50 = vadd.f32 %v16077_v22, %v16075_v60  ;;  %v4932_v55 = vsel %vm4929_vm10, %v16078_v31, %v4927_v27  ;;  %v4895_v23 = vadd.f32 %v13244_v52, %v13283_v14  ;;  %vm4897_vm6 = vweird.f32 %v13244_v52  ;;  %v7224_v22 = vld [vmem:[%s7390_s15 + $0x18] sm:$0xff]  ;;  %v7225_v31 = vld [vmem:[%s7390_s15] sm:$0xff] }
 0x7e4   : > { %5847 = vmatpush.xpose.msrb.mxu0 %v5537_v24  ;;  %5867 = vmatpush.xpose.msrb.mxu1 %v5538_v2  ;;  %v4913_v40 = vsel %vm13595_vm4, %v13219_v15, %v4909_v11  ;;  %v4917_v4 = vor.u32 1.1754944e-38, %v4916_v8  ;;  %vm4896_vm15 = vweird.f32 %v13161_v30  ;;  %v4902_v38 = vand.u32 2147483648, %v13161_v30  ;;  %v5918_v8 = vld [vmem:[%s13693_s3 + $0x18] sm:$0xff]  ;;  %v5931_v11 = vpop.permute.xlu1 %5930 }
 0x7e5   : > { %5891 = vmatmul.f32.vlgmr.msra.gmra.mxu2 %v403_v12  ;;  %5911 = vmatmul.f32.vlgmr.msra.gmra.mxu3 %v456_v50  ;;  %v5535_v35 = vmul.f32 %v16081_v43, %v4932_v55  ;;  %v5536_v17 = vmul.f32 %v16082_v56, %v4932_v55  ;;  %vm4915_vm12 = vcmp.eq.f32.partialorder %v4914_v3, 8.507059e+37  ;;  %v4900_v9 = vand.u32 2147483647, %v13161_v30  ;;  %vm4898_vm7 = vmor %vm4896_vm15, %vm4897_vm6  ;;  %v5612_v30 = vpop.f32.mrf.mxu2  ;;  %v5672_v45 = vpop.f32.mrf.mxu3  ;;  %v7226_v43 = vld [vmem:[%s7390_s15 + $0x28] sm:$0xff]  ;;  %v7227_v56 = vld [vmem:[%s7390_s15 + $0x10] sm:$0xff] }
 0x7e6   : > { %v4918_v15 = vsel %vm4915_vm12, %v4917_v4, %v4913_v40  ;;  %v4899_v14 = vsel %vm4898_vm7, %v13244_v52, %v4895_v23  ;;  %v4903_v62 = vor.u32 1.1754944e-38, %v4902_v38  ;;  %v5713_v59 = vadd.f32 %v5712_v6, %v5692_v32 }
 0x7e7   : > { %v5533_v49 = vmul.f32 %v16083_v18, %v4918_v15  ;;  %v5534_v25 = vmul.f32 %v16084_v29, %v4918_v15  ;;  %vm4901_vm9 = vcmp.eq.f32.partialorder %v4900_v9, 8.507059e+37  ;;  %v5633_v54 = vadd.f32 %v5632_v33, %v5612_v30 }
 0x7e8   : > { %5848 = vmatpush.xpose.msrb.mxu0 %v5535_v35  ;;  %5868 = vmatpush.xpose.msrb.mxu1 %v5536_v17  ;;  %v4904_v47 = vsel %vm4901_vm9, %v4903_v62, %v4899_v14 }
 0x7e9   : > { %v5531_v13 = vmul.f32 %v16085_v5, %v4904_v47  ;;  %v5532_v41 = vmul.f32 %v16086_v39, %v4904_v47  ;;  %v5941_v9 = vpop.permute.xlu0 %5940  ;;  %v7230_v39 = vld [vmem:[%s7390_s15 + $0x30] sm:$0xff] }
 0x7ec   : > { %5849 = vmatpush.xpose.msrb.mxu0 %v5533_v49  ;;  %5869 = vmatpush.xpose.msrb.mxu1 %v5534_v25  ;;  %v7228_v49 = vld [vmem:[%s7390_s15 + $0x38] sm:$0xff]  ;;  %v7229_v25 = vld [vmem:[%s7390_s15 + $0x20] sm:$0xff] }
 0x7ed   : > { %v5652_v52 = vpop.f32.mrf.mxu2  ;;  %v5752_v28 = vpop.f32.mrf.mxu3 }
 0x7ee   : > { %v5673_v61 = vadd.f32 %v5672_v45, %v5652_v52 }
 0x7f0   : > { %5850 = vmatpush.xpose.msrb.mxu0 %v5531_v13  ;;  %5870 = vmatpush.xpose.msrb.mxu1 %v5532_v41 }
 0x7f3   : > { %5851 = vmatmul.f32.vlgmr.msrb.gmra.mxu0 %v403_v12  ;;  %5871 = vmatmul.f32.vlgmr.msrb.gmra.mxu1 %v456_v50 }
 0x7f5   : > { %v5732_v16 = vpop.f32.mrf.mxu2 }
 0x7f6   : > { %v5753_v51 = vadd.f32 %v5752_v28, %v5732_v16 }
 0x820   : > { %v5812_v46 = vpop.f32.mrf.mxu2  ;;  %v5832_v53 = vpop.f32.mrf.mxu3 }
 0x821   : > { %v5833_v48 = vadd.f32 %v5832_v53, %v5812_v46 }
 0x82e   : > { %v5772_v20 = vpop.f32.mrf.mxu0  ;;  %v5792_v0 = vpop.f32.mrf.mxu1 }
 0x82f   : > { %v5793_v1 = vadd.f32 %v5792_v0, %v5772_v20 }
 0x868   : > { %v5892_v10 = vpop.f32.mrf.mxu2  ;;  %v5912_v36 = vpop.f32.mrf.mxu3 }
 0x869   : > { %v5913_v26 = vadd.f32 %v5912_v36, %v5892_v10 }
 0x86b   : > { %5996 = vmatpush.msra.mxu1 %v5913_v26 }
 0x86d   : > { %5997 = vmatpush.msra.mxu1 %v5833_v48 }
 0x86f   : > { %5998 = vmatpush.msra.mxu1 %v5753_v51 }
 0x870   : > { %v5852_v58 = vpop.f32.mrf.mxu0  ;;  %v5872_v21 = vpop.f32.mrf.mxu1 }
 0x871   : > { %5999 = vmatpush.msra.mxu1 %v5673_v61  ;;  %v5873_v37 = vadd.f32 %v5872_v21, %v5852_v58 }
 0x872   : > { %6398 = vmatmul.msk.f32.vlgmr.msra.gmra.mxu1 %vm315_vm0, %v5915_v34 }
 0x873   : > { %5967 = vmatpush.msra.mxu0 %v5873_v37 }
 0x875   : > { %5968 = vmatpush.msra.mxu0 %v5793_v1 }
 0x877   : > { %5969 = vmatpush.msra.mxu0 %v5713_v59 }
 0x879   : > { %5970 = vmatpush.msra.mxu0 %v5633_v54 }
 0x87a   : > { %6399 = vmatmul.msk.f32.gmra.mxu1 %vm315_vm0, %v5916_v63  ;;  %6394 = vmatmul.msk.f32.vlgmr.msra.gmra.mxu0 %vm315_vm0, %v5915_v34 }
 0x882   : > { %6400 = vmatmul.msk.f32.gmra.mxu1 %vm315_vm0, %v5917_v57  ;;  %6395 = vmatmul.msk.f32.gmra.mxu0 %vm315_vm0, %v5916_v63 }
 0x88a   : > { %6401 = vmatmul.msk.f32.gmra.mxu1 %vm315_vm0, %v5918_v8  ;;  %6396 = vmatmul.msk.f32.gmra.mxu0 %vm315_vm0, %v5917_v57 }
 0x892   : > { %6397 = vmatmul.msk.f32.gmra.mxu0 %vm315_vm0, %v5918_v8 }
 0x8ef   : > { %v6001_v24 = vpop.f32.mrf.mxu1 }
 0x8f0   : > { %v6002_v27 = vadd.f32 %v6001_v24, %v5926_v7 }
 0x8f2   : > { %v6014_v2 = vadd.f32 %v7223_v42, %v6002_v27 }
 0x8f4   : > { %6022 = vst [vmem:[%s13639_s16 + $0x8] sm:$0xff] %v6014_v2 }
 0x8f7   : > { %v6004_v3 = vpop.f32.mrf.mxu1  ;;  %v5972_v60 = vpop.f32.mrf.mxu0 }
 0x8f8   : > { %v6005_v44 = vadd.f32 %v6004_v3, %v5931_v11  ;;  %v5973_v12 = vadd.f32 %v5972_v60, %v5926_v7 }
 0x8fa   : > { %v6016_v50 = vadd.f32 %v7224_v22, %v6005_v44  ;;  %v6013_v55 = vadd.f32 %v7225_v31, %v5973_v12 }
 0x8fc   : > { %6024 = vst [vmem:[%s13639_s16 + $0x18] sm:$0xff] %v6016_v50 }
 0x8fd   : > { %6021 = vst [vmem:[%s13639_s16] sm:$0xff] %v6013_v55 }
 0x8ff   : > { %v6007_v40 = vpop.f32.mrf.mxu1  ;;  %v5975_v23 = vpop.f32.mrf.mxu0 }
 0x900   : > { %v6008_v4 = vadd.f32 %v6007_v40, %v5936_v19  ;;  %v5976_v38 = vadd.f32 %v5975_v23, %v5931_v11 }
 0x902   : > { %v6018_v35 = vadd.f32 %v7226_v43, %v6008_v4  ;;  %v6015_v17 = vadd.f32 %v7227_v56, %v5976_v38 }
 0x904   : > { %6026 = vst [vmem:[%s13639_s16 + $0x28] sm:$0xff] %v6018_v35 }
 0x905   : > { %6023 = vst [vmem:[%s13639_s16 + $0x10] sm:$0xff] %v6015_v17 }
 0x907   : > { %v6010_v15 = vpop.f32.mrf.mxu1  ;;  %v5978_v14 = vpop.f32.mrf.mxu0 }
 0x908   : > { %v6011_v62 = vadd.f32 %v6010_v15, %v5941_v9  ;;  %v5979_v18 = vadd.f32 %v5978_v14, %v5936_v19 }
 0x90a   : > { %v6020_v29 = vadd.f32 %v7228_v49, %v6011_v62  ;;  %v6017_v47 = vadd.f32 %v7229_v25, %v5979_v18 }
 0x90c   : > { %6028 = vst [vmem:[%s13639_s16 + $0x38] sm:$0xff] %v6020_v29 }
 0x90d   : > { %6025 = vst [vmem:[%s13639_s16 + $0x20] sm:$0xff] %v6017_v47 }
 0x90f   : > { %v5981_v5 = vpop.f32.mrf.mxu0 }
 0x910   : > { %v5982_v13 = vadd.f32 %v5981_v5, %v5941_v9 }
 0x912   : > { %v6019_v41 = vadd.f32 %v7230_v39, %v5982_v13 }
 0x914   : > { %6027 = vst [vmem:[%s13639_s16 + $0x30] sm:$0xff] %v6019_v41 }
 0x915   : > { %7258 = shalt.err (!%p7255_p3)
}
 0x916   : > { %s7296_s15 = smov 256   ;;  %s7297_s13 = smov 16  }
 0x917   : > { %6409 = dma.vmem_to_hbm [thread:$0]  (%p7366_p5), %s6043_s30, 1024, %s6045_s6, %s6030_s22, %s7296_s15, %s7296_s15, %s7297_s13  }
 0x918 PF: > { %p6415_p4 = scmp.ge.s32.totalorder %s7293_s21, 2  ;;  %s6059_s16 = sand.u32 1, %s7281_s18  }
 0x919   : > { %s6060_s17 = scalar_lea.sflag [#allocation3], %s6059_s16 }
 0x91a   : > { %p6412_p7 = pnand %p6415_p4, %p7370_p6 }
 0x91c   : > { %p6413_p8 = pneg %p6412_p7 }
 0x91e   : > { %7276 = dma.done.wait (%p6413_p8), %s6060_s17, 1024  }
 0x91f   : > { %7278 = vsyncadd (%p6413_p8), %s6060_s17, 4294966272  ;;  %p15_p9 = scmp.ge.s32.totalorder %s7353_s24, 4   ;;  %s16087_s18 = smov %s7285_s19 }
 0x920   : > { %s16088_s19 = smov %s7289_s20  ;;  %s16089_s20 = smov %s7364_s27 }
 0x921   : > { %s16090_s21 = smov %s7353_s24  ;;  %17 = sbr.rel (!%p15_p9) target bundleno = 3 (0x3), region = 75 }
 0x926   :  { %6066 = vsyncpa [#allocation3], 1 }
 0x927   :  { %6068 = vsyncpa [#allocation3 + $0x1], 1 }

</bundles_post_ra>
